<compile_context>
chip_gen: v5e
topology: v5e:2x2
jax: 0.10.0
libtpu: 0.0.40
codegen_flags: <defaults>
</compile_context>

<pallas_src>
import jax
import jax.numpy as jnp
from jax import lax
from jax.experimental import pallas as pl
from jax.experimental.pallas import tpu as pltpu


# ----------------------------------------------------------------------------
# Pallas kernel: full forward pass for one batch block (BB sequences).
# Layout: features/gates on sublanes, batch on lanes.
# ----------------------------------------------------------------------------
def cnn_lstm_kernel(
    x_ref,                          # (Din, T*BB)  columns ordered (t, local_b)
    cw_ref, cb_ref,                 # (C, Din), (C, 1)      Conv1d(k=1)
    wih0_ref, whh0_ref, b0_ref,     # (4H, C), (4H, H), (4H, 1)  LSTM layer 0
    wih1_ref, whh1_ref, b1_ref,     # (4H, H), (4H, H), (4H, 1)  LSTM layer 1
    lw_ref, lb_ref,                 # (O, H), (O, 1)        final Linear
    out_ref,                        # (O, BB)               lane-dense output
    gates_ref,                      # scratch (4H, T*BB): hoisted layer-0 pre-gates
    h0_ref, c0_ref,                 # scratch (H, BB): layer-0 state
    h1_ref, c1_ref,                 # scratch (H, BB): layer-1 state
    max_ref,                        # scratch (H, BB): running max of layer-1 h
):
    H = whh0_ref.shape[1]
    BB = out_ref.shape[1]
    T = x_ref.shape[1] // BB
    f32 = jnp.float32
    cdt = cw_ref.dtype              # matmul operand dtype (f32 or bf16)

    def mdot(w, act):
        # MXU matmul with f32 accumulation; activations cast to weight dtype.
        return jnp.dot(w, act.astype(cdt), preferred_element_type=f32)

    # ---- Hoisted (non-recurrent) work for the whole sequence at once --------
    # Conv1d(k=1) == per-timestep linear; tanh -> MaxPool1d(k=1)=identity ->
    # relu; then LSTM layer-0 input projection + bias.
    conv = jnp.maximum(
        jnp.tanh(mdot(cw_ref[...], x_ref[...]) + cb_ref[...]), 0.0
    )                                                       # (C, T*BB) f32
    gates_ref[...] = mdot(wih0_ref[...], conv) + b0_ref[...]  # (4H, T*BB)

    # Constant sublane mask selecting the "g" (cell-input, tanh) gate rows.
    row = lax.broadcasted_iota(jnp.int32, (4 * H, BB), 0)
    is_g = (row >= 2 * H) & (row < 3 * H)

    # Hoist weights/biases out of the loop (single VMEM load each).
    whh0 = whh0_ref[...]
    whh1 = whh1_ref[...]
    wih1 = wih1_ref[...]
    b1 = b1_ref[...]

    def cell(pre_gates, whh, h_ref_, c_ref_):
        # Only MXU op on the recurrent critical path.
        gates = pre_gates + mdot(whh, h_ref_[...])
        # Single full-vreg activation pass:
        #   sigmoid(v) = 0.5*tanh(0.5*v) + 0.5  (rows i/f/o),  tanh(v) (rows g)
        t_ = jnp.tanh(jnp.where(is_g, gates, 0.5 * gates))
        act = jnp.where(is_g, t_, 0.5 * t_ + 0.5)
        i = act[0 * H:1 * H, :]          # aligned sublane slices (H % 8 == 0)
        f = act[1 * H:2 * H, :]
        g = act[2 * H:3 * H, :]
        o = act[3 * H:4 * H, :]
        c_new = f * c_ref_[...] + i * g
        h_new = o * jnp.tanh(c_new)
        c_ref_[...] = c_new
        h_ref_[...] = h_new
        return h_new

    def pre0(t):
        col = pl.multiple_of(t * BB, BB)   # BB % 128 == 0 -> lane-aligned
        return gates_ref[:, pl.ds(col, BB)]

    # ---- Init state ----------------------------------------------------------
    zero = jnp.zeros((H, BB), f32)
    h0_ref[...] = zero
    c0_ref[...] = zero
    h1_ref[...] = zero
    c1_ref[...] = zero
    max_ref[...] = jnp.full((H, BB), -jnp.inf, f32)

    # ---- Interleaved 2-layer recurrence --------------------------------------
    # iteration 0: layer-0 step 0 only.
    cell(pre0(0), whh0, h0_ref, c0_ref)

    # iterations 1..T-1: layer-1 step (t-1) + layer-0 step t (independent
    # inside one iteration -> overlap in the VLIW schedule).
    def body(t, carry):
        pre1 = mdot(wih1, h0_ref[...]) + b1      # uses h0_{t-1} (read pre-store)
        cell(pre0(t), whh0, h0_ref, c0_ref)      # layer-0 step t
        h1_new = cell(pre1, whh1, h1_ref, c1_ref)  # layer-1 step t-1
        max_ref[...] = jnp.maximum(max_ref[...], h1_new)
        return carry

    lax.fori_loop(1, T, body, 0, unroll=True)

    # epilogue: layer-1 step T-1.
    pre1 = mdot(wih1, h0_ref[...]) + b1
    h1_new = cell(pre1, whh1, h1_ref, c1_ref)
    max_ref[...] = jnp.maximum(max_ref[...], h1_new)

    # ---- Pool (tanh hoisted: max∘tanh == tanh∘max), Linear, tanh -------------
    pooled = jnp.tanh(max_ref[...])                           # (H, BB)
    out_ref[...] = jnp.tanh(mdot(lw_ref[...], pooled) + lb_ref[...])


# ----------------------------------------------------------------------------
# Wrapper
# ----------------------------------------------------------------------------
def cnn_lstm_forward(x, p, *, batch_block=None, matmul_dtype=jnp.float32):
    """x: (B, T, input_size) float32. Returns (B, output_size) float32.

    batch_block: lanes per grid program; must be a multiple of 128.
      Default: 128 for small B, 256 for large B (B > 384 also keeps NB >= 2 so
      the "parallel" grid axis shards across v7x's two TensorCores).
    matmul_dtype: jnp.float32 or jnp.bfloat16 (MXU operands only; all
      elementwise / EUP math and accumulation stay f32).
    """
    B, T, Din = x.shape
    H = p["whh0"].shape[1]
    O = p["lin_w"].shape[0]
    C = p["conv_w"].shape[0]

    if batch_block is None:
        batch_block = 128 if B <= 384 else 256
    BB = batch_block
    assert BB % 128 == 0, "batch_block must be a multiple of 128 (lane dim)"
    NB = pl.cdiv(B, BB)
    Bp = NB * BB
    if Bp != B:
        x = jnp.concatenate([x, jnp.zeros((Bp - B, T, Din), x.dtype)], axis=0)

    # Repack to (Din, NB*T*BB) with columns ordered (nb, t, local_b): each grid
    # program reads one contiguous (Din, T*BB) slab; batch lives in lanes.
    x2d = (
        x.reshape(NB, BB, T, Din)
        .transpose(3, 0, 2, 1)
        .reshape(Din, NB * T * BB)
        .astype(matmul_dtype)
    )

    mm = lambda w: w.astype(matmul_dtype)
    cw = mm(p["conv_w"])                      # (C, Din)
    cb = p["conv_b"].reshape(C, 1)
    wih0 = mm(p["wih0"])                      # (4H, C)
    whh0 = mm(p["whh0"])                      # (4H, H)
    b0 = p["b0"].reshape(4 * H, 1)
    wih1 = mm(p["wih1"])                      # (4H, H)
    whh1 = mm(p["whh1"])                      # (4H, H)
    b1 = p["b1"].reshape(4 * H, 1)
    lw = mm(p["lin_w"])                       # (O, H)
    lb = p["lin_b"].reshape(O, 1)

    def fixed(a):  # full-array block, resident across all grid steps
        return pl.BlockSpec(a.shape, lambda nb: (0,) * a.ndim)

    out = pl.pallas_call(
        cnn_lstm_kernel,
        out_shape=jax.ShapeDtypeStruct((O, Bp), jnp.float32),
        grid=(NB,),
        in_specs=[
            pl.BlockSpec((Din, T * BB), lambda nb: (0, nb)),   # x slab
            fixed(cw), fixed(cb),
            fixed(wih0), fixed(whh0), fixed(b0),
            fixed(wih1), fixed(whh1), fixed(b1),
            fixed(lw), fixed(lb),
        ],
        out_specs=pl.BlockSpec((O, BB), lambda nb: (0, nb)),
        scratch_shapes=[
            pltpu.VMEM((4 * H, T * BB), jnp.float32),   # hoisted pre-gates
            pltpu.VMEM((H, BB), jnp.float32),           # h0
            pltpu.VMEM((H, BB), jnp.float32),           # c0
            pltpu.VMEM((H, BB), jnp.float32),           # h1
            pltpu.VMEM((H, BB), jnp.float32),           # c1
            pltpu.VMEM((H, BB), jnp.float32),           # running max of h1
        ],
        compiler_params=pltpu.CompilerParams(
            dimension_semantics=("parallel",)
        ),
    )(x2d, cw, cb, wih0, whh0, b0, wih1, whh1, b1, lw, lb)

    return out.T[:B]


# ----------------------------------------------------------------------------
# Pure-JAX reference (same math) for a correctness check.
# ----------------------------------------------------------------------------
def reference_forward(x, p):
    H = p["whh0"].shape[1]
    conv = jnp.einsum("btd,cd->btc", x, p["conv_w"]) + p["conv_b"]
    conv = jnp.maximum(jnp.tanh(conv), 0.0)

    def lstm_layer(seq, wih, whh, b):
        B = seq.shape[0]

        def step(carry, xt):
            h, c = carry
            gates = xt @ wih.T + h @ whh.T + b
            i = jax.nn.sigmoid(gates[:, 0 * H:1 * H])
            f = jax.nn.sigmoid(gates[:, 1 * H:2 * H])
            g = jnp.tanh(gates[:, 2 * H:3 * H])
            o = jax.nn.sigmoid(gates[:, 3 * H:4 * H])
            c = f * c + i * g
            h = o * jnp.tanh(c)
            return (h, c), h

        init = (jnp.zeros((B, H), jnp.float32), jnp.zeros((B, H), jnp.float32))
        _, hs = lax.scan(step, init, jnp.transpose(seq, (1, 0, 2)))
        return jnp.transpose(hs, (1, 0, 2))

    h0 = lstm_layer(conv, p["wih0"], p["whh0"], p["b0"])
    h1 = lstm_layer(h0, p["wih1"], p["whh1"], p["b1"])
    pooled = jnp.max(jnp.tanh(h1), axis=1)
    return jnp.tanh(pooled @ p["lin_w"].T + p["lin_b"])


# ----------------------------------------------------------------------------
# Deterministic synthetic parameters + example run
# ----------------------------------------------------------------------------
def make_params(key, input_size, cnn_filter, hidden_size, output_size):
    ks = jax.random.split(key, 10)
    s = 0.1
    f32 = jnp.float32
    return {
        # Conv1d(input_size, cnn_filter, 1): weight (C, Din, 1) -> (C, Din)
        "conv_w": jax.random.normal(ks[0], (cnn_filter, input_size), f32) * s,
        "conv_b": jax.random.normal(ks[1], (cnn_filter,), f32) * s,
        # LSTM layer 0 (input = cnn_filter); b_ih + b_hh folded together
        "wih0": jax.random.normal(ks[2], (4 * hidden_size, cnn_filter), f32) * s,
        "whh0": jax.random.normal(ks[3], (4 * hidden_size, hidden_size), f32) * s,
        "b0": jax.random.normal(ks[4], (4 * hidden_size,), f32) * s,
        # LSTM layer 1 (input = hidden_size)
        "wih1": jax.random.normal(ks[5], (4 * hidden_size, hidden_size), f32) * s,
        "whh1": jax.random.normal(ks[6], (4 * hidden_size, hidden_size), f32) * s,
        "b1": jax.random.normal(ks[7], (4 * hidden_size,), f32) * s,
        # Linear(hidden_size, output_size)
        "lin_w": jax.random.normal(ks[8], (output_size, hidden_size), f32) * s,
        "lin_b": jax.random.normal(ks[9], (output_size,), f32) * s,
    }


if __name__ == "__main__":
    # config: input_size=4, cnn_filter=16, hidden_size=32, output_size=4
    B, T = 2, 8
    INPUT_SIZE, CNN_FILTER, HIDDEN, OUTPUT = 4, 16, 32, 4

    key = jax.random.PRNGKey(0)
    kx, kp = jax.random.split(key)
    x = jax.random.normal(kx, (B, T, INPUT_SIZE), jnp.float32)
    params = make_params(kp, INPUT_SIZE, CNN_FILTER, HIDDEN, OUTPUT)

    ref = jax.block_until_ready(reference_forward(x, params))

    # f32 MXU path (exact-math check).
    out_f32 = jax.block_until_ready(cnn_lstm_forward(x, params))
    assert out_f32.shape == (B, OUTPUT), out_f32.shape
    assert jnp.allclose(out_f32, ref, atol=1e-4, rtol=1e-4), (out_f32, ref)

    # bf16 MXU-operand path (v6e/v7x optimization); loose tolerance.
    out_bf16 = jax.block_until_ready(
        cnn_lstm_forward(x, params, matmul_dtype=jnp.bfloat16)
    )
    assert out_bf16.shape == (B, OUTPUT), out_bf16.shape
    assert jnp.all(jnp.isfinite(out_bf16))
    assert jnp.allclose(out_bf16, ref, atol=1e-1, rtol=1e-1), (out_bf16, ref)

    print("KERNEL_OK")
</pallas_src>

<mosaic_0001>
module attributes {stable_mosaic.version = 11 : i64} {
  func.func @cnn_lstm_kernel(%arg0: i32, %arg1: memref<4x1024xf32, #tpu.memory_space<vmem>>, %arg2: memref<16x4xf32, #tpu.memory_space<vmem>>, %arg3: memref<16x1xf32, #tpu.memory_space<vmem>>, %arg4: memref<128x16xf32, #tpu.memory_space<vmem>>, %arg5: memref<128x32xf32, #tpu.memory_space<vmem>>, %arg6: memref<128x1xf32, #tpu.memory_space<vmem>>, %arg7: memref<128x32xf32, #tpu.memory_space<vmem>>, %arg8: memref<128x32xf32, #tpu.memory_space<vmem>>, %arg9: memref<128x1xf32, #tpu.memory_space<vmem>>, %arg10: memref<4x32xf32, #tpu.memory_space<vmem>>, %arg11: memref<4x1xf32, #tpu.memory_space<vmem>>, %arg12: memref<4x128xf32, #tpu.memory_space<vmem>>, %arg13: memref<128x1024xf32, #tpu.memory_space<vmem>>, %arg14: memref<32x128xf32, #tpu.memory_space<vmem>>, %arg15: memref<32x128xf32, #tpu.memory_space<vmem>>, %arg16: memref<32x128xf32, #tpu.memory_space<vmem>>, %arg17: memref<32x128xf32, #tpu.memory_space<vmem>>, %arg18: memref<32x128xf32, #tpu.memory_space<vmem>>) attributes {dimension_semantics = [#tpu.dimension_semantics<parallel>], iteration_bounds = array<i64: 1>, scalar_prefetch = 0 : i64, scratch_operands = 6 : i64, tpu.core_type = #tpu.core_type<tc>, window_params = [{transform_indices = @transform_0, window_bounds = array<i64: 4, 1024>}, {pipeline_mode = #tpu.pipeline_mode<synchronous>, transform_indices = @transform_1, window_bounds = array<i64: 16, 4>}, {pipeline_mode = #tpu.pipeline_mode<synchronous>, transform_indices = @transform_2, window_bounds = array<i64: 16, 1>}, {pipeline_mode = #tpu.pipeline_mode<synchronous>, transform_indices = @transform_3, window_bounds = array<i64: 128, 16>}, {pipeline_mode = #tpu.pipeline_mode<synchronous>, transform_indices = @transform_4, window_bounds = array<i64: 128, 32>}, {pipeline_mode = #tpu.pipeline_mode<synchronous>, transform_indices = @transform_5, window_bounds = array<i64: 128, 1>}, {pipeline_mode = #tpu.pipeline_mode<synchronous>, transform_indices = @transform_6, window_bounds = array<i64: 128, 32>}, {pipeline_mode = #tpu.pipeline_mode<synchronous>, transform_indices = @transform_7, window_bounds = array<i64: 128, 32>}, {pipeline_mode = #tpu.pipeline_mode<synchronous>, transform_indices = @transform_8, window_bounds = array<i64: 128, 1>}, {pipeline_mode = #tpu.pipeline_mode<synchronous>, transform_indices = @transform_9, window_bounds = array<i64: 4, 32>}, {pipeline_mode = #tpu.pipeline_mode<synchronous>, transform_indices = @transform_10, window_bounds = array<i64: 4, 1>}, {transform_indices = @transform_11, window_bounds = array<i64: 4, 128>}]} {
    %c0 = arith.constant 0 : index
    %c0_0 = arith.constant 0 : index
    %0 = vector.load %arg2[%c0, %c0_0] : memref<16x4xf32, #tpu.memory_space<vmem>>, vector<16x4xf32>
    %c0_1 = arith.constant 0 : index
    %c0_2 = arith.constant 0 : index
    %1 = vector.load %arg1[%c0_1, %c0_2] : memref<4x1024xf32, #tpu.memory_space<vmem>>, vector<4x1024xf32>
    %cst = arith.constant dense<0.000000e+00> : vector<16x1024xf32>
    %2 = tpu.matmul %0, %1, %cst {dimension_numbers = #tpu.dot_dimension_numbers<[1], [0], [0], [1], [0, 0, 1, 1], [], []>} : vector<16x4xf32>, vector<4x1024xf32>, vector<16x1024xf32> -> vector<16x1024xf32>
    %c0_3 = arith.constant 0 : index
    %c0_4 = arith.constant 0 : index
    %3 = vector.load %arg3[%c0_3, %c0_4] : memref<16x1xf32, #tpu.memory_space<vmem>>, vector<16x1xf32>
    %4 = vector.broadcast %3 : vector<16x1xf32> to vector<16x1024xf32>
    %5 = arith.addf %2, %4 : vector<16x1024xf32>
    %6 = math.tanh %5 : vector<16x1024xf32>
    %cst_5 = arith.constant 0.000000e+00 : f32
    %7 = vector.broadcast %cst_5 : f32 to vector<16x1024xf32>
    %8 = arith.maximumf %6, %7 : vector<16x1024xf32>
    %c0_6 = arith.constant 0 : index
    %c0_7 = arith.constant 0 : index
    %9 = vector.load %arg4[%c0_6, %c0_7] : memref<128x16xf32, #tpu.memory_space<vmem>>, vector<128x16xf32>
    %cst_8 = arith.constant dense<0.000000e+00> : vector<128x1024xf32>
    %10 = tpu.matmul %9, %8, %cst_8 {dimension_numbers = #tpu.dot_dimension_numbers<[1], [0], [0], [1], [0, 0, 1, 1], [], []>} : vector<128x16xf32>, vector<16x1024xf32>, vector<128x1024xf32> -> vector<128x1024xf32>
    %c0_9 = arith.constant 0 : index
    %c0_10 = arith.constant 0 : index
    %11 = vector.load %arg6[%c0_9, %c0_10] : memref<128x1xf32, #tpu.memory_space<vmem>>, vector<128x1xf32>
    %12 = vector.broadcast %11 : vector<128x1xf32> to vector<128x1024xf32>
    %13 = arith.addf %10, %12 : vector<128x1024xf32>
    %c0_11 = arith.constant 0 : index
    %c0_12 = arith.constant 0 : index
    %14 = vector.load %arg13[%c0_11, %c0_12] : memref<128x1024xf32, #tpu.memory_space<vmem>>, vector<128x1024xf32>
    tpu.vector_store %arg13[%c0_11, %c0_12], %13 {strides = array<i32>} : memref<128x1024xf32, #tpu.memory_space<vmem>>, vector<128x1024xf32>,
    %15 = tpu.iota {dimensions = array<i32: 0>} : vector<128x128xi32>
    %c64_i32 = arith.constant 64 : i32
    %16 = vector.broadcast %c64_i32 : i32 to vector<128x128xi32>
    %17 = arith.cmpi sge, %15, %16 : vector<128x128xi32>
    %c96_i32 = arith.constant 96 : i32
    %18 = vector.broadcast %c96_i32 : i32 to vector<128x128xi32>
    %19 = arith.cmpi slt, %15, %18 : vector<128x128xi32>
    %20 = arith.andi %17, %19 : vector<128x128xi1>
    %c0_13 = arith.constant 0 : index
    %c0_14 = arith.constant 0 : index
    %21 = vector.load %arg5[%c0_13, %c0_14] : memref<128x32xf32, #tpu.memory_space<vmem>>, vector<128x32xf32>
    %c0_15 = arith.constant 0 : index
    %c0_16 = arith.constant 0 : index
    %22 = vector.load %arg8[%c0_15, %c0_16] : memref<128x32xf32, #tpu.memory_space<vmem>>, vector<128x32xf32>
    %c0_17 = arith.constant 0 : index
    %c0_18 = arith.constant 0 : index
    %23 = vector.load %arg7[%c0_17, %c0_18] : memref<128x32xf32, #tpu.memory_space<vmem>>, vector<128x32xf32>
    %c0_19 = arith.constant 0 : index
    %c0_20 = arith.constant 0 : index
    %24 = vector.load %arg9[%c0_19, %c0_20] : memref<128x1xf32, #tpu.memory_space<vmem>>, vector<128x1xf32>
    %cst_21 = arith.constant 0.000000e+00 : f32
    %25 = vector.broadcast %cst_21 : f32 to vector<32x128xf32>
    %c0_22 = arith.constant 0 : index
    %c0_23 = arith.constant 0 : index
    %26 = vector.load %arg14[%c0_22, %c0_23] : memref<32x128xf32, #tpu.memory_space<vmem>>, vector<32x128xf32>
    tpu.vector_store %arg14[%c0_22, %c0_23], %25 {strides = array<i32>} : memref<32x128xf32, #tpu.memory_space<vmem>>, vector<32x128xf32>,
    %c0_24 = arith.constant 0 : index
    %c0_25 = arith.constant 0 : index
    %27 = vector.load %arg15[%c0_24, %c0_25] : memref<32x128xf32, #tpu.memory_space<vmem>>, vector<32x128xf32>
    tpu.vector_store %arg15[%c0_24, %c0_25], %25 {strides = array<i32>} : memref<32x128xf32, #tpu.memory_space<vmem>>, vector<32x128xf32>,
    %c0_26 = arith.constant 0 : index
    %c0_27 = arith.constant 0 : index
    %28 = vector.load %arg16[%c0_26, %c0_27] : memref<32x128xf32, #tpu.memory_space<vmem>>, vector<32x128xf32>
    tpu.vector_store %arg16[%c0_26, %c0_27], %25 {strides = array<i32>} : memref<32x128xf32, #tpu.memory_space<vmem>>, vector<32x128xf32>,
    %c0_28 = arith.constant 0 : index
    %c0_29 = arith.constant 0 : index
    %29 = vector.load %arg17[%c0_28, %c0_29] : memref<32x128xf32, #tpu.memory_space<vmem>>, vector<32x128xf32>
    tpu.vector_store %arg17[%c0_28, %c0_29], %25 {strides = array<i32>} : memref<32x128xf32, #tpu.memory_space<vmem>>, vector<32x128xf32>,
    %cst_30 = arith.constant 0xFF800000 : f32
    %30 = vector.broadcast %cst_30 : f32 to vector<32x128xf32>
    %c0_31 = arith.constant 0 : index
    %c0_32 = arith.constant 0 : index
    %31 = vector.load %arg18[%c0_31, %c0_32] : memref<32x128xf32, #tpu.memory_space<vmem>>, vector<32x128xf32>
    tpu.vector_store %arg18[%c0_31, %c0_32], %30 {strides = array<i32>} : memref<32x128xf32, #tpu.memory_space<vmem>>, vector<32x128xf32>,
    %c0_i32 = arith.constant 0 : i32
    %32 = tpu.assume_multiple %c0_i32, 128 : i32
    %c0_33 = arith.constant 0 : index
    %33 = arith.index_cast %32 : i32 to index
    %34 = vector.load %arg13[%c0_33, %33] : memref<128x1024xf32, #tpu.memory_space<vmem>>, vector<128x128xf32>
    %c0_34 = arith.constant 0 : index
    %c0_35 = arith.constant 0 : index
    %35 = vector.load %arg14[%c0_34, %c0_35] : memref<32x128xf32, #tpu.memory_space<vmem>>, vector<32x128xf32>
    %cst_36 = arith.constant dense<0.000000e+00> : vector<128x128xf32>
    %36 = tpu.matmul %21, %35, %cst_36 {dimension_numbers = #tpu.dot_dimension_numbers<[1], [0], [0], [1], [0, 0, 1, 1], [], []>} : vector<128x32xf32>, vector<32x128xf32>, vector<128x128xf32> -> vector<128x128xf32>
    %37 = arith.addf %34, %36 : vector<128x128xf32>
    %cst_37 = arith.constant 5.000000e-01 : f32
    %38 = vector.broadcast %cst_37 : f32 to vector<128x128xf32>
    %39 = arith.mulf %38, %37 : vector<128x128xf32>
    %40 = arith.select %20, %37, %39 : vector<128x128xi1>, vector<128x128xf32>
    %41 = math.tanh %40 : vector<128x128xf32>
    %cst_38 = arith.constant 5.000000e-01 : f32
    %42 = vector.broadcast %cst_38 : f32 to vector<128x128xf32>
    %43 = arith.mulf %42, %41 : vector<128x128xf32>
    %cst_39 = arith.constant 5.000000e-01 : f32
    %44 = vector.broadcast %cst_39 : f32 to vector<128x128xf32>
    %45 = arith.addf %43, %44 : vector<128x128xf32>
    %46 = arith.select %20, %41, %45 : vector<128x128xi1>, vector<128x128xf32>
    %47 = vector.extract_strided_slice %46 {offsets = [0, 0], sizes = [32, 128], strides = [1, 1]} : vector<128x128xf32> to vector<32x128xf32>
    %48 = vector.extract_strided_slice %46 {offsets = [32, 0], sizes = [32, 128], strides = [1, 1]} : vector<128x128xf32> to vector<32x128xf32>
    %49 = vector.extract_strided_slice %46 {offsets = [64, 0], sizes = [32, 128], strides = [1, 1]} : vector<128x128xf32> to vector<32x128xf32>
    %50 = vector.extract_strided_slice %46 {offsets = [96, 0], sizes = [32, 128], strides = [1, 1]} : vector<128x128xf32> to vector<32x128xf32>
    %c0_40 = arith.constant 0 : index
    %c0_41 = arith.constant 0 : index
    %51 = vector.load %arg15[%c0_40, %c0_41] : memref<32x128xf32, #tpu.memory_space<vmem>>, vector<32x128xf32>
    %52 = arith.mulf %48, %51 : vector<32x128xf32>
    %53 = arith.mulf %47, %49 : vector<32x128xf32>
    %54 = arith.addf %52, %53 : vector<32x128xf32>
    %55 = math.tanh %54 : vector<32x128xf32>
    %56 = arith.mulf %50, %55 : vector<32x128xf32>
    %c0_42 = arith.constant 0 : index
    %c0_43 = arith.constant 0 : index
    %57 = vector.load %arg15[%c0_42, %c0_43] : memref<32x128xf32, #tpu.memory_space<vmem>>, vector<32x128xf32>
    tpu.vector_store %arg15[%c0_42, %c0_43], %54 {strides = array<i32>} : memref<32x128xf32, #tpu.memory_space<vmem>>, vector<32x128xf32>,
    %c0_44 = arith.constant 0 : index
    %c0_45 = arith.constant 0 : index
    %58 = vector.load %arg14[%c0_44, %c0_45] : memref<32x128xf32, #tpu.memory_space<vmem>>, vector<32x128xf32>
    tpu.vector_store %arg14[%c0_44, %c0_45], %56 {strides = array<i32>} : memref<32x128xf32, #tpu.memory_space<vmem>>, vector<32x128xf32>,
    %c1_i32 = arith.constant 1 : i32
    %c0_46 = arith.constant 0 : index
    %c0_47 = arith.constant 0 : index
    %59 = vector.load %arg14[%c0_46, %c0_47] : memref<32x128xf32, #tpu.memory_space<vmem>>, vector<32x128xf32>
    %cst_48 = arith.constant dense<0.000000e+00> : vector<128x128xf32>
    %60 = tpu.matmul %23, %59, %cst_48 {dimension_numbers = #tpu.dot_dimension_numbers<[1], [0], [0], [1], [0, 0, 1, 1], [], []>} : vector<128x32xf32>, vector<32x128xf32>, vector<128x128xf32> -> vector<128x128xf32>
    %61 = vector.broadcast %24 : vector<128x1xf32> to vector<128x128xf32>
    %62 = arith.addf %60, %61 : vector<128x128xf32>
    %c128_i32 = arith.constant 128 : i32
    %63 = arith.muli %c1_i32, %c128_i32 : i32
    %64 = tpu.assume_multiple %63, 128 : i32
    %c0_49 = arith.constant 0 : index
    %65 = arith.index_cast %64 : i32 to index
    %66 = vector.load %arg13[%c0_49, %65] : memref<128x1024xf32, #tpu.memory_space<vmem>>, vector<128x128xf32>
    %c0_50 = arith.constant 0 : index
    %c0_51 = arith.constant 0 : index
    %67 = vector.load %arg14[%c0_50, %c0_51] : memref<32x128xf32, #tpu.memory_space<vmem>>, vector<32x128xf32>
    %cst_52 = arith.constant dense<0.000000e+00> : vector<128x128xf32>
    %68 = tpu.matmul %21, %67, %cst_52 {dimension_numbers = #tpu.dot_dimension_numbers<[1], [0], [0], [1], [0, 0, 1, 1], [], []>} : vector<128x32xf32>, vector<32x128xf32>, vector<128x128xf32> -> vector<128x128xf32>
    %69 = arith.addf %66, %68 : vector<128x128xf32>
    %cst_53 = arith.constant 5.000000e-01 : f32
    %70 = vector.broadcast %cst_53 : f32 to vector<128x128xf32>
    %71 = arith.mulf %70, %69 : vector<128x128xf32>
    %72 = arith.select %20, %69, %71 : vector<128x128xi1>, vector<128x128xf32>
    %73 = math.tanh %72 : vector<128x128xf32>
    %cst_54 = arith.constant 5.000000e-01 : f32
    %74 = vector.broadcast %cst_54 : f32 to vector<128x128xf32>
    %75 = arith.mulf %74, %73 : vector<128x128xf32>
    %cst_55 = arith.constant 5.000000e-01 : f32
    %76 = vector.broadcast %cst_55 : f32 to vector<128x128xf32>
    %77 = arith.addf %75, %76 : vector<128x128xf32>
    %78 = arith.select %20, %73, %77 : vector<128x128xi1>, vector<128x128xf32>
    %79 = vector.extract_strided_slice %78 {offsets = [0, 0], sizes = [32, 128], strides = [1, 1]} : vector<128x128xf32> to vector<32x128xf32>
    %80 = vector.extract_strided_slice %78 {offsets = [32, 0], sizes = [32, 128], strides = [1, 1]} : vector<128x128xf32> to vector<32x128xf32>
    %81 = vector.extract_strided_slice %78 {offsets = [64, 0], sizes = [32, 128], strides = [1, 1]} : vector<128x128xf32> to vector<32x128xf32>
    %82 = vector.extract_strided_slice %78 {offsets = [96, 0], sizes = [32, 128], strides = [1, 1]} : vector<128x128xf32> to vector<32x128xf32>
    %c0_56 = arith.constant 0 : index
    %c0_57 = arith.constant 0 : index
    %83 = vector.load %arg15[%c0_56, %c0_57] : memref<32x128xf32, #tpu.memory_space<vmem>>, vector<32x128xf32>
    %84 = arith.mulf %80, %83 : vector<32x128xf32>
    %85 = arith.mulf %79, %81 : vector<32x128xf32>
    %86 = arith.addf %84, %85 : vector<32x128xf32>
    %87 = math.tanh %86 : vector<32x128xf32>
    %88 = arith.mulf %82, %87 : vector<32x128xf32>
    %c0_58 = arith.constant 0 : index
    %c0_59 = arith.constant 0 : index
    %89 = vector.load %arg15[%c0_58, %c0_59] : memref<32x128xf32, #tpu.memory_space<vmem>>, vector<32x128xf32>
    tpu.vector_store %arg15[%c0_58, %c0_59], %86 {strides = array<i32>} : memref<32x128xf32, #tpu.memory_space<vmem>>, vector<32x128xf32>,
    %c0_60 = arith.constant 0 : index
    %c0_61 = arith.constant 0 : index
    %90 = vector.load %arg14[%c0_60, %c0_61] : memref<32x128xf32, #tpu.memory_space<vmem>>, vector<32x128xf32>
    tpu.vector_store %arg14[%c0_60, %c0_61], %88 {strides = array<i32>} : memref<32x128xf32, #tpu.memory_space<vmem>>, vector<32x128xf32>,
    %c0_62 = arith.constant 0 : index
    %c0_63 = arith.constant 0 : index
    %91 = vector.load %arg16[%c0_62, %c0_63] : memref<32x128xf32, #tpu.memory_space<vmem>>, vector<32x128xf32>
    %cst_64 = arith.constant dense<0.000000e+00> : vector<128x128xf32>
    %92 = tpu.matmul %22, %91, %cst_64 {dimension_numbers = #tpu.dot_dimension_numbers<[1], [0], [0], [1], [0, 0, 1, 1], [], []>} : vector<128x32xf32>, vector<32x128xf32>, vector<128x128xf32> -> vector<128x128xf32>
    %93 = arith.addf %62, %92 : vector<128x128xf32>
    %cst_65 = arith.constant 5.000000e-01 : f32
    %94 = vector.broadcast %cst_65 : f32 to vector<128x128xf32>
    %95 = arith.mulf %94, %93 : vector<128x128xf32>
    %96 = arith.select %20, %93, %95 : vector<128x128xi1>, vector<128x128xf32>
    %97 = math.tanh %96 : vector<128x128xf32>
    %cst_66 = arith.constant 5.000000e-01 : f32
    %98 = vector.broadcast %cst_66 : f32 to vector<128x128xf32>
    %99 = arith.mulf %98, %97 : vector<128x128xf32>
    %cst_67 = arith.constant 5.000000e-01 : f32
    %100 = vector.broadcast %cst_67 : f32 to vector<128x128xf32>
    %101 = arith.addf %99, %100 : vector<128x128xf32>
    %102 = arith.select %20, %97, %101 : vector<128x128xi1>, vector<128x128xf32>
    %103 = vector.extract_strided_slice %102 {offsets = [0, 0], sizes = [32, 128], strides = [1, 1]} : vector<128x128xf32> to vector<32x128xf32>
    %104 = vector.extract_strided_slice %102 {offsets = [32, 0], sizes = [32, 128], strides = [1, 1]} : vector<128x128xf32> to vector<32x128xf32>
    %105 = vector.extract_strided_slice %102 {offsets = [64, 0], sizes = [32, 128], strides = [1, 1]} : vector<128x128xf32> to vector<32x128xf32>
    %106 = vector.extract_strided_slice %102 {offsets = [96, 0], sizes = [32, 128], strides = [1, 1]} : vector<128x128xf32> to vector<32x128xf32>
    %c0_68 = arith.constant 0 : index
    %c0_69 = arith.constant 0 : index
    %107 = vector.load %arg17[%c0_68, %c0_69] : memref<32x128xf32, #tpu.memory_space<vmem>>, vector<32x128xf32>
    %108 = arith.mulf %104, %107 : vector<32x128xf32>
    %109 = arith.mulf %103, %105 : vector<32x128xf32>
    %110 = arith.addf %108, %109 : vector<32x128xf32>
    %111 = math.tanh %110 : vector<32x128xf32>
    %112 = arith.mulf %106, %111 : vector<32x128xf32>
    %c0_70 = arith.constant 0 : index
    %c0_71 = arith.constant 0 : index
    %113 = vector.load %arg17[%c0_70, %c0_71] : memref<32x128xf32, #tpu.memory_space<vmem>>, vector<32x128xf32>
    tpu.vector_store %arg17[%c0_70, %c0_71], %110 {strides = array<i32>} : memref<32x128xf32, #tpu.memory_space<vmem>>, vector<32x128xf32>,
    %c0_72 = arith.constant 0 : index
    %c0_73 = arith.constant 0 : index
    %114 = vector.load %arg16[%c0_72, %c0_73] : memref<32x128xf32, #tpu.memory_space<vmem>>, vector<32x128xf32>
    tpu.vector_store %arg16[%c0_72, %c0_73], %112 {strides = array<i32>} : memref<32x128xf32, #tpu.memory_space<vmem>>, vector<32x128xf32>,
    %c0_74 = arith.constant 0 : index
    %c0_75 = arith.constant 0 : index
    %115 = vector.load %arg18[%c0_74, %c0_75] : memref<32x128xf32, #tpu.memory_space<vmem>>, vector<32x128xf32>
    %116 = arith.maximumf %115, %112 : vector<32x128xf32>
    %c0_76 = arith.constant 0 : index
    %c0_77 = arith.constant 0 : index
    %117 = vector.load %arg18[%c0_76, %c0_77] : memref<32x128xf32, #tpu.memory_space<vmem>>, vector<32x128xf32>
    tpu.vector_store %arg18[%c0_76, %c0_77], %116 {strides = array<i32>} : memref<32x128xf32, #tpu.memory_space<vmem>>, vector<32x128xf32>,
    %c2_i32 = arith.constant 2 : i32
    %c0_78 = arith.constant 0 : index
    %c0_79 = arith.constant 0 : index
    %118 = vector.load %arg14[%c0_78, %c0_79] : memref<32x128xf32, #tpu.memory_space<vmem>>, vector<32x128xf32>
    %cst_80 = arith.constant dense<0.000000e+00> : vector<128x128xf32>
    %119 = tpu.matmul %23, %118, %cst_80 {dimension_numbers = #tpu.dot_dimension_numbers<[1], [0], [0], [1], [0, 0, 1, 1], [], []>} : vector<128x32xf32>, vector<32x128xf32>, vector<128x128xf32> -> vector<128x128xf32>
    %120 = vector.broadcast %24 : vector<128x1xf32> to vector<128x128xf32>
    %121 = arith.addf %119, %120 : vector<128x128xf32>
    %c128_i32_81 = arith.constant 128 : i32
    %122 = arith.muli %c2_i32, %c128_i32_81 : i32
    %123 = tpu.assume_multiple %122, 128 : i32
    %c0_82 = arith.constant 0 : index
    %124 = arith.index_cast %123 : i32 to index
    %125 = vector.load %arg13[%c0_82, %124] : memref<128x1024xf32, #tpu.memory_space<vmem>>, vector<128x128xf32>
    %c0_83 = arith.constant 0 : index
    %c0_84 = arith.constant 0 : index
    %126 = vector.load %arg14[%c0_83, %c0_84] : memref<32x128xf32, #tpu.memory_space<vmem>>, vector<32x128xf32>
    %cst_85 = arith.constant dense<0.000000e+00> : vector<128x128xf32>
    %127 = tpu.matmul %21, %126, %cst_85 {dimension_numbers = #tpu.dot_dimension_numbers<[1], [0], [0], [1], [0, 0, 1, 1], [], []>} : vector<128x32xf32>, vector<32x128xf32>, vector<128x128xf32> -> vector<128x128xf32>
    %128 = arith.addf %125, %127 : vector<128x128xf32>
    %cst_86 = arith.constant 5.000000e-01 : f32
    %129 = vector.broadcast %cst_86 : f32 to vector<128x128xf32>
    %130 = arith.mulf %129, %128 : vector<128x128xf32>
    %131 = arith.select %20, %128, %130 : vector<128x128xi1>, vector<128x128xf32>
    %132 = math.tanh %131 : vector<128x128xf32>
    %cst_87 = arith.constant 5.000000e-01 : f32
    %133 = vector.broadcast %cst_87 : f32 to vector<128x128xf32>
    %134 = arith.mulf %133, %132 : vector<128x128xf32>
    %cst_88 = arith.constant 5.000000e-01 : f32
    %135 = vector.broadcast %cst_88 : f32 to vector<128x128xf32>
    %136 = arith.addf %134, %135 : vector<128x128xf32>
    %137 = arith.select %20, %132, %136 : vector<128x128xi1>, vector<128x128xf32>
    %138 = vector.extract_strided_slice %137 {offsets = [0, 0], sizes = [32, 128], strides = [1, 1]} : vector<128x128xf32> to vector<32x128xf32>
    %139 = vector.extract_strided_slice %137 {offsets = [32, 0], sizes = [32, 128], strides = [1, 1]} : vector<128x128xf32> to vector<32x128xf32>
    %140 = vector.extract_strided_slice %137 {offsets = [64, 0], sizes = [32, 128], strides = [1, 1]} : vector<128x128xf32> to vector<32x128xf32>
    %141 = vector.extract_strided_slice %137 {offsets = [96, 0], sizes = [32, 128], strides = [1, 1]} : vector<128x128xf32> to vector<32x128xf32>
    %c0_89 = arith.constant 0 : index
    %c0_90 = arith.constant 0 : index
    %142 = vector.load %arg15[%c0_89, %c0_90] : memref<32x128xf32, #tpu.memory_space<vmem>>, vector<32x128xf32>
    %143 = arith.mulf %139, %142 : vector<32x128xf32>
    %144 = arith.mulf %138, %140 : vector<32x128xf32>
    %145 = arith.addf %143, %144 : vector<32x128xf32>
    %146 = math.tanh %145 : vector<32x128xf32>
    %147 = arith.mulf %141, %146 : vector<32x128xf32>
    %c0_91 = arith.constant 0 : index
    %c0_92 = arith.constant 0 : index
    %148 = vector.load %arg15[%c0_91, %c0_92] : memref<32x128xf32, #tpu.memory_space<vmem>>, vector<32x128xf32>
    tpu.vector_store %arg15[%c0_91, %c0_92], %145 {strides = array<i32>} : memref<32x128xf32, #tpu.memory_space<vmem>>, vector<32x128xf32>,
    %c0_93 = arith.constant 0 : index
    %c0_94 = arith.constant 0 : index
    %149 = vector.load %arg14[%c0_93, %c0_94] : memref<32x128xf32, #tpu.memory_space<vmem>>, vector<32x128xf32>
    tpu.vector_store %arg14[%c0_93, %c0_94], %147 {strides = array<i32>} : memref<32x128xf32, #tpu.memory_space<vmem>>, vector<32x128xf32>,
    %c0_95 = arith.constant 0 : index
    %c0_96 = arith.constant 0 : index
    %150 = vector.load %arg16[%c0_95, %c0_96] : memref<32x128xf32, #tpu.memory_space<vmem>>, vector<32x128xf32>
    %cst_97 = arith.constant dense<0.000000e+00> : vector<128x128xf32>
    %151 = tpu.matmul %22, %150, %cst_97 {dimension_numbers = #tpu.dot_dimension_numbers<[1], [0], [0], [1], [0, 0, 1, 1], [], []>} : vector<128x32xf32>, vector<32x128xf32>, vector<128x128xf32> -> vector<128x128xf32>
    %152 = arith.addf %121, %151 : vector<128x128xf32>
    %cst_98 = arith.constant 5.000000e-01 : f32
    %153 = vector.broadcast %cst_98 : f32 to vector<128x128xf32>
    %154 = arith.mulf %153, %152 : vector<128x128xf32>
    %155 = arith.select %20, %152, %154 : vector<128x128xi1>, vector<128x128xf32>
    %156 = math.tanh %155 : vector<128x128xf32>
    %cst_99 = arith.constant 5.000000e-01 : f32
    %157 = vector.broadcast %cst_99 : f32 to vector<128x128xf32>
    %158 = arith.mulf %157, %156 : vector<128x128xf32>
    %cst_100 = arith.constant 5.000000e-01 : f32
    %159 = vector.broadcast %cst_100 : f32 to vector<128x128xf32>
    %160 = arith.addf %158, %159 : vector<128x128xf32>
    %161 = arith.select %20, %156, %160 : vector<128x128xi1>, vector<128x128xf32>
    %162 = vector.extract_strided_slice %161 {offsets = [0, 0], sizes = [32, 128], strides = [1, 1]} : vector<128x128xf32> to vector<32x128xf32>
    %163 = vector.extract_strided_slice %161 {offsets = [32, 0], sizes = [32, 128], strides = [1, 1]} : vector<128x128xf32> to vector<32x128xf32>
    %164 = vector.extract_strided_slice %161 {offsets = [64, 0], sizes = [32, 128], strides = [1, 1]} : vector<128x128xf32> to vector<32x128xf32>
    %165 = vector.extract_strided_slice %161 {offsets = [96, 0], sizes = [32, 128], strides = [1, 1]} : vector<128x128xf32> to vector<32x128xf32>
    %c0_101 = arith.constant 0 : index
    %c0_102 = arith.constant 0 : index
    %166 = vector.load %arg17[%c0_101, %c0_102] : memref<32x128xf32, #tpu.memory_space<vmem>>, vector<32x128xf32>
    %167 = arith.mulf %163, %166 : vector<32x128xf32>
    %168 = arith.mulf %162, %164 : vector<32x128xf32>
    %169 = arith.addf %167, %168 : vector<32x128xf32>
    %170 = math.tanh %169 : vector<32x128xf32>
    %171 = arith.mulf %165, %170 : vector<32x128xf32>
    %c0_103 = arith.constant 0 : index
    %c0_104 = arith.constant 0 : index
    %172 = vector.load %arg17[%c0_103, %c0_104] : memref<32x128xf32, #tpu.memory_space<vmem>>, vector<32x128xf32>
    tpu.vector_store %arg17[%c0_103, %c0_104], %169 {strides = array<i32>} : memref<32x128xf32, #tpu.memory_space<vmem>>, vector<32x128xf32>,
    %c0_105 = arith.constant 0 : index
    %c0_106 = arith.constant 0 : index
    %173 = vector.load %arg16[%c0_105, %c0_106] : memref<32x128xf32, #tpu.memory_space<vmem>>, vector<32x128xf32>
    tpu.vector_store %arg16[%c0_105, %c0_106], %171 {strides = array<i32>} : memref<32x128xf32, #tpu.memory_space<vmem>>, vector<32x128xf32>,
    %c0_107 = arith.constant 0 : index
    %c0_108 = arith.constant 0 : index
    %174 = vector.load %arg18[%c0_107, %c0_108] : memref<32x128xf32, #tpu.memory_space<vmem>>, vector<32x128xf32>
    %175 = arith.maximumf %174, %171 : vector<32x128xf32>
    %c0_109 = arith.constant 0 : index
    %c0_110 = arith.constant 0 : index
    %176 = vector.load %arg18[%c0_109, %c0_110] : memref<32x128xf32, #tpu.memory_space<vmem>>, vector<32x128xf32>
    tpu.vector_store %arg18[%c0_109, %c0_110], %175 {strides = array<i32>} : memref<32x128xf32, #tpu.memory_space<vmem>>, vector<32x128xf32>,
    %c3_i32 = arith.constant 3 : i32
    %c0_111 = arith.constant 0 : index
    %c0_112 = arith.constant 0 : index
    %177 = vector.load %arg14[%c0_111, %c0_112] : memref<32x128xf32, #tpu.memory_space<vmem>>, vector<32x128xf32>
    %cst_113 = arith.constant dense<0.000000e+00> : vector<128x128xf32>
    %178 = tpu.matmul %23, %177, %cst_113 {dimension_numbers = #tpu.dot_dimension_numbers<[1], [0], [0], [1], [0, 0, 1, 1], [], []>} : vector<128x32xf32>, vector<32x128xf32>, vector<128x128xf32> -> vector<128x128xf32>
    %179 = vector.broadcast %24 : vector<128x1xf32> to vector<128x128xf32>
    %180 = arith.addf %178, %179 : vector<128x128xf32>
    %c128_i32_114 = arith.constant 128 : i32
    %181 = arith.muli %c3_i32, %c128_i32_114 : i32
    %182 = tpu.assume_multiple %181, 128 : i32
    %c0_115 = arith.constant 0 : index
    %183 = arith.index_cast %182 : i32 to index
    %184 = vector.load %arg13[%c0_115, %183] : memref<128x1024xf32, #tpu.memory_space<vmem>>, vector<128x128xf32>
    %c0_116 = arith.constant 0 : index
    %c0_117 = arith.constant 0 : index
    %185 = vector.load %arg14[%c0_116, %c0_117] : memref<32x128xf32, #tpu.memory_space<vmem>>, vector<32x128xf32>
    %cst_118 = arith.constant dense<0.000000e+00> : vector<128x128xf32>
    %186 = tpu.matmul %21, %185, %cst_118 {dimension_numbers = #tpu.dot_dimension_numbers<[1], [0], [0], [1], [0, 0, 1, 1], [], []>} : vector<128x32xf32>, vector<32x128xf32>, vector<128x128xf32> -> vector<128x128xf32>
    %187 = arith.addf %184, %186 : vector<128x128xf32>
    %cst_119 = arith.constant 5.000000e-01 : f32
    %188 = vector.broadcast %cst_119 : f32 to vector<128x128xf32>
    %189 = arith.mulf %188, %187 : vector<128x128xf32>
    %190 = arith.select %20, %187, %189 : vector<128x128xi1>, vector<128x128xf32>
    %191 = math.tanh %190 : vector<128x128xf32>
    %cst_120 = arith.constant 5.000000e-01 : f32
    %192 = vector.broadcast %cst_120 : f32 to vector<128x128xf32>
    %193 = arith.mulf %192, %191 : vector<128x128xf32>
    %cst_121 = arith.constant 5.000000e-01 : f32
    %194 = vector.broadcast %cst_121 : f32 to vector<128x128xf32>
    %195 = arith.addf %193, %194 : vector<128x128xf32>
    %196 = arith.select %20, %191, %195 : vector<128x128xi1>, vector<128x128xf32>
    %197 = vector.extract_strided_slice %196 {offsets = [0, 0], sizes = [32, 128], strides = [1, 1]} : vector<128x128xf32> to vector<32x128xf32>
    %198 = vector.extract_strided_slice %196 {offsets = [32, 0], sizes = [32, 128], strides = [1, 1]} : vector<128x128xf32> to vector<32x128xf32>
    %199 = vector.extract_strided_slice %196 {offsets = [64, 0], sizes = [32, 128], strides = [1, 1]} : vector<128x128xf32> to vector<32x128xf32>
    %200 = vector.extract_strided_slice %196 {offsets = [96, 0], sizes = [32, 128], strides = [1, 1]} : vector<128x128xf32> to vector<32x128xf32>
    %c0_122 = arith.constant 0 : index
    %c0_123 = arith.constant 0 : index
    %201 = vector.load %arg15[%c0_122, %c0_123] : memref<32x128xf32, #tpu.memory_space<vmem>>, vector<32x128xf32>
    %202 = arith.mulf %198, %201 : vector<32x128xf32>
    %203 = arith.mulf %197, %199 : vector<32x128xf32>
    %204 = arith.addf %202, %203 : vector<32x128xf32>
    %205 = math.tanh %204 : vector<32x128xf32>
    %206 = arith.mulf %200, %205 : vector<32x128xf32>
    %c0_124 = arith.constant 0 : index
    %c0_125 = arith.constant 0 : index
    %207 = vector.load %arg15[%c0_124, %c0_125] : memref<32x128xf32, #tpu.memory_space<vmem>>, vector<32x128xf32>
    tpu.vector_store %arg15[%c0_124, %c0_125], %204 {strides = array<i32>} : memref<32x128xf32, #tpu.memory_space<vmem>>, vector<32x128xf32>,
    %c0_126 = arith.constant 0 : index
    %c0_127 = arith.constant 0 : index
    %208 = vector.load %arg14[%c0_126, %c0_127] : memref<32x128xf32, #tpu.memory_space<vmem>>, vector<32x128xf32>
    tpu.vector_store %arg14[%c0_126, %c0_127], %206 {strides = array<i32>} : memref<32x128xf32, #tpu.memory_space<vmem>>, vector<32x128xf32>,
    %c0_128 = arith.constant 0 : index
    %c0_129 = arith.constant 0 : index
    %209 = vector.load %arg16[%c0_128, %c0_129] : memref<32x128xf32, #tpu.memory_space<vmem>>, vector<32x128xf32>
    %cst_130 = arith.constant dense<0.000000e+00> : vector<128x128xf32>
    %210 = tpu.matmul %22, %209, %cst_130 {dimension_numbers = #tpu.dot_dimension_numbers<[1], [0], [0], [1], [0, 0, 1, 1], [], []>} : vector<128x32xf32>, vector<32x128xf32>, vector<128x128xf32> -> vector<128x128xf32>
    %211 = arith.addf %180, %210 : vector<128x128xf32>
    %cst_131 = arith.constant 5.000000e-01 : f32
    %212 = vector.broadcast %cst_131 : f32 to vector<128x128xf32>
    %213 = arith.mulf %212, %211 : vector<128x128xf32>
    %214 = arith.select %20, %211, %213 : vector<128x128xi1>, vector<128x128xf32>
    %215 = math.tanh %214 : vector<128x128xf32>
    %cst_132 = arith.constant 5.000000e-01 : f32
    %216 = vector.broadcast %cst_132 : f32 to vector<128x128xf32>
    %217 = arith.mulf %216, %215 : vector<128x128xf32>
    %cst_133 = arith.constant 5.000000e-01 : f32
    %218 = vector.broadcast %cst_133 : f32 to vector<128x128xf32>
    %219 = arith.addf %217, %218 : vector<128x128xf32>
    %220 = arith.select %20, %215, %219 : vector<128x128xi1>, vector<128x128xf32>
    %221 = vector.extract_strided_slice %220 {offsets = [0, 0], sizes = [32, 128], strides = [1, 1]} : vector<128x128xf32> to vector<32x128xf32>
    %222 = vector.extract_strided_slice %220 {offsets = [32, 0], sizes = [32, 128], strides = [1, 1]} : vector<128x128xf32> to vector<32x128xf32>
    %223 = vector.extract_strided_slice %220 {offsets = [64, 0], sizes = [32, 128], strides = [1, 1]} : vector<128x128xf32> to vector<32x128xf32>
    %224 = vector.extract_strided_slice %220 {offsets = [96, 0], sizes = [32, 128], strides = [1, 1]} : vector<128x128xf32> to vector<32x128xf32>
    %c0_134 = arith.constant 0 : index
    %c0_135 = arith.constant 0 : index
    %225 = vector.load %arg17[%c0_134, %c0_135] : memref<32x128xf32, #tpu.memory_space<vmem>>, vector<32x128xf32>
    %226 = arith.mulf %222, %225 : vector<32x128xf32>
    %227 = arith.mulf %221, %223 : vector<32x128xf32>
    %228 = arith.addf %226, %227 : vector<32x128xf32>
    %229 = math.tanh %228 : vector<32x128xf32>
    %230 = arith.mulf %224, %229 : vector<32x128xf32>
    %c0_136 = arith.constant 0 : index
    %c0_137 = arith.constant 0 : index
    %231 = vector.load %arg17[%c0_136, %c0_137] : memref<32x128xf32, #tpu.memory_space<vmem>>, vector<32x128xf32>
    tpu.vector_store %arg17[%c0_136, %c0_137], %228 {strides = array<i32>} : memref<32x128xf32, #tpu.memory_space<vmem>>, vector<32x128xf32>,
    %c0_138 = arith.constant 0 : index
    %c0_139 = arith.constant 0 : index
    %232 = vector.load %arg16[%c0_138, %c0_139] : memref<32x128xf32, #tpu.memory_space<vmem>>, vector<32x128xf32>
    tpu.vector_store %arg16[%c0_138, %c0_139], %230 {strides = array<i32>} : memref<32x128xf32, #tpu.memory_space<vmem>>, vector<32x128xf32>,
    %c0_140 = arith.constant 0 : index
    %c0_141 = arith.constant 0 : index
    %233 = vector.load %arg18[%c0_140, %c0_141] : memref<32x128xf32, #tpu.memory_space<vmem>>, vector<32x128xf32>
    %234 = arith.maximumf %233, %230 : vector<32x128xf32>
    %c0_142 = arith.constant 0 : index
    %c0_143 = arith.constant 0 : index
    %235 = vector.load %arg18[%c0_142, %c0_143] : memref<32x128xf32, #tpu.memory_space<vmem>>, vector<32x128xf32>
    tpu.vector_store %arg18[%c0_142, %c0_143], %234 {strides = array<i32>} : memref<32x128xf32, #tpu.memory_space<vmem>>, vector<32x128xf32>,
    %c4_i32 = arith.constant 4 : i32
    %c0_144 = arith.constant 0 : index
    %c0_145 = arith.constant 0 : index
    %236 = vector.load %arg14[%c0_144, %c0_145] : memref<32x128xf32, #tpu.memory_space<vmem>>, vector<32x128xf32>
    %cst_146 = arith.constant dense<0.000000e+00> : vector<128x128xf32>
    %237 = tpu.matmul %23, %236, %cst_146 {dimension_numbers = #tpu.dot_dimension_numbers<[1], [0], [0], [1], [0, 0, 1, 1], [], []>} : vector<128x32xf32>, vector<32x128xf32>, vector<128x128xf32> -> vector<128x128xf32>
    %238 = vector.broadcast %24 : vector<128x1xf32> to vector<128x128xf32>
    %239 = arith.addf %237, %238 : vector<128x128xf32>
    %c128_i32_147 = arith.constant 128 : i32
    %240 = arith.muli %c4_i32, %c128_i32_147 : i32
    %241 = tpu.assume_multiple %240, 128 : i32
    %c0_148 = arith.constant 0 : index
    %242 = arith.index_cast %241 : i32 to index
    %243 = vector.load %arg13[%c0_148, %242] : memref<128x1024xf32, #tpu.memory_space<vmem>>, vector<128x128xf32>
    %c0_149 = arith.constant 0 : index
    %c0_150 = arith.constant 0 : index
    %244 = vector.load %arg14[%c0_149, %c0_150] : memref<32x128xf32, #tpu.memory_space<vmem>>, vector<32x128xf32>
    %cst_151 = arith.constant dense<0.000000e+00> : vector<128x128xf32>
    %245 = tpu.matmul %21, %244, %cst_151 {dimension_numbers = #tpu.dot_dimension_numbers<[1], [0], [0], [1], [0, 0, 1, 1], [], []>} : vector<128x32xf32>, vector<32x128xf32>, vector<128x128xf32> -> vector<128x128xf32>
    %246 = arith.addf %243, %245 : vector<128x128xf32>
    %cst_152 = arith.constant 5.000000e-01 : f32
    %247 = vector.broadcast %cst_152 : f32 to vector<128x128xf32>
    %248 = arith.mulf %247, %246 : vector<128x128xf32>
    %249 = arith.select %20, %246, %248 : vector<128x128xi1>, vector<128x128xf32>
    %250 = math.tanh %249 : vector<128x128xf32>
    %cst_153 = arith.constant 5.000000e-01 : f32
    %251 = vector.broadcast %cst_153 : f32 to vector<128x128xf32>
    %252 = arith.mulf %251, %250 : vector<128x128xf32>
    %cst_154 = arith.constant 5.000000e-01 : f32
    %253 = vector.broadcast %cst_154 : f32 to vector<128x128xf32>
    %254 = arith.addf %252, %253 : vector<128x128xf32>
    %255 = arith.select %20, %250, %254 : vector<128x128xi1>, vector<128x128xf32>
    %256 = vector.extract_strided_slice %255 {offsets = [0, 0], sizes = [32, 128], strides = [1, 1]} : vector<128x128xf32> to vector<32x128xf32>
    %257 = vector.extract_strided_slice %255 {offsets = [32, 0], sizes = [32, 128], strides = [1, 1]} : vector<128x128xf32> to vector<32x128xf32>
    %258 = vector.extract_strided_slice %255 {offsets = [64, 0], sizes = [32, 128], strides = [1, 1]} : vector<128x128xf32> to vector<32x128xf32>
    %259 = vector.extract_strided_slice %255 {offsets = [96, 0], sizes = [32, 128], strides = [1, 1]} : vector<128x128xf32> to vector<32x128xf32>
    %c0_155 = arith.constant 0 : index
    %c0_156 = arith.constant 0 : index
    %260 = vector.load %arg15[%c0_155, %c0_156] : memref<32x128xf32, #tpu.memory_space<vmem>>, vector<32x128xf32>
    %261 = arith.mulf %257, %260 : vector<32x128xf32>
    %262 = arith.mulf %256, %258 : vector<32x128xf32>
    %263 = arith.addf %261, %262 : vector<32x128xf32>
    %264 = math.tanh %263 : vector<32x128xf32>
    %265 = arith.mulf %259, %264 : vector<32x128xf32>
    %c0_157 = arith.constant 0 : index
    %c0_158 = arith.constant 0 : index
    %266 = vector.load %arg15[%c0_157, %c0_158] : memref<32x128xf32, #tpu.memory_space<vmem>>, vector<32x128xf32>
    tpu.vector_store %arg15[%c0_157, %c0_158], %263 {strides = array<i32>} : memref<32x128xf32, #tpu.memory_space<vmem>>, vector<32x128xf32>,
    %c0_159 = arith.constant 0 : index
    %c0_160 = arith.constant 0 : index
    %267 = vector.load %arg14[%c0_159, %c0_160] : memref<32x128xf32, #tpu.memory_space<vmem>>, vector<32x128xf32>
    tpu.vector_store %arg14[%c0_159, %c0_160], %265 {strides = array<i32>} : memref<32x128xf32, #tpu.memory_space<vmem>>, vector<32x128xf32>,
    %c0_161 = arith.constant 0 : index
    %c0_162 = arith.constant 0 : index
    %268 = vector.load %arg16[%c0_161, %c0_162] : memref<32x128xf32, #tpu.memory_space<vmem>>, vector<32x128xf32>
    %cst_163 = arith.constant dense<0.000000e+00> : vector<128x128xf32>
    %269 = tpu.matmul %22, %268, %cst_163 {dimension_numbers = #tpu.dot_dimension_numbers<[1], [0], [0], [1], [0, 0, 1, 1], [], []>} : vector<128x32xf32>, vector<32x128xf32>, vector<128x128xf32> -> vector<128x128xf32>
    %270 = arith.addf %239, %269 : vector<128x128xf32>
    %cst_164 = arith.constant 5.000000e-01 : f32
    %271 = vector.broadcast %cst_164 : f32 to vector<128x128xf32>
    %272 = arith.mulf %271, %270 : vector<128x128xf32>
    %273 = arith.select %20, %270, %272 : vector<128x128xi1>, vector<128x128xf32>
    %274 = math.tanh %273 : vector<128x128xf32>
    %cst_165 = arith.constant 5.000000e-01 : f32
    %275 = vector.broadcast %cst_165 : f32 to vector<128x128xf32>
    %276 = arith.mulf %275, %274 : vector<128x128xf32>
    %cst_166 = arith.constant 5.000000e-01 : f32
    %277 = vector.broadcast %cst_166 : f32 to vector<128x128xf32>
    %278 = arith.addf %276, %277 : vector<128x128xf32>
    %279 = arith.select %20, %274, %278 : vector<128x128xi1>, vector<128x128xf32>
    %280 = vector.extract_strided_slice %279 {offsets = [0, 0], sizes = [32, 128], strides = [1, 1]} : vector<128x128xf32> to vector<32x128xf32>
    %281 = vector.extract_strided_slice %279 {offsets = [32, 0], sizes = [32, 128], strides = [1, 1]} : vector<128x128xf32> to vector<32x128xf32>
    %282 = vector.extract_strided_slice %279 {offsets = [64, 0], sizes = [32, 128], strides = [1, 1]} : vector<128x128xf32> to vector<32x128xf32>
    %283 = vector.extract_strided_slice %279 {offsets = [96, 0], sizes = [32, 128], strides = [1, 1]} : vector<128x128xf32> to vector<32x128xf32>
    %c0_167 = arith.constant 0 : index
    %c0_168 = arith.constant 0 : index
    %284 = vector.load %arg17[%c0_167, %c0_168] : memref<32x128xf32, #tpu.memory_space<vmem>>, vector<32x128xf32>
    %285 = arith.mulf %281, %284 : vector<32x128xf32>
    %286 = arith.mulf %280, %282 : vector<32x128xf32>
    %287 = arith.addf %285, %286 : vector<32x128xf32>
    %288 = math.tanh %287 : vector<32x128xf32>
    %289 = arith.mulf %283, %288 : vector<32x128xf32>
    %c0_169 = arith.constant 0 : index
    %c0_170 = arith.constant 0 : index
    %290 = vector.load %arg17[%c0_169, %c0_170] : memref<32x128xf32, #tpu.memory_space<vmem>>, vector<32x128xf32>
    tpu.vector_store %arg17[%c0_169, %c0_170], %287 {strides = array<i32>} : memref<32x128xf32, #tpu.memory_space<vmem>>, vector<32x128xf32>,
    %c0_171 = arith.constant 0 : index
    %c0_172 = arith.constant 0 : index
    %291 = vector.load %arg16[%c0_171, %c0_172] : memref<32x128xf32, #tpu.memory_space<vmem>>, vector<32x128xf32>
    tpu.vector_store %arg16[%c0_171, %c0_172], %289 {strides = array<i32>} : memref<32x128xf32, #tpu.memory_space<vmem>>, vector<32x128xf32>,
    %c0_173 = arith.constant 0 : index
    %c0_174 = arith.constant 0 : index
    %292 = vector.load %arg18[%c0_173, %c0_174] : memref<32x128xf32, #tpu.memory_space<vmem>>, vector<32x128xf32>
    %293 = arith.maximumf %292, %289 : vector<32x128xf32>
    %c0_175 = arith.constant 0 : index
    %c0_176 = arith.constant 0 : index
    %294 = vector.load %arg18[%c0_175, %c0_176] : memref<32x128xf32, #tpu.memory_space<vmem>>, vector<32x128xf32>
    tpu.vector_store %arg18[%c0_175, %c0_176], %293 {strides = array<i32>} : memref<32x128xf32, #tpu.memory_space<vmem>>, vector<32x128xf32>,
    %c5_i32 = arith.constant 5 : i32
    %c0_177 = arith.constant 0 : index
    %c0_178 = arith.constant 0 : index
    %295 = vector.load %arg14[%c0_177, %c0_178] : memref<32x128xf32, #tpu.memory_space<vmem>>, vector<32x128xf32>
    %cst_179 = arith.constant dense<0.000000e+00> : vector<128x128xf32>
    %296 = tpu.matmul %23, %295, %cst_179 {dimension_numbers = #tpu.dot_dimension_numbers<[1], [0], [0], [1], [0, 0, 1, 1], [], []>} : vector<128x32xf32>, vector<32x128xf32>, vector<128x128xf32> -> vector<128x128xf32>
    %297 = vector.broadcast %24 : vector<128x1xf32> to vector<128x128xf32>
    %298 = arith.addf %296, %297 : vector<128x128xf32>
    %c128_i32_180 = arith.constant 128 : i32
    %299 = arith.muli %c5_i32, %c128_i32_180 : i32
    %300 = tpu.assume_multiple %299, 128 : i32
    %c0_181 = arith.constant 0 : index
    %301 = arith.index_cast %300 : i32 to index
    %302 = vector.load %arg13[%c0_181, %301] : memref<128x1024xf32, #tpu.memory_space<vmem>>, vector<128x128xf32>
    %c0_182 = arith.constant 0 : index
    %c0_183 = arith.constant 0 : index
    %303 = vector.load %arg14[%c0_182, %c0_183] : memref<32x128xf32, #tpu.memory_space<vmem>>, vector<32x128xf32>
    %cst_184 = arith.constant dense<0.000000e+00> : vector<128x128xf32>
    %304 = tpu.matmul %21, %303, %cst_184 {dimension_numbers = #tpu.dot_dimension_numbers<[1], [0], [0], [1], [0, 0, 1, 1], [], []>} : vector<128x32xf32>, vector<32x128xf32>, vector<128x128xf32> -> vector<128x128xf32>
    %305 = arith.addf %302, %304 : vector<128x128xf32>
    %cst_185 = arith.constant 5.000000e-01 : f32
    %306 = vector.broadcast %cst_185 : f32 to vector<128x128xf32>
    %307 = arith.mulf %306, %305 : vector<128x128xf32>
    %308 = arith.select %20, %305, %307 : vector<128x128xi1>, vector<128x128xf32>
    %309 = math.tanh %308 : vector<128x128xf32>
    %cst_186 = arith.constant 5.000000e-01 : f32
    %310 = vector.broadcast %cst_186 : f32 to vector<128x128xf32>
    %311 = arith.mulf %310, %309 : vector<128x128xf32>
    %cst_187 = arith.constant 5.000000e-01 : f32
    %312 = vector.broadcast %cst_187 : f32 to vector<128x128xf32>
    %313 = arith.addf %311, %312 : vector<128x128xf32>
    %314 = arith.select %20, %309, %313 : vector<128x128xi1>, vector<128x128xf32>
    %315 = vector.extract_strided_slice %314 {offsets = [0, 0], sizes = [32, 128], strides = [1, 1]} : vector<128x128xf32> to vector<32x128xf32>
    %316 = vector.extract_strided_slice %314 {offsets = [32, 0], sizes = [32, 128], strides = [1, 1]} : vector<128x128xf32> to vector<32x128xf32>
    %317 = vector.extract_strided_slice %314 {offsets = [64, 0], sizes = [32, 128], strides = [1, 1]} : vector<128x128xf32> to vector<32x128xf32>
    %318 = vector.extract_strided_slice %314 {offsets = [96, 0], sizes = [32, 128], strides = [1, 1]} : vector<128x128xf32> to vector<32x128xf32>
    %c0_188 = arith.constant 0 : index
    %c0_189 = arith.constant 0 : index
    %319 = vector.load %arg15[%c0_188, %c0_189] : memref<32x128xf32, #tpu.memory_space<vmem>>, vector<32x128xf32>
    %320 = arith.mulf %316, %319 : vector<32x128xf32>
    %321 = arith.mulf %315, %317 : vector<32x128xf32>
    %322 = arith.addf %320, %321 : vector<32x128xf32>
    %323 = math.tanh %322 : vector<32x128xf32>
    %324 = arith.mulf %318, %323 : vector<32x128xf32>
    %c0_190 = arith.constant 0 : index
    %c0_191 = arith.constant 0 : index
    %325 = vector.load %arg15[%c0_190, %c0_191] : memref<32x128xf32, #tpu.memory_space<vmem>>, vector<32x128xf32>
    tpu.vector_store %arg15[%c0_190, %c0_191], %322 {strides = array<i32>} : memref<32x128xf32, #tpu.memory_space<vmem>>, vector<32x128xf32>,
    %c0_192 = arith.constant 0 : index
    %c0_193 = arith.constant 0 : index
    %326 = vector.load %arg14[%c0_192, %c0_193] : memref<32x128xf32, #tpu.memory_space<vmem>>, vector<32x128xf32>
    tpu.vector_store %arg14[%c0_192, %c0_193], %324 {strides = array<i32>} : memref<32x128xf32, #tpu.memory_space<vmem>>, vector<32x128xf32>,
    %c0_194 = arith.constant 0 : index
    %c0_195 = arith.constant 0 : index
    %327 = vector.load %arg16[%c0_194, %c0_195] : memref<32x128xf32, #tpu.memory_space<vmem>>, vector<32x128xf32>
    %cst_196 = arith.constant dense<0.000000e+00> : vector<128x128xf32>
    %328 = tpu.matmul %22, %327, %cst_196 {dimension_numbers = #tpu.dot_dimension_numbers<[1], [0], [0], [1], [0, 0, 1, 1], [], []>} : vector<128x32xf32>, vector<32x128xf32>, vector<128x128xf32> -> vector<128x128xf32>
    %329 = arith.addf %298, %328 : vector<128x128xf32>
    %cst_197 = arith.constant 5.000000e-01 : f32
    %330 = vector.broadcast %cst_197 : f32 to vector<128x128xf32>
    %331 = arith.mulf %330, %329 : vector<128x128xf32>
    %332 = arith.select %20, %329, %331 : vector<128x128xi1>, vector<128x128xf32>
    %333 = math.tanh %332 : vector<128x128xf32>
    %cst_198 = arith.constant 5.000000e-01 : f32
    %334 = vector.broadcast %cst_198 : f32 to vector<128x128xf32>
    %335 = arith.mulf %334, %333 : vector<128x128xf32>
    %cst_199 = arith.constant 5.000000e-01 : f32
    %336 = vector.broadcast %cst_199 : f32 to vector<128x128xf32>
    %337 = arith.addf %335, %336 : vector<128x128xf32>
    %338 = arith.select %20, %333, %337 : vector<128x128xi1>, vector<128x128xf32>
    %339 = vector.extract_strided_slice %338 {offsets = [0, 0], sizes = [32, 128], strides = [1, 1]} : vector<128x128xf32> to vector<32x128xf32>
    %340 = vector.extract_strided_slice %338 {offsets = [32, 0], sizes = [32, 128], strides = [1, 1]} : vector<128x128xf32> to vector<32x128xf32>
    %341 = vector.extract_strided_slice %338 {offsets = [64, 0], sizes = [32, 128], strides = [1, 1]} : vector<128x128xf32> to vector<32x128xf32>
    %342 = vector.extract_strided_slice %338 {offsets = [96, 0], sizes = [32, 128], strides = [1, 1]} : vector<128x128xf32> to vector<32x128xf32>
    %c0_200 = arith.constant 0 : index
    %c0_201 = arith.constant 0 : index
    %343 = vector.load %arg17[%c0_200, %c0_201] : memref<32x128xf32, #tpu.memory_space<vmem>>, vector<32x128xf32>
    %344 = arith.mulf %340, %343 : vector<32x128xf32>
    %345 = arith.mulf %339, %341 : vector<32x128xf32>
    %346 = arith.addf %344, %345 : vector<32x128xf32>
    %347 = math.tanh %346 : vector<32x128xf32>
    %348 = arith.mulf %342, %347 : vector<32x128xf32>
    %c0_202 = arith.constant 0 : index
    %c0_203 = arith.constant 0 : index
    %349 = vector.load %arg17[%c0_202, %c0_203] : memref<32x128xf32, #tpu.memory_space<vmem>>, vector<32x128xf32>
    tpu.vector_store %arg17[%c0_202, %c0_203], %346 {strides = array<i32>} : memref<32x128xf32, #tpu.memory_space<vmem>>, vector<32x128xf32>,
    %c0_204 = arith.constant 0 : index
    %c0_205 = arith.constant 0 : index
    %350 = vector.load %arg16[%c0_204, %c0_205] : memref<32x128xf32, #tpu.memory_space<vmem>>, vector<32x128xf32>
    tpu.vector_store %arg16[%c0_204, %c0_205], %348 {strides = array<i32>} : memref<32x128xf32, #tpu.memory_space<vmem>>, vector<32x128xf32>,
    %c0_206 = arith.constant 0 : index
    %c0_207 = arith.constant 0 : index
    %351 = vector.load %arg18[%c0_206, %c0_207] : memref<32x128xf32, #tpu.memory_space<vmem>>, vector<32x128xf32>
    %352 = arith.maximumf %351, %348 : vector<32x128xf32>
    %c0_208 = arith.constant 0 : index
    %c0_209 = arith.constant 0 : index
    %353 = vector.load %arg18[%c0_208, %c0_209] : memref<32x128xf32, #tpu.memory_space<vmem>>, vector<32x128xf32>
    tpu.vector_store %arg18[%c0_208, %c0_209], %352 {strides = array<i32>} : memref<32x128xf32, #tpu.memory_space<vmem>>, vector<32x128xf32>,
    %c6_i32 = arith.constant 6 : i32
    %c0_210 = arith.constant 0 : index
    %c0_211 = arith.constant 0 : index
    %354 = vector.load %arg14[%c0_210, %c0_211] : memref<32x128xf32, #tpu.memory_space<vmem>>, vector<32x128xf32>
    %cst_212 = arith.constant dense<0.000000e+00> : vector<128x128xf32>
    %355 = tpu.matmul %23, %354, %cst_212 {dimension_numbers = #tpu.dot_dimension_numbers<[1], [0], [0], [1], [0, 0, 1, 1], [], []>} : vector<128x32xf32>, vector<32x128xf32>, vector<128x128xf32> -> vector<128x128xf32>
    %356 = vector.broadcast %24 : vector<128x1xf32> to vector<128x128xf32>
    %357 = arith.addf %355, %356 : vector<128x128xf32>
    %c128_i32_213 = arith.constant 128 : i32
    %358 = arith.muli %c6_i32, %c128_i32_213 : i32
    %359 = tpu.assume_multiple %358, 128 : i32
    %c0_214 = arith.constant 0 : index
    %360 = arith.index_cast %359 : i32 to index
    %361 = vector.load %arg13[%c0_214, %360] : memref<128x1024xf32, #tpu.memory_space<vmem>>, vector<128x128xf32>
    %c0_215 = arith.constant 0 : index
    %c0_216 = arith.constant 0 : index
    %362 = vector.load %arg14[%c0_215, %c0_216] : memref<32x128xf32, #tpu.memory_space<vmem>>, vector<32x128xf32>
    %cst_217 = arith.constant dense<0.000000e+00> : vector<128x128xf32>
    %363 = tpu.matmul %21, %362, %cst_217 {dimension_numbers = #tpu.dot_dimension_numbers<[1], [0], [0], [1], [0, 0, 1, 1], [], []>} : vector<128x32xf32>, vector<32x128xf32>, vector<128x128xf32> -> vector<128x128xf32>
    %364 = arith.addf %361, %363 : vector<128x128xf32>
    %cst_218 = arith.constant 5.000000e-01 : f32
    %365 = vector.broadcast %cst_218 : f32 to vector<128x128xf32>
    %366 = arith.mulf %365, %364 : vector<128x128xf32>
    %367 = arith.select %20, %364, %366 : vector<128x128xi1>, vector<128x128xf32>
    %368 = math.tanh %367 : vector<128x128xf32>
    %cst_219 = arith.constant 5.000000e-01 : f32
    %369 = vector.broadcast %cst_219 : f32 to vector<128x128xf32>
    %370 = arith.mulf %369, %368 : vector<128x128xf32>
    %cst_220 = arith.constant 5.000000e-01 : f32
    %371 = vector.broadcast %cst_220 : f32 to vector<128x128xf32>
    %372 = arith.addf %370, %371 : vector<128x128xf32>
    %373 = arith.select %20, %368, %372 : vector<128x128xi1>, vector<128x128xf32>
    %374 = vector.extract_strided_slice %373 {offsets = [0, 0], sizes = [32, 128], strides = [1, 1]} : vector<128x128xf32> to vector<32x128xf32>
    %375 = vector.extract_strided_slice %373 {offsets = [32, 0], sizes = [32, 128], strides = [1, 1]} : vector<128x128xf32> to vector<32x128xf32>
    %376 = vector.extract_strided_slice %373 {offsets = [64, 0], sizes = [32, 128], strides = [1, 1]} : vector<128x128xf32> to vector<32x128xf32>
    %377 = vector.extract_strided_slice %373 {offsets = [96, 0], sizes = [32, 128], strides = [1, 1]} : vector<128x128xf32> to vector<32x128xf32>
    %c0_221 = arith.constant 0 : index
    %c0_222 = arith.constant 0 : index
    %378 = vector.load %arg15[%c0_221, %c0_222] : memref<32x128xf32, #tpu.memory_space<vmem>>, vector<32x128xf32>
    %379 = arith.mulf %375, %378 : vector<32x128xf32>
    %380 = arith.mulf %374, %376 : vector<32x128xf32>
    %381 = arith.addf %379, %380 : vector<32x128xf32>
    %382 = math.tanh %381 : vector<32x128xf32>
    %383 = arith.mulf %377, %382 : vector<32x128xf32>
    %c0_223 = arith.constant 0 : index
    %c0_224 = arith.constant 0 : index
    %384 = vector.load %arg15[%c0_223, %c0_224] : memref<32x128xf32, #tpu.memory_space<vmem>>, vector<32x128xf32>
    tpu.vector_store %arg15[%c0_223, %c0_224], %381 {strides = array<i32>} : memref<32x128xf32, #tpu.memory_space<vmem>>, vector<32x128xf32>,
    %c0_225 = arith.constant 0 : index
    %c0_226 = arith.constant 0 : index
    %385 = vector.load %arg14[%c0_225, %c0_226] : memref<32x128xf32, #tpu.memory_space<vmem>>, vector<32x128xf32>
    tpu.vector_store %arg14[%c0_225, %c0_226], %383 {strides = array<i32>} : memref<32x128xf32, #tpu.memory_space<vmem>>, vector<32x128xf32>,
    %c0_227 = arith.constant 0 : index
    %c0_228 = arith.constant 0 : index
    %386 = vector.load %arg16[%c0_227, %c0_228] : memref<32x128xf32, #tpu.memory_space<vmem>>, vector<32x128xf32>
    %cst_229 = arith.constant dense<0.000000e+00> : vector<128x128xf32>
    %387 = tpu.matmul %22, %386, %cst_229 {dimension_numbers = #tpu.dot_dimension_numbers<[1], [0], [0], [1], [0, 0, 1, 1], [], []>} : vector<128x32xf32>, vector<32x128xf32>, vector<128x128xf32> -> vector<128x128xf32>
    %388 = arith.addf %357, %387 : vector<128x128xf32>
    %cst_230 = arith.constant 5.000000e-01 : f32
    %389 = vector.broadcast %cst_230 : f32 to vector<128x128xf32>
    %390 = arith.mulf %389, %388 : vector<128x128xf32>
    %391 = arith.select %20, %388, %390 : vector<128x128xi1>, vector<128x128xf32>
    %392 = math.tanh %391 : vector<128x128xf32>
    %cst_231 = arith.constant 5.000000e-01 : f32
    %393 = vector.broadcast %cst_231 : f32 to vector<128x128xf32>
    %394 = arith.mulf %393, %392 : vector<128x128xf32>
    %cst_232 = arith.constant 5.000000e-01 : f32
    %395 = vector.broadcast %cst_232 : f32 to vector<128x128xf32>
    %396 = arith.addf %394, %395 : vector<128x128xf32>
    %397 = arith.select %20, %392, %396 : vector<128x128xi1>, vector<128x128xf32>
    %398 = vector.extract_strided_slice %397 {offsets = [0, 0], sizes = [32, 128], strides = [1, 1]} : vector<128x128xf32> to vector<32x128xf32>
    %399 = vector.extract_strided_slice %397 {offsets = [32, 0], sizes = [32, 128], strides = [1, 1]} : vector<128x128xf32> to vector<32x128xf32>
    %400 = vector.extract_strided_slice %397 {offsets = [64, 0], sizes = [32, 128], strides = [1, 1]} : vector<128x128xf32> to vector<32x128xf32>
    %401 = vector.extract_strided_slice %397 {offsets = [96, 0], sizes = [32, 128], strides = [1, 1]} : vector<128x128xf32> to vector<32x128xf32>
    %c0_233 = arith.constant 0 : index
    %c0_234 = arith.constant 0 : index
    %402 = vector.load %arg17[%c0_233, %c0_234] : memref<32x128xf32, #tpu.memory_space<vmem>>, vector<32x128xf32>
    %403 = arith.mulf %399, %402 : vector<32x128xf32>
    %404 = arith.mulf %398, %400 : vector<32x128xf32>
    %405 = arith.addf %403, %404 : vector<32x128xf32>
    %406 = math.tanh %405 : vector<32x128xf32>
    %407 = arith.mulf %401, %406 : vector<32x128xf32>
    %c0_235 = arith.constant 0 : index
    %c0_236 = arith.constant 0 : index
    %408 = vector.load %arg17[%c0_235, %c0_236] : memref<32x128xf32, #tpu.memory_space<vmem>>, vector<32x128xf32>
    tpu.vector_store %arg17[%c0_235, %c0_236], %405 {strides = array<i32>} : memref<32x128xf32, #tpu.memory_space<vmem>>, vector<32x128xf32>,
    %c0_237 = arith.constant 0 : index
    %c0_238 = arith.constant 0 : index
    %409 = vector.load %arg16[%c0_237, %c0_238] : memref<32x128xf32, #tpu.memory_space<vmem>>, vector<32x128xf32>
    tpu.vector_store %arg16[%c0_237, %c0_238], %407 {strides = array<i32>} : memref<32x128xf32, #tpu.memory_space<vmem>>, vector<32x128xf32>,
    %c0_239 = arith.constant 0 : index
    %c0_240 = arith.constant 0 : index
    %410 = vector.load %arg18[%c0_239, %c0_240] : memref<32x128xf32, #tpu.memory_space<vmem>>, vector<32x128xf32>
    %411 = arith.maximumf %410, %407 : vector<32x128xf32>
    %c0_241 = arith.constant 0 : index
    %c0_242 = arith.constant 0 : index
    %412 = vector.load %arg18[%c0_241, %c0_242] : memref<32x128xf32, #tpu.memory_space<vmem>>, vector<32x128xf32>
    tpu.vector_store %arg18[%c0_241, %c0_242], %411 {strides = array<i32>} : memref<32x128xf32, #tpu.memory_space<vmem>>, vector<32x128xf32>,
    %c7_i32 = arith.constant 7 : i32
    %c0_243 = arith.constant 0 : index
    %c0_244 = arith.constant 0 : index
    %413 = vector.load %arg14[%c0_243, %c0_244] : memref<32x128xf32, #tpu.memory_space<vmem>>, vector<32x128xf32>
    %cst_245 = arith.constant dense<0.000000e+00> : vector<128x128xf32>
    %414 = tpu.matmul %23, %413, %cst_245 {dimension_numbers = #tpu.dot_dimension_numbers<[1], [0], [0], [1], [0, 0, 1, 1], [], []>} : vector<128x32xf32>, vector<32x128xf32>, vector<128x128xf32> -> vector<128x128xf32>
    %415 = vector.broadcast %24 : vector<128x1xf32> to vector<128x128xf32>
    %416 = arith.addf %414, %415 : vector<128x128xf32>
    %c128_i32_246 = arith.constant 128 : i32
    %417 = arith.muli %c7_i32, %c128_i32_246 : i32
    %418 = tpu.assume_multiple %417, 128 : i32
    %c0_247 = arith.constant 0 : index
    %419 = arith.index_cast %418 : i32 to index
    %420 = vector.load %arg13[%c0_247, %419] : memref<128x1024xf32, #tpu.memory_space<vmem>>, vector<128x128xf32>
    %c0_248 = arith.constant 0 : index
    %c0_249 = arith.constant 0 : index
    %421 = vector.load %arg14[%c0_248, %c0_249] : memref<32x128xf32, #tpu.memory_space<vmem>>, vector<32x128xf32>
    %cst_250 = arith.constant dense<0.000000e+00> : vector<128x128xf32>
    %422 = tpu.matmul %21, %421, %cst_250 {dimension_numbers = #tpu.dot_dimension_numbers<[1], [0], [0], [1], [0, 0, 1, 1], [], []>} : vector<128x32xf32>, vector<32x128xf32>, vector<128x128xf32> -> vector<128x128xf32>
    %423 = arith.addf %420, %422 : vector<128x128xf32>
    %cst_251 = arith.constant 5.000000e-01 : f32
    %424 = vector.broadcast %cst_251 : f32 to vector<128x128xf32>
    %425 = arith.mulf %424, %423 : vector<128x128xf32>
    %426 = arith.select %20, %423, %425 : vector<128x128xi1>, vector<128x128xf32>
    %427 = math.tanh %426 : vector<128x128xf32>
    %cst_252 = arith.constant 5.000000e-01 : f32
    %428 = vector.broadcast %cst_252 : f32 to vector<128x128xf32>
    %429 = arith.mulf %428, %427 : vector<128x128xf32>
    %cst_253 = arith.constant 5.000000e-01 : f32
    %430 = vector.broadcast %cst_253 : f32 to vector<128x128xf32>
    %431 = arith.addf %429, %430 : vector<128x128xf32>
    %432 = arith.select %20, %427, %431 : vector<128x128xi1>, vector<128x128xf32>
    %433 = vector.extract_strided_slice %432 {offsets = [0, 0], sizes = [32, 128], strides = [1, 1]} : vector<128x128xf32> to vector<32x128xf32>
    %434 = vector.extract_strided_slice %432 {offsets = [32, 0], sizes = [32, 128], strides = [1, 1]} : vector<128x128xf32> to vector<32x128xf32>
    %435 = vector.extract_strided_slice %432 {offsets = [64, 0], sizes = [32, 128], strides = [1, 1]} : vector<128x128xf32> to vector<32x128xf32>
    %436 = vector.extract_strided_slice %432 {offsets = [96, 0], sizes = [32, 128], strides = [1, 1]} : vector<128x128xf32> to vector<32x128xf32>
    %c0_254 = arith.constant 0 : index
    %c0_255 = arith.constant 0 : index
    %437 = vector.load %arg15[%c0_254, %c0_255] : memref<32x128xf32, #tpu.memory_space<vmem>>, vector<32x128xf32>
    %438 = arith.mulf %434, %437 : vector<32x128xf32>
    %439 = arith.mulf %433, %435 : vector<32x128xf32>
    %440 = arith.addf %438, %439 : vector<32x128xf32>
    %441 = math.tanh %440 : vector<32x128xf32>
    %442 = arith.mulf %436, %441 : vector<32x128xf32>
    %c0_256 = arith.constant 0 : index
    %c0_257 = arith.constant 0 : index
    %443 = vector.load %arg15[%c0_256, %c0_257] : memref<32x128xf32, #tpu.memory_space<vmem>>, vector<32x128xf32>
    tpu.vector_store %arg15[%c0_256, %c0_257], %440 {strides = array<i32>} : memref<32x128xf32, #tpu.memory_space<vmem>>, vector<32x128xf32>,
    %c0_258 = arith.constant 0 : index
    %c0_259 = arith.constant 0 : index
    %444 = vector.load %arg14[%c0_258, %c0_259] : memref<32x128xf32, #tpu.memory_space<vmem>>, vector<32x128xf32>
    tpu.vector_store %arg14[%c0_258, %c0_259], %442 {strides = array<i32>} : memref<32x128xf32, #tpu.memory_space<vmem>>, vector<32x128xf32>,
    %c0_260 = arith.constant 0 : index
    %c0_261 = arith.constant 0 : index
    %445 = vector.load %arg16[%c0_260, %c0_261] : memref<32x128xf32, #tpu.memory_space<vmem>>, vector<32x128xf32>
    %cst_262 = arith.constant dense<0.000000e+00> : vector<128x128xf32>
    %446 = tpu.matmul %22, %445, %cst_262 {dimension_numbers = #tpu.dot_dimension_numbers<[1], [0], [0], [1], [0, 0, 1, 1], [], []>} : vector<128x32xf32>, vector<32x128xf32>, vector<128x128xf32> -> vector<128x128xf32>
    %447 = arith.addf %416, %446 : vector<128x128xf32>
    %cst_263 = arith.constant 5.000000e-01 : f32
    %448 = vector.broadcast %cst_263 : f32 to vector<128x128xf32>
    %449 = arith.mulf %448, %447 : vector<128x128xf32>
    %450 = arith.select %20, %447, %449 : vector<128x128xi1>, vector<128x128xf32>
    %451 = math.tanh %450 : vector<128x128xf32>
    %cst_264 = arith.constant 5.000000e-01 : f32
    %452 = vector.broadcast %cst_264 : f32 to vector<128x128xf32>
    %453 = arith.mulf %452, %451 : vector<128x128xf32>
    %cst_265 = arith.constant 5.000000e-01 : f32
    %454 = vector.broadcast %cst_265 : f32 to vector<128x128xf32>
    %455 = arith.addf %453, %454 : vector<128x128xf32>
    %456 = arith.select %20, %451, %455 : vector<128x128xi1>, vector<128x128xf32>
    %457 = vector.extract_strided_slice %456 {offsets = [0, 0], sizes = [32, 128], strides = [1, 1]} : vector<128x128xf32> to vector<32x128xf32>
    %458 = vector.extract_strided_slice %456 {offsets = [32, 0], sizes = [32, 128], strides = [1, 1]} : vector<128x128xf32> to vector<32x128xf32>
    %459 = vector.extract_strided_slice %456 {offsets = [64, 0], sizes = [32, 128], strides = [1, 1]} : vector<128x128xf32> to vector<32x128xf32>
    %460 = vector.extract_strided_slice %456 {offsets = [96, 0], sizes = [32, 128], strides = [1, 1]} : vector<128x128xf32> to vector<32x128xf32>
    %c0_266 = arith.constant 0 : index
    %c0_267 = arith.constant 0 : index
    %461 = vector.load %arg17[%c0_266, %c0_267] : memref<32x128xf32, #tpu.memory_space<vmem>>, vector<32x128xf32>
    %462 = arith.mulf %458, %461 : vector<32x128xf32>
    %463 = arith.mulf %457, %459 : vector<32x128xf32>
    %464 = arith.addf %462, %463 : vector<32x128xf32>
    %465 = math.tanh %464 : vector<32x128xf32>
    %466 = arith.mulf %460, %465 : vector<32x128xf32>
    %c0_268 = arith.constant 0 : index
    %c0_269 = arith.constant 0 : index
    %467 = vector.load %arg17[%c0_268, %c0_269] : memref<32x128xf32, #tpu.memory_space<vmem>>, vector<32x128xf32>
    tpu.vector_store %arg17[%c0_268, %c0_269], %464 {strides = array<i32>} : memref<32x128xf32, #tpu.memory_space<vmem>>, vector<32x128xf32>,
    %c0_270 = arith.constant 0 : index
    %c0_271 = arith.constant 0 : index
    %468 = vector.load %arg16[%c0_270, %c0_271] : memref<32x128xf32, #tpu.memory_space<vmem>>, vector<32x128xf32>
    tpu.vector_store %arg16[%c0_270, %c0_271], %466 {strides = array<i32>} : memref<32x128xf32, #tpu.memory_space<vmem>>, vector<32x128xf32>,
    %c0_272 = arith.constant 0 : index
    %c0_273 = arith.constant 0 : index
    %469 = vector.load %arg18[%c0_272, %c0_273] : memref<32x128xf32, #tpu.memory_space<vmem>>, vector<32x128xf32>
    %470 = arith.maximumf %469, %466 : vector<32x128xf32>
    %c0_274 = arith.constant 0 : index
    %c0_275 = arith.constant 0 : index
    %471 = vector.load %arg18[%c0_274, %c0_275] : memref<32x128xf32, #tpu.memory_space<vmem>>, vector<32x128xf32>
    tpu.vector_store %arg18[%c0_274, %c0_275], %470 {strides = array<i32>} : memref<32x128xf32, #tpu.memory_space<vmem>>, vector<32x128xf32>,
    %c7_i32_276 = arith.constant 7 : i32
    %c0_277 = arith.constant 0 : index
    %c0_278 = arith.constant 0 : index
    %472 = vector.load %arg14[%c0_277, %c0_278] : memref<32x128xf32, #tpu.memory_space<vmem>>, vector<32x128xf32>
    %cst_279 = arith.constant dense<0.000000e+00> : vector<128x128xf32>
    %473 = tpu.matmul %23, %472, %cst_279 {dimension_numbers = #tpu.dot_dimension_numbers<[1], [0], [0], [1], [0, 0, 1, 1], [], []>} : vector<128x32xf32>, vector<32x128xf32>, vector<128x128xf32> -> vector<128x128xf32>
    %474 = vector.broadcast %24 : vector<128x1xf32> to vector<128x128xf32>
    %475 = arith.addf %473, %474 : vector<128x128xf32>
    %c0_280 = arith.constant 0 : index
    %c0_281 = arith.constant 0 : index
    %476 = vector.load %arg16[%c0_280, %c0_281] : memref<32x128xf32, #tpu.memory_space<vmem>>, vector<32x128xf32>
    %cst_282 = arith.constant dense<0.000000e+00> : vector<128x128xf32>
    %477 = tpu.matmul %22, %476, %cst_282 {dimension_numbers = #tpu.dot_dimension_numbers<[1], [0], [0], [1], [0, 0, 1, 1], [], []>} : vector<128x32xf32>, vector<32x128xf32>, vector<128x128xf32> -> vector<128x128xf32>
    %478 = arith.addf %475, %477 : vector<128x128xf32>
    %cst_283 = arith.constant 5.000000e-01 : f32
    %479 = vector.broadcast %cst_283 : f32 to vector<128x128xf32>
    %480 = arith.mulf %479, %478 : vector<128x128xf32>
    %481 = arith.select %20, %478, %480 : vector<128x128xi1>, vector<128x128xf32>
    %482 = math.tanh %481 : vector<128x128xf32>
    %cst_284 = arith.constant 5.000000e-01 : f32
    %483 = vector.broadcast %cst_284 : f32 to vector<128x128xf32>
    %484 = arith.mulf %483, %482 : vector<128x128xf32>
    %cst_285 = arith.constant 5.000000e-01 : f32
    %485 = vector.broadcast %cst_285 : f32 to vector<128x128xf32>
    %486 = arith.addf %484, %485 : vector<128x128xf32>
    %487 = arith.select %20, %482, %486 : vector<128x128xi1>, vector<128x128xf32>
    %488 = vector.extract_strided_slice %487 {offsets = [0, 0], sizes = [32, 128], strides = [1, 1]} : vector<128x128xf32> to vector<32x128xf32>
    %489 = vector.extract_strided_slice %487 {offsets = [32, 0], sizes = [32, 128], strides = [1, 1]} : vector<128x128xf32> to vector<32x128xf32>
    %490 = vector.extract_strided_slice %487 {offsets = [64, 0], sizes = [32, 128], strides = [1, 1]} : vector<128x128xf32> to vector<32x128xf32>
    %491 = vector.extract_strided_slice %487 {offsets = [96, 0], sizes = [32, 128], strides = [1, 1]} : vector<128x128xf32> to vector<32x128xf32>
    %c0_286 = arith.constant 0 : index
    %c0_287 = arith.constant 0 : index
    %492 = vector.load %arg17[%c0_286, %c0_287] : memref<32x128xf32, #tpu.memory_space<vmem>>, vector<32x128xf32>
    %493 = arith.mulf %489, %492 : vector<32x128xf32>
    %494 = arith.mulf %488, %490 : vector<32x128xf32>
    %495 = arith.addf %493, %494 : vector<32x128xf32>
    %496 = math.tanh %495 : vector<32x128xf32>
    %497 = arith.mulf %491, %496 : vector<32x128xf32>
    %c0_288 = arith.constant 0 : index
    %c0_289 = arith.constant 0 : index
    %498 = vector.load %arg17[%c0_288, %c0_289] : memref<32x128xf32, #tpu.memory_space<vmem>>, vector<32x128xf32>
    tpu.vector_store %arg17[%c0_288, %c0_289], %495 {strides = array<i32>} : memref<32x128xf32, #tpu.memory_space<vmem>>, vector<32x128xf32>,
    %c0_290 = arith.constant 0 : index
    %c0_291 = arith.constant 0 : index
    %499 = vector.load %arg16[%c0_290, %c0_291] : memref<32x128xf32, #tpu.memory_space<vmem>>, vector<32x128xf32>
    tpu.vector_store %arg16[%c0_290, %c0_291], %497 {strides = array<i32>} : memref<32x128xf32, #tpu.memory_space<vmem>>, vector<32x128xf32>,
    %c0_292 = arith.constant 0 : index
    %c0_293 = arith.constant 0 : index
    %500 = vector.load %arg18[%c0_292, %c0_293] : memref<32x128xf32, #tpu.memory_space<vmem>>, vector<32x128xf32>
    %501 = arith.maximumf %500, %497 : vector<32x128xf32>
    %c0_294 = arith.constant 0 : index
    %c0_295 = arith.constant 0 : index
    %502 = vector.load %arg18[%c0_294, %c0_295] : memref<32x128xf32, #tpu.memory_space<vmem>>, vector<32x128xf32>
    tpu.vector_store %arg18[%c0_294, %c0_295], %501 {strides = array<i32>} : memref<32x128xf32, #tpu.memory_space<vmem>>, vector<32x128xf32>,
    %c0_296 = arith.constant 0 : index
    %c0_297 = arith.constant 0 : index
    %503 = vector.load %arg18[%c0_296, %c0_297] : memref<32x128xf32, #tpu.memory_space<vmem>>, vector<32x128xf32>
    %504 = math.tanh %503 : vector<32x128xf32>
    %c0_298 = arith.constant 0 : index
    %c0_299 = arith.constant 0 : index
    %505 = vector.load %arg10[%c0_298, %c0_299] : memref<4x32xf32, #tpu.memory_space<vmem>>, vector<4x32xf32>
    %cst_300 = arith.constant dense<0.000000e+00> : vector<4x128xf32>
    %506 = tpu.matmul %505, %504, %cst_300 {dimension_numbers = #tpu.dot_dimension_numbers<[1], [0], [0], [1], [0, 0, 1, 1], [], []>} : vector<4x32xf32>, vector<32x128xf32>, vector<4x128xf32> -> vector<4x128xf32>
    %c0_301 = arith.constant 0 : index
    %c0_302 = arith.constant 0 : index
    %507 = vector.load %arg11[%c0_301, %c0_302] : memref<4x1xf32, #tpu.memory_space<vmem>>, vector<4x1xf32>
    %508 = vector.broadcast %507 : vector<4x1xf32> to vector<4x128xf32>
    %509 = arith.addf %506, %508 : vector<4x128xf32>
    %510 = math.tanh %509 : vector<4x128xf32>
    %c0_303 = arith.constant 0 : index
    %c0_304 = arith.constant 0 : index
    %511 = vector.load %arg12[%c0_303, %c0_304] : memref<4x128xf32, #tpu.memory_space<vmem>>, vector<4x128xf32>
    tpu.vector_store %arg12[%c0_303, %c0_304], %510 {strides = array<i32>} : memref<4x128xf32, #tpu.memory_space<vmem>>, vector<4x128xf32>,
    return
  }
  func.func @transform_0(%arg0: i32) -> (i32, i32) {
    %c0_i32 = arith.constant 0 : i32
    %c0_i32_0 = arith.constant 0 : i32
    return %c0_i32, %arg0 : i32, i32
  }
  func.func @transform_1(%arg0: i32) -> (i32, i32) {
    %c0_i32 = arith.constant 0 : i32
    %c0_i32_0 = arith.constant 0 : i32
    %c0_i32_1 = arith.constant 0 : i32
    return %c0_i32, %c0_i32_0 : i32, i32
  }
  func.func @transform_2(%arg0: i32) -> (i32, i32) {
    %c0_i32 = arith.constant 0 : i32
    %c0_i32_0 = arith.constant 0 : i32
    %c0_i32_1 = arith.constant 0 : i32
    return %c0_i32, %c0_i32_0 : i32, i32
  }
  func.func @transform_3(%arg0: i32) -> (i32, i32) {
    %c0_i32 = arith.constant 0 : i32
    %c0_i32_0 = arith.constant 0 : i32
    %c0_i32_1 = arith.constant 0 : i32
    return %c0_i32, %c0_i32_0 : i32, i32
  }
  func.func @transform_4(%arg0: i32) -> (i32, i32) {
    %c0_i32 = arith.constant 0 : i32
    %c0_i32_0 = arith.constant 0 : i32
    %c0_i32_1 = arith.constant 0 : i32
    return %c0_i32, %c0_i32_0 : i32, i32
  }
  func.func @transform_5(%arg0: i32) -> (i32, i32) {
    %c0_i32 = arith.constant 0 : i32
    %c0_i32_0 = arith.constant 0 : i32
    %c0_i32_1 = arith.constant 0 : i32
    return %c0_i32, %c0_i32_0 : i32, i32
  }
  func.func @transform_6(%arg0: i32) -> (i32, i32) {
    %c0_i32 = arith.constant 0 : i32
    %c0_i32_0 = arith.constant 0 : i32
    %c0_i32_1 = arith.constant 0 : i32
    return %c0_i32, %c0_i32_0 : i32, i32
  }
  func.func @transform_7(%arg0: i32) -> (i32, i32) {
    %c0_i32 = arith.constant 0 : i32
    %c0_i32_0 = arith.constant 0 : i32
    %c0_i32_1 = arith.constant 0 : i32
    return %c0_i32, %c0_i32_0 : i32, i32
  }
  func.func @transform_8(%arg0: i32) -> (i32, i32) {
    %c0_i32 = arith.constant 0 : i32
    %c0_i32_0 = arith.constant 0 : i32
    %c0_i32_1 = arith.constant 0 : i32
    return %c0_i32, %c0_i32_0 : i32, i32
  }
  func.func @transform_9(%arg0: i32) -> (i32, i32) {
    %c0_i32 = arith.constant 0 : i32
    %c0_i32_0 = arith.constant 0 : i32
    %c0_i32_1 = arith.constant 0 : i32
    return %c0_i32, %c0_i32_0 : i32, i32
  }
  func.func @transform_10(%arg0: i32) -> (i32, i32) {
    %c0_i32 = arith.constant 0 : i32
    %c0_i32_0 = arith.constant 0 : i32
    %c0_i32_1 = arith.constant 0 : i32
    return %c0_i32, %c0_i32_0 : i32, i32
  }
  func.func @transform_11(%arg0: i32) -> (i32, i32) {
    %c0_i32 = arith.constant 0 : i32
    %c0_i32_0 = arith.constant 0 : i32
    return %c0_i32, %arg0 : i32, i32
  }
}

</mosaic_0001>

<bundles_post_ra>
// kernel: tpu_custom_call.1
= control target key start
LH: loop header
LB: loop body
LE: loop exit
PB: predicated region body
PF: predicated region fallthrough
CT: control target
= control target key end

     0   :  { %v7115_v3 = vmov 0   ;;  %s11040_s0 = inlined_call_operand.vmem [shape: f32[4,1024], index: 0, kind: input, shape index: {}]   ;;  %s11041_s1 = inlined_call_operand.vmem [shape: f32[16,4], index: 1, kind: input, shape index: {}]   ;;  %s11042_s2 = inlined_call_operand.vmem [shape: f32[16,1], index: 2, kind: input, shape index: {}]   ;;  %s11043_s3 = inlined_call_operand.vmem [shape: f32[128,16], index: 3, kind: input, shape index: {}]   ;;  %s11044_s4 = inlined_call_operand.vmem [shape: f32[128,32], index: 4, kind: input, shape index: {}]   ;;  %s11045_s5 = inlined_call_operand.vmem [shape: f32[128,1], index: 5, kind: input, shape index: {}]   ;;  %s11046_s6 = inlined_call_operand.vmem [shape: f32[128,32], index: 6, kind: input, shape index: {}]   ;;  %s11047_s7 = inlined_call_operand.vmem [shape: f32[128,32], index: 7, kind: input, shape index: {}]   ;;  %s11048_s8 = inlined_call_operand.vmem [shape: f32[128,1], index: 8, kind: input, shape index: {}]   ;;  %s11049_s9 = inlined_call_operand.vmem [shape: f32[4,32], index: 9, kind: input, shape index: {}]   ;;  %s11050_s10 = inlined_call_operand.vmem [shape: f32[4,1], index: 10, kind: input, shape index: {}]   ;;  %s11051_s11 = inlined_call_operand.hbm [shape: f32[4,128], index: 11, kind: output, shape index: {}]  }
   0x1   :  { %v46_v0 = vld [vmem:[%s11042_s2 + $0x8] sm:$0xff]  ;;  %v41_v1 = vld [vmem:[%s11040_s0] sm:$0xff]  ;;  %6258 = vset.pattern.permute.xlu0 %v7115_v3  ;;  %6260 = vset.pattern.permute.xlu2 %v7115_v3  ;;  %v43_v4 = vld [vmem:[%s11040_s0 + $0x10] sm:$0xff] }
   0x2   :  { %v42_v2 = vld [vmem:[%s11040_s0 + $0x8] sm:$0xff]  ;;  %61 = vst [vmem:[#allocation1] ss:$2 sm:$0xff] %v41_v1  ;;  %54 = vperm.xlu0 %6258, %v46_v0   ;;  %v44_v5 = vld [vmem:[%s11040_s0 + $0x18] sm:$0xff]  ;;  %6259 = vset.pattern.permute.xlu1 %v7115_v3 }
   0x3   :  { %63 = vst [vmem:[#allocation1 + $0x10] ss:$2 sm:$0xff] %v42_v2 }
   0x4   :  { %65 = vst [vmem:[#allocation1 + $0x20] ss:$2 sm:$0xff] %v43_v4 }
   0x5   :  { %16 = vsyncpa [#allocation9], 0  ;;  %67 = vst [vmem:[#allocation1 + $0x30] ss:$2 sm:$0xff] %v44_v5  ;;  %vm83_vm0 = vcmask 1043456   ;;  %v45_v6 = vld [vmem:[%s11042_s2] sm:$0xff] }
   0x6   :  { %v39_v7 = vld [vmem:[%s11041_s1] sm:$0xff]  ;;  %vm76_vm1 = vcmask 31744   ;;  %v333_v16 = vld [vmem:[%s11045_s5 + $0x8] sm:$0xff]  ;;  %v346_v20 = vld [vmem:[%s11045_s5 + $0x70] sm:$0xff]  ;;  %vm428_vm2 = vcmask 130048   ;;  %vm1294_vm3 = vcmask 261120  }
   0x7   :  { %v40_v17 = vld [vmem:[%s11041_s1 + $0x8] sm:$0xff]  ;;  %v336_v18 = vld [vmem:[%s11045_s5 + $0x20] sm:$0xff]  ;;  %v1241_v21 = vld [vmem:[%s11048_s8 + $0x18] sm:$0xff]  ;;  %s7117_s1 = smov [#allocation8]   ;;  %s5709_s18 = sshll.u32 %s11051_s11, 4  ;;  %s5710_s18 = int_to_ptr.hbm [resolvable:$true] %s5709_s18 }
   0x8   :  { %v341_v19 = vld [vmem:[%s11045_s5 + $0x48] sm:$0xff]  ;;  %v1244_v22 = vld [vmem:[%s11048_s8 + $0x30] sm:$0xff]  ;;  %v1238_v23 = vld [vmem:[%s11048_s8] sm:$0xff]  ;;  %s5707_s16 = sshll.u32 %s7117_s1, 4  ;;  %s5708_s16 = int_to_ptr.vmem [resolvable:$true] %s5707_s16 }
   0x9   :  { %v68_v8 = vld.sshfl [vmem:[#allocation1] sm:$0xff pattern:$0x75316420]  ;;  %v69_v9 = vld.sshfl [vmem:[#allocation1 + $0x8] sm:$0xff pattern:$0x75316420] }
   0xa   :  { %5718 = vmatpush.msk.msra.mxu0 %vm83_vm0, %v68_v8  ;;  %5721 = vmatpush.msk.msra.mxu1 %vm83_vm0, %v69_v9  ;;  %v70_v10 = vld.sshfl [vmem:[#allocation1 + $0x10] sm:$0xff pattern:$0x75316420]  ;;  %v71_v11 = vld.sshfl [vmem:[#allocation1 + $0x18] sm:$0xff pattern:$0x75316420] }
   0xb   :  { %5724 = vmatpush.msk.msra.mxu2 %vm83_vm0, %v70_v10  ;;  %5727 = vmatpush.msk.msra.mxu3 %vm83_vm0, %v71_v11  ;;  %v72_v12 = vld.sshfl [vmem:[#allocation1 + $0x20] sm:$0xff pattern:$0x75316420]  ;;  %v73_v13 = vld.sshfl [vmem:[#allocation1 + $0x28] sm:$0xff pattern:$0x75316420] }
   0xc   :  { %49 = vperm.xlu0 %6258, %v45_v6   ;;  %5719 = vmatmul.msk.f32.vlgmr.msra.gmra.mxu0 %vm76_vm1, %v39_v7  ;;  %v74_v14 = vld.sshfl [vmem:[#allocation1 + $0x30] sm:$0xff pattern:$0x75316420]  ;;  %v75_v15 = vld.sshfl [vmem:[#allocation1 + $0x38] sm:$0xff pattern:$0x75316420] }
   0xd   :  { %5722 = vmatmul.msk.f32.vlgmr.msra.gmra.mxu1 %vm76_vm1, %v39_v7  ;;  %5725 = vmatmul.msk.f32.vlgmr.msra.gmra.mxu2 %vm76_vm1, %v39_v7  ;;  %v1248_v24 = vld [vmem:[%s11048_s8 + $0x50] sm:$0xff]  ;;  %v1246_v25 = vld [vmem:[%s11048_s8 + $0x40] sm:$0xff] }
   0xe   :  { %5728 = vmatmul.msk.f32.vlgmr.msra.gmra.mxu3 %vm76_vm1, %v39_v7  ;;  %5730 = vmatpush.msk.msrb.mxu0 %vm83_vm0, %v72_v12  ;;  %v1250_v26 = vld [vmem:[%s11048_s8 + $0x60] sm:$0xff]  ;;  %v334_v39 = vld [vmem:[%s11045_s5 + $0x10] sm:$0xff] }
   0xf   :  { %5733 = vmatpush.msk.msrb.mxu1 %vm83_vm0, %v73_v13  ;;  %5736 = vmatpush.msk.msrb.mxu2 %vm83_vm0, %v74_v14  ;;  %v338_v50 = vld [vmem:[%s11045_s5 + $0x30] sm:$0xff]  ;;  %v7277_v56 = vld [vmem:[%s11043_s3] sm:$0xff]  ;;  %v7298_v14 = vld [vmem:[%s11043_s3 + $0x8] sm:$0xff] }
  0x10   :  { %5739 = vmatpush.msk.msrb.mxu3 %vm83_vm0, %v75_v15  ;;  %360 = vperm.xlu2 %6260, %v334_v39   ;;  %v332_v6 = vld [vmem:[%s11045_s5] sm:$0xff] }
  0x11   :  { %v7345_v39 = vld [vmem:[%s11043_s3 + $0x20] sm:$0xff] }
  0x14   :  { %355 = vperm.xlu0 %6258, %v333_v16   ;;  %5720 = vmatmul.msk.f32.gmra.mxu0 %vm76_vm1, %v40_v17 }
  0x15   :  { %5723 = vmatmul.msk.f32.gmra.mxu1 %vm76_vm1, %v40_v17  ;;  %5726 = vmatmul.msk.f32.gmra.mxu2 %vm76_vm1, %v40_v17 }
  0x16   :  { %5729 = vmatmul.msk.f32.gmra.mxu3 %vm76_vm1, %v40_v17 }
  0x18   :  { %380 = vperm.xlu2 %6260, %v338_v50   ;;  %v345_v50 = vld [vmem:[%s11045_s5 + $0x68] sm:$0xff] }
  0x1c   :  { %370 = vperm.xlu0 %6258, %v336_v18   ;;  %5731 = vmatmul.msk.f32.vlgmr.msrb.gmra.mxu0 %vm76_vm1, %v39_v7 }
  0x1d   :  { %5734 = vmatmul.msk.f32.vlgmr.msrb.gmra.mxu1 %vm76_vm1, %v39_v7  ;;  %5737 = vmatmul.msk.f32.vlgmr.msrb.gmra.mxu2 %vm76_vm1, %v39_v7 }
  0x1e   :  { %5740 = vmatmul.msk.f32.vlgmr.msrb.gmra.mxu3 %vm76_vm1, %v39_v7  ;;  %v335_v7 = vld [vmem:[%s11045_s5 + $0x18] sm:$0xff] }
  0x1f   :  { %365 = vperm.xlu1 %6259, %v335_v7  }
  0x20   :  { %350 = vperm.xlu2 %6260, %v332_v6  }
  0x24   :  { %395 = vperm.xlu0 %6258, %v341_v19   ;;  %5732 = vmatmul.msk.f32.gmra.mxu0 %vm76_vm1, %v40_v17 }
  0x25   :  { %5735 = vmatmul.msk.f32.gmra.mxu1 %vm76_vm1, %v40_v17  ;;  %5738 = vmatmul.msk.f32.gmra.mxu2 %vm76_vm1, %v40_v17 }
  0x26   :  { %5741 = vmatmul.msk.f32.gmra.mxu3 %vm76_vm1, %v40_v17 }
  0x2c   :  { %420 = vperm.xlu0 %6258, %v346_v20  }
  0x34   :  { %1573 = vperm.xlu0 %6258, %v1241_v21   ;;  %v339_v21 = vld [vmem:[%s11045_s5 + $0x38] sm:$0xff] }
  0x35   :  { %385 = vperm.xlu1 %6259, %v339_v21  }
  0x3c   :  { %1588 = vperm.xlu0 %6258, %v1244_v22  }
  0x44   :  { %1558 = vperm.xlu0 %6258, %v1238_v23  }
  0x4c   :  { %1608 = vperm.xlu0 %6258, %v1248_v24  }
  0x54   :  { %1598 = vperm.xlu0 %6258, %v1246_v25  }
  0x5c   :  { %1618 = vperm.xlu0 %6258, %v1250_v26  }
  0x74   :  { %v7256_v27 = vpop.permute.xlu0 %54 }
  0x7e   :  { %v7258_v30 = vpop.permute.xlu0 %49 }
  0x89   :  { %v117_v28 = vpop.f32.mrf.mxu0 }
  0x8a   :  { %v140_v29 = vpop.f32.mrf.mxu1  ;;  %v118_v31 = vadd.f32 %v117_v28, %v7258_v30 }
  0x8b   :  { %v141_v32 = vadd.f32 %v140_v29, %v7258_v30 }
  0x8c   :  { %6261 = vtanh.f32 %v118_v31 }
  0x8d   :  { %6263 = vtanh.f32 %v141_v32 }
  0x90   :  { %v163_v33 = vpop.f32.mrf.mxu2 }
  0x91   :  { %v186_v34 = vpop.f32.mrf.mxu3  ;;  %v120_v35 = vpop.f32.mrf.mxu0  ;;  %v164_v40 = vadd.f32 %v163_v33, %v7258_v30 }
  0x92   :  { %v121_v36 = vadd.f32 %v120_v35, %v7256_v27  ;;  %v143_v37 = vpop.f32.mrf.mxu1  ;;  %v187_v41 = vadd.f32 %v186_v34, %v7258_v30  ;;  %v6262_v43 = vpop.eup %6261  ;;  %v337_v34 = vld [vmem:[%s11045_s5 + $0x28] sm:$0xff] }
  0x93   :  { %v144_v38 = vadd.f32 %v143_v37, %v7256_v27  ;;  %v6264_v47 = vpop.eup %6263  ;;  %v300_v55 = vmax.f32 %v6262_v43, 0.0  ;;  %375 = vperm.xlu1 %6259, %v337_v34   ;;  %v342_v43 = vld [vmem:[%s11045_s5 + $0x50] sm:$0xff] }
  0x94   :  { %6265 = vtanh.f32 %v121_v36  ;;  %v301_v59 = vmax.f32 %v6264_v47, 0.0  ;;  %400 = vperm.xlu2 %6260, %v342_v43   ;;  %v7419_v47 = vld [vmem:[%s11043_s3 + $0x48] sm:$0xff] }
  0x95   :  { %6267 = vtanh.f32 %v144_v38  ;;  %v7332_v38 = vld [vmem:[%s11043_s3 + $0x18] sm:$0xff]  ;;  %v1239_v43 = vld [vmem:[%s11048_s8 + $0x8] sm:$0xff] }
  0x96   :  { %6269 = vtanh.f32 %v164_v40  ;;  %v7358_v40 = vld [vmem:[%s11043_s3 + $0x28] sm:$0xff] }
  0x97   :  { %6271 = vtanh.f32 %v187_v41  ;;  %v7371_v41 = vld [vmem:[%s11043_s3 + $0x30] sm:$0xff] }
  0x98   :  { %v166_v42 = vpop.f32.mrf.mxu2 }
  0x99   :  { %v167_v44 = vadd.f32 %v166_v42, %v7256_v27  ;;  %v189_v45 = vpop.f32.mrf.mxu3  ;;  %v209_v46 = vpop.f32.mrf.mxu0  ;;  %v7384_v42 = vld [vmem:[%s11043_s3 + $0x38] sm:$0xff] }
  0x9a   :  { %v190_v48 = vadd.f32 %v189_v45, %v7256_v27  ;;  %v232_v49 = vpop.f32.mrf.mxu1  ;;  %v6266_v51 = vpop.eup %6265  ;;  %v210_v58 = vadd.f32 %v209_v46, %v7258_v30  ;;  %v340_v45 = vld [vmem:[%s11045_s5 + $0x40] sm:$0xff]  ;;  %v343_v46 = vld [vmem:[%s11045_s5 + $0x58] sm:$0xff] }
  0x9b   :  { %6273 = vtanh.f32 %v167_v44  ;;  %v6268_v52 = vpop.eup %6267  ;;  %v308_v53 = vmax.f32 %v6266_v51, 0.0  ;;  %v233_v61 = vadd.f32 %v232_v49, %v7258_v30  ;;  %v7400_v44 = vld [vmem:[%s11043_s3 + $0x40] sm:$0xff]  ;;  %405 = vperm.xlu1 %6259, %v343_v46   ;;  %v7435_v49 = vld [vmem:[%s11043_s3 + $0x50] sm:$0xff]  ;;  %v7451_v51 = vld [vmem:[%s11043_s3 + $0x58] sm:$0xff] }
  0x9c   :  { %6275 = vtanh.f32 %v190_v48  ;;  %v309_v54 = vmax.f32 %v6268_v52, 0.0  ;;  %v6270_v57 = vpop.eup %6269  ;;  %390 = vperm.xlu2 %6260, %v340_v45   ;;  %v347_v48 = vld [vmem:[%s11045_s5 + $0x78] sm:$0xff]  ;;  %v7464_v52 = vld [vmem:[%s11043_s3 + $0x60] sm:$0xff] }
  0x9d   :  { %491 = vmatpush.msra.mxu0 %v308_v53  ;;  %v6272_v60 = vpop.eup %6271  ;;  %6277 = vtanh.f32 %v210_v58  ;;  %v302_v10 = vmax.f32 %v6270_v57, 0.0  ;;  %v344_v53 = vld [vmem:[%s11045_s5 + $0x60] sm:$0xff]  ;;  %v7506_v57 = vld [vmem:[%s11043_s3 + $0x78] sm:$0xff] }
  0x9e   :  { %556 = vmatpush.msra.mxu1 %v309_v54  ;;  %6279 = vtanh.f32 %v233_v61  ;;  %v303_v12 = vmax.f32 %v6272_v60, 0.0  ;;  %v7480_v54 = vld [vmem:[%s11043_s3 + $0x68] sm:$0xff]  ;;  %v7775_v45 = vld [vmem:[%s11044_s4 + $0x20] sm:$0xff] }
  0x9f   :  { %492 = vmatpush.msra.mxu0 %v300_v55  ;;  %v7493_v55 = vld [vmem:[%s11043_s3 + $0x70] sm:$0xff]  ;;  %v1242_v46 = vld [vmem:[%s11048_s8 + $0x20] sm:$0xff] }
  0xa0   :  { %v255_v62 = vpop.f32.mrf.mxu2  ;;  %557 = vmatpush.msra.mxu1 %v301_v59  ;;  %5742 = vmatmul.msk.f32.vlgmr.msra.gmra.mxu0 %vm428_vm2, %v7277_v56 }
  0xa1   :  { %v6274_v63 = vpop.eup %6273  ;;  %v278_v0 = vpop.f32.mrf.mxu3  ;;  %5758 = vmatmul.msk.f32.vlgmr.msra.gmra.mxu1 %vm428_vm2, %v7277_v56  ;;  %v256_v11 = vadd.f32 %v255_v62, %v7258_v30 }
  0xa2   :  { %v212_v1 = vpop.f32.mrf.mxu0  ;;  %v6276_v2 = vpop.eup %6275  ;;  %v310_v3 = vmax.f32 %v6274_v63, 0.0  ;;  %v279_v13 = vadd.f32 %v278_v0, %v7258_v30 }
  0xa3   :  { %v213_v4 = vadd.f32 %v212_v1, %v7256_v27  ;;  %v235_v5 = vpop.f32.mrf.mxu1  ;;  %v311_v8 = vmax.f32 %v6276_v2, 0.0  ;;  %v6278_v16 = vpop.eup %6277  ;;  %425 = vperm.xlu1 %6259, %v347_v48   ;;  %v7787_v48 = vld [vmem:[%s11044_s4 + $0x28] sm:$0xff] }
  0xa4   :  { %v236_v9 = vadd.f32 %v235_v5, %v7256_v27  ;;  %621 = vmatpush.msra.mxu2 %v310_v3  ;;  %v6280_v19 = vpop.eup %6279  ;;  %v304_v26 = vmax.f32 %v6278_v16, 0.0  ;;  %410 = vperm.xlu2 %6260, %v344_v53  }
  0xa5   :  { %6281 = vtanh.f32 %v213_v4  ;;  %686 = vmatpush.msra.mxu3 %v311_v8  ;;  %v305_v29 = vmax.f32 %v6280_v19, 0.0 }
  0xa6   :  { %6283 = vtanh.f32 %v236_v9  ;;  %622 = vmatpush.msra.mxu2 %v302_v10 }
  0xa7   :  { %687 = vmatpush.msra.mxu3 %v303_v12  ;;  %5774 = vmatmul.msk.f32.vlgmr.msra.gmra.mxu2 %vm428_vm2, %v7277_v56  ;;  %6285 = vtanh.f32 %v256_v11 }
  0xa8   :  { %5790 = vmatmul.msk.f32.vlgmr.msra.gmra.mxu3 %vm428_vm2, %v7277_v56  ;;  %v258_v15 = vpop.f32.mrf.mxu2  ;;  %5743 = vmatmul.msk.f32.gmra.mxu0 %vm428_vm2, %v7298_v14  ;;  %6287 = vtanh.f32 %v279_v13 }
  0xa9   :  { %v259_v17 = vadd.f32 %v258_v15, %v7256_v27  ;;  %v281_v18 = vpop.f32.mrf.mxu3  ;;  %5759 = vmatmul.msk.f32.gmra.mxu1 %vm428_vm2, %v7298_v14 }
  0xaa   :  { %v282_v20 = vadd.f32 %v281_v18, %v7256_v27  ;;  %v7316_v27 = vld [vmem:[%s11043_s3 + $0x10] sm:$0xff]  ;;  %v7116_v18 = vmov 0.0  }
  0xab   :  { %v6282_v22 = vpop.eup %6281  ;;  %6289 = vtanh.f32 %v259_v17  ;;  %415 = vperm.xlu1 %6259, %v345_v50  }
  0xac   :  { %v6284_v23 = vpop.eup %6283  ;;  %v312_v24 = vmax.f32 %v6282_v22, 0.0  ;;  %6291 = vtanh.f32 %v282_v20 }
  0xad   :  { %v313_v25 = vmax.f32 %v6284_v23, 0.0  ;;  %v6286_v28 = vpop.eup %6285 }
  0xae   :  { %751 = vmatpush.msrb.mxu0 %v312_v24  ;;  %v6288_v30 = vpop.eup %6287  ;;  %v306_v36 = vmax.f32 %v6286_v28, 0.0 }
  0xaf   :  { %816 = vmatpush.msrb.mxu1 %v313_v25  ;;  %5775 = vmatmul.msk.f32.gmra.mxu2 %vm428_vm2, %v7298_v14  ;;  %v307_v37 = vmax.f32 %v6288_v30, 0.0 }
  0xb0   :  { %5791 = vmatmul.msk.f32.gmra.mxu3 %vm428_vm2, %v7298_v14  ;;  %752 = vmatpush.msrb.mxu0 %v304_v26 }
  0xb1   :  { %v6290_v31 = vpop.eup %6289  ;;  %817 = vmatpush.msrb.mxu1 %v305_v29  ;;  %5744 = vmatmul.msk.f32.gmra.mxu0 %vm428_vm2, %v7316_v27 }
  0xb2   :  { %v6292_v32 = vpop.eup %6291  ;;  %v314_v33 = vmax.f32 %v6290_v31, 0.0  ;;  %5760 = vmatmul.msk.f32.gmra.mxu1 %vm428_vm2, %v7316_v27  ;;  %1358 = vmatpush.msra.mxu0 %v7116_v18 }
  0xb3   :  { %v315_v35 = vmax.f32 %v6292_v32, 0.0 }
  0xb4   :  { %881 = vmatpush.msrb.mxu2 %v314_v33  ;;  %v7725_v33 = vld [vmem:[%s11044_s4] sm:$0xff] }
  0xb5   :  { %946 = vmatpush.msrb.mxu3 %v315_v35 }
  0xb6   :  { %882 = vmatpush.msrb.mxu2 %v306_v36 }
  0xb7   :  { %947 = vmatpush.msrb.mxu3 %v307_v37  ;;  %5776 = vmatmul.msk.f32.gmra.mxu2 %vm428_vm2, %v7316_v27  ;;  %v7742_v37 = vld [vmem:[%s11044_s4 + $0x8] sm:$0xff] }
  0xb8   :  { %5792 = vmatmul.msk.f32.gmra.mxu3 %vm428_vm2, %v7316_v27 }
  0xb9   :  { %5745 = vmatmul.msk.f32.gmra.mxu0 %vm428_vm2, %v7332_v38  ;;  %2042 = vmatpush.msra.mxu3 %v7116_v18 }
  0xba   :  { %5761 = vmatmul.msk.f32.gmra.mxu1 %vm428_vm2, %v7332_v38 }
  0xbf   :  { %5777 = vmatmul.msk.f32.gmra.mxu2 %vm428_vm2, %v7332_v38 }
  0xc0   :  { %5793 = vmatmul.msk.f32.gmra.mxu3 %vm428_vm2, %v7332_v38 }
  0xc1   :  { %5746 = vmatmul.msk.f32.gmra.mxu0 %vm428_vm2, %v7345_v39 }
  0xc2   :  { %5762 = vmatmul.msk.f32.gmra.mxu1 %vm428_vm2, %v7345_v39 }
  0xc7   :  { %5778 = vmatmul.msk.f32.gmra.mxu2 %vm428_vm2, %v7345_v39 }
  0xc8   :  { %5794 = vmatmul.msk.f32.gmra.mxu3 %vm428_vm2, %v7345_v39 }
  0xc9   :  { %5747 = vmatmul.msk.f32.gmra.mxu0 %vm428_vm2, %v7358_v40 }
  0xca   :  { %5763 = vmatmul.msk.f32.gmra.mxu1 %vm428_vm2, %v7358_v40 }
  0xcf   :  { %5779 = vmatmul.msk.f32.gmra.mxu2 %vm428_vm2, %v7358_v40 }
  0xd0   :  { %5795 = vmatmul.msk.f32.gmra.mxu3 %vm428_vm2, %v7358_v40 }
  0xd1   :  { %5748 = vmatmul.msk.f32.gmra.mxu0 %vm428_vm2, %v7371_v41 }
  0xd2   :  { %5764 = vmatmul.msk.f32.gmra.mxu1 %vm428_vm2, %v7371_v41 }
  0xd7   :  { %5780 = vmatmul.msk.f32.gmra.mxu2 %vm428_vm2, %v7371_v41 }
  0xd8   :  { %5796 = vmatmul.msk.f32.gmra.mxu3 %vm428_vm2, %v7371_v41 }
  0xd9   :  { %5749 = vmatmul.msk.f32.gmra.mxu0 %vm428_vm2, %v7384_v42 }
  0xda   :  { %5765 = vmatmul.msk.f32.gmra.mxu1 %vm428_vm2, %v7384_v42 }
  0xdf   :  { %5781 = vmatmul.msk.f32.gmra.mxu2 %vm428_vm2, %v7384_v42 }
  0xe0   :  { %5797 = vmatmul.msk.f32.gmra.mxu3 %vm428_vm2, %v7384_v42 }
  0xe1   :  { %5750 = vmatmul.msk.f32.gmra.mxu0 %vm428_vm2, %v7400_v44 }
  0xe2   :  { %5766 = vmatmul.msk.f32.gmra.mxu1 %vm428_vm2, %v7400_v44 }
  0xe7   :  { %5782 = vmatmul.msk.f32.gmra.mxu2 %vm428_vm2, %v7400_v44 }
  0xe8   :  { %5798 = vmatmul.msk.f32.gmra.mxu3 %vm428_vm2, %v7400_v44 }
  0xe9   :  { %5751 = vmatmul.msk.f32.gmra.mxu0 %vm428_vm2, %v7419_v47 }
  0xea   :  { %5767 = vmatmul.msk.f32.gmra.mxu1 %vm428_vm2, %v7419_v47 }
  0xef   :  { %5783 = vmatmul.msk.f32.gmra.mxu2 %vm428_vm2, %v7419_v47 }
  0xf0   :  { %5799 = vmatmul.msk.f32.gmra.mxu3 %vm428_vm2, %v7419_v47 }
  0xf1   :  { %5752 = vmatmul.msk.f32.gmra.mxu0 %vm428_vm2, %v7435_v49 }
  0xf2   :  { %5768 = vmatmul.msk.f32.gmra.mxu1 %vm428_vm2, %v7435_v49 }
  0xf7   :  { %5784 = vmatmul.msk.f32.gmra.mxu2 %vm428_vm2, %v7435_v49 }
  0xf8   :  { %5800 = vmatmul.msk.f32.gmra.mxu3 %vm428_vm2, %v7435_v49 }
  0xf9   :  { %5753 = vmatmul.msk.f32.gmra.mxu0 %vm428_vm2, %v7451_v51 }
  0xfa   :  { %5769 = vmatmul.msk.f32.gmra.mxu1 %vm428_vm2, %v7451_v51 }
  0xff   :  { %5785 = vmatmul.msk.f32.gmra.mxu2 %vm428_vm2, %v7451_v51 }
 0x100   :  { %5801 = vmatmul.msk.f32.gmra.mxu3 %vm428_vm2, %v7451_v51 }
 0x101   :  { %5754 = vmatmul.msk.f32.gmra.mxu0 %vm428_vm2, %v7464_v52 }
 0x102   :  { %5770 = vmatmul.msk.f32.gmra.mxu1 %vm428_vm2, %v7464_v52 }
 0x107   :  { %5786 = vmatmul.msk.f32.gmra.mxu2 %vm428_vm2, %v7464_v52 }
 0x108   :  { %5802 = vmatmul.msk.f32.gmra.mxu3 %vm428_vm2, %v7464_v52 }
 0x109   :  { %5755 = vmatmul.msk.f32.gmra.mxu0 %vm428_vm2, %v7480_v54 }
 0x10a   :  { %5771 = vmatmul.msk.f32.gmra.mxu1 %vm428_vm2, %v7480_v54 }
 0x10f   :  { %5787 = vmatmul.msk.f32.gmra.mxu2 %vm428_vm2, %v7480_v54 }
 0x110   :  { %5803 = vmatmul.msk.f32.gmra.mxu3 %vm428_vm2, %v7480_v54 }
 0x111   :  { %5756 = vmatmul.msk.f32.gmra.mxu0 %vm428_vm2, %v7493_v55 }
 0x112   :  { %5772 = vmatmul.msk.f32.gmra.mxu1 %vm428_vm2, %v7493_v55 }
 0x117   :  { %5788 = vmatmul.msk.f32.gmra.mxu2 %vm428_vm2, %v7493_v55 }
 0x118   :  { %5804 = vmatmul.msk.f32.gmra.mxu3 %vm428_vm2, %v7493_v55 }
 0x119   :  { %5757 = vmatmul.msk.f32.gmra.mxu0 %vm428_vm2, %v7506_v57 }
 0x11a   :  { %5773 = vmatmul.msk.f32.gmra.mxu1 %vm428_vm2, %v7506_v57 }
 0x11d   :  { %v7516_v58 = vpop.f32.mrf.mxu0 }
 0x11e   :  { %v7586_v0 = vpop.f32.mrf.mxu1 }
 0x11f   :  { %5789 = vmatmul.msk.f32.gmra.mxu2 %vm428_vm2, %v7506_v57  ;;  %11360 = vst [vmem:[#allocation11_spill] sm:$0xff] %v7586_v0 }
 0x120   :  { %5805 = vmatmul.msk.f32.gmra.mxu3 %vm428_vm2, %v7506_v57 }
 0x121   :  { %5806 = vmatmul.msk.f32.vlgmr.msrb.gmra.mxu0 %vm428_vm2, %v7277_v56 }
 0x122   :  { %5822 = vmatmul.msk.f32.vlgmr.msrb.gmra.mxu1 %vm428_vm2, %v7277_v56 }
 0x125   :  { %v7526_v59 = vpop.f32.mrf.mxu0 }
 0x126   :  { %v7602_v4 = vpop.f32.mrf.mxu1 }
 0x127   :  { %5838 = vmatmul.msk.f32.vlgmr.msrb.gmra.mxu2 %vm428_vm2, %v7277_v56  ;;  %11363 = vst [vmem:[#allocation14_spill] sm:$0xff] %v7602_v4 }
 0x128   :  { %5854 = vmatmul.msk.f32.vlgmr.msrb.gmra.mxu3 %vm428_vm2, %v7277_v56 }
 0x129   :  { %5807 = vmatmul.msk.f32.gmra.mxu0 %vm428_vm2, %v7298_v14 }
 0x12a   :  { %5823 = vmatmul.msk.f32.gmra.mxu1 %vm428_vm2, %v7298_v14  ;;  %v7594_v2 = vpop.f32.mrf.mxu2 }
 0x12b   :  { %11361 = vst [vmem:[#allocation12_spill] sm:$0xff] %v7594_v2  ;;  %v7598_v3 = vpop.f32.mrf.mxu3  ;;  %v7955_v2 = vpop.permute.xlu0 %355 }
 0x12c   :  { %11362 = vst [vmem:[#allocation13_spill] sm:$0xff] %v7598_v3 }
 0x12d   :  { %11421 = vst [vmem:[#allocation72_spill] sm:$0xff] %v7955_v2 }
 0x12e   :  { %v7536_v60 = vpop.f32.mrf.mxu0 }
 0x12f   :  { %5839 = vmatmul.msk.f32.gmra.mxu2 %vm428_vm2, %v7298_v14  ;;  %v7622_v9 = vpop.f32.mrf.mxu1 }
 0x130   :  { %5855 = vmatmul.msk.f32.gmra.mxu3 %vm428_vm2, %v7298_v14  ;;  %11366 = vst [vmem:[#allocation17_spill] sm:$0xff] %v7622_v9 }
 0x131   :  { %5808 = vmatmul.msk.f32.gmra.mxu0 %vm428_vm2, %v7316_v27 }
 0x132   :  { %5824 = vmatmul.msk.f32.gmra.mxu1 %vm428_vm2, %v7316_v27  ;;  %v7614_v6 = vpop.f32.mrf.mxu2 }
 0x133   :  { %11364 = vst [vmem:[#allocation15_spill] sm:$0xff] %v7614_v6  ;;  %v7616_v7 = vpop.f32.mrf.mxu3 }
 0x134   :  { %11365 = vst [vmem:[#allocation16_spill] sm:$0xff] %v7616_v7 }
 0x136   :  { %v7546_v56 = vpop.f32.mrf.mxu0 }
 0x137   :  { %5840 = vmatmul.msk.f32.gmra.mxu2 %vm428_vm2, %v7316_v27  ;;  %v7642_v13 = vpop.f32.mrf.mxu1 }
 0x138   :  { %5856 = vmatmul.msk.f32.gmra.mxu3 %vm428_vm2, %v7316_v27  ;;  %11369 = vst [vmem:[#allocation20_spill] sm:$0xff] %v7642_v13 }
 0x139   :  { %5809 = vmatmul.msk.f32.gmra.mxu0 %vm428_vm2, %v7332_v38 }
 0x13a   :  { %5825 = vmatmul.msk.f32.gmra.mxu1 %vm428_vm2, %v7332_v38  ;;  %v7630_v10 = vpop.f32.mrf.mxu2 }
 0x13b   :  { %11367 = vst [vmem:[#allocation18_spill] sm:$0xff] %v7630_v10  ;;  %v7632_v11 = vpop.f32.mrf.mxu3  ;;  %v7941_v10 = vpop.permute.xlu2 %360 }
 0x13c   :  { %11368 = vst [vmem:[#allocation19_spill] sm:$0xff] %v7632_v11 }
 0x13d   :  { %11415 = vst [vmem:[#allocation66_spill] sm:$0xff] %v7941_v10 }
 0x13e   :  { %v7556_v61 = vpop.f32.mrf.mxu0 }
 0x13f   :  { %5841 = vmatmul.msk.f32.gmra.mxu2 %vm428_vm2, %v7332_v38  ;;  %v7660_v17 = vpop.f32.mrf.mxu1 }
 0x140   :  { %5857 = vmatmul.msk.f32.gmra.mxu3 %vm428_vm2, %v7332_v38  ;;  %11372 = vst [vmem:[#allocation23_spill] sm:$0xff] %v7660_v17 }
 0x141   :  { %5810 = vmatmul.msk.f32.gmra.mxu0 %vm428_vm2, %v7345_v39 }
 0x142   :  { %5826 = vmatmul.msk.f32.gmra.mxu1 %vm428_vm2, %v7345_v39  ;;  %v7648_v15 = vpop.f32.mrf.mxu2 }
 0x143   :  { %11370 = vst [vmem:[#allocation21_spill] sm:$0xff] %v7648_v15  ;;  %v7652_v16 = vpop.f32.mrf.mxu3 }
 0x144   :  { %11371 = vst [vmem:[#allocation22_spill] sm:$0xff] %v7652_v16 }
 0x146   :  { %v7566_v62 = vpop.f32.mrf.mxu0 }
 0x147   :  { %5842 = vmatmul.msk.f32.gmra.mxu2 %vm428_vm2, %v7345_v39  ;;  %v7676_v22 = vpop.f32.mrf.mxu1 }
 0x148   :  { %5858 = vmatmul.msk.f32.gmra.mxu3 %vm428_vm2, %v7345_v39  ;;  %11375 = vst [vmem:[#allocation26_spill] sm:$0xff] %v7676_v22  ;;  %v7751_v39 = vld [vmem:[%s11044_s4 + $0x10] sm:$0xff] }
 0x149   :  { %5811 = vmatmul.msk.f32.gmra.mxu0 %vm428_vm2, %v7358_v40 }
 0x14a   :  { %5827 = vmatmul.msk.f32.gmra.mxu1 %vm428_vm2, %v7358_v40  ;;  %v7668_v20 = vpop.f32.mrf.mxu2 }
 0x14b   :  { %11373 = vst [vmem:[#allocation24_spill] sm:$0xff] %v7668_v20  ;;  %v7672_v21 = vpop.f32.mrf.mxu3 }
 0x14c   :  { %11374 = vst [vmem:[#allocation25_spill] sm:$0xff] %v7672_v21 }
 0x14e   :  { %v7576_v63 = vpop.f32.mrf.mxu0 }
 0x14f   :  { %5843 = vmatmul.msk.f32.gmra.mxu2 %vm428_vm2, %v7358_v40  ;;  %v7696_v27 = vpop.f32.mrf.mxu1 }
 0x150   :  { %5859 = vmatmul.msk.f32.gmra.mxu3 %vm428_vm2, %v7358_v40  ;;  %11378 = vst [vmem:[#allocation29_spill] sm:$0xff] %v7696_v27  ;;  %v1245_v40 = vld [vmem:[%s11048_s8 + $0x38] sm:$0xff] }
 0x151   :  { %5812 = vmatmul.msk.f32.gmra.mxu0 %vm428_vm2, %v7371_v41  ;;  %1593 = vperm.xlu1 %6259, %v1245_v40   ;;  %v7826_v40 = vld [vmem:[%s11044_s4 + $0x40] sm:$0xff] }
 0x152   :  { %5828 = vmatmul.msk.f32.gmra.mxu1 %vm428_vm2, %v7371_v41  ;;  %v7688_v24 = vpop.f32.mrf.mxu2 }
 0x153   :  { %11376 = vst [vmem:[#allocation27_spill] sm:$0xff] %v7688_v24  ;;  %v7690_v25 = vpop.f32.mrf.mxu3 }
 0x154   :  { %11377 = vst [vmem:[#allocation28_spill] sm:$0xff] %v7690_v25 }
 0x156   :  { %v7588_v1 = vpop.f32.mrf.mxu0 }
 0x157   :  { %5844 = vmatmul.msk.f32.gmra.mxu2 %vm428_vm2, %v7371_v41  ;;  %v7716_v31 = vpop.f32.mrf.mxu1 }
 0x158   :  { %5860 = vmatmul.msk.f32.gmra.mxu3 %vm428_vm2, %v7371_v41  ;;  %11381 = vst [vmem:[#allocation32_spill] sm:$0xff] %v7716_v31  ;;  %v7967_v31 = vpop.permute.xlu0 %370 }
 0x159   :  { %5813 = vmatmul.msk.f32.gmra.mxu0 %vm428_vm2, %v7384_v42  ;;  %1563 = vperm.xlu1 %6259, %v1239_v43   ;;  %v1243_v43 = vld [vmem:[%s11048_s8 + $0x28] sm:$0xff]  ;;  %11427 = vst [vmem:[#allocation78_spill] sm:$0xff] %v7967_v31 }
 0x15a   :  { %5829 = vmatmul.msk.f32.gmra.mxu1 %vm428_vm2, %v7384_v42  ;;  %v7704_v28 = vpop.f32.mrf.mxu2 }
 0x15b   :  { %11379 = vst [vmem:[#allocation30_spill] sm:$0xff] %v7704_v28  ;;  %v7706_v29 = vpop.f32.mrf.mxu3 }
 0x15c   :  { %11380 = vst [vmem:[#allocation31_spill] sm:$0xff] %v7706_v29 }
 0x15e   :  { %v7604_v5 = vpop.f32.mrf.mxu0 }
 0x15f   :  { %5845 = vmatmul.msk.f32.gmra.mxu2 %vm428_vm2, %v7384_v42  ;;  %v7915_v16 = vpop.f32.mrf.mxu1 }
 0x160   :  { %5861 = vmatmul.msk.f32.gmra.mxu3 %vm428_vm2, %v7384_v42  ;;  %v7763_v42 = vld [vmem:[%s11044_s4 + $0x18] sm:$0xff]  ;;  %11403 = vst [vmem:[#allocation54_spill] sm:$0xff] %v7915_v16 }
 0x161   :  { %5814 = vmatmul.msk.f32.gmra.mxu0 %vm428_vm2, %v7400_v44  ;;  %1578 = vperm.xlu1 %6259, %v1242_v46  }
 0x162   :  { %5830 = vmatmul.msk.f32.gmra.mxu1 %vm428_vm2, %v7400_v44  ;;  %v7727_v34 = vpop.f32.mrf.mxu2 }
 0x163   :  { %11383 = vst [vmem:[#allocation34_spill] sm:$0xff] %v7727_v34  ;;  %v7731_v35 = vpop.f32.mrf.mxu3  ;;  %v7933_v34 = vpop.permute.xlu1 %365 }
 0x164   :  { %11384 = vst [vmem:[#allocation35_spill] sm:$0xff] %v7731_v35 }
 0x165   :  { %11412 = vst [vmem:[#allocation63_spill] sm:$0xff] %v7933_v34 }
 0x166   :  { %v7618_v8 = vpop.f32.mrf.mxu0 }
 0x167   :  { %5846 = vmatmul.msk.f32.gmra.mxu2 %vm428_vm2, %v7400_v44  ;;  %v7921_v7 = vpop.f32.mrf.mxu1 }
 0x168   :  { %5862 = vmatmul.msk.f32.gmra.mxu3 %vm428_vm2, %v7400_v44  ;;  %11406 = vst [vmem:[#allocation57_spill] sm:$0xff] %v7921_v7 }
 0x169   :  { %5815 = vmatmul.msk.f32.gmra.mxu0 %vm428_vm2, %v7419_v47 }
 0x16a   :  { %5831 = vmatmul.msk.f32.gmra.mxu1 %vm428_vm2, %v7419_v47  ;;  %v7919_v29 = vpop.f32.mrf.mxu2 }
 0x16b   :  { %11405 = vst [vmem:[#allocation56_spill] sm:$0xff] %v7919_v29 }
 0x16e   :  { %v7634_v12 = vpop.f32.mrf.mxu0 }
 0x16f   :  { %5847 = vmatmul.msk.f32.gmra.mxu2 %vm428_vm2, %v7419_v47 }
 0x170   :  { %5863 = vmatmul.msk.f32.gmra.mxu3 %vm428_vm2, %v7419_v47 }
 0x171   :  { %5816 = vmatmul.msk.f32.gmra.mxu0 %vm428_vm2, %v7435_v49 }
 0x172   :  { %5832 = vmatmul.msk.f32.gmra.mxu1 %vm428_vm2, %v7435_v49  ;;  %v7925_v3 = vpop.f32.mrf.mxu2 }
 0x173   :  { %11408 = vst [vmem:[#allocation59_spill] sm:$0xff] %v7925_v3  ;;  %v7945_v3 = vpop.permute.xlu1 %385 }
 0x174   :  { %11417 = vst [vmem:[#allocation68_spill] sm:$0xff] %v7945_v3 }
 0x176   :  { %v7646_v14 = vpop.f32.mrf.mxu0 }
 0x177   :  { %5848 = vmatmul.msk.f32.gmra.mxu2 %vm428_vm2, %v7435_v49 }
 0x178   :  { %5864 = vmatmul.msk.f32.gmra.mxu3 %vm428_vm2, %v7435_v49  ;;  %v1247_v49 = vld [vmem:[%s11048_s8 + $0x48] sm:$0xff] }
 0x179   :  { %5817 = vmatmul.msk.f32.gmra.mxu0 %vm428_vm2, %v7451_v51  ;;  %1603 = vperm.xlu1 %6259, %v1247_v49   ;;  %v7838_v49 = vld [vmem:[%s11044_s4 + $0x48] sm:$0xff] }
 0x17a   :  { %5833 = vmatmul.msk.f32.gmra.mxu1 %vm428_vm2, %v7451_v51  ;;  %v7931_v15 = vpop.f32.mrf.mxu2 }
 0x17b   :  { %11411 = vst [vmem:[#allocation62_spill] sm:$0xff] %v7931_v15  ;;  %v7953_v15 = vpop.permute.xlu2 %380 }
 0x17c   :  { %11420 = vst [vmem:[#allocation71_spill] sm:$0xff] %v7953_v15 }
 0x17e   :  { %v7662_v19 = vpop.f32.mrf.mxu0 }
 0x17f   :  { %5849 = vmatmul.msk.f32.gmra.mxu2 %vm428_vm2, %v7451_v51 }
 0x180   :  { %5865 = vmatmul.msk.f32.gmra.mxu3 %vm428_vm2, %v7451_v51  ;;  %v7799_v51 = vld [vmem:[%s11044_s4 + $0x30] sm:$0xff] }
 0x181   :  { %5818 = vmatmul.msk.f32.gmra.mxu0 %vm428_vm2, %v7464_v52 }
 0x182   :  { %5834 = vmatmul.msk.f32.gmra.mxu1 %vm428_vm2, %v7464_v52 }
 0x183   :  { %v7965_v7 = vpop.permute.xlu2 %350 }
 0x184   :  { %11426 = vst [vmem:[#allocation77_spill] sm:$0xff] %v7965_v7 }
 0x186   :  { %v7678_v23 = vpop.f32.mrf.mxu0 }
 0x187   :  { %5850 = vmatmul.msk.f32.gmra.mxu2 %vm428_vm2, %v7464_v52 }
 0x188   :  { %5866 = vmatmul.msk.f32.gmra.mxu3 %vm428_vm2, %v7464_v52  ;;  %v1252_v52 = vld [vmem:[%s11048_s8 + $0x70] sm:$0xff] }
 0x189   :  { %5819 = vmatmul.msk.f32.gmra.mxu0 %vm428_vm2, %v7480_v54  ;;  %1628 = vperm.xlu1 %6259, %v1252_v52   ;;  %v1249_v52 = vld [vmem:[%s11048_s8 + $0x58] sm:$0xff] }
 0x18a   :  { %5835 = vmatmul.msk.f32.gmra.mxu1 %vm428_vm2, %v7480_v54 }
 0x18b   :  { %v7973_v27 = vpop.permute.xlu2 %400 }
 0x18c   :  { %11430 = vst [vmem:[#allocation81_spill] sm:$0xff] %v7973_v27 }
 0x18e   :  { %v7692_v26 = vpop.f32.mrf.mxu0 }
 0x18f   :  { %5851 = vmatmul.msk.f32.gmra.mxu2 %vm428_vm2, %v7480_v54 }
 0x190   :  { %5867 = vmatmul.msk.f32.gmra.mxu3 %vm428_vm2, %v7480_v54  ;;  %v7811_v54 = vld [vmem:[%s11044_s4 + $0x38] sm:$0xff] }
 0x191   :  { %5820 = vmatmul.msk.f32.gmra.mxu0 %vm428_vm2, %v7493_v55 }
 0x192   :  { %5836 = vmatmul.msk.f32.gmra.mxu1 %vm428_vm2, %v7493_v55 }
 0x196   :  { %v7708_v30 = vpop.f32.mrf.mxu0 }
 0x197   :  { %5852 = vmatmul.msk.f32.gmra.mxu2 %vm428_vm2, %v7493_v55 }
 0x198   :  { %5868 = vmatmul.msk.f32.gmra.mxu3 %vm428_vm2, %v7493_v55  ;;  %v1240_v55 = vld [vmem:[%s11048_s8 + $0x10] sm:$0xff] }
 0x199   :  { %5821 = vmatmul.msk.f32.gmra.mxu0 %vm428_vm2, %v7506_v57  ;;  %1568 = vperm.xlu2 %6260, %v1240_v55  }
 0x19a   :  { %5837 = vmatmul.msk.f32.gmra.mxu1 %vm428_vm2, %v7506_v57 }
 0x19e   :  { %v7720_v32 = vpop.f32.mrf.mxu0 }
 0x19f   :  { %11382 = vst [vmem:[#allocation33_spill] sm:$0xff] %v7720_v32  ;;  %5853 = vmatmul.msk.f32.gmra.mxu2 %vm428_vm2, %v7506_v57 }
 0x1a0   :  { %5869 = vmatmul.msk.f32.gmra.mxu3 %vm428_vm2, %v7506_v57  ;;  %v5671_v57 = vld [vmem:[%s11050_s10] sm:$0xf] }
 0x1a1   :  { %5870 = vmatmul.msk.f32.vlgmr.msra.gmra.mxu0 %vm1294_vm3, %v7725_v33  ;;  %5674 = vperm.xlu1 %6259, %v5671_v57   ;;  %v7850_v57 = vld [vmem:[%s11044_s4 + $0x50] sm:$0xff] }
 0x1a2   :  { %1583 = vperm.xlu2 %6260, %v1243_v43   ;;  %v1253_v43 = vld [vmem:[%s11048_s8 + $0x78] sm:$0xff] }
 0x1a6   :  { %v7737_v36 = vpop.f32.mrf.mxu0 }
 0x1a7   :  { %11385 = vst [vmem:[#allocation36_spill] sm:$0xff] %v7737_v36 }
 0x1a9   :  { %5871 = vmatmul.msk.f32.gmra.mxu0 %vm1294_vm3, %v7742_v37 }
 0x1aa   :  { %1613 = vperm.xlu2 %6260, %v1249_v52   ;;  %v7862_v52 = vld [vmem:[%s11044_s4 + $0x58] sm:$0xff] }
 0x1ae   :  { %v7746_v38 = vpop.f32.mrf.mxu0 }
 0x1af   :  { %11386 = vst [vmem:[#allocation37_spill] sm:$0xff] %v7746_v38 }
 0x1b1   :  { %5872 = vmatmul.msk.f32.gmra.mxu0 %vm1294_vm3, %v7751_v39 }
 0x1b2   :  { %1633 = vperm.xlu2 %6260, %v1253_v43   ;;  %v7874_v43 = vld [vmem:[%s11044_s4 + $0x60] sm:$0xff] }
 0x1b6   :  { %v7758_v41 = vpop.f32.mrf.mxu0 }
 0x1b7   :  { %11387 = vst [vmem:[#allocation38_spill] sm:$0xff] %v7758_v41 }
 0x1b9   :  { %5873 = vmatmul.msk.f32.gmra.mxu0 %vm1294_vm3, %v7763_v42 }
 0x1be   :  { %v7770_v44 = vpop.f32.mrf.mxu0 }
 0x1bf   :  { %11388 = vst [vmem:[#allocation39_spill] sm:$0xff] %v7770_v44 }
 0x1c1   :  { %5874 = vmatmul.msk.f32.gmra.mxu0 %vm1294_vm3, %v7775_v45 }
 0x1c6   :  { %v7782_v47 = vpop.f32.mrf.mxu0 }
 0x1c7   :  { %11389 = vst [vmem:[#allocation40_spill] sm:$0xff] %v7782_v47 }
 0x1c9   :  { %5875 = vmatmul.msk.f32.gmra.mxu0 %vm1294_vm3, %v7787_v48 }
 0x1ce   :  { %v7794_v50 = vpop.f32.mrf.mxu0 }
 0x1cf   :  { %11390 = vst [vmem:[#allocation41_spill] sm:$0xff] %v7794_v50 }
 0x1d1   :  { %5876 = vmatmul.msk.f32.gmra.mxu0 %vm1294_vm3, %v7799_v51 }
 0x1d6   :  { %v7806_v53 = vpop.f32.mrf.mxu0 }
 0x1d7   :  { %11391 = vst [vmem:[#allocation42_spill] sm:$0xff] %v7806_v53  ;;  %v7883_v53 = vld [vmem:[%s11044_s4 + $0x68] sm:$0xff] }
 0x1d9   :  { %5877 = vmatmul.msk.f32.gmra.mxu0 %vm1294_vm3, %v7811_v54 }
 0x1de   :  { %v7821_v18 = vpop.f32.mrf.mxu0 }
 0x1df   :  { %11392 = vst [vmem:[#allocation43_spill] sm:$0xff] %v7821_v18 }
 0x1e1   :  { %5878 = vmatmul.msk.f32.gmra.mxu0 %vm1294_vm3, %v7826_v40 }
 0x1e6   :  { %v7833_v46 = vpop.f32.mrf.mxu0 }
 0x1e7   :  { %11393 = vst [vmem:[#allocation44_spill] sm:$0xff] %v7833_v46 }
 0x1e9   :  { %5879 = vmatmul.msk.f32.gmra.mxu0 %vm1294_vm3, %v7838_v49 }
 0x1ee   :  { %v7845_v55 = vpop.f32.mrf.mxu0 }
 0x1ef   :  { %11394 = vst [vmem:[#allocation45_spill] sm:$0xff] %v7845_v55  ;;  %v1251_v55 = vld [vmem:[%s11048_s8 + $0x68] sm:$0xff] }
 0x1f0   :  { %1623 = vperm.xlu2 %6260, %v1251_v55  }
 0x1f1   :  { %5880 = vmatmul.msk.f32.gmra.mxu0 %vm1294_vm3, %v7850_v57 }
 0x1f6   :  { %v7857_v46 = vpop.f32.mrf.mxu0 }
 0x1f7   :  { %11395 = vst [vmem:[#allocation46_spill] sm:$0xff] %v7857_v46 }
 0x1f9   :  { %5881 = vmatmul.msk.f32.gmra.mxu0 %vm1294_vm3, %v7862_v52 }
 0x1fe   :  { %v7869_v18 = vpop.f32.mrf.mxu0 }
 0x1ff   :  { %11396 = vst [vmem:[#allocation47_spill] sm:$0xff] %v7869_v18  ;;  %v7892_v18 = vld [vmem:[%s11044_s4 + $0x70] sm:$0xff] }
 0x201   :  { %5882 = vmatmul.msk.f32.gmra.mxu0 %vm1294_vm3, %v7874_v43 }
 0x206   :  { %v7878_v46 = vpop.f32.mrf.mxu0 }
 0x207   :  { %11397 = vst [vmem:[#allocation48_spill] sm:$0xff] %v7878_v46  ;;  %v7901_v46 = vld [vmem:[%s11044_s4 + $0x78] sm:$0xff] }
 0x209   :  { %5883 = vmatmul.msk.f32.gmra.mxu0 %vm1294_vm3, %v7883_v53 }
 0x20e   :  { %v7887_v55 = vpop.f32.mrf.mxu0 }
 0x20f   :  { %11398 = vst [vmem:[#allocation49_spill] sm:$0xff] %v7887_v55  ;;  %v7907_v55 = vpop.f32.mrf.mxu3 }
 0x210   :  { %11400 = vst [vmem:[#allocation51_spill] sm:$0xff] %v7907_v55 }
 0x211   :  { %5884 = vmatmul.msk.f32.gmra.mxu0 %vm1294_vm3, %v7892_v18 }
 0x216   :  { %v7896_v50 = vpop.f32.mrf.mxu0 }
 0x217   :  { %11399 = vst [vmem:[#allocation50_spill] sm:$0xff] %v7896_v50  ;;  %v7909_v41 = vpop.f32.mrf.mxu3 }
 0x218   :  { %11401 = vst [vmem:[#allocation52_spill] sm:$0xff] %v7909_v41  ;;  %v7927_v41 = vpop.f32.mrf.mxu1 }
 0x219   :  { %5885 = vmatmul.msk.f32.gmra.mxu0 %vm1294_vm3, %v7901_v46  ;;  %11409 = vst [vmem:[#allocation60_spill] sm:$0xff] %v7927_v41 }
 0x21e   :  { %v7905_v47 = vpop.f32.mrf.mxu0 }
 0x21f   :  { %v7911_v36 = vpop.f32.mrf.mxu3 }
 0x220   :  { %11402 = vst [vmem:[#allocation53_spill] sm:$0xff] %v7911_v36 }
 0x226   :  { %v1363_v44 = vpop.f32.mrf.mxu0 }
 0x227   :  { %v7917_v35 = vpop.f32.mrf.mxu3 }
 0x228   :  { %11404 = vst [vmem:[#allocation55_spill] sm:$0xff] %v7917_v35  ;;  %v7935_v35 = vpop.f32.mrf.mxu1 }
 0x229   :  { %11413 = vst [vmem:[#allocation64_spill] sm:$0xff] %v7935_v35  ;;  %v7959_v35 = vpop.permute.xlu1 %375 }
 0x22a   :  { %11423 = vst [vmem:[#allocation74_spill] sm:$0xff] %v7959_v35 }
 0x22e   :  { %v1366_v38 = vpop.f32.mrf.mxu0 }
 0x22f   :  { %v7923_v25 = vpop.f32.mrf.mxu3 }
 0x230   :  { %11407 = vst [vmem:[#allocation58_spill] sm:$0xff] %v7923_v25  ;;  %v7943_v25 = vpop.f32.mrf.mxu2 }
 0x231   :  { %11416 = vst [vmem:[#allocation67_spill] sm:$0xff] %v7943_v25 }
 0x236   :  { %v1369_v32 = vpop.f32.mrf.mxu0 }
 0x237   :  { %v7929_v36 = vpop.f32.mrf.mxu3 }
 0x238   :  { %11410 = vst [vmem:[#allocation61_spill] sm:$0xff] %v7929_v36  ;;  %v7949_v36 = vpop.f32.mrf.mxu1  ;;  %v7957_v20 = vpop.f32.mrf.mxu2 }
 0x239   :  { %11418 = vst [vmem:[#allocation69_spill] sm:$0xff] %v7949_v36  ;;  %v7969_v36 = vpop.permute.xlu1 %405 }
 0x23a   :  { %11422 = vst [vmem:[#allocation73_spill] sm:$0xff] %v7957_v20  ;;  %v498_v20 = vadd.f32 %v7526_v59, %v7955_v2  ;;  %v7991_v59 = vpop.permute.xlu0 %395 }
 0x23b   :  { %11428 = vst [vmem:[#allocation79_spill] sm:$0xff] %v7969_v36 }
 0x23c   :  { %v1409_v13 = vadd.f32 %v1363_v44, %v498_v20  ;;  %11433 = vst [vmem:[#allocation84_spill] sm:$0xff] %v7991_v59 }
 0x23e   :  { %v7913_v50 = vpop.f32.mrf.mxu0 }
 0x23f   :  { %v7937_v29 = vpop.f32.mrf.mxu3 }
 0x240   :  { %11414 = vst [vmem:[#allocation65_spill] sm:$0xff] %v7937_v29  ;;  %v7961_v41 = vpop.f32.mrf.mxu1 }
 0x241   :  { %11424 = vst [vmem:[#allocation75_spill] sm:$0xff] %v7961_v41  ;;  %v516_v41 = vadd.f32 %v7588_v1, %v7945_v3  ;;  %v495_v1 = vadd.f32 %v7516_v58, %v7965_v7  ;;  %v7997_v20 = vpop.permute.xlu1 %425  ;;  %v1425_v3 = vmul.f32 0.5, %v1409_v13 }
 0x242   :  { %11434 = vst [vmem:[#allocation85_spill] sm:$0xff] %v7997_v20 }
 0x243   :  { %6293 = vtanh.f32 %v1425_v3  ;;  %v1206_v3 = vld [vmem:[%s11047_s7] sm:$0xff] }
 0x244   :  { %5918 = vmatmul.msk.f32.vlgmr.msra.gmra.mxu3 %vm1294_vm3, %v1206_v3 }
 0x246   :  { %v1375_v11 = vpop.f32.mrf.mxu0 }
 0x247   :  { %v7951_v24 = vpop.f32.mrf.mxu3 }
 0x248   :  { %11419 = vst [vmem:[#allocation70_spill] sm:$0xff] %v7951_v24  ;;  %v7971_v24 = vpop.f32.mrf.mxu2  ;;  %v7975_v22 = vpop.f32.mrf.mxu1 }
 0x249   :  { %11429 = vst [vmem:[#allocation80_spill] sm:$0xff] %v7971_v24  ;;  %v501_v24 = vadd.f32 %v7536_v60, %v7941_v10 }
 0x24a   :  { %11431 = vst [vmem:[#allocation82_spill] sm:$0xff] %v7975_v22  ;;  %v513_v22 = vadd.f32 %v7576_v63, %v7953_v15  ;;  %v8004_v15 = vpop.permute.xlu2 %390 }
 0x24b   :  { %11436 = vst [vmem:[#allocation87_spill] sm:$0xff] %v8004_v15 }
 0x24e   :  { %v1378_v55 = vpop.f32.mrf.mxu0 }
 0x24f   :  { %v7963_v25 = vpop.f32.mrf.mxu3  ;;  %v1414_v60 = vadd.f32 %v1378_v55, %v513_v22 }
 0x250   :  { %11425 = vst [vmem:[#allocation76_spill] sm:$0xff] %v7963_v25  ;;  %v504_v25 = vadd.f32 %v7546_v56, %v7933_v34  ;;  %v1410_v56 = vadd.f32 %v1366_v38, %v501_v24  ;;  %v7999_v44 = vpop.f32.mrf.mxu2 }
 0x251   :  { %11435 = vst [vmem:[#allocation86_spill] sm:$0xff] %v7999_v44  ;;  %v1430_v13 = vmul.f32 0.5, %v1414_v60 }
 0x252   :  { %v1411_v4 = vadd.f32 %v1369_v32, %v504_v25  ;;  %v507_v25 = vadd.f32 %v7556_v61, %v7967_v31  ;;  %v1408_v32 = vadd.f32 %v7905_v47, %v495_v1  ;;  %v1426_v24 = vmul.f32 0.5, %v1410_v56  ;;  %v8018_v47 = vpop.permute.xlu0 %420  ;;  %v8023_v56 = vpop.permute.xlu1 %415 }
 0x253   :  { %v528_v61 = vadd.f32 %v7646_v14, %v7969_v36  ;;  %11438 = vst [vmem:[#allocation89_spill] sm:$0xff] %v8018_v47  ;;  %v522_v14 = vadd.f32 %v7618_v8, %v7991_v59  ;;  %v8027_v60 = vpop.permute.xlu2 %410 }
 0x254   :  { %v1427_v63 = vmul.f32 0.5, %v1411_v4  ;;  %v1412_v58 = vadd.f32 %v7913_v50, %v507_v25  ;;  %v1424_v4 = vmul.f32 0.5, %v1408_v32  ;;  %v6294_v50 = vpop.eup %6293  ;;  %11439 = vst [vmem:[#allocation90_spill] sm:$0xff] %v8023_v56  ;;  %v537_v25 = vadd.f32 %v7692_v26, %v8018_v47 }
 0x255   :  { %11441 = vst [vmem:[#allocation92_spill] sm:$0xff] %v8027_v60 }
 0x256   :  { %v1381_v21 = vpop.f32.mrf.mxu0  ;;  %6295 = vtanh.f32 %v1427_v63 }
 0x257   :  { %v7979_v17 = vpop.f32.mrf.mxu3  ;;  %v1415_v0 = vadd.f32 %v1381_v21, %v516_v41 }
 0x258   :  { %11432 = vst [vmem:[#allocation83_spill] sm:$0xff] %v7979_v17  ;;  %v510_v17 = vadd.f32 %v7566_v62, %v7959_v35  ;;  %v8006_v62 = vpop.f32.mrf.mxu1  ;;  %v8025_v1 = vpop.f32.mrf.mxu2 }
 0x259   :  { %v1431_v41 = vmul.f32 0.5, %v1415_v0  ;;  %v1428_v0 = vmul.f32 0.5, %v1412_v58  ;;  %11440 = vst [vmem:[#allocation91_spill] sm:$0xff] %v8025_v1 }
 0x25a   :  { %v1413_v21 = vadd.f32 %v1375_v11, %v510_v17  ;;  %v525_v11 = vadd.f32 %v7634_v12, %v7973_v27 }
 0x25b   :  { %6297 = vtanh.f32 %v1431_v41 }
 0x25c   :  { %v1429_v55 = vmul.f32 0.5, %v1413_v21  ;;  %6299 = vtanh.f32 %v1426_v24  ;;  %v519_v21 = vadd.f32 %v7604_v5, %v8004_v15  ;;  %v534_v24 = vadd.f32 %v7678_v23, %v8023_v56  ;;  %v1207_v5 = vld [vmem:[%s11047_s7 + $0x8] sm:$0xff] }
 0x25d   :  { %6301 = vtanh.f32 %v1430_v13  ;;  %v531_v13 = vadd.f32 %v7662_v19, %v8027_v60  ;;  %5919 = vmatmul.msk.f32.gmra.mxu3 %vm1294_vm3, %v1207_v5 }
 0x25e   :  { %v7939_v28 = vpop.f32.mrf.mxu0  ;;  %6303 = vtanh.f32 %v1429_v55 }
 0x25f   :  { %v8009_v38 = vpop.f32.mrf.mxu3  ;;  %6305 = vtanh.f32 %v1424_v4 }
 0x260   :  { %11437 = vst [vmem:[#allocation88_spill] sm:$0xff] %v8009_v38  ;;  %6307 = vtanh.f32 %v1428_v0  ;;  %v8038_v55 = vpop.f32.mrf.mxu1 }
 0x261   :  { %11442 = vst [vmem:[#allocation93_spill] sm:$0xff] %v8038_v55 }
 0x266   :  { %v7947_v6 = vpop.f32.mrf.mxu0 }
 0x267   :  { %v1417_v32 = vadd.f32 %v7947_v6, %v522_v14  ;;  %v8040_v26 = vpop.f32.mrf.mxu3 }
 0x268   :  { %11443 = vst [vmem:[#allocation94_spill] sm:$0xff] %v8040_v26 }
 0x26e   :  { %v1390_v29 = vpop.f32.mrf.mxu0 }
 0x26f   :  { %v1418_v12 = vadd.f32 %v1390_v29, %v525_v11 }
 0x276   :  { %v1393_v16 = vpop.f32.mrf.mxu0 }
 0x277   :  { %v1419_v17 = vadd.f32 %v1393_v16, %v528_v61  ;;  %v6296_v16 = vpop.eup %6295  ;;  %v1416_v61 = vadd.f32 %v7939_v28, %v519_v21 }
 0x278   :  { %v6298_v63 = vpop.eup %6297  ;;  %v1475_v4 = vmul.f32 0.5, %v6296_v16 }
 0x279   :  { %6309 = vtanh.f32 %v1419_v17  ;;  %v6300_v41 = vpop.eup %6299  ;;  %v1479_v0 = vmul.f32 0.5, %v6298_v63 }
 0x27a   :  { %v6302_v58 = vpop.eup %6301  ;;  %6311 = vtanh.f32 %v1418_v12  ;;  %v1474_v17 = vmul.f32 0.5, %v6300_v41  ;;  %v1473_v12 = vmul.f32 0.5, %v6294_v50  ;;  %v1491_v16 = vadd.f32 0.5, %v1475_v4  ;;  %v8050_v41 = vpop.f32.mrf.mxu2 }
 0x27b   :  { %v6304_v6 = vpop.eup %6303  ;;  %6313 = vtanh.f32 %v1417_v32  ;;  %v1478_v14 = vmul.f32 0.5, %v6302_v58  ;;  %v1495_v63 = vadd.f32 0.5, %v1479_v0  ;;  %11444 = vst [vmem:[#allocation95_spill] sm:$0xff] %v8050_v41  ;;  %v8290_v41 = vld [vmem:[%s11046_s6 + $0x48] sm:$0xff] }
 0x27c   :  { %v6306_v11 = vpop.eup %6305  ;;  %v1477_v21 = vmul.f32 0.5, %v6304_v6  ;;  %6315 = vtanh.f32 %v1416_v61  ;;  %v1489_v61 = vadd.f32 0.5, %v1473_v12  ;;  %11499 = vst [vmem:[#allocation150_spill] sm:$0xff] %v8290_v41 }
 0x27d   :  { %v6308_v3 = vpop.eup %6307  ;;  %v1472_v32 = vmul.f32 0.5, %v6306_v11  ;;  %v1494_v26 = vadd.f32 0.5, %v1478_v14  ;;  %v1527_v4 = vmul.f32 0.0, %v1495_v63 }
 0x27e   :  { %v7985_v9 = vpop.f32.mrf.mxu0  ;;  %v1493_v38 = vadd.f32 0.5, %v1477_v21 }
 0x27f   :  { %v1420_v19 = vadd.f32 %v7985_v9, %v531_v13  ;;  %v6310_v28 = vpop.eup %6309  ;;  %v1490_v9 = vadd.f32 0.5, %v1474_v17  ;;  %v1476_v13 = vmul.f32 0.5, %v6308_v3  ;;  %v8057_v17 = vpop.f32.mrf.mxu1  ;;  %v1488_v3 = vadd.f32 0.5, %v1472_v32 }
 0x280   :  { %v1531_v5 = vmul.f32 %v6310_v28, %v1491_v16  ;;  %11446 = vst [vmem:[#allocation97_spill] sm:$0xff] %v8057_v17 }
 0x281   :  { %v1436_v58 = vmul.f32 0.5, %v1420_v19  ;;  %v8059_v19 = vpop.f32.mrf.mxu3  ;;  %v1492_v14 = vadd.f32 0.5, %v1476_v13 }
 0x282   :  { %11447 = vst [vmem:[#allocation98_spill] sm:$0xff] %v8059_v19  ;;  %v8061_v12 = vadd.f32 %v1531_v5, %v1527_v4 }
 0x284   :  { %11448 = vst [vmem:[#allocation99_spill] sm:$0xff] %v8061_v12 }
 0x286   :  { %v1399_v22 = vpop.f32.mrf.mxu0 }
 0x287   :  { %v1421_v23 = vadd.f32 %v1399_v22, %v534_v24  ;;  %v6312_v24 = vpop.eup %6311 }
 0x288   :  { %v6314_v6 = vpop.eup %6313  ;;  %v1530_v0 = vmul.f32 %v6312_v24, %v1490_v9  ;;  %v1524_v24 = vmul.f32 0.0, %v1492_v14 }
 0x289   :  { %v1437_v22 = vmul.f32 0.5, %v1421_v23  ;;  %v6316_v11 = vpop.eup %6315  ;;  %v1529_v28 = vmul.f32 %v6314_v6, %v1489_v61  ;;  %v8083_v6 = vpop.f32.mrf.mxu1 }
 0x28a   :  { %v1528_v16 = vmul.f32 %v6316_v11, %v1488_v3  ;;  %11454 = vst [vmem:[#allocation105_spill] sm:$0xff] %v8083_v6  ;;  %v8085_v61 = vpop.f32.mrf.mxu3 }
 0x28b   :  { %11455 = vst [vmem:[#allocation106_spill] sm:$0xff] %v8085_v61 }
 0x28e   :  { %v1402_v8 = vpop.f32.mrf.mxu0 }
 0x28f   :  { %v1422_v29 = vadd.f32 %v1402_v8, %v537_v25  ;;  %v540_v8 = vadd.f32 %v7708_v30, %v7997_v20  ;;  %v8055_v30 = vld [vmem:[%s11047_s7 + $0x10] sm:$0xff] }
 0x290   :  { %11445 = vst [vmem:[#allocation96_spill] sm:$0xff] %v8055_v30  ;;  %5920 = vmatmul.msk.f32.gmra.mxu3 %vm1294_vm3, %v8055_v30  ;;  %v11533_v30 = vld [vmem:[#allocation11_spill] sm:$0xff] }
 0x291   :  { %v1438_v25 = vmul.f32 0.5, %v1422_v29 }
 0x293   :  { %6317 = vtanh.f32 %v1438_v25  ;;  %v1526_v25 = vmul.f32 0.0, %v1494_v26  ;;  %v8070_v26 = vpop.f32.mrf.mxu2 }
 0x294   :  { %6319 = vtanh.f32 %v1437_v22  ;;  %11451 = vst [vmem:[#allocation102_spill] sm:$0xff] %v8070_v26 }
 0x295   :  { %6321 = vtanh.f32 %v1436_v58  ;;  %v8065_v63 = vadd.f32 %v1530_v0, %v1526_v25  ;;  %v8075_v58 = vld [vmem:[%s11047_s7 + $0x18] sm:$0xff] }
 0x296   :  { %v1405_v29 = vpop.f32.mrf.mxu0  ;;  %11452 = vst [vmem:[#allocation103_spill] sm:$0xff] %v8075_v58 }
 0x297   :  { %v1423_v50 = vadd.f32 %v1405_v29, %v540_v8  ;;  %v1525_v8 = vmul.f32 0.0, %v1493_v38  ;;  %11449 = vst [vmem:[#allocation100_spill] sm:$0xff] %v8065_v63  ;;  %v8077_v38 = vadd.f32 %v1528_v16, %v1524_v24 }
 0x298   :  { %5921 = vmatmul.msk.f32.gmra.mxu3 %vm1294_vm3, %v8075_v58 }
 0x299   :  { %v1439_v23 = vmul.f32 0.5, %v1423_v50  ;;  %v6318_v21 = vpop.eup %6317  ;;  %v8067_v9 = vadd.f32 %v1529_v28, %v1525_v8  ;;  %11453 = vst [vmem:[#allocation104_spill] sm:$0xff] %v8077_v38  ;;  %v8091_v8 = vld [vmem:[%s11047_s7 + $0x20] sm:$0xff] }
 0x29a   :  { %v6320_v22 = vpop.eup %6319  ;;  %v1486_v13 = vmul.f32 0.5, %v6318_v21  ;;  %11456 = vst [vmem:[#allocation107_spill] sm:$0xff] %v8091_v8 }
 0x29b   :  { %6323 = vtanh.f32 %v1439_v23  ;;  %11450 = vst [vmem:[#allocation101_spill] sm:$0xff] %v8067_v9  ;;  %v6322_v32 = vpop.eup %6321  ;;  %v1485_v5 = vmul.f32 0.5, %v6320_v22  ;;  %v8093_v22 = vpop.f32.mrf.mxu2 }
 0x29c   :  { %6325 = vtanh.f32 %v8061_v12  ;;  %v1484_v4 = vmul.f32 0.5, %v6322_v32  ;;  %v1502_v0 = vadd.f32 0.5, %v1486_v13  ;;  %11457 = vst [vmem:[#allocation108_spill] sm:$0xff] %v8093_v22 }
 0x29d   :  { %6327 = vtanh.f32 %v8065_v63  ;;  %v1501_v3 = vadd.f32 0.5, %v1485_v5  ;;  %v8102_v5 = vpop.f32.mrf.mxu1 }
 0x29e   :  { %6329 = vtanh.f32 %v8067_v9  ;;  %v1500_v28 = vadd.f32 0.5, %v1484_v4  ;;  %11459 = vst [vmem:[#allocation110_spill] sm:$0xff] %v8102_v5  ;;  %v8113_v4 = vld [vmem:[%s11047_s7 + $0x28] sm:$0xff] }
 0x29f   :  { %6331 = vtanh.f32 %v8077_v38  ;;  %11461 = vst [vmem:[#allocation112_spill] sm:$0xff] %v8113_v4  ;;  %v11534_v9 = vld [vmem:[#allocation14_spill] sm:$0xff] }
 0x2a0   :  { %5922 = vmatmul.msk.f32.gmra.mxu3 %vm1294_vm3, %v8091_v8  ;;  %v563_v63 = vadd.f32 %v11534_v9, %v7955_v2 }
 0x2a1   :  { %v6324_v29 = vpop.eup %6323 }
 0x2a2   :  { %v1487_v50 = vmul.f32 0.5, %v6324_v29  ;;  %v6326_v11 = vpop.eup %6325  ;;  %v8100_v29 = vld [vmem:[%s11046_s6] sm:$0xff] }
 0x2a3   :  { %v6328_v25 = vpop.eup %6327  ;;  %11458 = vst [vmem:[#allocation109_spill] sm:$0xff] %v8100_v29 }
 0x2a4   :  { %v1503_v23 = vadd.f32 0.5, %v1487_v50  ;;  %v1542_v21 = vmul.f32 %v6328_v25, %v1502_v0  ;;  %v6330_v16 = vpop.eup %6329  ;;  %v8104_v50 = vpop.f32.mrf.mxu3 }
 0x2a5   :  { %v1541_v24 = vmul.f32 %v6330_v16, %v1501_v3  ;;  %v6332_v32 = vpop.eup %6331  ;;  %11460 = vst [vmem:[#allocation111_spill] sm:$0xff] %v8104_v50  ;;  %v8117_v0 = vpop.f32.mrf.mxu2  ;;  %v8135_v3 = vld [vmem:[%s11047_s7 + $0x30] sm:$0xff]  ;;  %v8164_v16 = vld [vmem:[%s11046_s6 + $0x18] sm:$0xff]  ;;  %v8186_v50 = vld [vmem:[%s11046_s6 + $0x20] sm:$0xff] }
 0x2a6   :  { %v1543_v14 = vmul.f32 %v6326_v11, %v1503_v23  ;;  %v1540_v13 = vmul.f32 %v6332_v32, %v1500_v28  ;;  %11462 = vst [vmem:[#allocation113_spill] sm:$0xff] %v8117_v0  ;;  %v8122_v23 = vld [vmem:[%s11046_s6 + $0x8] sm:$0xff] }
 0x2a7   :  { %11463 = vst [vmem:[#allocation114_spill] sm:$0xff] %v8122_v23 }
 0x2a8   :  { %1696 = vmatpush.msra.mxu1 %v1543_v14  ;;  %1778 = vmatpush.msra.mxu2 %v1543_v14  ;;  %11466 = vst [vmem:[#allocation117_spill] sm:$0xff] %v8135_v3  ;;  %v8142_v14 = vld [vmem:[%s11046_s6 + $0x10] sm:$0xff] }
 0x2a9   :  { %5923 = vmatmul.msk.f32.gmra.mxu3 %vm1294_vm3, %v8113_v4  ;;  %11467 = vst [vmem:[#allocation118_spill] sm:$0xff] %v8142_v14 }
 0x2aa   :  { %1697 = vmatpush.msra.mxu1 %v1542_v21  ;;  %1779 = vmatpush.msra.mxu2 %v1542_v21  ;;  %11472 = vst [vmem:[#allocation123_spill] sm:$0xff] %v8164_v16 }
 0x2ab   :  { %11477 = vst [vmem:[#allocation128_spill] sm:$0xff] %v8186_v50 }
 0x2ac   :  { %1698 = vmatpush.msra.mxu1 %v1541_v24  ;;  %1780 = vmatpush.msra.mxu2 %v1541_v24  ;;  %v8130_v11 = vpop.f32.mrf.mxu3  ;;  %v8175_v24 = vld [vmem:[%s11047_s7 + $0x40] sm:$0xff] }
 0x2ad   :  { %11465 = vst [vmem:[#allocation116_spill] sm:$0xff] %v8130_v11  ;;  %v8144_v25 = vpop.f32.mrf.mxu2 }
 0x2ae   :  { %1699 = vmatpush.msra.mxu1 %v1540_v13  ;;  %1781 = vmatpush.msra.mxu2 %v1540_v13  ;;  %11468 = vst [vmem:[#allocation119_spill] sm:$0xff] %v8144_v25 }
 0x2af   :  { %5886 = vmatmul.msk.f32.vlgmr.msra.gmra.mxu1 %vm1294_vm3, %v8100_v29  ;;  %5902 = vmatmul.msk.f32.vlgmr.msra.gmra.mxu2 %vm1294_vm3, %v7725_v33  ;;  %v8128_v33 = vpop.f32.mrf.mxu1  ;;  %11474 = vst [vmem:[#allocation125_spill] sm:$0xff] %v8175_v24 }
 0x2b0   :  { %11464 = vst [vmem:[#allocation115_spill] sm:$0xff] %v8128_v33 }
 0x2b1   :  { %5924 = vmatmul.msk.f32.gmra.mxu3 %vm1294_vm3, %v8135_v3 }
 0x2b4   :  { %v8157_v21 = vpop.f32.mrf.mxu3 }
 0x2b5   :  { %11471 = vst [vmem:[#allocation122_spill] sm:$0xff] %v8157_v21 }
 0x2b7   :  { %5887 = vmatmul.msk.f32.gmra.mxu1 %vm1294_vm3, %v8122_v23  ;;  %5903 = vmatmul.msk.f32.gmra.mxu2 %vm1294_vm3, %v7742_v37  ;;  %v8153_v37 = vld [vmem:[%s11047_s7 + $0x38] sm:$0xff]  ;;  %v8155_v28 = vpop.f32.mrf.mxu1  ;;  %v560_v23 = vadd.f32 %v11533_v30, %v7965_v7 }
 0x2b8   :  { %11469 = vst [vmem:[#allocation120_spill] sm:$0xff] %v8153_v37 }
 0x2b9   :  { %11470 = vst [vmem:[#allocation121_spill] sm:$0xff] %v8155_v28  ;;  %5925 = vmatmul.msk.f32.gmra.mxu3 %vm1294_vm3, %v8153_v37  ;;  %v8426_v37 = vpop.permute.xlu2 %1568 }
 0x2ba   :  { %11528 = vst [vmem:[#allocation179_spill] sm:$0xff] %v8426_v37 }
 0x2bc   :  { %v8181_v13 = vpop.f32.mrf.mxu3 }
 0x2bd   :  { %11476 = vst [vmem:[#allocation127_spill] sm:$0xff] %v8181_v13  ;;  %v8204_v13 = vld [vmem:[%s11046_s6 + $0x28] sm:$0xff] }
 0x2be   :  { %11480 = vst [vmem:[#allocation131_spill] sm:$0xff] %v8204_v13 }
 0x2bf   :  { %5888 = vmatmul.msk.f32.gmra.mxu1 %vm1294_vm3, %v8142_v14  ;;  %5904 = vmatmul.msk.f32.gmra.mxu2 %vm1294_vm3, %v7751_v39  ;;  %v8170_v39 = vpop.f32.mrf.mxu2  ;;  %v8179_v32 = vpop.f32.mrf.mxu1 }
 0x2c0   :  { %11473 = vst [vmem:[#allocation124_spill] sm:$0xff] %v8170_v39  ;;  %v8239_v39 = vld [vmem:[%s11047_s7 + $0x58] sm:$0xff] }
 0x2c1   :  { %5926 = vmatmul.msk.f32.gmra.mxu3 %vm1294_vm3, %v8175_v24  ;;  %11475 = vst [vmem:[#allocation126_spill] sm:$0xff] %v8179_v32  ;;  %v8441_v58 = vpop.permute.xlu2 %1583 }
 0x2c2   :  { %11488 = vst [vmem:[#allocation139_spill] sm:$0xff] %v8239_v39 }
 0x2c3   :  { %11532 = vst [vmem:[#allocation183_spill] sm:$0xff] %v8441_v58 }
 0x2c4   :  { %v8208_v61 = vpop.f32.mrf.mxu3 }
 0x2c5   :  { %11482 = vst [vmem:[#allocation133_spill] sm:$0xff] %v8208_v61  ;;  %v8226_v61 = vld [vmem:[%s11046_s6 + $0x30] sm:$0xff] }
 0x2c6   :  { %11485 = vst [vmem:[#allocation136_spill] sm:$0xff] %v8226_v61 }
 0x2c7   :  { %5889 = vmatmul.msk.f32.gmra.mxu1 %vm1294_vm3, %v8164_v16  ;;  %5905 = vmatmul.msk.f32.gmra.mxu2 %vm1294_vm3, %v7763_v42  ;;  %v8195_v42 = vld [vmem:[%s11047_s7 + $0x48] sm:$0xff]  ;;  %v8197_v11 = vpop.f32.mrf.mxu2  ;;  %v8206_v21 = vpop.f32.mrf.mxu1 }
 0x2c8   :  { %11478 = vst [vmem:[#allocation129_spill] sm:$0xff] %v8195_v42 }
 0x2c9   :  { %11479 = vst [vmem:[#allocation130_spill] sm:$0xff] %v8197_v11  ;;  %5927 = vmatmul.msk.f32.gmra.mxu3 %vm1294_vm3, %v8195_v42 }
 0x2ca   :  { %11481 = vst [vmem:[#allocation132_spill] sm:$0xff] %v8206_v21 }
 0x2cc   :  { %v8234_v11 = vpop.f32.mrf.mxu3 }
 0x2cd   :  { %11487 = vst [vmem:[#allocation138_spill] sm:$0xff] %v8234_v11 }
 0x2cf   :  { %5890 = vmatmul.msk.f32.gmra.mxu1 %vm1294_vm3, %v8186_v50  ;;  %5906 = vmatmul.msk.f32.gmra.mxu2 %vm1294_vm3, %v7775_v45  ;;  %v8217_v45 = vld [vmem:[%s11047_s7 + $0x50] sm:$0xff]  ;;  %v8221_v19 = vpop.f32.mrf.mxu2 }
 0x2d0   :  { %11483 = vst [vmem:[#allocation134_spill] sm:$0xff] %v8217_v45 }
 0x2d1   :  { %5928 = vmatmul.msk.f32.gmra.mxu3 %vm1294_vm3, %v8217_v45  ;;  %11484 = vst [vmem:[#allocation135_spill] sm:$0xff] %v8221_v19  ;;  %v8246_v19 = vld [vmem:[%s11046_s6 + $0x38] sm:$0xff] }
 0x2d2   :  { %11489 = vst [vmem:[#allocation140_spill] sm:$0xff] %v8246_v19 }
 0x2d4   :  { %v8261_v0 = vpop.f32.mrf.mxu3 }
 0x2d5   :  { %11493 = vst [vmem:[#allocation144_spill] sm:$0xff] %v8261_v0  ;;  %v8279_v0 = vld [vmem:[%s11047_s7 + $0x68] sm:$0xff] }
 0x2d6   :  { %11496 = vst [vmem:[#allocation147_spill] sm:$0xff] %v8279_v0 }
 0x2d7   :  { %5891 = vmatmul.msk.f32.gmra.mxu1 %vm1294_vm3, %v8204_v13  ;;  %5907 = vmatmul.msk.f32.gmra.mxu2 %vm1294_vm3, %v7787_v48  ;;  %v8232_v48 = vpop.f32.mrf.mxu1  ;;  %v8248_v25 = vpop.f32.mrf.mxu2 }
 0x2d8   :  { %11486 = vst [vmem:[#allocation137_spill] sm:$0xff] %v8232_v48  ;;  %v8343_v48 = vld [vmem:[%s11046_s6 + $0x60] sm:$0xff] }
 0x2d9   :  { %5929 = vmatmul.msk.f32.gmra.mxu3 %vm1294_vm3, %v8239_v39  ;;  %11490 = vst [vmem:[#allocation141_spill] sm:$0xff] %v8248_v25  ;;  %v8268_v25 = vld [vmem:[%s11046_s6 + $0x40] sm:$0xff]  ;;  %v8410_v39 = vpop.permute.xlu0 %1573 }
 0x2da   :  { %11494 = vst [vmem:[#allocation145_spill] sm:$0xff] %v8268_v25 }
 0x2db   :  { %11510 = vst [vmem:[#allocation161_spill] sm:$0xff] %v8343_v48 }
 0x2dc   :  { %v8285_v26 = vpop.f32.mrf.mxu3  ;;  %11522 = vst [vmem:[#allocation173_spill] sm:$0xff] %v8410_v39 }
 0x2dd   :  { %11498 = vst [vmem:[#allocation149_spill] sm:$0xff] %v8285_v26  ;;  %v8308_v26 = vld [vmem:[%s11046_s6 + $0x50] sm:$0xff] }
 0x2de   :  { %11502 = vst [vmem:[#allocation153_spill] sm:$0xff] %v8308_v26 }
 0x2df   :  { %5892 = vmatmul.msk.f32.gmra.mxu1 %vm1294_vm3, %v8226_v61  ;;  %5908 = vmatmul.msk.f32.gmra.mxu2 %vm1294_vm3, %v7799_v51  ;;  %v8257_v51 = vld [vmem:[%s11047_s7 + $0x60] sm:$0xff]  ;;  %v8259_v11 = vpop.f32.mrf.mxu1 }
 0x2e0   :  { %11491 = vst [vmem:[#allocation142_spill] sm:$0xff] %v8257_v51 }
 0x2e1   :  { %11492 = vst [vmem:[#allocation143_spill] sm:$0xff] %v8259_v11  ;;  %5930 = vmatmul.msk.f32.gmra.mxu3 %vm1294_vm3, %v8257_v51  ;;  %v8418_v42 = vpop.permute.xlu0 %1588 }
 0x2e2   :  { %11524 = vst [vmem:[#allocation175_spill] sm:$0xff] %v8418_v42 }
 0x2e4   :  { %v8312_v11 = vpop.f32.mrf.mxu3 }
 0x2e5   :  { %11504 = vst [vmem:[#allocation155_spill] sm:$0xff] %v8312_v11  ;;  %v8330_v11 = vld [vmem:[%s11046_s6 + $0x58] sm:$0xff] }
 0x2e6   :  { %11507 = vst [vmem:[#allocation158_spill] sm:$0xff] %v8330_v11 }
 0x2e7   :  { %5893 = vmatmul.msk.f32.gmra.mxu1 %vm1294_vm3, %v8246_v19  ;;  %5909 = vmatmul.msk.f32.gmra.mxu2 %vm1294_vm3, %v7811_v54  ;;  %v8274_v54 = vpop.f32.mrf.mxu2  ;;  %v8283_v22 = vpop.f32.mrf.mxu1 }
 0x2e8   :  { %11495 = vst [vmem:[#allocation146_spill] sm:$0xff] %v8274_v54  ;;  %v8424_v19 = vpop.permute.xlu1 %1593 }
 0x2e9   :  { %5931 = vmatmul.msk.f32.gmra.mxu3 %vm1294_vm3, %v8279_v0  ;;  %11497 = vst [vmem:[#allocation148_spill] sm:$0xff] %v8283_v22  ;;  %v8432_v13 = vpop.permute.xlu0 %1558 }
 0x2ea   :  { %11527 = vst [vmem:[#allocation178_spill] sm:$0xff] %v8424_v19 }
 0x2eb   :  { %11530 = vst [vmem:[#allocation181_spill] sm:$0xff] %v8432_v13 }
 0x2ef   :  { %5894 = vmatmul.msk.f32.gmra.mxu1 %vm1294_vm3, %v8268_v25  ;;  %5910 = vmatmul.msk.f32.gmra.mxu2 %vm1294_vm3, %v7826_v40  ;;  %v8299_v40 = vld [vmem:[%s11047_s7 + $0x70] sm:$0xff]  ;;  %v8301_v54 = vpop.f32.mrf.mxu2  ;;  %v8310_v22 = vpop.f32.mrf.mxu1 }
 0x2f0   :  { %11500 = vst [vmem:[#allocation151_spill] sm:$0xff] %v8299_v40  ;;  %v8438_v8 = vpop.permute.xlu1 %1563 }
 0x2f1   :  { %11501 = vst [vmem:[#allocation152_spill] sm:$0xff] %v8301_v54  ;;  %5932 = vmatmul.msk.f32.gmra.mxu3 %vm1294_vm3, %v8299_v40 }
 0x2f2   :  { %11503 = vst [vmem:[#allocation154_spill] sm:$0xff] %v8310_v22  ;;  %v8332_v22 = vpop.f32.mrf.mxu3 }
 0x2f3   :  { %11508 = vst [vmem:[#allocation159_spill] sm:$0xff] %v8332_v22 }
 0x2f4   :  { %11531 = vst [vmem:[#allocation182_spill] sm:$0xff] %v8438_v8 }
 0x2f7   :  { %5895 = vmatmul.msk.f32.gmra.mxu1 %vm1294_vm3, %v8290_v41  ;;  %5911 = vmatmul.msk.f32.gmra.mxu2 %vm1294_vm3, %v7838_v49  ;;  %v8321_v49 = vld [vmem:[%s11047_s7 + $0x78] sm:$0xff]  ;;  %v8325_v54 = vpop.f32.mrf.mxu2 }
 0x2f8   :  { %11505 = vst [vmem:[#allocation156_spill] sm:$0xff] %v8321_v49  ;;  %v8458_v9 = vpop.permute.xlu1 %1578 }
 0x2f9   :  { %5933 = vmatmul.msk.f32.gmra.mxu3 %vm1294_vm3, %v8321_v49  ;;  %11506 = vst [vmem:[#allocation157_spill] sm:$0xff] %v8325_v54 }
 0x2fa   :  { %v2044_v21 = vpop.f32.mrf.mxu3  ;;  %11537 = vst [vmem:[#allocation14_spill] sm:$0xff] %v8458_v9 }
 0x2ff   :  { %5896 = vmatmul.msk.f32.gmra.mxu1 %vm1294_vm3, %v8308_v26  ;;  %5912 = vmatmul.msk.f32.gmra.mxu2 %vm1294_vm3, %v7850_v57  ;;  %v8338_v57 = vpop.f32.mrf.mxu1  ;;  %v8345_v54 = vpop.f32.mrf.mxu2 }
 0x300   :  { %11509 = vst [vmem:[#allocation160_spill] sm:$0xff] %v8338_v57 }
 0x301   :  { %11511 = vst [vmem:[#allocation162_spill] sm:$0xff] %v8345_v54 }
 0x302   :  { %v2047_v57 = vpop.f32.mrf.mxu3 }
 0x307   :  { %5897 = vmatmul.msk.f32.gmra.mxu1 %vm1294_vm3, %v8330_v11  ;;  %5913 = vmatmul.msk.f32.gmra.mxu2 %vm1294_vm3, %v7862_v52  ;;  %v8351_v22 = vpop.f32.mrf.mxu1  ;;  %v8356_v52 = vld [vmem:[%s11046_s6 + $0x68] sm:$0xff]  ;;  %v8362_v54 = vpop.f32.mrf.mxu2 }
 0x308   :  { %11512 = vst [vmem:[#allocation163_spill] sm:$0xff] %v8351_v22 }
 0x309   :  { %11513 = vst [vmem:[#allocation164_spill] sm:$0xff] %v8356_v52 }
 0x30a   :  { %11514 = vst [vmem:[#allocation165_spill] sm:$0xff] %v8362_v54  ;;  %v8382_v54 = vld [vmem:[%s11046_s6 + $0x78] sm:$0xff] }
 0x30b   :  { %11519 = vst [vmem:[#allocation170_spill] sm:$0xff] %v8382_v54 }
 0x30f   :  { %5898 = vmatmul.msk.f32.gmra.mxu1 %vm1294_vm3, %v8343_v48  ;;  %5914 = vmatmul.msk.f32.gmra.mxu2 %vm1294_vm3, %v7874_v43  ;;  %v8364_v32 = vpop.f32.mrf.mxu1  ;;  %v8369_v43 = vld [vmem:[%s11046_s6 + $0x70] sm:$0xff]  ;;  %v8375_v22 = vpop.f32.mrf.mxu2 }
 0x310   :  { %11515 = vst [vmem:[#allocation166_spill] sm:$0xff] %v8364_v32 }
 0x311   :  { %11516 = vst [vmem:[#allocation167_spill] sm:$0xff] %v8369_v43 }
 0x312   :  { %11517 = vst [vmem:[#allocation168_spill] sm:$0xff] %v8375_v22 }
 0x313   :  { %v2050_v28 = vpop.f32.mrf.mxu3 }
 0x317   :  { %5899 = vmatmul.msk.f32.gmra.mxu1 %vm1294_vm3, %v8356_v52  ;;  %5915 = vmatmul.msk.f32.gmra.mxu2 %vm1294_vm3, %v7883_v53  ;;  %v8377_v53 = vpop.f32.mrf.mxu1  ;;  %v8388_v32 = vpop.f32.mrf.mxu2 }
 0x318   :  { %11518 = vst [vmem:[#allocation169_spill] sm:$0xff] %v8377_v53 }
 0x319   :  { %11520 = vst [vmem:[#allocation171_spill] sm:$0xff] %v8388_v32 }
 0x31f   :  { %5900 = vmatmul.msk.f32.gmra.mxu1 %vm1294_vm3, %v8369_v43  ;;  %5916 = vmatmul.msk.f32.gmra.mxu2 %vm1294_vm3, %v7892_v18  ;;  %v8390_v18 = vpop.f32.mrf.mxu3 }
 0x327   :  { %5901 = vmatmul.msk.f32.gmra.mxu1 %vm1294_vm3, %v8382_v54  ;;  %5917 = vmatmul.msk.f32.gmra.mxu2 %vm1294_vm3, %v7901_v46  ;;  %v8392_v6 = vpop.f32.mrf.mxu3 }
 0x32c   :  { %v1701_v33 = vpop.f32.mrf.mxu1 }
 0x32d   :  { %v1702_v16 = vadd.f32 %v1701_v33, %v8432_v13 }
 0x32f   :  { %v8394_v55 = vpop.f32.mrf.mxu3  ;;  %v2092_v29 = vadd.f32 %v2044_v21, %v1702_v16 }
 0x332   :  { %v1783_v22 = vpop.f32.mrf.mxu2 }
 0x333   :  { %v1831_v12 = vadd.f32 %v1783_v22, %v560_v23  ;;  %v11538_v23 = vld [vmem:[#allocation20_spill] sm:$0xff] }
 0x334   :  { %v1704_v5 = vpop.f32.mrf.mxu1 }
 0x335   :  { %v1705_v14 = vadd.f32 %v1704_v5, %v8438_v8  ;;  %v1847_v30 = vmul.f32 0.5, %v1831_v12 }
 0x337   :  { %v8396_v54 = vpop.f32.mrf.mxu3 }
 0x33a   :  { %v1786_v53 = vpop.f32.mrf.mxu2 }
 0x33b   :  { %v1832_v13 = vadd.f32 %v1786_v53, %v563_v63 }
 0x33c   :  { %v1707_v17 = vpop.f32.mrf.mxu1 }
 0x33d   :  { %v1708_v38 = vadd.f32 %v1707_v17, %v8426_v37  ;;  %v8456_v17 = vpop.permute.xlu0 %1608  ;;  %v1848_v63 = vmul.f32 0.5, %v1832_v13 }
 0x33e   :  { %11536 = vst [vmem:[#allocation11_spill] sm:$0xff] %v8456_v17 }
 0x33f   :  { %v8402_v40 = vpop.f32.mrf.mxu3  ;;  %v2094_v5 = vadd.f32 %v2050_v28, %v1708_v38 }
 0x341   :  { %v2110_v38 = vmul.f32 0.5, %v2094_v5 }
 0x342   :  { %v1789_v1 = vpop.f32.mrf.mxu2 }
 0x344   :  { %v1710_v44 = vpop.f32.mrf.mxu1 }
 0x345   :  { %v1711_v8 = vadd.f32 %v1710_v44, %v8410_v39 }
 0x347   :  { %v8406_v48 = vpop.f32.mrf.mxu3  ;;  %v2095_v44 = vadd.f32 %v8390_v18, %v1711_v8  ;;  %v11540_v18 = vld [vmem:[#allocation23_spill] sm:$0xff] }
 0x348   :  { %11521 = vst [vmem:[#allocation172_spill] sm:$0xff] %v8406_v48 }
 0x34a   :  { %v1792_v49 = vpop.f32.mrf.mxu2 }
 0x34c   :  { %v1713_v43 = vpop.f32.mrf.mxu1 }
 0x34f   :  { %v8412_v26 = vpop.f32.mrf.mxu3 }
 0x350   :  { %11523 = vst [vmem:[#allocation174_spill] sm:$0xff] %v8412_v26  ;;  %v11535_v26 = vld [vmem:[#allocation17_spill] sm:$0xff] }
 0x351   :  { %v566_v33 = vadd.f32 %v11535_v26, %v7941_v10  ;;  %v1714_v26 = vadd.f32 %v1713_v43, %v8458_v9 }
 0x352   :  { %v8398_v46 = vpop.f32.mrf.mxu2 }
 0x353   :  { %v1833_v21 = vadd.f32 %v1789_v1, %v566_v33  ;;  %v2096_v53 = vadd.f32 %v8392_v6, %v1714_v26  ;;  %v572_v33 = vadd.f32 %v11540_v18, %v7967_v31  ;;  %v11542_v6 = vld [vmem:[#allocation71_spill] sm:$0xff] }
 0x354   :  { %v8400_v32 = vpop.f32.mrf.mxu1 }
 0x355   :  { %v1849_v12 = vmul.f32 0.5, %v1833_v21  ;;  %v1717_v8 = vadd.f32 %v8400_v32, %v8441_v58 }
 0x357   :  { %v8422_v24 = vpop.f32.mrf.mxu3 }
 0x358   :  { %11526 = vst [vmem:[#allocation177_spill] sm:$0xff] %v8422_v24  ;;  %v2108_v24 = vmul.f32 0.5, %v2092_v29 }
 0x35a   :  { %v8404_v52 = vpop.f32.mrf.mxu2  ;;  %6333 = vtanh.f32 %v2108_v24  ;;  %v2111_v24 = vmul.f32 0.5, %v2095_v44  ;;  %v2112_v44 = vmul.f32 0.5, %v2096_v53  ;;  %v11551_v53 = vld [vmem:[#allocation69_spill] sm:$0xff] }
 0x35b   :  { %6335 = vtanh.f32 %v1847_v30  ;;  %v11543_v30 = vld [vmem:[#allocation29_spill] sm:$0xff]  ;;  %v8510_v9 = vadd.f32 %v11551_v53, %v8027_v60 }
 0x35c   :  { %v1719_v0 = vpop.f32.mrf.mxu1  ;;  %v578_v21 = vadd.f32 %v11543_v30, %v11542_v6  ;;  %v2097_v30 = vadd.f32 %v8394_v55, %v1717_v8  ;;  %v11553_v55 = vld [vmem:[#allocation75_spill] sm:$0xff] }
 0x35d   :  { %v1720_v29 = vadd.f32 %v1719_v0, %v8418_v42  ;;  %v8519_v8 = vadd.f32 %v11553_v55, %v8023_v56 }
 0x35f   :  { %v8436_v50 = vpop.f32.mrf.mxu3  ;;  %v2098_v43 = vadd.f32 %v8396_v54, %v1720_v29  ;;  %v11547_v54 = vld [vmem:[#allocation57_spill] sm:$0xff]  ;;  %v8495_v29 = vpop.permute.xlu0 %1598 }
 0x360   :  { %v6334_v0 = vpop.eup %6333  ;;  %11548 = vst [vmem:[#allocation20_spill] sm:$0xff] %v8495_v29 }
 0x361   :  { %v2156_v37 = vmul.f32 0.5, %v6334_v0 }
 0x362   :  { %v8408_v51 = vpop.f32.mrf.mxu2 }
 0x363   :  { %v1837_v56 = vadd.f32 %v8408_v51, %v578_v21 }
 0x364   :  { %v1722_v11 = vpop.f32.mrf.mxu1 }
 0x365   :  { %v1723_v1 = vadd.f32 %v1722_v11, %v8424_v19  ;;  %v2114_v19 = vmul.f32 0.5, %v2098_v43 }
 0x367   :  { %v8454_v16 = vpop.f32.mrf.mxu3  ;;  %v2099_v11 = vadd.f32 %v8402_v40, %v1723_v1  ;;  %v11546_v40 = vld [vmem:[#allocation54_spill] sm:$0xff] }
 0x368   :  { %v8487_v26 = vadd.f32 %v11546_v40, %v8004_v15 }
 0x36a   :  { %v8414_v45 = vpop.f32.mrf.mxu2 }
 0x36c   :  { %v8416_v41 = vpop.f32.mrf.mxu1 }
 0x36f   :  { %v8493_v1 = vpop.f32.mrf.mxu3 }
 0x372   :  { %v8420_v25 = vpop.f32.mrf.mxu2 }
 0x373   :  { %11525 = vst [vmem:[#allocation176_spill] sm:$0xff] %v8420_v25  ;;  %v2093_v25 = vadd.f32 %v2047_v57, %v1705_v14  ;;  %v569_v14 = vadd.f32 %v11538_v23, %v7933_v34  ;;  %v8462_v57 = vpop.permute.xlu2 %1613  ;;  %v6336_v23 = vpop.eup %6335  ;;  %v2113_v34 = vmul.f32 0.5, %v2097_v30 }
 0x374   :  { %v8428_v61 = vpop.f32.mrf.mxu1  ;;  %11539 = vst [vmem:[#allocation17_spill] sm:$0xff] %v8462_v57 }
 0x375   :  { %v2109_v22 = vmul.f32 0.5, %v2093_v25  ;;  %v1834_v25 = vadd.f32 %v1792_v49, %v569_v14  ;;  %v11541_v49 = vld [vmem:[#allocation26_spill] sm:$0xff]  ;;  %v11544_v14 = vld [vmem:[#allocation68_spill] sm:$0xff] }
 0x376   :  { %v575_v5 = vadd.f32 %v11541_v49, %v7959_v35  ;;  %v8501_v49 = vpop.permute.xlu1 %1603 }
 0x377   :  { %6337 = vtanh.f32 %v2109_v22  ;;  %v1850_v22 = vmul.f32 0.5, %v1834_v25  ;;  %v11549_v25 = vld [vmem:[#allocation60_spill] sm:$0xff] }
 0x378   :  { %6339 = vtanh.f32 %v1848_v63  ;;  %v11545_v63 = vld [vmem:[#allocation32_spill] sm:$0xff]  ;;  %v8499_v18 = vadd.f32 %v11549_v25, %v7973_v27 }
 0x379   :  { %6341 = vtanh.f32 %v2110_v38  ;;  %v581_v32 = vadd.f32 %v11545_v63, %v11544_v14  ;;  %v8491_v38 = vadd.f32 %v11547_v54, %v7991_v59  ;;  %v2115_v63 = vmul.f32 0.5, %v2099_v11  ;;  %v11550_v54 = vld [vmem:[#allocation64_spill] sm:$0xff]  ;;  %v11554_v11 = vld [vmem:[#allocation82_spill] sm:$0xff] }
 0x37a   :  { %v8430_v3 = vpop.f32.mrf.mxu2  ;;  %6343 = vtanh.f32 %v1849_v12  ;;  %v8506_v58 = vadd.f32 %v11550_v54, %v7969_v36  ;;  %v8523_v54 = vadd.f32 %v11554_v11, %v8018_v47  ;;  %v1895_v36 = vmul.f32 0.5, %v6336_v23 }
 0x37b   :  { %11529 = vst [vmem:[#allocation180_spill] sm:$0xff] %v8430_v3  ;;  %6345 = vtanh.f32 %v2111_v24  ;;  %v8512_v42 = vpop.permute.xlu2 %1633  ;;  %v1838_v25 = vadd.f32 %v8414_v45, %v581_v32  ;;  %v1835_v45 = vadd.f32 %v8398_v46, %v572_v33  ;;  %v8534_v33 = vadd.f32 0.5, %v2156_v37 }
 0x37c   :  { %v8434_v4 = vpop.f32.mrf.mxu1  ;;  %11552 = vst [vmem:[#allocation23_spill] sm:$0xff] %v8512_v42  ;;  %6347 = vtanh.f32 %v1850_v22  ;;  %v1836_v22 = vadd.f32 %v8404_v52, %v575_v5  ;;  %v8536_v23 = vadd.f32 0.5, %v1895_v36  ;;  %v1853_v37 = vmul.f32 0.5, %v1837_v56  ;;  %v2086_v5 = vpop.f32.mrf.mxu3  ;;  %v11558_v56 = vld [vmem:[#allocation177_spill] sm:$0xff] }
 0x37d   :  { %v6338_v12 = vpop.eup %6337  ;;  %6349 = vtanh.f32 %v2112_v44  ;;  %v1854_v11 = vmul.f32 0.5, %v1838_v25  ;;  %v1851_v44 = vmul.f32 0.5, %v1835_v45 }
 0x37e   :  { %v6340_v40 = vpop.eup %6339  ;;  %v2157_v32 = vmul.f32 0.5, %v6338_v12  ;;  %6351 = vtanh.f32 %v2115_v63  ;;  %v8548_v63 = vpop.permute.xlu0 %1618 }
 0x37f   :  { %v6342_v24 = vpop.eup %6341  ;;  %v1896_v27 = vmul.f32 0.5, %v6340_v40  ;;  %6353 = vtanh.f32 %v2114_v19  ;;  %v1732_v19 = vadd.f32 %v8434_v4, %v8456_v17  ;;  %11555 = vst [vmem:[#allocation26_spill] sm:$0xff] %v8548_v63  ;;  %v8550_v4 = vpop.permute.xlu1 %1628 }
 0x380   :  { %v6344_v60 = vpop.eup %6343  ;;  %v2158_v55 = vmul.f32 0.5, %v6342_v24  ;;  %v8540_v21 = vadd.f32 0.5, %v2157_v32  ;;  %6355 = vtanh.f32 %v2113_v34  ;;  %11556 = vst [vmem:[#allocation29_spill] sm:$0xff] %v8550_v4  ;;  %v1729_v34 = vadd.f32 %v8428_v61, %v8501_v49 }
 0x381   :  { %v6346_v47 = vpop.eup %6345  ;;  %v1897_v0 = vmul.f32 0.5, %v6344_v60  ;;  %v8542_v12 = vadd.f32 0.5, %v1896_v27  ;;  %6357 = vtanh.f32 %v1854_v11  ;;  %v1852_v27 = vmul.f32 0.5, %v1836_v22 }
 0x382   :  { %v8449_v3 = vpop.f32.mrf.mxu2  ;;  %v6348_v51 = vpop.eup %6347  ;;  %v8546_v52 = vadd.f32 0.5, %v2158_v55  ;;  %v2102_v24 = vadd.f32 %v11558_v56, %v1732_v19  ;;  %v11559_v55 = vld [vmem:[#allocation172_spill] sm:$0xff]  ;;  %v11560_v56 = vld [vmem:[#allocation174_spill] sm:$0xff] }
 0x383   :  { %v6350_v60 = vpop.eup %6349  ;;  %v8552_v40 = vadd.f32 0.5, %v1897_v0  ;;  %v8556_v25 = vpop.permute.xlu2 %1623 }
 0x384   :  { %v1734_v48 = vpop.f32.mrf.mxu1  ;;  %v6352_v30 = vpop.eup %6351  ;;  %11557 = vst [vmem:[#allocation32_spill] sm:$0xff] %v8556_v25  ;;  %v2160_v32 = vmul.f32 0.5, %v6350_v60 }
 0x385   :  { %v1735_v53 = vadd.f32 %v1734_v48, %v8462_v57  ;;  %v8530_v48 = vadd.f32 %v8006_v62, %v7997_v20  ;;  %v1726_v62 = vadd.f32 %v8416_v41, %v8495_v29  ;;  %v6354_v41 = vpop.eup %6353  ;;  %v2101_v20 = vadd.f32 %v11560_v56, %v1729_v34 }
 0x386   :  { %v2162_v19 = vmul.f32 0.5, %v6354_v41  ;;  %v11562_v41 = vld [vmem:[#allocation180_spill] sm:$0xff] }
 0x387   :  { %v2103_v46 = vadd.f32 %v8436_v50, %v1735_v53  ;;  %v2159_v50 = vmul.f32 0.5, %v6346_v47  ;;  %v1898_v47 = vmul.f32 0.5, %v6348_v51  ;;  %v2100_v11 = vadd.f32 %v11559_v55, %v1726_v62 }
 0x389   :  { %6359 = vtanh.f32 %v2103_v46  ;;  %v2175_v61 = vadd.f32 0.5, %v2159_v50  ;;  %v2163_v46 = vmul.f32 0.5, %v6352_v30  ;;  %v1914_v60 = vadd.f32 0.5, %v1898_v47 }
 0x38a   :  { %v8468_v28 = vpop.f32.mrf.mxu2  ;;  %6361 = vtanh.f32 %v1851_v44  ;;  %v6356_v44 = vpop.eup %6355  ;;  %v1840_v47 = vadd.f32 %v11562_v41, %v8491_v38 }
 0x38b   :  { %6363 = vtanh.f32 %v1853_v37  ;;  %v1842_v51 = vadd.f32 %v8468_v28, %v8506_v58  ;;  %v8570_v37 = vadd.f32 0.5, %v2160_v32  ;;  %v11561_v58 = vld [vmem:[#allocation176_spill] sm:$0xff]  ;;  %v2161_v34 = vmul.f32 0.5, %v6356_v44 }
 0x38c   :  { %v8471_v13 = vpop.f32.mrf.mxu1  ;;  %6365 = vtanh.f32 %v1852_v27  ;;  %v1839_v28 = vadd.f32 %v11561_v58, %v8487_v26 }
 0x38d   :  { %v1738_v53 = vadd.f32 %v8471_v13, %v8548_v63  ;;  %v6358_v63 = vpop.eup %6357  ;;  %6367 = vtanh.f32 %v2102_v24 }
 0x38e   :  { %6369 = vtanh.f32 %v2100_v11 }
 0x38f   :  { %v2104_v62 = vadd.f32 %v8454_v16, %v1738_v53  ;;  %v6360_v50 = vpop.eup %6359  ;;  %6371 = vtanh.f32 %v1842_v51 }
 0x390   :  { %v6362_v27 = vpop.eup %6361  ;;  %6373 = vtanh.f32 %v2101_v20  ;;  %v2215_v32 = vmul.f32 %v6360_v50, %v2175_v61 }
 0x391   :  { %v6364_v53 = vpop.eup %6363  ;;  %v2120_v26 = vmul.f32 0.5, %v2104_v62  ;;  %v1899_v44 = vmul.f32 0.5, %v6362_v27 }
 0x392   :  { %v8515_v39 = vpop.f32.mrf.mxu2  ;;  %v6366_v11 = vpop.eup %6365  ;;  %v1901_v61 = vmul.f32 0.5, %v6364_v53  ;;  %v11563_v53 = vld [vmem:[#allocation99_spill] sm:$0xff] }
 0x393   :  { %v1843_v20 = vadd.f32 %v8515_v39, %v8510_v9  ;;  %v2177_v39 = vadd.f32 0.5, %v2161_v34 }
 0x394   :  { %v1740_v43 = vpop.f32.mrf.mxu1  ;;  %v1917_v41 = vadd.f32 0.5, %v1901_v61 }
 0x395   :  { %v1741_v0 = vadd.f32 %v1740_v43, %v8556_v25  ;;  %v1841_v43 = vadd.f32 %v8449_v3, %v8499_v18  ;;  %v2178_v3 = vadd.f32 0.5, %v2162_v19 }
 0x397   :  { %v2105_v30 = vadd.f32 %v8493_v1, %v1741_v0  ;;  %6375 = vtanh.f32 %v1841_v43  ;;  %v2089_v1 = vpop.f32.mrf.mxu3  ;;  %v2210_v9 = vmul.f32 0.0, %v2178_v3 }
 0x398   :  { %6377 = vtanh.f32 %v1839_v28 }
 0x399   :  { %v2121_v0 = vmul.f32 0.5, %v2105_v30  ;;  %6379 = vtanh.f32 %v1840_v47  ;;  %v1859_v30 = vmul.f32 0.5, %v1843_v20 }
 0x39a   :  { %v1822_v36 = vpop.f32.mrf.mxu2 }
 0x39c   :  { %v1743_v45 = vpop.f32.mrf.mxu1 }
 0x39d   :  { %v1744_v22 = vadd.f32 %v1743_v45, %v8550_v4  ;;  %v1902_v45 = vmul.f32 0.5, %v6358_v63 }
 0x39f   :  { %v2106_v13 = vadd.f32 %v2086_v5, %v1744_v22  ;;  %v2179_v5 = vadd.f32 0.5, %v2163_v46  ;;  %v1844_v22 = vadd.f32 %v1822_v36, %v8519_v8  ;;  %v6368_v46 = vpop.eup %6367  ;;  %v1918_v43 = vadd.f32 0.5, %v1902_v45 }
 0x3a0   :  { %v6370_v63 = vpop.eup %6369  ;;  %v2214_v36 = vmul.f32 %v6368_v46, %v8546_v52 }
 0x3a1   :  { %v2122_v16 = vmul.f32 0.5, %v2106_v13  ;;  %v2211_v51 = vmul.f32 0.0, %v2179_v5  ;;  %v6372_v56 = vpop.eup %6371  ;;  %v1900_v13 = vmul.f32 0.5, %v6366_v11  ;;  %v1860_v50 = vmul.f32 0.5, %v1844_v22 }
 0x3a2   :  { %v1825_v24 = vpop.f32.mrf.mxu2  ;;  %v6374_v8 = vpop.eup %6373  ;;  %v1954_v47 = vmul.f32 %v6372_v56, %v1914_v60  ;;  %v1950_v45 = vmul.f32 %v1918_v43, %v11563_v53  ;;  %v8589_v34 = vadd.f32 %v2214_v36, %v2210_v9  ;;  %v1915_v60 = vadd.f32 0.5, %v1899_v44  ;;  %v11565_v44 = vld [vmem:[#allocation101_spill] sm:$0xff]  ;;  %v11566_v43 = vld [vmem:[#allocation104_spill] sm:$0xff] }
 0x3a3   :  { %v1845_v18 = vadd.f32 %v1825_v24, %v8523_v54  ;;  %6381 = vtanh.f32 %v2122_v16  ;;  %v8582_v62 = vadd.f32 %v2215_v32, %v2211_v51  ;;  %v6376_v28 = vpop.eup %6375  ;;  %v2213_v52 = vmul.f32 %v6374_v8, %v8540_v21 }
 0x3a4   :  { %v1746_v55 = vpop.f32.mrf.mxu1  ;;  %6383 = vtanh.f32 %v2120_v26  ;;  %v6378_v5 = vpop.eup %6377  ;;  %v1953_v3 = vmul.f32 %v6376_v28, %v8552_v40  ;;  %v2208_v51 = vmul.f32 0.0, %v8570_v37  ;;  %v1947_v8 = vmul.f32 %v1915_v60, %v11566_v43  ;;  %v11575_v43 = vld [vmem:[#allocation118_spill] sm:$0xff] }
 0x3a5   :  { %v1747_v38 = vadd.f32 %v1746_v55, %v8512_v42  ;;  %v1861_v54 = vmul.f32 0.5, %v1845_v18  ;;  %6385 = vtanh.f32 %v2121_v0  ;;  %v6380_v16 = vpop.eup %6379  ;;  %v1916_v18 = vadd.f32 0.5, %v1900_v13  ;;  %v11564_v0 = vld [vmem:[#allocation100_spill] sm:$0xff] }
 0x3a6   :  { %v1949_v22 = vmul.f32 %v1917_v41, %v11564_v0  ;;  %v1952_v21 = vmul.f32 %v6380_v16, %v8542_v12 }
 0x3a7   :  { %v2107_v19 = vadd.f32 %v2089_v1, %v1747_v38  ;;  %6387 = vtanh.f32 %v1861_v54  ;;  %v2209_v1 = vmul.f32 0.0, %v2177_v39  ;;  %v8595_v38 = vadd.f32 %v1954_v47, %v1950_v45 }
 0x3a8   :  { %v1948_v61 = vmul.f32 %v1916_v18, %v11565_v44  ;;  %v11571_v44 = vld [vmem:[#allocation109_spill] sm:$0xff] }
 0x3a9   :  { %v2123_v58 = vmul.f32 0.5, %v2107_v19  ;;  %v6382_v32 = vpop.eup %6381  ;;  %v8598_v40 = vadd.f32 %v2213_v52, %v2209_v1 }
 0x3aa   :  { %v1828_v27 = vpop.f32.mrf.mxu2  ;;  %v6384_v55 = vpop.eup %6383  ;;  %v2170_v20 = vmul.f32 0.5, %v6382_v32  ;;  %v8608_v37 = vadd.f32 %v1952_v21, %v1948_v61  ;;  %v8642_v61 = vld [vmem:[%s11044_s4] sm:$0xff] }
 0x3ab   :  { %6389 = vtanh.f32 %v2123_v58  ;;  %v1846_v24 = vadd.f32 %v1828_v27, %v8530_v48  ;;  %v2212_v48 = vmul.f32 %v6370_v63, %v8534_v33  ;;  %v6386_v11 = vpop.eup %6385  ;;  %v1951_v33 = vmul.f32 %v6378_v5, %v8536_v23 }
 0x3ac   :  { %6391 = vtanh.f32 %v8582_v62  ;;  %v8602_v63 = vadd.f32 %v1953_v3, %v1949_v22  ;;  %v2169_v36 = vmul.f32 0.5, %v6386_v11  ;;  %v2186_v58 = vadd.f32 0.5, %v2170_v20  ;;  %v8633_v20 = vld [vmem:[%s11047_s7] sm:$0xff] }
 0x3ad   :  { %6393 = vtanh.f32 %v1860_v50  ;;  %v1862_v26 = vmul.f32 0.5, %v1846_v24  ;;  %v6388_v46 = vpop.eup %6387  ;;  %v8605_v12 = vadd.f32 %v2212_v48, %v2208_v51  ;;  %v8612_v9 = vadd.f32 %v1951_v33, %v1947_v8  ;;  %v8649_v33 = vld [vmem:[%s11047_s7 + $0x8] sm:$0xff]  ;;  %v8669_v8 = vld [vmem:[%s11044_s4 + $0x10] sm:$0xff] }
 0x3ae   :  { %6395 = vtanh.f32 %v1859_v30  ;;  %v1909_v28 = vmul.f32 0.5, %v6388_v46  ;;  %v2168_v30 = vmul.f32 0.5, %v6384_v55  ;;  %v2185_v24 = vadd.f32 0.5, %v2169_v36  ;;  %11572 = vst [vmem:[#allocation69_spill] sm:$0xff] %v8649_v33  ;;  %v11577_v36 = vld [vmem:[#allocation103_spill] sm:$0xff] }
 0x3af   :  { %6397 = vtanh.f32 %v1862_v26  ;;  %11576 = vst [vmem:[#allocation75_spill] sm:$0xff] %v8669_v8 }
 0x3b0   :  { %6399 = vtanh.f32 %v8589_v34  ;;  %v1925_v18 = vadd.f32 0.5, %v1909_v28  ;;  %v2184_v32 = vadd.f32 0.5, %v2168_v30  ;;  %v11580_v28 = vld [vmem:[#allocation107_spill] sm:$0xff]  ;;  %v11583_v30 = vld [vmem:[#allocation112_spill] sm:$0xff] }
 0x3b1   :  { %v6390_v54 = vpop.eup %6389  ;;  %6401 = vtanh.f32 %v8595_v38 }
 0x3b2   :  { %v6392_v19 = vpop.eup %6391  ;;  %v2171_v56 = vmul.f32 0.5, %v6390_v54  ;;  %6403 = vtanh.f32 %v8598_v40 }
 0x3b3   :  { %v6394_v13 = vpop.eup %6393  ;;  %6405 = vtanh.f32 %v8602_v63 }
 0x3b4   :  { %v6396_v50 = vpop.eup %6395  ;;  %v2187_v23 = vadd.f32 0.5, %v2171_v56  ;;  %v1908_v27 = vmul.f32 0.5, %v6394_v13  ;;  %6407 = vtanh.f32 %v8605_v12  ;;  %v8658_v56 = vld [vmem:[%s11044_s4 + $0x8] sm:$0xff]  ;;  %v11574_v13 = vld [vmem:[#allocation96_spill] sm:$0xff] }
 0x3b5   :  { %v6398_v39 = vpop.eup %6397  ;;  %6409 = vtanh.f32 %v8608_v37  ;;  %v1907_v16 = vmul.f32 0.5, %v6396_v50  ;;  %v11578_v50 = vld [vmem:[#allocation123_spill] sm:$0xff] }
 0x3b6   :  { %v8615_v5 = vmul.f32 %v6392_v19, %v2187_v23  ;;  %v1910_v41 = vmul.f32 0.5, %v6398_v39  ;;  %v6400_v47 = vpop.eup %6399  ;;  %6411 = vtanh.f32 %v8612_v9  ;;  %v1924_v26 = vadd.f32 0.5, %v1908_v27  ;;  %v11573_v19 = vld [vmem:[#allocation114_spill] sm:$0xff]  ;;  %v11581_v23 = vld [vmem:[#allocation128_spill] sm:$0xff]  ;;  %v11584_v27 = vld [vmem:[#allocation131_spill] sm:$0xff] }
 0x3b7   :  { %v8620_v45 = vmul.f32 %v6400_v47, %v2186_v58  ;;  %v6402_v52 = vpop.eup %6401  ;;  %v1923_v11 = vadd.f32 0.5, %v1907_v16  ;;  %v8680_v58 = vld [vmem:[%s11044_s4 + $0x18] sm:$0xff]  ;;  %v8691_v39 = vld [vmem:[%s11044_s4 + $0x20] sm:$0xff]  ;;  %v8713_v16 = vld [vmem:[%s11044_s4 + $0x30] sm:$0xff] }
 0x3b8   :  { %11567 = vst [vmem:[#allocation54_spill] sm:$0xff] %v8615_v5  ;;  %v1926_v53 = vadd.f32 0.5, %v1910_v41  ;;  %2559 = vmatpush.msrb.mxu2 %v8615_v5  ;;  %v6404_v3 = vpop.eup %6403  ;;  %v8702_v41 = vld [vmem:[%s11044_s4 + $0x28] sm:$0xff]  ;;  %v11586_v47 = vld [vmem:[#allocation117_spill] sm:$0xff]  ;;  %v11616_v5 = vld [vmem:[#allocation24_spill] sm:$0xff] }
 0x3b9   :  { %11568 = vst [vmem:[#allocation57_spill] sm:$0xff] %v8620_v45  ;;  %v6406_v60 = vpop.eup %6405  ;;  %v8624_v1 = vmul.f32 %v6404_v3, %v2185_v24  ;;  %v11587_v24 = vld [vmem:[#allocation136_spill] sm:$0xff]  ;;  %v11593_v3 = vld [vmem:[#allocation145_spill] sm:$0xff] }
 0x3ba   :  { %v1966_v55 = vmul.f32 %v6402_v52, %v1926_v53  ;;  %2560 = vmatpush.msrb.mxu2 %v8620_v45  ;;  %v6408_v48 = vpop.eup %6407  ;;  %v1965_v0 = vmul.f32 %v6406_v60, %v1925_v18  ;;  %11579 = vst [vmem:[#allocation82_spill] sm:$0xff] %v8680_v58  ;;  %v11589_v18 = vld [vmem:[#allocation120_spill] sm:$0xff]  ;;  %v11596_v60 = vld [vmem:[#allocation150_spill] sm:$0xff]  ;;  %v637_v45 = vadd.f32 %v11616_v5, %v7967_v31 }
 0x3bb   :  { %11569 = vst [vmem:[#allocation60_spill] sm:$0xff] %v8624_v1  ;;  %v6410_v22 = vpop.eup %6409  ;;  %v8627_v21 = vmul.f32 %v6408_v48, %v2184_v32  ;;  %v11590_v53 = vld [vmem:[#allocation140_spill] sm:$0xff]  ;;  %v11592_v32 = vld [vmem:[#allocation125_spill] sm:$0xff]  ;;  %v8746_v48 = vld [vmem:[%s11044_s4 + $0x48] sm:$0xff] }
 0x3bc   :  { %2264 = vmatpush.msrb.mxu0 %v1966_v55  ;;  %2346 = vmatpush.msrb.mxu1 %v1966_v55  ;;  %v1964_v46 = vmul.f32 %v6410_v22, %v1924_v26  ;;  %v6412_v51 = vpop.eup %6411  ;;  %11582 = vst [vmem:[#allocation177_spill] sm:$0xff] %v8691_v39  ;;  %v8724_v52 = vld [vmem:[%s11044_s4 + $0x38] sm:$0xff]  ;;  %v8735_v26 = vld [vmem:[%s11044_s4 + $0x40] sm:$0xff]  ;;  %v8757_v22 = vld [vmem:[%s11044_s4 + $0x50] sm:$0xff] }
 0x3bd   :  { %2561 = vmatpush.msrb.mxu2 %v8624_v1  ;;  %11570 = vst [vmem:[#allocation64_spill] sm:$0xff] %v8627_v21  ;;  %v1963_v54 = vmul.f32 %v6412_v51, %v1923_v11  ;;  %v11595_v55 = vld [vmem:[#allocation129_spill] sm:$0xff]  ;;  %v11598_v11 = vld [vmem:[#allocation134_spill] sm:$0xff] }
 0x3be   :  { %2265 = vmatpush.msrb.mxu0 %v1965_v0  ;;  %2347 = vmatpush.msrb.mxu1 %v1965_v0  ;;  %11585 = vst [vmem:[#allocation172_spill] sm:$0xff] %v8702_v41  ;;  %v11599_v0 = vld [vmem:[#allocation153_spill] sm:$0xff]  ;;  %v11602_v51 = vld [vmem:[#allocation158_spill] sm:$0xff] }
 0x3bf   :  { %2562 = vmatpush.msrb.mxu2 %v8627_v21  ;;  %11588 = vst [vmem:[#allocation174_spill] sm:$0xff] %v8713_v16 }
 0x3c0   :  { %5966 = vmatmul.msk.f32.vlgmr.msrb.gmra.mxu2 %vm1294_vm3, %v8633_v20  ;;  %2266 = vmatpush.msrb.mxu0 %v1964_v46  ;;  %11591 = vst [vmem:[#allocation176_spill] sm:$0xff] %v8724_v52 }
 0x3c1   :  { %2348 = vmatpush.msrb.mxu1 %v1964_v46  ;;  %11594 = vst [vmem:[#allocation180_spill] sm:$0xff] %v8735_v26  ;;  %v11601_v46 = vld [vmem:[#allocation139_spill] sm:$0xff] }
 0x3c2   :  { %2267 = vmatpush.msrb.mxu0 %v1963_v54  ;;  %11597 = vst [vmem:[#allocation99_spill] sm:$0xff] %v8746_v48 }
 0x3c3   :  { %2349 = vmatpush.msrb.mxu1 %v1963_v54  ;;  %5934 = vmatmul.msk.f32.vlgmr.msrb.gmra.mxu0 %vm1294_vm3, %v11571_v44  ;;  %11600 = vst [vmem:[#allocation100_spill] sm:$0xff] %v8757_v22  ;;  %v8768_v54 = vld [vmem:[%s11044_s4 + $0x58] sm:$0xff]  ;;  %v11604_v44 = vld [vmem:[#allocation142_spill] sm:$0xff] }
 0x3c4   :  { %5950 = vmatmul.msk.f32.vlgmr.msrb.gmra.mxu1 %vm1294_vm3, %v8642_v61  ;;  %11603 = vst [vmem:[#allocation101_spill] sm:$0xff] %v8768_v54 }
 0x3c8   :  { %5967 = vmatmul.msk.f32.gmra.mxu2 %vm1294_vm3, %v8649_v33  ;;  %v11627_v33 = vld [vmem:[#allocation81_spill] sm:$0xff] }
 0x3cb   :  { %5935 = vmatmul.msk.f32.gmra.mxu0 %vm1294_vm3, %v11573_v19  ;;  %v11605_v19 = vld [vmem:[#allocation161_spill] sm:$0xff] }
 0x3cc   :  { %5951 = vmatmul.msk.f32.gmra.mxu1 %vm1294_vm3, %v8658_v56 }
 0x3d0   :  { %5968 = vmatmul.msk.f32.gmra.mxu2 %vm1294_vm3, %v11574_v13  ;;  %v8779_v13 = vld [vmem:[%s11044_s4 + $0x60] sm:$0xff] }
 0x3d1   :  { %11606 = vst [vmem:[#allocation104_spill] sm:$0xff] %v8779_v13 }
 0x3d3   :  { %5936 = vmatmul.msk.f32.gmra.mxu0 %vm1294_vm3, %v11575_v43  ;;  %v11607_v43 = vld [vmem:[#allocation147_spill] sm:$0xff] }
 0x3d4   :  { %5952 = vmatmul.msk.f32.gmra.mxu1 %vm1294_vm3, %v8669_v8 }
 0x3d8   :  { %5969 = vmatmul.msk.f32.gmra.mxu2 %vm1294_vm3, %v11577_v36  ;;  %v11608_v36 = vld [vmem:[#allocation164_spill] sm:$0xff] }
 0x3db   :  { %5937 = vmatmul.msk.f32.gmra.mxu0 %vm1294_vm3, %v11578_v50  ;;  %v8790_v50 = vld [vmem:[%s11044_s4 + $0x68] sm:$0xff] }
 0x3dc   :  { %5953 = vmatmul.msk.f32.gmra.mxu1 %vm1294_vm3, %v8680_v58  ;;  %11609 = vst [vmem:[#allocation109_spill] sm:$0xff] %v8790_v50 }
 0x3e0   :  { %5970 = vmatmul.msk.f32.gmra.mxu2 %vm1294_vm3, %v11580_v28  ;;  %v11610_v28 = vld [vmem:[#allocation151_spill] sm:$0xff] }
 0x3e3   :  { %5938 = vmatmul.msk.f32.gmra.mxu0 %vm1294_vm3, %v11581_v23  ;;  %v11611_v23 = vld [vmem:[#allocation167_spill] sm:$0xff] }
 0x3e4   :  { %5954 = vmatmul.msk.f32.gmra.mxu1 %vm1294_vm3, %v8691_v39 }
 0x3e8   :  { %5971 = vmatmul.msk.f32.gmra.mxu2 %vm1294_vm3, %v11583_v30  ;;  %v8801_v30 = vld [vmem:[%s11044_s4 + $0x70] sm:$0xff] }
 0x3e9   :  { %11612 = vst [vmem:[#allocation114_spill] sm:$0xff] %v8801_v30 }
 0x3eb   :  { %5939 = vmatmul.msk.f32.gmra.mxu0 %vm1294_vm3, %v11584_v27  ;;  %v11613_v27 = vld [vmem:[#allocation156_spill] sm:$0xff] }
 0x3ec   :  { %5955 = vmatmul.msk.f32.gmra.mxu1 %vm1294_vm3, %v8702_v41  ;;  %v11619_v41 = vld [vmem:[#allocation15_spill] sm:$0xff] }
 0x3ed   :  { %v628_v5 = vadd.f32 %v11619_v41, %v7955_v2 }
 0x3f0   :  { %5972 = vmatmul.msk.f32.gmra.mxu2 %vm1294_vm3, %v11586_v47  ;;  %v11614_v47 = vld [vmem:[#allocation170_spill] sm:$0xff] }
 0x3f3   :  { %5940 = vmatmul.msk.f32.gmra.mxu0 %vm1294_vm3, %v11587_v24  ;;  %v8812_v24 = vld [vmem:[%s11044_s4 + $0x78] sm:$0xff] }
 0x3f4   :  { %5956 = vmatmul.msk.f32.gmra.mxu1 %vm1294_vm3, %v8713_v16  ;;  %11615 = vst [vmem:[#allocation96_spill] sm:$0xff] %v8812_v24 }
 0x3f8   :  { %5973 = vmatmul.msk.f32.gmra.mxu2 %vm1294_vm3, %v11589_v18 }
 0x3fb   :  { %5941 = vmatmul.msk.f32.gmra.mxu0 %vm1294_vm3, %v11590_v53 }
 0x3fc   :  { %5957 = vmatmul.msk.f32.gmra.mxu1 %vm1294_vm3, %v8724_v52 }
 0x400   :  { %5974 = vmatmul.msk.f32.gmra.mxu2 %vm1294_vm3, %v11592_v32 }
 0x403   :  { %5942 = vmatmul.msk.f32.gmra.mxu0 %vm1294_vm3, %v11593_v3 }
 0x404   :  { %5958 = vmatmul.msk.f32.gmra.mxu1 %vm1294_vm3, %v8735_v26 }
 0x408   :  { %5975 = vmatmul.msk.f32.gmra.mxu2 %vm1294_vm3, %v11595_v55 }
 0x40b   :  { %5943 = vmatmul.msk.f32.gmra.mxu0 %vm1294_vm3, %v11596_v60 }
 0x40c   :  { %5959 = vmatmul.msk.f32.gmra.mxu1 %vm1294_vm3, %v8746_v48  ;;  %v11618_v48 = vld [vmem:[#allocation27_spill] sm:$0xff] }
 0x40d   :  { %v640_v26 = vadd.f32 %v11618_v48, %v7959_v35  ;;  %v11621_v48 = vld [vmem:[#allocation30_spill] sm:$0xff] }
 0x410   :  { %5976 = vmatmul.msk.f32.gmra.mxu2 %vm1294_vm3, %v11598_v11 }
 0x413   :  { %5944 = vmatmul.msk.f32.gmra.mxu0 %vm1294_vm3, %v11599_v0 }
 0x414   :  { %5960 = vmatmul.msk.f32.gmra.mxu1 %vm1294_vm3, %v8757_v22 }
 0x418   :  { %5977 = vmatmul.msk.f32.gmra.mxu2 %vm1294_vm3, %v11601_v46 }
 0x41b   :  { %5945 = vmatmul.msk.f32.gmra.mxu0 %vm1294_vm3, %v11602_v51 }
 0x41c   :  { %5961 = vmatmul.msk.f32.gmra.mxu1 %vm1294_vm3, %v8768_v54 }
 0x420   :  { %5978 = vmatmul.msk.f32.gmra.mxu2 %vm1294_vm3, %v11604_v44 }
 0x423   :  { %5946 = vmatmul.msk.f32.gmra.mxu0 %vm1294_vm3, %v11605_v19 }
 0x424   :  { %5962 = vmatmul.msk.f32.gmra.mxu1 %vm1294_vm3, %v8779_v13 }
 0x428   :  { %5979 = vmatmul.msk.f32.gmra.mxu2 %vm1294_vm3, %v11607_v43 }
 0x42b   :  { %5947 = vmatmul.msk.f32.gmra.mxu0 %vm1294_vm3, %v11608_v36 }
 0x42c   :  { %5963 = vmatmul.msk.f32.gmra.mxu1 %vm1294_vm3, %v8790_v50 }
 0x430   :  { %5980 = vmatmul.msk.f32.gmra.mxu2 %vm1294_vm3, %v11610_v28 }
 0x433   :  { %5948 = vmatmul.msk.f32.gmra.mxu0 %vm1294_vm3, %v11611_v23 }
 0x434   :  { %5964 = vmatmul.msk.f32.gmra.mxu1 %vm1294_vm3, %v8801_v30 }
 0x438   :  { %5981 = vmatmul.msk.f32.gmra.mxu2 %vm1294_vm3, %v11613_v27 }
 0x43b   :  { %5949 = vmatmul.msk.f32.gmra.mxu0 %vm1294_vm3, %v11614_v47 }
 0x43c   :  { %5965 = vmatmul.msk.f32.gmra.mxu1 %vm1294_vm3, %v8812_v24  ;;  %v11617_v24 = vld [vmem:[#allocation12_spill] sm:$0xff] }
 0x43d   :  { %v625_v30 = vadd.f32 %v11617_v24, %v7965_v7 }
 0x440   :  { %v8816_v18 = vpop.f32.mrf.mxu0 }
 0x441   :  { %v2351_v53 = vpop.f32.mrf.mxu1 }
 0x442   :  { %v2399_v54 = vadd.f32 %v2351_v53, %v625_v30  ;;  %v11620_v30 = vld [vmem:[#allocation18_spill] sm:$0xff] }
 0x443   :  { %v8818_v32 = vpop.f32.mrf.mxu2 }
 0x444   :  { %v2415_v52 = vmul.f32 0.5, %v2399_v54  ;;  %v643_v54 = vadd.f32 %v11621_v48, %v11542_v6 }
 0x448   :  { %v8820_v3 = vpop.f32.mrf.mxu0 }
 0x449   :  { %v2354_v55 = vpop.f32.mrf.mxu1 }
 0x44a   :  { %v2400_v58 = vadd.f32 %v2354_v55, %v628_v5 }
 0x44b   :  { %v8822_v60 = vpop.f32.mrf.mxu2 }
 0x44c   :  { %v2416_v24 = vmul.f32 0.5, %v2400_v58 }
 0x450   :  { %v8824_v11 = vpop.f32.mrf.mxu0 }
 0x451   :  { %v2357_v0 = vpop.f32.mrf.mxu1 }
 0x453   :  { %v8826_v46 = vpop.f32.mrf.mxu2 }
 0x458   :  { %v8828_v51 = vpop.f32.mrf.mxu0 }
 0x459   :  { %v2360_v44 = vpop.f32.mrf.mxu1 }
 0x45b   :  { %v8830_v19 = vpop.f32.mrf.mxu2 }
 0x460   :  { %v8832_v43 = vpop.f32.mrf.mxu0 }
 0x461   :  { %v2363_v36 = vpop.f32.mrf.mxu1 }
 0x462   :  { %v2403_v50 = vadd.f32 %v2363_v36, %v637_v45  ;;  %v11622_v36 = vld [vmem:[#allocation56_spill] sm:$0xff] }
 0x463   :  { %v8834_v28 = vpop.f32.mrf.mxu2  ;;  %v649_v35 = vadd.f32 %v11622_v36, %v8004_v15  ;;  %v11623_v36 = vld [vmem:[#allocation34_spill] sm:$0xff] }
 0x464   :  { %v2419_v22 = vmul.f32 0.5, %v2403_v50  ;;  %v631_v50 = vadd.f32 %v11620_v30, %v7941_v10  ;;  %v646_v15 = vadd.f32 %v11623_v36, %v11544_v14 }
 0x466   :  { %6413 = vtanh.f32 %v2419_v22  ;;  %v2401_v22 = vadd.f32 %v2357_v0, %v631_v50  ;;  %v11624_v0 = vld [vmem:[#allocation59_spill] sm:$0xff] }
 0x467   :  { %6415 = vtanh.f32 %v2415_v52  ;;  %v652_v50 = vadd.f32 %v11624_v0, %v7991_v59 }
 0x468   :  { %v8836_v23 = vpop.f32.mrf.mxu0  ;;  %v2417_v30 = vmul.f32 0.5, %v2401_v22 }
 0x469   :  { %v2366_v27 = vpop.f32.mrf.mxu1 }
 0x46a   :  { %v2404_v39 = vadd.f32 %v2366_v27, %v640_v26 }
 0x46b   :  { %v8838_v47 = vpop.f32.mrf.mxu2 }
 0x46c   :  { %v2420_v45 = vmul.f32 0.5, %v2404_v39  ;;  %v6414_v53 = vpop.eup %6413 }
 0x46d   :  { %v6416_v55 = vpop.eup %6415  ;;  %v2467_v39 = vmul.f32 0.5, %v6414_v53 }
 0x46e   :  { %6417 = vtanh.f32 %v2420_v45  ;;  %v2463_v58 = vmul.f32 0.5, %v6416_v55  ;;  %v11626_v45 = vld [vmem:[#allocation21_spill] sm:$0xff] }
 0x46f   :  { %6419 = vtanh.f32 %v2416_v24  ;;  %v2483_v48 = vadd.f32 0.5, %v2467_v39 }
 0x470   :  { %v8842_v1 = vpop.f32.mrf.mxu0  ;;  %v2479_v53 = vadd.f32 0.5, %v2463_v58 }
 0x471   :  { %v2369_v21 = vpop.f32.mrf.mxu1 }
 0x472   :  { %v2405_v27 = vadd.f32 %v2369_v21, %v643_v54 }
 0x473   :  { %v8846_v13 = vpop.f32.mrf.mxu2 }
 0x474   :  { %v2421_v10 = vmul.f32 0.5, %v2405_v27  ;;  %v6418_v6 = vpop.eup %6417 }
 0x475   :  { %v6420_v21 = vpop.eup %6419  ;;  %v2468_v39 = vmul.f32 0.5, %v6418_v6 }
 0x476   :  { %v2464_v0 = vmul.f32 0.5, %v6420_v21 }
 0x478   :  { %v8850_v16 = vpop.f32.mrf.mxu0 }
 0x479   :  { %v2372_v31 = vpop.f32.mrf.mxu1 }
 0x47a   :  { %v2406_v22 = vadd.f32 %v2372_v31, %v646_v15 }
 0x47b   :  { %v8854_v8 = vpop.f32.mrf.mxu2 }
 0x47c   :  { %v2422_v7 = vmul.f32 0.5, %v2406_v22 }
 0x480   :  { %v8862_v41 = vpop.f32.mrf.mxu0 }
 0x481   :  { %v2375_v26 = vpop.f32.mrf.mxu1 }
 0x482   :  { %v2407_v52 = vadd.f32 %v2375_v26, %v649_v35  ;;  %v11625_v35 = vld [vmem:[#allocation63_spill] sm:$0xff] }
 0x483   :  { %v8864_v5 = vpop.f32.mrf.mxu2  ;;  %v634_v24 = vadd.f32 %v11626_v45, %v11625_v35 }
 0x484   :  { %6421 = vtanh.f32 %v2407_v52  ;;  %v2515_v52 = vmul.f32 %v2483_v48, %v8612_v9 }
 0x485   :  { %6423 = vtanh.f32 %v2417_v30  ;;  %v2402_v27 = vadd.f32 %v2360_v44, %v634_v24  ;;  %v2484_v30 = vadd.f32 0.5, %v2468_v39  ;;  %v2480_v44 = vadd.f32 0.5, %v2464_v0 }
 0x486   :  { %6425 = vtanh.f32 %v2421_v10  ;;  %v11628_v10 = vld [vmem:[#allocation62_spill] sm:$0xff] }
 0x487   :  { %v2418_v58 = vmul.f32 0.5, %v2402_v27  ;;  %v655_v15 = vadd.f32 %v11628_v10, %v11627_v33  ;;  %v11629_v27 = vld [vmem:[#allocation79_spill] sm:$0xff] }
 0x488   :  { %v8870_v2 = vpop.f32.mrf.mxu0 }
 0x489   :  { %v2378_v54 = vpop.f32.mrf.mxu1 }
 0x48a   :  { %v6422_v26 = vpop.eup %6421  ;;  %v2408_v55 = vadd.f32 %v2378_v54, %v652_v50  ;;  %v2516_v50 = vmul.f32 %v2484_v30, %v8608_v37 }
 0x48b   :  { %v2519_v36 = vmul.f32 %v6422_v26, %v2479_v53  ;;  %v8875_v14 = vpop.f32.mrf.mxu2  ;;  %v6424_v45 = vpop.eup %6423 }
 0x48c   :  { %6427 = vtanh.f32 %v2408_v55  ;;  %v6426_v35 = vpop.eup %6425  ;;  %v2465_v54 = vmul.f32 0.5, %v6424_v45  ;;  %v11631_v45 = vld [vmem:[#allocation181_spill] sm:$0xff] }
 0x48d   :  { %v8877_v59 = vadd.f32 %v2519_v36, %v2515_v52  ;;  %6429 = vtanh.f32 %v2422_v7  ;;  %v2469_v21 = vmul.f32 0.5, %v6426_v35  ;;  %v11630_v52 = vld [vmem:[#allocation67_spill] sm:$0xff] }
 0x48e   :  { %6431 = vtanh.f32 %v2418_v58  ;;  %v658_v39 = vadd.f32 %v11630_v52, %v11629_v27  ;;  %v2481_v7 = vadd.f32 0.5, %v2465_v54 }
 0x48f   :  { %v2485_v22 = vadd.f32 0.5, %v2469_v21 }
 0x490   :  { %v8881_v31 = vpop.f32.mrf.mxu0 }
 0x491   :  { %v2381_v9 = vpop.f32.mrf.mxu1  ;;  %v2517_v37 = vmul.f32 %v2485_v22, %v8602_v63 }
 0x492   :  { %v6428_v6 = vpop.eup %6427  ;;  %v2409_v48 = vadd.f32 %v2381_v9, %v655_v15  ;;  %v2270_v9 = vadd.f32 %v8816_v18, %v11631_v45 }
 0x493   :  { %v2520_v24 = vmul.f32 %v6428_v6, %v2480_v44  ;;  %v8884_v53 = vpop.f32.mrf.mxu2  ;;  %v6430_v55 = vpop.eup %6429 }
 0x494   :  { %6433 = vtanh.f32 %v2409_v48  ;;  %v6432_v0 = vpop.eup %6431  ;;  %v2470_v35 = vmul.f32 0.5, %v6430_v55  ;;  %v2612_v55 = vadd.f32 %v8818_v32, %v2270_v9 }
 0x495   :  { %v8886_v26 = vadd.f32 %v2520_v24, %v2516_v50  ;;  %v2466_v6 = vmul.f32 0.5, %v6432_v0  ;;  %v11632_v50 = vld [vmem:[#allocation179_spill] sm:$0xff]  ;;  %v11633_v24 = vld [vmem:[#allocation173_spill] sm:$0xff] }
 0x496   :  { %v2276_v21 = vadd.f32 %v8824_v11, %v11632_v50  ;;  %v2279_v54 = vadd.f32 %v8828_v51, %v11633_v24  ;;  %v2486_v52 = vadd.f32 0.5, %v2470_v35  ;;  %v11636_v11 = vld [vmem:[#allocation175_spill] sm:$0xff]  ;;  %v2628_v9 = vmul.f32 0.5, %v2612_v55 }
 0x498   :  { %v2302_v36 = vpop.f32.mrf.mxu0  ;;  %v2615_v51 = vadd.f32 %v8830_v19, %v2279_v54  ;;  %v2518_v35 = vmul.f32 %v2486_v52, %v8595_v38 }
 0x499   :  { %v2384_v10 = vpop.f32.mrf.mxu1 }
 0x49a   :  { %v6434_v58 = vpop.eup %6433  ;;  %v2410_v15 = vadd.f32 %v2384_v10, %v658_v39  ;;  %v11634_v39 = vld [vmem:[#allocation182_spill] sm:$0xff]  ;;  %v2631_v38 = vmul.f32 0.5, %v2615_v51  ;;  %v11640_v51 = vld [vmem:[#allocation73_spill] sm:$0xff] }
 0x49b   :  { %v2521_v30 = vmul.f32 %v6434_v58, %v2481_v7  ;;  %v2597_v44 = vpop.f32.mrf.mxu2  ;;  %v2273_v63 = vadd.f32 %v8820_v3, %v11634_v39  ;;  %v2482_v7 = vadd.f32 0.5, %v2466_v6  ;;  %v11635_v10 = vld [vmem:[#allocation178_spill] sm:$0xff] }
 0x49c   :  { %6435 = vtanh.f32 %v2410_v15  ;;  %v2291_v18 = vadd.f32 %v8850_v16, %v11635_v10  ;;  %v2614_v15 = vadd.f32 %v8826_v46, %v2276_v21  ;;  %v11637_v6 = vld [vmem:[#allocation14_spill] sm:$0xff]  ;;  %v11638_v21 = vld [vmem:[#allocation183_spill] sm:$0xff] }
 0x49d   :  { %v8893_v48 = vadd.f32 %v2521_v30, %v2517_v37  ;;  %v2288_v37 = vadd.f32 %v8842_v1, %v11636_v11  ;;  %v2613_v32 = vadd.f32 %v8822_v60, %v2273_v63  ;;  %v2282_v16 = vadd.f32 %v8832_v43, %v11637_v6 }
 0x49e   :  { %v2619_v10 = vadd.f32 %v8854_v8, %v2291_v18  ;;  %v2630_v46 = vmul.f32 0.5, %v2614_v15  ;;  %v2285_v1 = vadd.f32 %v8836_v23, %v11638_v21  ;;  %6437 = vtanh.f32 %v2628_v9 }
 0x49f   :  { %v2618_v19 = vadd.f32 %v8846_v13, %v2288_v37  ;;  %v2629_v54 = vmul.f32 0.5, %v2613_v32  ;;  %v2616_v60 = vadd.f32 %v8834_v28, %v2282_v16  ;;  %v2300_v13 = vadd.f32 %v8881_v31, %v8456_v17  ;;  %v11639_v37 = vld [vmem:[#allocation92_spill] sm:$0xff] }
 0x4a0   :  { %v8901_v22 = vpop.f32.mrf.mxu0  ;;  %v2635_v63 = vmul.f32 0.5, %v2619_v10  ;;  %6439 = vtanh.f32 %v2630_v46  ;;  %v2617_v43 = vadd.f32 %v8838_v47, %v2285_v1  ;;  %v11641_v47 = vld [vmem:[#allocation89_spill] sm:$0xff]  ;;  %v2294_v31 = vadd.f32 %v8862_v41, %v8495_v29 }
 0x4a1   :  { %v2387_v0 = vpop.f32.mrf.mxu1  ;;  %v2634_v8 = vmul.f32 0.5, %v2618_v19  ;;  %6441 = vtanh.f32 %v2631_v38  ;;  %v2632_v23 = vmul.f32 0.5, %v2616_v60  ;;  %v2622_v46 = vadd.f32 %v8884_v53, %v2300_v13  ;;  %v11643_v38 = vld [vmem:[#allocation90_spill] sm:$0xff] }
 0x4a2   :  { %v6436_v58 = vpop.eup %6435  ;;  %6443 = vtanh.f32 %v2629_v54  ;;  %v11644_v54 = vld [vmem:[#allocation80_spill] sm:$0xff] }
 0x4a3   :  { %v2522_v3 = vmul.f32 %v6436_v58, %v2482_v7  ;;  %v8911_v30 = vpop.f32.mrf.mxu2  ;;  %v2303_v7 = vadd.f32 %v2302_v36, %v8462_v57  ;;  %6445 = vtanh.f32 %v2635_v63  ;;  %v2633_v58 = vmul.f32 0.5, %v2617_v43 }
 0x4a4   :  { %6447 = vtanh.f32 %v2634_v8  ;;  %v6438_v15 = vpop.eup %6437  ;;  %v2297_v36 = vadd.f32 %v8870_v2, %v8501_v49  ;;  %v664_v60 = vadd.f32 %v11644_v54, %v11643_v38 }
 0x4a5   :  { %v8917_v24 = vadd.f32 %v2522_v3, %v2518_v35  ;;  %v2623_v28 = vadd.f32 %v2597_v44, %v2303_v7  ;;  %v661_v35 = vadd.f32 %v11640_v51, %v11639_v37  ;;  %v11642_v3 = vld [vmem:[#allocation86_spill] sm:$0xff]  ;;  %6449 = vtanh.f32 %v2632_v23 }
 0x4a6   :  { %v6440_v10 = vpop.eup %6439  ;;  %v667_v32 = vadd.f32 %v11642_v3, %v11641_v47  ;;  %6451 = vtanh.f32 %v2633_v58  ;;  %v2621_v53 = vadd.f32 %v8875_v14, %v2297_v36  ;;  %v2620_v3 = vadd.f32 %v8864_v5, %v2294_v31 }
 0x4a7   :  { %v6442_v16 = vpop.eup %6441  ;;  %6453 = vtanh.f32 %v2623_v28  ;;  %v2411_v2 = vadd.f32 %v2387_v0, %v661_v35  ;;  %v2678_v51 = vmul.f32 0.5, %v6440_v10  ;;  %v2676_v0 = vmul.f32 0.5, %v6438_v15 }
 0x4a8   :  { %v2308_v52 = vpop.f32.mrf.mxu0  ;;  %v6444_v19 = vpop.eup %6443  ;;  %v2679_v41 = vmul.f32 0.5, %v6442_v16  ;;  %6455 = vtanh.f32 %v2622_v46 }
 0x4a9   :  { %v2390_v55 = vpop.f32.mrf.mxu1  ;;  %v6446_v43 = vpop.eup %6445  ;;  %v2309_v8 = vadd.f32 %v2308_v52, %v8556_v25  ;;  %v2677_v38 = vmul.f32 0.5, %v6444_v19  ;;  %v2427_v16 = vmul.f32 0.5, %v2411_v2  ;;  %6457 = vtanh.f32 %v2621_v53 }
 0x4aa   :  { %v6448_v23 = vpop.eup %6447  ;;  %v2412_v13 = vadd.f32 %v2390_v55, %v664_v60  ;;  %v2683_v35 = vmul.f32 0.5, %v6446_v43  ;;  %v2694_v55 = vadd.f32 0.5, %v2678_v51  ;;  %v2695_v36 = vadd.f32 0.5, %v2679_v41 }
 0x4ab   :  { %v2603_v18 = vpop.f32.mrf.mxu2  ;;  %v2682_v10 = vmul.f32 0.5, %v6448_v23  ;;  %6459 = vtanh.f32 %v2620_v3 }
 0x4ac   :  { %v2625_v37 = vadd.f32 %v2603_v18, %v2309_v8  ;;  %v2428_v5 = vmul.f32 0.5, %v2412_v13  ;;  %v2699_v43 = vadd.f32 0.5, %v2683_v35 }
 0x4ad   :  { %v2698_v8 = vadd.f32 0.5, %v2682_v10 }
 0x4ae   :  { %v2731_v3 = vmul.f32 %v2699_v43, %v8582_v62 }
 0x4af   :  { %v2730_v10 = vmul.f32 %v2698_v8, %v8589_v34 }
 0x4b0   :  { %v2311_v9 = vpop.f32.mrf.mxu0 }
 0x4b1   :  { %v2312_v44 = vadd.f32 %v2311_v9, %v8550_v4  ;;  %v2393_v1 = vpop.f32.mrf.mxu1  ;;  %v11645_v9 = vld [vmem:[#allocation26_spill] sm:$0xff]  ;;  %v6450_v4 = vpop.eup %6449 }
 0x4b2   :  { %v2413_v63 = vadd.f32 %v2393_v1, %v667_v32  ;;  %v2306_v54 = vadd.f32 %v8901_v22, %v11645_v9  ;;  %v11646_v32 = vld [vmem:[#allocation85_spill] sm:$0xff]  ;;  %v11647_v1 = vld [vmem:[#allocation91_spill] sm:$0xff]  ;;  %v6452_v14 = vpop.eup %6451 }
 0x4b3   :  { %v2606_v7 = vpop.f32.mrf.mxu2  ;;  %v670_v28 = vadd.f32 %v11647_v1, %v11646_v32  ;;  %v6454_v46 = vpop.eup %6453  ;;  %v2681_v18 = vmul.f32 0.5, %v6452_v14  ;;  %v2692_v1 = vadd.f32 0.5, %v2676_v0  ;;  %v11715_v32 = vld [vmem:[#allocation35_spill] sm:$0xff] }
 0x4b4   :  { %v2626_v58 = vadd.f32 %v2606_v7, %v2312_v44  ;;  %v2429_v52 = vmul.f32 0.5, %v2413_v63  ;;  %v2624_v22 = vadd.f32 %v8911_v30, %v2306_v54  ;;  %v2680_v63 = vmul.f32 0.5, %v6450_v4  ;;  %v6456_v2 = vpop.eup %6455 }
 0x4b5   :  { %v2641_v7 = vmul.f32 0.5, %v2625_v37  ;;  %v2735_v51 = vmul.f32 %v6454_v46, %v2695_v36  ;;  %v6458_v30 = vpop.eup %6457  ;;  %v2734_v54 = vmul.f32 %v6456_v2, %v2694_v55  ;;  %v2697_v35 = vadd.f32 0.5, %v2681_v18 }
 0x4b6   :  { %v2642_v44 = vmul.f32 0.5, %v2626_v58  ;;  %6461 = vtanh.f32 %v2429_v52  ;;  %v2640_v13 = vmul.f32 0.5, %v2624_v22  ;;  %v6460_v58 = vpop.eup %6459  ;;  %v2696_v37 = vadd.f32 0.5, %v2680_v63 }
 0x4b7   :  { %6463 = vtanh.f32 %v2427_v16  ;;  %v8950_v16 = vadd.f32 %v2735_v51, %v2731_v3  ;;  %v2732_v62 = vmul.f32 %v6460_v58, %v2692_v1  ;;  %v8952_v55 = vadd.f32 %v2734_v54, %v2730_v10 }
 0x4b8   :  { %v2314_v31 = vpop.f32.mrf.mxu0  ;;  %6465 = vtanh.f32 %v2428_v5  ;;  %v2728_v34 = vmul.f32 %v2696_v37, %v8605_v12 }
 0x4b9   :  { %v2315_v15 = vadd.f32 %v2314_v31, %v8512_v42  ;;  %v2396_v60 = vpop.f32.mrf.mxu1  ;;  %6467 = vtanh.f32 %v2642_v44  ;;  %11648 = vst [vmem:[#allocation118_spill] sm:$0xff] %v8950_v16  ;;  %v11712_v42 = vld [vmem:[#allocation87_spill] sm:$0xff] }
 0x4ba   :  { %v2414_v19 = vadd.f32 %v2396_v60, %v670_v28  ;;  %v2693_v28 = vadd.f32 0.5, %v2677_v38  ;;  %11649 = vst [vmem:[#allocation103_spill] sm:$0xff] %v8952_v55  ;;  %v2729_v38 = vmul.f32 %v2697_v35, %v8598_v40  ;;  %v8962_v43 = vadd.f32 %v2732_v62, %v2728_v34  ;;  %v8994_v34 = vld [vmem:[%s11046_s6 + $0x8] sm:$0xff] }
 0x4bb   :  { %v2609_v23 = vpop.f32.mrf.mxu2  ;;  %11656 = vst [vmem:[#allocation136_spill] sm:$0xff] %v8994_v34 }
 0x4bc   :  { %v2430_v41 = vmul.f32 0.5, %v2414_v19  ;;  %v2627_v53 = vadd.f32 %v2609_v23, %v2315_v15  ;;  %v6462_v52 = vpop.eup %6461  ;;  %v2733_v36 = vmul.f32 %v6458_v30, %v2693_v28 }
 0x4bd   :  { %v6464_v14 = vpop.eup %6463  ;;  %v2477_v31 = vmul.f32 0.5, %v6462_v52 }
 0x4be   :  { %6469 = vtanh.f32 %v2430_v41  ;;  %v2643_v4 = vmul.f32 0.5, %v2627_v53  ;;  %v6466_v5 = vpop.eup %6465  ;;  %v8959_v44 = vadd.f32 %v2733_v36, %v2729_v38  ;;  %v2475_v2 = vmul.f32 0.5, %v6464_v14 }
 0x4bf   :  { %6471 = vtanh.f32 %v2641_v7  ;;  %v6468_v0 = vpop.eup %6467  ;;  %v2476_v15 = vmul.f32 0.5, %v6466_v5  ;;  %v2493_v18 = vadd.f32 0.5, %v2477_v31  ;;  %v8980_v31 = vld [vmem:[%s11046_s6] sm:$0xff] }
 0x4c0   :  { %6473 = vtanh.f32 %v2643_v4  ;;  %11650 = vst [vmem:[#allocation123_spill] sm:$0xff] %v8959_v44  ;;  %v2690_v19 = vmul.f32 0.5, %v6468_v0  ;;  %v2491_v58 = vadd.f32 0.5, %v2475_v2  ;;  %v9046_v2 = vld [vmem:[%s11047_s7 + $0x20] sm:$0xff] }
 0x4c1   :  { %6475 = vtanh.f32 %v2640_v13  ;;  %v2492_v41 = vadd.f32 0.5, %v2476_v15  ;;  %11654 = vst [vmem:[#allocation131_spill] sm:$0xff] %v8980_v31  ;;  %v9014_v15 = vld [vmem:[%s11047_s7 + $0x10] sm:$0xff] }
 0x4c2   :  { %6477 = vtanh.f32 %v8917_v24  ;;  %v2706_v54 = vadd.f32 0.5, %v2690_v19  ;;  %11660 = vst [vmem:[#allocation140_spill] sm:$0xff] %v9014_v15  ;;  %v9037_v19 = vld [vmem:[%s11046_s6 + $0x20] sm:$0xff] }
 0x4c3   :  { %6479 = vtanh.f32 %v8893_v48  ;;  %11664 = vst [vmem:[#allocation129_spill] sm:$0xff] %v9037_v19 }
 0x4c4   :  { %v6470_v46 = vpop.eup %6469  ;;  %6481 = vtanh.f32 %v8950_v16  ;;  %11666 = vst [vmem:[#allocation150_spill] sm:$0xff] %v9046_v2 }
 0x4c5   :  { %v6472_v22 = vpop.eup %6471  ;;  %v2478_v60 = vmul.f32 0.5, %v6470_v46  ;;  %6483 = vtanh.f32 %v8886_v26 }
 0x4c6   :  { %v6474_v63 = vpop.eup %6473  ;;  %6485 = vtanh.f32 %v8952_v55  ;;  %v2689_v23 = vmul.f32 0.5, %v6472_v22  ;;  %v11657_v22 = vld [vmem:[#allocation69_spill] sm:$0xff] }
 0x4c7   :  { %v6476_v40 = vpop.eup %6475  ;;  %v2494_v8 = vadd.f32 0.5, %v2478_v60  ;;  %v2691_v12 = vmul.f32 0.5, %v6474_v63  ;;  %6487 = vtanh.f32 %v8877_v59  ;;  %v11662_v60 = vld [vmem:[#allocation82_spill] sm:$0xff]  ;;  %v9030_v63 = vld [vmem:[%s11047_s7 + $0x18] sm:$0xff] }
 0x4c8   :  { %v6478_v7 = vpop.eup %6477  ;;  %6489 = vtanh.f32 %v8959_v44  ;;  %v2688_v3 = vmul.f32 0.5, %v6476_v40  ;;  %v2705_v52 = vadd.f32 0.5, %v2689_v23  ;;  %11663 = vst [vmem:[#allocation145_spill] sm:$0xff] %v9030_v63  ;;  %v11665_v40 = vld [vmem:[#allocation177_spill] sm:$0xff]  ;;  %v11671_v23 = vld [vmem:[#allocation174_spill] sm:$0xff] }
 0x4c9   :  { %v6480_v51 = vpop.eup %6479  ;;  %v2534_v53 = vmul.f32 %v6478_v7, %v2494_v8  ;;  %v2707_v13 = vadd.f32 0.5, %v2691_v12  ;;  %6491 = vtanh.f32 %v8962_v43  ;;  %v11668_v8 = vld [vmem:[#allocation172_spill] sm:$0xff]  ;;  %v9062_v12 = vld [vmem:[%s11047_s7 + $0x28] sm:$0xff] }
 0x4ca   :  { %v6482_v30 = vpop.eup %6481  ;;  %v2533_v28 = vmul.f32 %v6480_v51, %v2493_v18  ;;  %v2704_v14 = vadd.f32 0.5, %v2688_v3  ;;  %v9053_v18 = vld [vmem:[%s11046_s6 + $0x28] sm:$0xff]  ;;  %11669 = vst [vmem:[#allocation153_spill] sm:$0xff] %v9062_v12  ;;  %v9069_v7 = vld [vmem:[%s11046_s6 + $0x30] sm:$0xff] }
 0x4cb   :  { %v6484_v4 = vpop.eup %6483  ;;  %v8967_v1 = vmul.f32 %v6482_v30, %v2707_v13  ;;  %2784 = vmatpush.msrb.mxu3 %v2534_v53  ;;  %2866 = vmatpush.msra.mxu0 %v2534_v53  ;;  %11667 = vst [vmem:[#allocation134_spill] sm:$0xff] %v9053_v18  ;;  %v9078_v51 = vld [vmem:[%s11047_s7 + $0x30] sm:$0xff]  ;;  %v9094_v13 = vld [vmem:[%s11047_s7 + $0x38] sm:$0xff]  ;;  %v9101_v30 = vld [vmem:[%s11046_s6 + $0x40] sm:$0xff] }
 0x4cc   :  { %v6486_v35 = vpop.eup %6485  ;;  %v2532_v37 = vmul.f32 %v6484_v4, %v2492_v41  ;;  %11670 = vst [vmem:[#allocation139_spill] sm:$0xff] %v9069_v7  ;;  %v9085_v41 = vld [vmem:[%s11046_s6 + $0x38] sm:$0xff]  ;;  %v9117_v4 = vld [vmem:[%s11046_s6 + $0x48] sm:$0xff] }
 0x4cd   :  { %11651 = vst [vmem:[#allocation107_spill] sm:$0xff] %v8967_v1  ;;  %2785 = vmatpush.msrb.mxu3 %v2533_v28  ;;  %2867 = vmatpush.msra.mxu0 %v2533_v28  ;;  %v6488_v10 = vpop.eup %6487  ;;  %v8971_v36 = vmul.f32 %v6486_v35, %v2706_v54  ;;  %v11674_v53 = vld [vmem:[#allocation176_spill] sm:$0xff]  ;;  %v9110_v54 = vld [vmem:[%s11047_s7 + $0x40] sm:$0xff]  ;;  %v9126_v28 = vld [vmem:[%s11047_s7 + $0x48] sm:$0xff] }
 0x4ce   :  { %3079 = vmatpush.msra.mxu1 %v8967_v1  ;;  %v6490_v5 = vpop.eup %6489  ;;  %v2531_v62 = vmul.f32 %v6488_v10, %v2491_v58  ;;  %11672 = vst [vmem:[#allocation158_spill] sm:$0xff] %v9078_v51  ;;  %v11677_v3 = vld [vmem:[#allocation180_spill] sm:$0xff]  ;;  %v11680_v58 = vld [vmem:[#allocation99_spill] sm:$0xff] }
 0x4cf   :  { %11652 = vst [vmem:[#allocation128_spill] sm:$0xff] %v8971_v36  ;;  %2786 = vmatpush.msrb.mxu3 %v2532_v37  ;;  %2868 = vmatpush.msra.mxu0 %v2532_v37  ;;  %v8974_v0 = vmul.f32 %v6490_v5, %v2705_v52  ;;  %v6492_v38 = vpop.eup %6491  ;;  %v9133_v35 = vld [vmem:[%s11046_s6 + $0x50] sm:$0xff]  ;;  %v9149_v10 = vld [vmem:[%s11046_s6 + $0x58] sm:$0xff] }
 0x4d0   :  { %3080 = vmatpush.msra.mxu1 %v8971_v36  ;;  %v8984_v46 = vmul.f32 %v6492_v38, %v2704_v14  ;;  %11673 = vst [vmem:[#allocation142_spill] sm:$0xff] %v9085_v41  ;;  %v11683_v52 = vld [vmem:[#allocation100_spill] sm:$0xff]  ;;  %v11686_v14 = vld [vmem:[#allocation101_spill] sm:$0xff] }
 0x4d1   :  { %11653 = vst [vmem:[#allocation112_spill] sm:$0xff] %v8974_v0  ;;  %2787 = vmatpush.msrb.mxu3 %v2531_v62  ;;  %2869 = vmatpush.msra.mxu0 %v2531_v62  ;;  %v9142_v37 = vld [vmem:[%s11047_s7 + $0x50] sm:$0xff]  ;;  %v9158_v5 = vld [vmem:[%s11047_s7 + $0x58] sm:$0xff]  ;;  %v9165_v62 = vld [vmem:[%s11046_s6 + $0x60] sm:$0xff] }
 0x4d2   :  { %3081 = vmatpush.msra.mxu1 %v8974_v0  ;;  %5982 = vmatmul.msk.f32.vlgmr.msrb.gmra.mxu3 %vm1294_vm3, %v8980_v31  ;;  %11655 = vst [vmem:[#allocation117_spill] sm:$0xff] %v8984_v46  ;;  %v11689_v38 = vld [vmem:[#allocation104_spill] sm:$0xff] }
 0x4d3   :  { %5998 = vmatmul.msk.f32.vlgmr.msra.gmra.mxu0 %vm1294_vm3, %v8642_v61  ;;  %v9005_v61 = vld [vmem:[%s11046_s6 + $0x10] sm:$0xff]  ;;  %11675 = vst [vmem:[#allocation161_spill] sm:$0xff] %v9094_v13 }
 0x4d4   :  { %3082 = vmatpush.msra.mxu1 %v8984_v46  ;;  %11658 = vst [vmem:[#allocation120_spill] sm:$0xff] %v9005_v61  ;;  %v11706_v31 = vld [vmem:[#allocation72_spill] sm:$0xff] }
 0x4d5   :  { %6014 = vmatmul.msk.f32.vlgmr.msra.gmra.mxu1 %vm1294_vm3, %v8633_v20  ;;  %v11659_v20 = vld [vmem:[#allocation75_spill] sm:$0xff]  ;;  %11676 = vst [vmem:[#allocation147_spill] sm:$0xff] %v9101_v30  ;;  %v11707_v1 = vld [vmem:[#allocation16_spill] sm:$0xff] }
 0x4d6   :  { %11678 = vst [vmem:[#allocation164_spill] sm:$0xff] %v9110_v54  ;;  %v693_v36 = vadd.f32 %v11707_v1, %v11706_v31  ;;  %v11713_v1 = vld [vmem:[#allocation51_spill] sm:$0xff] }
 0x4d7   :  { %11679 = vst [vmem:[#allocation151_spill] sm:$0xff] %v9117_v4  ;;  %v714_v31 = vadd.f32 %v11713_v1, %v11712_v42 }
 0x4d8   :  { %11681 = vst [vmem:[#allocation167_spill] sm:$0xff] %v9126_v28 }
 0x4d9   :  { %11682 = vst [vmem:[#allocation156_spill] sm:$0xff] %v9133_v35 }
 0x4da   :  { %5983 = vmatmul.msk.f32.gmra.mxu3 %vm1294_vm3, %v8994_v34  ;;  %11684 = vst [vmem:[#allocation170_spill] sm:$0xff] %v9142_v37 }
 0x4db   :  { %5999 = vmatmul.msk.f32.gmra.mxu0 %vm1294_vm3, %v8658_v56  ;;  %v9021_v56 = vld [vmem:[%s11046_s6 + $0x18] sm:$0xff]  ;;  %11685 = vst [vmem:[#allocation24_spill] sm:$0xff] %v9149_v10 }
 0x4dc   :  { %11661 = vst [vmem:[#allocation125_spill] sm:$0xff] %v9021_v56 }
 0x4dd   :  { %6015 = vmatmul.msk.f32.gmra.mxu1 %vm1294_vm3, %v11657_v22  ;;  %11687 = vst [vmem:[#allocation12_spill] sm:$0xff] %v9158_v5  ;;  %v9174_v22 = vld [vmem:[%s11047_s7 + $0x60] sm:$0xff] }
 0x4de   :  { %11688 = vst [vmem:[#allocation27_spill] sm:$0xff] %v9165_v62 }
 0x4df   :  { %11690 = vst [vmem:[#allocation15_spill] sm:$0xff] %v9174_v22 }
 0x4e2   :  { %5984 = vmatmul.msk.f32.gmra.mxu3 %vm1294_vm3, %v9005_v61 }
 0x4e3   :  { %6000 = vmatmul.msk.f32.gmra.mxu0 %vm1294_vm3, %v11659_v20  ;;  %v9181_v20 = vld [vmem:[%s11046_s6 + $0x68] sm:$0xff] }
 0x4e4   :  { %11691 = vst [vmem:[#allocation18_spill] sm:$0xff] %v9181_v20 }
 0x4e5   :  { %6016 = vmatmul.msk.f32.gmra.mxu1 %vm1294_vm3, %v9014_v15  ;;  %v11704_v15 = vld [vmem:[#allocation74_spill] sm:$0xff] }
 0x4ea   :  { %5985 = vmatmul.msk.f32.gmra.mxu3 %vm1294_vm3, %v9021_v56  ;;  %v11705_v56 = vld [vmem:[#allocation28_spill] sm:$0xff] }
 0x4eb   :  { %6001 = vmatmul.msk.f32.gmra.mxu0 %vm1294_vm3, %v11662_v60  ;;  %v11692_v60 = vld [vmem:[#allocation109_spill] sm:$0xff]  ;;  %v705_v61 = vadd.f32 %v11705_v56, %v11704_v15  ;;  %v11710_v56 = vld [vmem:[#allocation71_spill] sm:$0xff] }
 0x4ed   :  { %6017 = vmatmul.msk.f32.gmra.mxu1 %vm1294_vm3, %v9030_v63 }
 0x4f2   :  { %5986 = vmatmul.msk.f32.gmra.mxu3 %vm1294_vm3, %v9037_v19 }
 0x4f3   :  { %6002 = vmatmul.msk.f32.gmra.mxu0 %vm1294_vm3, %v11665_v40  ;;  %v9190_v40 = vld [vmem:[%s11047_s7 + $0x68] sm:$0xff] }
 0x4f4   :  { %11693 = vst [vmem:[#allocation30_spill] sm:$0xff] %v9190_v40 }
 0x4f5   :  { %6018 = vmatmul.msk.f32.gmra.mxu1 %vm1294_vm3, %v9046_v2 }
 0x4fa   :  { %5987 = vmatmul.msk.f32.gmra.mxu3 %vm1294_vm3, %v9053_v18 }
 0x4fb   :  { %6003 = vmatmul.msk.f32.gmra.mxu0 %vm1294_vm3, %v11668_v8  ;;  %v9197_v8 = vld [vmem:[%s11046_s6 + $0x70] sm:$0xff] }
 0x4fc   :  { %11694 = vst [vmem:[#allocation56_spill] sm:$0xff] %v9197_v8 }
 0x4fd   :  { %6019 = vmatmul.msk.f32.gmra.mxu1 %vm1294_vm3, %v9062_v12 }
 0x502   :  { %5988 = vmatmul.msk.f32.gmra.mxu3 %vm1294_vm3, %v9069_v7 }
 0x503   :  { %6004 = vmatmul.msk.f32.gmra.mxu0 %vm1294_vm3, %v11671_v23  ;;  %v11695_v23 = vld [vmem:[#allocation114_spill] sm:$0xff] }
 0x505   :  { %6020 = vmatmul.msk.f32.gmra.mxu1 %vm1294_vm3, %v9078_v51  ;;  %v11702_v51 = vld [vmem:[#allocation77_spill] sm:$0xff] }
 0x50a   :  { %5989 = vmatmul.msk.f32.gmra.mxu3 %vm1294_vm3, %v9085_v41  ;;  %v11703_v41 = vld [vmem:[#allocation13_spill] sm:$0xff] }
 0x50b   :  { %6005 = vmatmul.msk.f32.gmra.mxu0 %vm1294_vm3, %v11674_v53  ;;  %v9206_v53 = vld [vmem:[%s11047_s7 + $0x70] sm:$0xff]  ;;  %v690_v12 = vadd.f32 %v11703_v41, %v11702_v51 }
 0x50c   :  { %11696 = vst [vmem:[#allocation34_spill] sm:$0xff] %v9206_v53 }
 0x50d   :  { %6021 = vmatmul.msk.f32.gmra.mxu1 %vm1294_vm3, %v9094_v13 }
 0x512   :  { %5990 = vmatmul.msk.f32.gmra.mxu3 %vm1294_vm3, %v9101_v30 }
 0x513   :  { %6006 = vmatmul.msk.f32.gmra.mxu0 %vm1294_vm3, %v11677_v3  ;;  %v9213_v3 = vld [vmem:[%s11046_s6 + $0x78] sm:$0xff] }
 0x514   :  { %11697 = vst [vmem:[#allocation59_spill] sm:$0xff] %v9213_v3 }
 0x515   :  { %6022 = vmatmul.msk.f32.gmra.mxu1 %vm1294_vm3, %v9110_v54  ;;  %v11700_v54 = vld [vmem:[#allocation78_spill] sm:$0xff] }
 0x51a   :  { %5991 = vmatmul.msk.f32.gmra.mxu3 %vm1294_vm3, %v9117_v4  ;;  %v11701_v4 = vld [vmem:[#allocation25_spill] sm:$0xff] }
 0x51b   :  { %6007 = vmatmul.msk.f32.gmra.mxu0 %vm1294_vm3, %v11680_v58  ;;  %v11698_v58 = vld [vmem:[#allocation96_spill] sm:$0xff]  ;;  %v702_v13 = vadd.f32 %v11701_v4, %v11700_v54 }
 0x51d   :  { %6023 = vmatmul.msk.f32.gmra.mxu1 %vm1294_vm3, %v9126_v28 }
 0x522   :  { %5992 = vmatmul.msk.f32.gmra.mxu3 %vm1294_vm3, %v9133_v35 }
 0x523   :  { %6008 = vmatmul.msk.f32.gmra.mxu0 %vm1294_vm3, %v11683_v52  ;;  %v9222_v52 = vld [vmem:[%s11047_s7 + $0x78] sm:$0xff] }
 0x524   :  { %11699 = vst [vmem:[#allocation21_spill] sm:$0xff] %v9222_v52 }
 0x525   :  { %6024 = vmatmul.msk.f32.gmra.mxu1 %vm1294_vm3, %v9142_v37 }
 0x52a   :  { %5993 = vmatmul.msk.f32.gmra.mxu3 %vm1294_vm3, %v9149_v10 }
 0x52b   :  { %6009 = vmatmul.msk.f32.gmra.mxu0 %vm1294_vm3, %v11686_v14 }
 0x52d   :  { %6025 = vmatmul.msk.f32.gmra.mxu1 %vm1294_vm3, %v9158_v5 }
 0x532   :  { %5994 = vmatmul.msk.f32.gmra.mxu3 %vm1294_vm3, %v9165_v62 }
 0x533   :  { %6010 = vmatmul.msk.f32.gmra.mxu0 %vm1294_vm3, %v11689_v38 }
 0x535   :  { %6026 = vmatmul.msk.f32.gmra.mxu1 %vm1294_vm3, %v9174_v22 }
 0x53a   :  { %5995 = vmatmul.msk.f32.gmra.mxu3 %vm1294_vm3, %v9181_v20 }
 0x53b   :  { %6011 = vmatmul.msk.f32.gmra.mxu0 %vm1294_vm3, %v11692_v60 }
 0x53d   :  { %6027 = vmatmul.msk.f32.gmra.mxu1 %vm1294_vm3, %v9190_v40 }
 0x542   :  { %5996 = vmatmul.msk.f32.gmra.mxu3 %vm1294_vm3, %v9197_v8 }
 0x543   :  { %6012 = vmatmul.msk.f32.gmra.mxu0 %vm1294_vm3, %v11695_v23 }
 0x545   :  { %6028 = vmatmul.msk.f32.gmra.mxu1 %vm1294_vm3, %v9206_v53 }
 0x54a   :  { %5997 = vmatmul.msk.f32.gmra.mxu3 %vm1294_vm3, %v9213_v3 }
 0x54b   :  { %6013 = vmatmul.msk.f32.gmra.mxu0 %vm1294_vm3, %v11698_v58 }
 0x54d   :  { %6029 = vmatmul.msk.f32.gmra.mxu1 %vm1294_vm3, %v9222_v52 }
 0x550   :  { %v2871_v14 = vpop.f32.mrf.mxu0 }
 0x551   :  { %v2919_v18 = vadd.f32 %v2871_v14, %v690_v12  ;;  %v11708_v12 = vld [vmem:[#allocation66_spill] sm:$0xff] }
 0x552   :  { %v9226_v38 = vpop.f32.mrf.mxu1 }
 0x553   :  { %v2935_v34 = vmul.f32 0.5, %v2919_v18  ;;  %v11711_v18 = vld [vmem:[#allocation31_spill] sm:$0xff] }
 0x554   :  { %v708_v15 = vadd.f32 %v11711_v18, %v11710_v56  ;;  %v11714_v56 = vld [vmem:[#allocation68_spill] sm:$0xff] }
 0x555   :  { %v9228_v60 = vpop.f32.mrf.mxu3  ;;  %v711_v1 = vadd.f32 %v11715_v32, %v11714_v56 }
 0x558   :  { %v2874_v23 = vpop.f32.mrf.mxu0 }
 0x559   :  { %v2920_v54 = vadd.f32 %v2874_v23, %v693_v36 }
 0x55a   :  { %v9230_v53 = vpop.f32.mrf.mxu1 }
 0x55b   :  { %v2936_v14 = vmul.f32 0.5, %v2920_v54 }
 0x55d   :  { %v9232_v3 = vpop.f32.mrf.mxu3 }
 0x560   :  { %v2877_v40 = vpop.f32.mrf.mxu0 }
 0x562   :  { %v9234_v58 = vpop.f32.mrf.mxu1 }
 0x565   :  { %v9236_v8 = vpop.f32.mrf.mxu3 }
 0x568   :  { %v2880_v22 = vpop.f32.mrf.mxu0 }
 0x56a   :  { %v9238_v20 = vpop.f32.mrf.mxu1 }
 0x56d   :  { %v9240_v5 = vpop.f32.mrf.mxu3 }
 0x570   :  { %v2883_v52 = vpop.f32.mrf.mxu0 }
 0x571   :  { %v2923_v7 = vadd.f32 %v2883_v52, %v702_v13 }
 0x572   :  { %v9242_v62 = vpop.f32.mrf.mxu1 }
 0x573   :  { %v2939_v63 = vmul.f32 0.5, %v2923_v7  ;;  %v11709_v7 = vld [vmem:[#allocation19_spill] sm:$0xff] }
 0x574   :  { %v696_v52 = vadd.f32 %v11709_v7, %v11708_v12 }
 0x575   :  { %v9244_v37 = vpop.f32.mrf.mxu3  ;;  %6493 = vtanh.f32 %v2939_v63 }
 0x576   :  { %6495 = vtanh.f32 %v2935_v34  ;;  %v2921_v63 = vadd.f32 %v2877_v40, %v696_v52  ;;  %v11716_v40 = vld [vmem:[#allocation84_spill] sm:$0xff] }
 0x577   :  { %v11717_v52 = vld [vmem:[#allocation52_spill] sm:$0xff] }
 0x578   :  { %v2886_v10 = vpop.f32.mrf.mxu0  ;;  %v2937_v54 = vmul.f32 0.5, %v2921_v63  ;;  %v717_v42 = vadd.f32 %v11717_v52, %v11716_v40  ;;  %v2790_v52 = vadd.f32 %v9228_v60, %v11631_v45 }
 0x579   :  { %v2924_v4 = vadd.f32 %v2886_v10, %v705_v61 }
 0x57a   :  { %v9246_v28 = vpop.f32.mrf.mxu1 }
 0x57b   :  { %v2940_v41 = vmul.f32 0.5, %v2924_v4  ;;  %v6494_v51 = vpop.eup %6493 }
 0x57c   :  { %v6496_v36 = vpop.eup %6495  ;;  %v2987_v23 = vmul.f32 0.5, %v6494_v51 }
 0x57d   :  { %v9248_v35 = vpop.f32.mrf.mxu3  ;;  %6497 = vtanh.f32 %v2940_v41  ;;  %v2983_v7 = vmul.f32 0.5, %v6496_v36 }
 0x57e   :  { %6499 = vtanh.f32 %v2936_v14  ;;  %v3003_v46 = vadd.f32 0.5, %v2987_v23 }
 0x57f   :  { %v2999_v51 = vadd.f32 0.5, %v2983_v7  ;;  %v2802_v7 = vadd.f32 %v9244_v37, %v11637_v6 }
 0x580   :  { %v2889_v30 = vpop.f32.mrf.mxu0 }
 0x581   :  { %v2925_v10 = vadd.f32 %v2889_v30, %v708_v15  ;;  %v11718_v15 = vld [vmem:[#allocation63_spill] sm:$0xff] }
 0x582   :  { %v9254_v2 = vpop.f32.mrf.mxu1 }
 0x583   :  { %v2941_v12 = vmul.f32 0.5, %v2925_v10  ;;  %v6498_v18 = vpop.eup %6497 }
 0x584   :  { %v6500_v41 = vpop.eup %6499  ;;  %v2988_v23 = vmul.f32 0.5, %v6498_v18 }
 0x585   :  { %v9256_v19 = vpop.f32.mrf.mxu3  ;;  %v2984_v40 = vmul.f32 0.5, %v6500_v41 }
 0x588   :  { %v2892_v16 = vpop.f32.mrf.mxu0 }
 0x589   :  { %v2926_v63 = vadd.f32 %v2892_v16, %v711_v1  ;;  %v3000_v1 = vadd.f32 0.5, %v2984_v40  ;;  %v2793_v40 = vadd.f32 %v9232_v3, %v11634_v39 }
 0x58a   :  { %v9262_v0 = vpop.f32.mrf.mxu1 }
 0x58b   :  { %v3133_v3 = vadd.f32 %v9230_v53, %v2793_v40 }
 0x58d   :  { %v9264_v13 = vpop.f32.mrf.mxu3 }
 0x590   :  { %v2895_v61 = vpop.f32.mrf.mxu0 }
 0x591   :  { %v2927_v34 = vadd.f32 %v2895_v61, %v714_v31  ;;  %v11719_v31 = vld [vmem:[#allocation22_spill] sm:$0xff] }
 0x592   :  { %v9272_v4 = vpop.f32.mrf.mxu1  ;;  %v699_v30 = vadd.f32 %v11719_v31, %v11718_v15 }
 0x593   :  { %6501 = vtanh.f32 %v2927_v34  ;;  %v3035_v34 = vmul.f32 %v3003_v46, %v8877_v59  ;;  %v11721_v46 = vld [vmem:[#allocation53_spill] sm:$0xff] }
 0x594   :  { %6503 = vtanh.f32 %v2937_v54  ;;  %v2922_v10 = vadd.f32 %v2880_v22, %v699_v30  ;;  %v3004_v54 = vadd.f32 0.5, %v2988_v23  ;;  %v720_v18 = vadd.f32 %v11721_v46, %v11627_v33 }
 0x595   :  { %v2813_v55 = vpop.f32.mrf.mxu3  ;;  %6505 = vtanh.f32 %v2941_v12  ;;  %v2942_v12 = vmul.f32 0.5, %v2926_v63  ;;  %v3132_v30 = vadd.f32 %v9226_v38, %v2790_v52 }
 0x596   :  { %v2938_v22 = vmul.f32 0.5, %v2922_v10  ;;  %v3036_v37 = vmul.f32 %v3004_v54, %v8886_v26  ;;  %v11723_v26 = vld [vmem:[#allocation55_spill] sm:$0xff] }
 0x598   :  { %v2898_v14 = vpop.f32.mrf.mxu0 }
 0x599   :  { %v6502_v61 = vpop.eup %6501  ;;  %v2928_v36 = vadd.f32 %v2898_v14, %v717_v42 }
 0x59a   :  { %v3039_v44 = vmul.f32 %v6502_v61, %v2999_v51  ;;  %v9281_v32 = vpop.f32.mrf.mxu1  ;;  %v6504_v42 = vpop.eup %6503 }
 0x59b   :  { %6507 = vtanh.f32 %v2928_v36  ;;  %v6506_v59 = vpop.eup %6505  ;;  %v3148_v36 = vmul.f32 0.5, %v3132_v30  ;;  %v2985_v10 = vmul.f32 0.5, %v6504_v42 }
 0x59c   :  { %v9285_v31 = vadd.f32 %v3039_v44, %v3035_v34  ;;  %v3136_v44 = vadd.f32 %v9242_v62, %v2802_v7  ;;  %6509 = vtanh.f32 %v2942_v12  ;;  %v2989_v14 = vmul.f32 0.5, %v6506_v59 }
 0x59d   :  { %v2816_v16 = vpop.f32.mrf.mxu3  ;;  %6511 = vtanh.f32 %v2938_v22  ;;  %v2805_v62 = vadd.f32 %v9248_v35, %v11638_v21  ;;  %v723_v12 = vadd.f32 %v11723_v26, %v11629_v27  ;;  %v2814_v22 = vadd.f32 %v2813_v55, %v8495_v29  ;;  %v11725_v26 = vld [vmem:[#allocation173_spill] sm:$0xff] }
 0x59e   :  { %11720 = vst [vmem:[#allocation62_spill] sm:$0xff] %v9285_v31  ;;  %v3152_v34 = vmul.f32 0.5, %v3136_v44  ;;  %v3005_v52 = vadd.f32 0.5, %v2989_v14  ;;  %v3001_v59 = vadd.f32 0.5, %v2985_v10  ;;  %v3149_v55 = vmul.f32 0.5, %v3133_v3 }
 0x59f   :  { %v3140_v44 = vadd.f32 %v9272_v4, %v2814_v22  ;;  %v2817_v10 = vadd.f32 %v2816_v16, %v8501_v49 }
 0x5a0   :  { %v2901_v51 = vpop.f32.mrf.mxu0  ;;  %v3037_v35 = vmul.f32 %v3005_v52, %v8893_v48 }
 0x5a1   :  { %v6508_v60 = vpop.eup %6507  ;;  %v2929_v41 = vadd.f32 %v2901_v51, %v720_v18  ;;  %v3137_v18 = vadd.f32 %v9246_v28, %v2805_v62  ;;  %v2808_v28 = vadd.f32 %v9256_v19, %v11636_v11  ;;  %v2799_v19 = vadd.f32 %v9240_v5, %v11725_v26 }
 0x5a2   :  { %v3040_v61 = vmul.f32 %v6508_v60, %v3000_v1  ;;  %v9294_v63 = vpop.f32.mrf.mxu1  ;;  %v6510_v7 = vpop.eup %6509  ;;  %v3141_v16 = vadd.f32 %v9281_v32, %v2817_v10 }
 0x5a3   :  { %6513 = vtanh.f32 %v2929_v41  ;;  %v6512_v54 = vpop.eup %6511  ;;  %v2990_v30 = vmul.f32 0.5, %v6510_v7  ;;  %v2796_v41 = vadd.f32 %v9236_v8, %v11632_v50  ;;  %v3153_v14 = vmul.f32 0.5, %v3137_v18  ;;  %v11727_v18 = vld [vmem:[#allocation178_spill] sm:$0xff] }
 0x5a4   :  { %v9298_v38 = vadd.f32 %v3040_v61, %v3036_v37  ;;  %6515 = vtanh.f32 %v3148_v36  ;;  %v2986_v53 = vmul.f32 0.5, %v6512_v54  ;;  %v3138_v7 = vadd.f32 %v9254_v2, %v2808_v28 }
 0x5a5   :  { %v2819_v23 = vpop.f32.mrf.mxu3  ;;  %6517 = vtanh.f32 %v3152_v34  ;;  %v3006_v36 = vadd.f32 0.5, %v2990_v30  ;;  %v3134_v34 = vadd.f32 %v9234_v58, %v2796_v41  ;;  %v3135_v5 = vadd.f32 %v9238_v20, %v2799_v19 }
 0x5a6   :  { %11722 = vst [vmem:[#allocation67_spill] sm:$0xff] %v9298_v38  ;;  %v3002_v4 = vadd.f32 0.5, %v2986_v53  ;;  %v2820_v32 = vadd.f32 %v2819_v23, %v8456_v17 }
 0x5a7   :  { %v3038_v22 = vmul.f32 %v3006_v36, %v8917_v24  ;;  %v3150_v3 = vmul.f32 0.5, %v3134_v34  ;;  %v3151_v28 = vmul.f32 0.5, %v3135_v5 }
 0x5a8   :  { %v2904_v42 = vpop.f32.mrf.mxu0  ;;  %v3142_v10 = vadd.f32 %v9294_v63, %v2820_v32  ;;  %v11729_v63 = vld [vmem:[#allocation92_spill] sm:$0xff] }
 0x5a9   :  { %v6514_v46 = vpop.eup %6513  ;;  %v2930_v1 = vadd.f32 %v2904_v42, %v723_v12 }
 0x5aa   :  { %v3041_v51 = vmul.f32 %v6514_v46, %v3001_v59  ;;  %v9308_v60 = vpop.f32.mrf.mxu1  ;;  %v6516_v48 = vpop.eup %6515  ;;  %v3154_v46 = vmul.f32 0.5, %v3138_v7 }
 0x5ab   :  { %6519 = vtanh.f32 %v2930_v1  ;;  %v6518_v40 = vpop.eup %6517  ;;  %v3196_v52 = vmul.f32 0.5, %v6516_v48  ;;  %v2811_v1 = vadd.f32 %v9264_v13, %v11727_v18 }
 0x5ac   :  { %v9313_v37 = vadd.f32 %v3041_v51, %v3037_v35  ;;  %6521 = vtanh.f32 %v3140_v44  ;;  %v3200_v12 = vmul.f32 0.5, %v6518_v40 }
 0x5ad   :  { %v2822_v61 = vpop.f32.mrf.mxu3  ;;  %6523 = vtanh.f32 %v3149_v55  ;;  %v3212_v30 = vadd.f32 0.5, %v3196_v52  ;;  %v3139_v13 = vadd.f32 %v9262_v0, %v2811_v1  ;;  %v11731_v1 = vld [vmem:[#allocation90_spill] sm:$0xff] }
 0x5ae   :  { %11724 = vst [vmem:[#allocation175_spill] sm:$0xff] %v9313_v37  ;;  %6525 = vtanh.f32 %v3153_v14  ;;  %v3216_v51 = vadd.f32 0.5, %v3200_v12 }
 0x5af   :  { %6527 = vtanh.f32 %v3141_v16  ;;  %v3155_v34 = vmul.f32 0.5, %v3139_v13 }
 0x5b0   :  { %v9319_v62 = vpop.f32.mrf.mxu0  ;;  %6529 = vtanh.f32 %v3150_v3  ;;  %v3248_v48 = vmul.f32 %v3216_v51, %v8962_v43  ;;  %v11728_v43 = vld [vmem:[#allocation65_spill] sm:$0xff] }
 0x5b1   :  { %v6520_v8 = vpop.eup %6519  ;;  %6531 = vtanh.f32 %v3154_v46 }
 0x5b2   :  { %v3042_v54 = vmul.f32 %v6520_v8, %v3002_v4  ;;  %v3120_v59 = vpop.f32.mrf.mxu1  ;;  %v6522_v58 = vpop.eup %6521 }
 0x5b3   :  { %v6524_v2 = vpop.eup %6523  ;;  %v3252_v55 = vmul.f32 %v6522_v58, %v3212_v30 }
 0x5b4   :  { %v9326_v42 = vadd.f32 %v3042_v54, %v3038_v22  ;;  %v6526_v44 = vpop.eup %6525  ;;  %v3197_v14 = vmul.f32 0.5, %v6524_v2  ;;  %v732_v22 = vadd.f32 %v11728_v43, %v11641_v47  ;;  %v2823_v54 = vadd.f32 %v2822_v61, %v8462_v57  ;;  %v11738_v43 = vld [vmem:[#allocation117_spill] sm:$0xff] }
 0x5b5   :  { %v2825_v35 = vpop.f32.mrf.mxu3  ;;  %v3201_v36 = vmul.f32 0.5, %v6526_v44  ;;  %v9336_v4 = vadd.f32 %v3252_v55, %v3248_v48  ;;  %v6528_v23 = vpop.eup %6527 }
 0x5b6   :  { %11726 = vst [vmem:[#allocation73_spill] sm:$0xff] %v9326_v42  ;;  %v2826_v24 = vadd.f32 %v2825_v35, %v11645_v9  ;;  %v6530_v52 = vpop.eup %6529  ;;  %v3213_v7 = vadd.f32 0.5, %v3197_v14  ;;  %v11732_v35 = vld [vmem:[#allocation61_spill] sm:$0xff] }
 0x5b7   :  { %v3217_v19 = vadd.f32 0.5, %v3201_v36  ;;  %v6532_v12 = vpop.eup %6531  ;;  %v729_v2 = vadd.f32 %v11732_v35, %v11731_v1  ;;  %v3198_v30 = vmul.f32 0.5, %v6530_v52 }
 0x5b8   :  { %v2910_v41 = vpop.f32.mrf.mxu0  ;;  %v3144_v53 = vadd.f32 %v3120_v59, %v2826_v24  ;;  %v11730_v59 = vld [vmem:[#allocation58_spill] sm:$0xff]  ;;  %v3253_v3 = vmul.f32 %v6528_v23, %v3213_v7  ;;  %v11733_v24 = vld [vmem:[#allocation123_spill] sm:$0xff]  ;;  %v3202_v32 = vmul.f32 0.5, %v6532_v12  ;;  %v11737_v12 = vld [vmem:[#allocation29_spill] sm:$0xff] }
 0x5b9   :  { %v726_v16 = vadd.f32 %v11730_v59, %v11729_v63  ;;  %v3249_v44 = vmul.f32 %v3217_v19, %v11733_v24  ;;  %v2932_v14 = vadd.f32 %v2910_v41, %v729_v2  ;;  %v3214_v19 = vadd.f32 0.5, %v3198_v30 }
 0x5ba   :  { %v3160_v20 = vmul.f32 0.5, %v3144_v53  ;;  %v3123_v40 = vpop.f32.mrf.mxu1  ;;  %v3143_v53 = vadd.f32 %v9308_v60, %v2823_v54 }
 0x5bb   :  { %v2931_v61 = vadd.f32 %v9319_v62, %v726_v16  ;;  %v9350_v36 = vadd.f32 %v3253_v3, %v3249_v44  ;;  %v3218_v62 = vadd.f32 0.5, %v3202_v32  ;;  %v2948_v59 = vmul.f32 0.5, %v2932_v14 }
 0x5bc   :  { %6533 = vtanh.f32 %v3160_v20 }
 0x5bd   :  { %v2828_v8 = vpop.f32.mrf.mxu3  ;;  %6535 = vtanh.f32 %v3151_v28  ;;  %11734 = vst [vmem:[#allocation86_spill] sm:$0xff] %v9350_v36 }
 0x5be   :  { %v2829_v0 = vadd.f32 %v2828_v8, %v8556_v25  ;;  %6537 = vtanh.f32 %v3142_v10  ;;  %v11736_v10 = vld [vmem:[#allocation70_spill] sm:$0xff] }
 0x5bf   :  { %6539 = vtanh.f32 %v9336_v4 }
 0x5c0   :  { %v2913_v58 = vpop.f32.mrf.mxu0  ;;  %v3145_v46 = vadd.f32 %v3123_v40, %v2829_v0  ;;  %6541 = vtanh.f32 %v3155_v34  ;;  %v11735_v40 = vld [vmem:[#allocation85_spill] sm:$0xff]  ;;  %v2947_v0 = vmul.f32 0.5, %v2931_v61 }
 0x5c1   :  { %v2933_v5 = vadd.f32 %v2913_v58, %v732_v22  ;;  %v735_v23 = vadd.f32 %v11736_v10, %v11735_v40  ;;  %v11739_v22 = vld [vmem:[#allocation64_spill] sm:$0xff] }
 0x5c2   :  { %v6534_v51 = vpop.eup %6533  ;;  %v3161_v55 = vmul.f32 0.5, %v3145_v46  ;;  %v3126_v28 = vpop.f32.mrf.mxu1  ;;  %v2760_v54 = vmax.f32 %v11739_v22, %v11738_v43 }
 0x5c3   :  { %v3208_v13 = vmul.f32 0.5, %v6534_v51  ;;  %v6536_v48 = vpop.eup %6535  ;;  %v2949_v8 = vmul.f32 0.5, %v2933_v5  ;;  %v11741_v51 = vld [vmem:[#allocation103_spill] sm:$0xff] }
 0x5c4   :  { %6543 = vtanh.f32 %v3161_v55  ;;  %v6538_v20 = vpop.eup %6537  ;;  %v3199_v35 = vmul.f32 0.5, %v6536_v48  ;;  %v3250_v24 = vmul.f32 %v3218_v62, %v11741_v51 }
 0x5c5   :  { %v3224_v34 = vadd.f32 0.5, %v3208_v13  ;;  %v2831_v52 = vpop.f32.mrf.mxu3  ;;  %v6540_v7 = vpop.eup %6539  ;;  %6545 = vtanh.f32 %v3143_v53  ;;  %v3254_v3 = vmul.f32 %v6538_v20, %v3214_v19  ;;  %v11745_v19 = vld [vmem:[#allocation60_spill] sm:$0xff] }
 0x5c6   :  { %v2832_v60 = vadd.f32 %v2831_v52, %v11737_v12  ;;  %v6542_v41 = vpop.eup %6541  ;;  %6547 = vtanh.f32 %v9350_v36  ;;  %v3215_v10 = vadd.f32 0.5, %v3199_v35 }
 0x5c7   :  { %v9357_v16 = vmul.f32 %v6540_v7, %v3224_v34  ;;  %6549 = vtanh.f32 %v2949_v8  ;;  %v3203_v44 = vmul.f32 0.5, %v6542_v41  ;;  %v9364_v53 = vadd.f32 %v3254_v3, %v3250_v24  ;;  %v11743_v34 = vld [vmem:[#allocation23_spill] sm:$0xff]  ;;  %v11744_v7 = vld [vmem:[#allocation112_spill] sm:$0xff]  ;;  %v11747_v3 = vld [vmem:[#allocation118_spill] sm:$0xff] }
 0x5c8   :  { %v2916_v58 = vpop.f32.mrf.mxu0  ;;  %v3146_v46 = vadd.f32 %v3126_v28, %v2832_v60  ;;  %6551 = vtanh.f32 %v2947_v0  ;;  %v2761_v62 = vmax.f32 %v11745_v19, %v11744_v7 }
 0x5c9   :  { %v2934_v2 = vadd.f32 %v2916_v58, %v735_v23  ;;  %v9361_v30 = vmax.f32 %v2760_v54, %v9357_v16  ;;  %6553 = vtanh.f32 %v2948_v59  ;;  %11742 = vst [vmem:[#allocation91_spill] sm:$0xff] %v9364_v53  ;;  %v3219_v23 = vadd.f32 0.5, %v3203_v44 }
 0x5ca   :  { %v6544_v5 = vpop.eup %6543  ;;  %v3162_v32 = vmul.f32 0.5, %v3146_v46  ;;  %v3129_v48 = vpop.f32.mrf.mxu1 }
 0x5cb   :  { %11740 = vst [vmem:[#allocation80_spill] sm:$0xff] %v9361_v30  ;;  %v3209_v61 = vmul.f32 0.5, %v6544_v5  ;;  %v2950_v55 = vmul.f32 0.5, %v2934_v2  ;;  %v6546_v14 = vpop.eup %6545  ;;  %v3251_v58 = vmul.f32 %v3219_v23, %v11747_v3  ;;  %v11807_v30 = vld [vmem:[#allocation72_spill] sm:$0xff] }
 0x5cc   :  { %6555 = vtanh.f32 %v3162_v32  ;;  %v6548_v20 = vpop.eup %6547  ;;  %v3255_v41 = vmul.f32 %v6546_v14, %v3215_v10 }
 0x5cd   :  { %v3225_v13 = vadd.f32 0.5, %v3209_v61  ;;  %6557 = vtanh.f32 %v2950_v55  ;;  %v2834_v28 = vpop.f32.mrf.mxu3  ;;  %v6550_v52 = vpop.eup %6549 }
 0x5ce   :  { %v2835_v8 = vadd.f32 %v2834_v28, %v11743_v34  ;;  %v6552_v60 = vpop.eup %6551  ;;  %6559 = vtanh.f32 %v9364_v53  ;;  %v2997_v46 = vmul.f32 0.5, %v6550_v52  ;;  %v9375_v51 = vadd.f32 %v3255_v41, %v3251_v58  ;;  %v11808_v53 = vld [vmem:[#allocation36_spill] sm:$0xff] }
 0x5cf   :  { %v3265_v0 = vmul.f32 %v6548_v20, %v3225_v13  ;;  %v6554_v22 = vpop.eup %6553  ;;  %6561 = vtanh.f32 %v9326_v42  ;;  %v2995_v55 = vmul.f32 0.5, %v6552_v60  ;;  %v11750_v20 = vld [vmem:[#allocation57_spill] sm:$0xff]  ;;  %v758_v12 = vadd.f32 %v11808_v53, %v11807_v30 }
 0x5d0   :  { %v3147_v43 = vadd.f32 %v3129_v48, %v2835_v8  ;;  %6563 = vtanh.f32 %v9313_v37  ;;  %11748 = vst [vmem:[#allocation75_spill] sm:$0xff] %v9375_v51  ;;  %v2996_v24 = vmul.f32 0.5, %v6554_v22  ;;  %v3013_v14 = vadd.f32 0.5, %v2997_v46  ;;  %v11749_v48 = vld [vmem:[#allocation128_spill] sm:$0xff]  ;;  %v11805_v37 = vld [vmem:[#allocation77_spill] sm:$0xff] }
 0x5d1   :  { %v9371_v54 = vmax.f32 %v2761_v62, %v3265_v0  ;;  %v2762_v10 = vmax.f32 %v11750_v20, %v11749_v48  ;;  %v3011_v41 = vadd.f32 0.5, %v2995_v55  ;;  %v9393_v55 = vld [vmem:[%s11044_s4] sm:$0xff]  ;;  %v9426_v48 = vld [vmem:[%s11047_s7 + $0x8] sm:$0xff] }
 0x5d2   :  { %v6556_v59 = vpop.eup %6555  ;;  %v3163_v35 = vmul.f32 0.5, %v3147_v43  ;;  %v3012_v8 = vadd.f32 0.5, %v2996_v24  ;;  %11756 = vst [vmem:[#allocation172_spill] sm:$0xff] %v9393_v55  ;;  %v11763_v20 = vld [vmem:[#allocation125_spill] sm:$0xff] }
 0x5d3   :  { %11746 = vst [vmem:[#allocation69_spill] sm:$0xff] %v9371_v54  ;;  %v6558_v2 = vpop.eup %6557  ;;  %v3210_v5 = vmul.f32 0.5, %v6556_v59  ;;  %v11806_v42 = vld [vmem:[#allocation33_spill] sm:$0xff] }
 0x5d4   :  { %v2998_v44 = vmul.f32 0.5, %v6558_v2  ;;  %6565 = vtanh.f32 %v3163_v35  ;;  %v6560_v61 = vpop.eup %6559  ;;  %v11752_v2 = vld [vmem:[#allocation107_spill] sm:$0xff]  ;;  %11762 = vst [vmem:[#allocation99_spill] sm:$0xff] %v9426_v48  ;;  %v755_v34 = vadd.f32 %v11806_v42, %v11805_v37  ;;  %v11810_v53 = vld [vmem:[#allocation37_spill] sm:$0xff] }
 0x5d5   :  { %v3226_v32 = vadd.f32 0.5, %v3210_v5  ;;  %6567 = vtanh.f32 %v9298_v38  ;;  %v6562_v28 = vpop.eup %6561  ;;  %v11753_v5 = vld [vmem:[#allocation54_spill] sm:$0xff] }
 0x5d6   :  { %v3014_v13 = vadd.f32 0.5, %v2998_v44  ;;  %6569 = vtanh.f32 %v9285_v31  ;;  %v6564_v7 = vpop.eup %6563  ;;  %v2763_v24 = vmax.f32 %v11753_v5, %v11752_v2  ;;  %v9490_v2 = vld [vmem:[%s11044_s4 + $0x40] sm:$0xff] }
 0x5d7   :  { %v3266_v23 = vmul.f32 %v6560_v61, %v3226_v32  ;;  %6571 = vtanh.f32 %v9375_v51  ;;  %v3053_v60 = vmul.f32 %v6564_v7, %v3013_v14  ;;  %v11755_v61 = vld [vmem:[#allocation131_spill] sm:$0xff]  ;;  %v11757_v14 = vld [vmem:[#allocation136_spill] sm:$0xff]  ;;  %v11768_v7 = vld [vmem:[#allocation145_spill] sm:$0xff]  ;;  %11779 = vst [vmem:[#allocation96_spill] sm:$0xff] %v9490_v2 }
 0x5d8   :  { %v3054_v52 = vmul.f32 %v6562_v28, %v3014_v13  ;;  %v9403_v13 = vld [vmem:[%s11044_s4 + $0x8] sm:$0xff]  ;;  %v9410_v28 = vld [vmem:[%s11047_s7] sm:$0xff] }
 0x5d9   :  { %v9382_v19 = vmax.f32 %v2762_v10, %v3266_v23  ;;  %11758 = vst [vmem:[#allocation174_spill] sm:$0xff] %v9403_v13  ;;  %v9435_v10 = vld [vmem:[%s11044_s4 + $0x18] sm:$0xff] }
 0x5da   :  { %v6566_v62 = vpop.eup %6565  ;;  %3304 = vmatpush.msra.mxu2 %v3054_v52  ;;  %3386 = vmatpush.msra.mxu3 %v3054_v52  ;;  %11759 = vst [vmem:[#allocation176_spill] sm:$0xff] %v9410_v28  ;;  %v9446_v52 = vld [vmem:[%s11044_s4 + $0x20] sm:$0xff] }
 0x5db   :  { %11751 = vst [vmem:[#allocation82_spill] sm:$0xff] %v9382_v19  ;;  %v6568_v43 = vpop.eup %6567  ;;  %v3211_v22 = vmul.f32 0.5, %v6566_v62  ;;  %v11769_v62 = vld [vmem:[#allocation134_spill] sm:$0xff]  ;;  %v11780_v5 = vld [vmem:[#allocation161_spill] sm:$0xff] }
 0x5dc   :  { %3305 = vmatpush.msra.mxu2 %v3053_v60  ;;  %3387 = vmatpush.msra.mxu3 %v3053_v60  ;;  %v3052_v59 = vmul.f32 %v6568_v43, %v3012_v8  ;;  %v6570_v3 = vpop.eup %6569  ;;  %11764 = vst [vmem:[#allocation100_spill] sm:$0xff] %v9435_v10  ;;  %v11766_v8 = vld [vmem:[#allocation129_spill] sm:$0xff]  ;;  %v11771_v60 = vld [vmem:[#allocation150_spill] sm:$0xff]  ;;  %v11772_v43 = vld [vmem:[#allocation139_spill] sm:$0xff] }
 0x5dd   :  { %v3227_v58 = vadd.f32 0.5, %v3211_v22  ;;  %v6572_v46 = vpop.eup %6571  ;;  %v3051_v35 = vmul.f32 %v6570_v3, %v3011_v41  ;;  %11767 = vst [vmem:[#allocation101_spill] sm:$0xff] %v9446_v52  ;;  %v9457_v41 = vld [vmem:[%s11044_s4 + $0x28] sm:$0xff]  ;;  %v9468_v22 = vld [vmem:[%s11044_s4 + $0x30] sm:$0xff] }
 0x5de   :  { %3306 = vmatpush.msra.mxu2 %v3052_v59  ;;  %3388 = vmatpush.msra.mxu3 %v3052_v59  ;;  %11770 = vst [vmem:[#allocation104_spill] sm:$0xff] %v9457_v41  ;;  %v11774_v59 = vld [vmem:[#allocation153_spill] sm:$0xff]  ;;  %v11775_v3 = vld [vmem:[#allocation142_spill] sm:$0xff] }
 0x5df   :  { %v3267_v44 = vmul.f32 %v6572_v46, %v3227_v58  ;;  %11773 = vst [vmem:[#allocation109_spill] sm:$0xff] %v9468_v22  ;;  %v9479_v58 = vld [vmem:[%s11044_s4 + $0x38] sm:$0xff]  ;;  %v11777_v46 = vld [vmem:[#allocation158_spill] sm:$0xff] }
 0x5e0   :  { %3307 = vmatpush.msra.mxu2 %v3051_v35  ;;  %3389 = vmatpush.msra.mxu3 %v3051_v35  ;;  %11776 = vst [vmem:[#allocation114_spill] sm:$0xff] %v9479_v58  ;;  %v11778_v35 = vld [vmem:[#allocation147_spill] sm:$0xff] }
 0x5e1   :  { %v9386_v32 = vmax.f32 %v2763_v24, %v3267_v44  ;;  %6030 = vmatmul.msk.f32.vlgmr.msra.gmra.mxu2 %vm1294_vm3, %v11755_v61  ;;  %6046 = vmatmul.msk.f32.vlgmr.msra.gmra.mxu3 %vm1294_vm3, %v9393_v55  ;;  %v11781_v24 = vld [vmem:[#allocation151_spill] sm:$0xff]  ;;  %v11783_v61 = vld [vmem:[#allocation164_spill] sm:$0xff] }
 0x5e2   :  { %3599 = vmatpush.msrb.mxu0 %v3267_v44  ;;  %v9501_v44 = vld [vmem:[%s11044_s4 + $0x48] sm:$0xff] }
 0x5e3   :  { %11754 = vst [vmem:[#allocation177_spill] sm:$0xff] %v9386_v32 }
 0x5e4   :  { %3600 = vmatpush.msrb.mxu0 %v3266_v23  ;;  %v11765_v23 = vld [vmem:[#allocation140_spill] sm:$0xff]  ;;  %11782 = vst [vmem:[#allocation25_spill] sm:$0xff] %v9501_v44 }
 0x5e6   :  { %3601 = vmatpush.msrb.mxu0 %v3265_v0  ;;  %v9419_v0 = vld [vmem:[%s11044_s4 + $0x10] sm:$0xff] }
 0x5e7   :  { %11761 = vst [vmem:[#allocation180_spill] sm:$0xff] %v9419_v0 }
 0x5e8   :  { %3602 = vmatpush.msrb.mxu0 %v9357_v16  ;;  %v11760_v16 = vld [vmem:[#allocation120_spill] sm:$0xff] }
 0x5e9   :  { %6031 = vmatmul.msk.f32.gmra.mxu2 %vm1294_vm3, %v11757_v14  ;;  %6047 = vmatmul.msk.f32.gmra.mxu3 %vm1294_vm3, %v9403_v13  ;;  %v11784_v14 = vld [vmem:[#allocation156_spill] sm:$0xff] }
 0x5ea   :  { %6062 = vmatmul.msk.f32.vlgmr.msrb.gmra.mxu0 %vm1294_vm3, %v9410_v28 }
 0x5f1   :  { %6032 = vmatmul.msk.f32.gmra.mxu2 %vm1294_vm3, %v11760_v16  ;;  %6048 = vmatmul.msk.f32.gmra.mxu3 %vm1294_vm3, %v9419_v0  ;;  %v9512_v16 = vld [vmem:[%s11044_s4 + $0x50] sm:$0xff] }
 0x5f2   :  { %6063 = vmatmul.msk.f32.gmra.mxu0 %vm1294_vm3, %v9426_v48  ;;  %11785 = vst [vmem:[#allocation13_spill] sm:$0xff] %v9512_v16 }
 0x5f9   :  { %6033 = vmatmul.msk.f32.gmra.mxu2 %vm1294_vm3, %v11763_v20  ;;  %6049 = vmatmul.msk.f32.gmra.mxu3 %vm1294_vm3, %v9435_v10  ;;  %v11786_v20 = vld [vmem:[#allocation167_spill] sm:$0xff] }
 0x5fa   :  { %6064 = vmatmul.msk.f32.gmra.mxu0 %vm1294_vm3, %v11765_v23  ;;  %v11787_v23 = vld [vmem:[#allocation24_spill] sm:$0xff] }
 0x601   :  { %6034 = vmatmul.msk.f32.gmra.mxu2 %vm1294_vm3, %v11766_v8  ;;  %6050 = vmatmul.msk.f32.gmra.mxu3 %vm1294_vm3, %v9446_v52  ;;  %v9523_v8 = vld [vmem:[%s11044_s4 + $0x58] sm:$0xff] }
 0x602   :  { %6065 = vmatmul.msk.f32.gmra.mxu0 %vm1294_vm3, %v11768_v7  ;;  %11788 = vst [vmem:[#allocation28_spill] sm:$0xff] %v9523_v8  ;;  %v11789_v7 = vld [vmem:[#allocation170_spill] sm:$0xff] }
 0x609   :  { %6035 = vmatmul.msk.f32.gmra.mxu2 %vm1294_vm3, %v11769_v62  ;;  %6051 = vmatmul.msk.f32.gmra.mxu3 %vm1294_vm3, %v9457_v41  ;;  %v11790_v62 = vld [vmem:[#allocation27_spill] sm:$0xff] }
 0x60a   :  { %6066 = vmatmul.msk.f32.gmra.mxu0 %vm1294_vm3, %v11771_v60  ;;  %v9534_v60 = vld [vmem:[%s11044_s4 + $0x60] sm:$0xff] }
 0x60b   :  { %11791 = vst [vmem:[#allocation16_spill] sm:$0xff] %v9534_v60 }
 0x611   :  { %6036 = vmatmul.msk.f32.gmra.mxu2 %vm1294_vm3, %v11772_v43  ;;  %6052 = vmatmul.msk.f32.gmra.mxu3 %vm1294_vm3, %v9468_v22  ;;  %v11792_v43 = vld [vmem:[#allocation12_spill] sm:$0xff] }
 0x612   :  { %6067 = vmatmul.msk.f32.gmra.mxu0 %vm1294_vm3, %v11774_v59  ;;  %v11793_v59 = vld [vmem:[#allocation18_spill] sm:$0xff] }
 0x619   :  { %6037 = vmatmul.msk.f32.gmra.mxu2 %vm1294_vm3, %v11775_v3  ;;  %6053 = vmatmul.msk.f32.gmra.mxu3 %vm1294_vm3, %v9479_v58  ;;  %v9545_v3 = vld [vmem:[%s11044_s4 + $0x68] sm:$0xff] }
 0x61a   :  { %6068 = vmatmul.msk.f32.gmra.mxu0 %vm1294_vm3, %v11777_v46  ;;  %11794 = vst [vmem:[#allocation19_spill] sm:$0xff] %v9545_v3  ;;  %v11795_v46 = vld [vmem:[#allocation15_spill] sm:$0xff] }
 0x621   :  { %6038 = vmatmul.msk.f32.gmra.mxu2 %vm1294_vm3, %v11778_v35  ;;  %6054 = vmatmul.msk.f32.gmra.mxu3 %vm1294_vm3, %v9490_v2  ;;  %v11796_v35 = vld [vmem:[#allocation56_spill] sm:$0xff] }
 0x622   :  { %6069 = vmatmul.msk.f32.gmra.mxu0 %vm1294_vm3, %v11780_v5  ;;  %v9556_v5 = vld [vmem:[%s11044_s4 + $0x70] sm:$0xff] }
 0x623   :  { %11797 = vst [vmem:[#allocation31_spill] sm:$0xff] %v9556_v5 }
 0x629   :  { %6039 = vmatmul.msk.f32.gmra.mxu2 %vm1294_vm3, %v11781_v24  ;;  %6055 = vmatmul.msk.f32.gmra.mxu3 %vm1294_vm3, %v9501_v44  ;;  %v11798_v24 = vld [vmem:[#allocation30_spill] sm:$0xff] }
 0x62a   :  { %6070 = vmatmul.msk.f32.gmra.mxu0 %vm1294_vm3, %v11783_v61  ;;  %v11799_v61 = vld [vmem:[#allocation59_spill] sm:$0xff] }
 0x631   :  { %6040 = vmatmul.msk.f32.gmra.mxu2 %vm1294_vm3, %v11784_v14  ;;  %6056 = vmatmul.msk.f32.gmra.mxu3 %vm1294_vm3, %v9512_v16  ;;  %v9567_v14 = vld [vmem:[%s11044_s4 + $0x78] sm:$0xff] }
 0x632   :  { %6071 = vmatmul.msk.f32.gmra.mxu0 %vm1294_vm3, %v11786_v20  ;;  %11800 = vst [vmem:[#allocation51_spill] sm:$0xff] %v9567_v14  ;;  %v11801_v20 = vld [vmem:[#allocation34_spill] sm:$0xff] }
 0x639   :  { %6041 = vmatmul.msk.f32.gmra.mxu2 %vm1294_vm3, %v11787_v23  ;;  %6057 = vmatmul.msk.f32.gmra.mxu3 %vm1294_vm3, %v9523_v8  ;;  %v11802_v23 = vld [vmem:[#allocation21_spill] sm:$0xff] }
 0x63a   :  { %6072 = vmatmul.msk.f32.gmra.mxu0 %vm1294_vm3, %v11789_v7 }
 0x641   :  { %6042 = vmatmul.msk.f32.gmra.mxu2 %vm1294_vm3, %v11790_v62  ;;  %6058 = vmatmul.msk.f32.gmra.mxu3 %vm1294_vm3, %v9534_v60 }
 0x642   :  { %6073 = vmatmul.msk.f32.gmra.mxu0 %vm1294_vm3, %v11792_v43 }
 0x649   :  { %6043 = vmatmul.msk.f32.gmra.mxu2 %vm1294_vm3, %v11793_v59  ;;  %6059 = vmatmul.msk.f32.gmra.mxu3 %vm1294_vm3, %v9545_v3 }
 0x64a   :  { %6074 = vmatmul.msk.f32.gmra.mxu0 %vm1294_vm3, %v11795_v46 }
 0x651   :  { %6044 = vmatmul.msk.f32.gmra.mxu2 %vm1294_vm3, %v11796_v35  ;;  %6060 = vmatmul.msk.f32.gmra.mxu3 %vm1294_vm3, %v9556_v5 }
 0x652   :  { %6075 = vmatmul.msk.f32.gmra.mxu0 %vm1294_vm3, %v11798_v24 }
 0x659   :  { %6045 = vmatmul.msk.f32.gmra.mxu2 %vm1294_vm3, %v11799_v61  ;;  %6061 = vmatmul.msk.f32.gmra.mxu3 %vm1294_vm3, %v9567_v14 }
 0x65a   :  { %6076 = vmatmul.msk.f32.gmra.mxu0 %vm1294_vm3, %v11801_v20 }
 0x662   :  { %6077 = vmatmul.msk.f32.gmra.mxu0 %vm1294_vm3, %v11802_v23 }
 0x664   :  { %v3309_v7 = vpop.f32.mrf.mxu2  ;;  %v3391_v62 = vpop.f32.mrf.mxu3 }
 0x665   :  { %v3310_v55 = vadd.f32 %v3309_v7, %v11631_v45  ;;  %v3439_v45 = vadd.f32 %v3391_v62, %v755_v34  ;;  %v11811_v34 = vld [vmem:[#allocation38_spill] sm:$0xff] }
 0x667   :  { %v3604_v43 = vpop.f32.mrf.mxu0 }
 0x668   :  { %v3652_v51 = vadd.f32 %v3604_v43, %v3310_v55  ;;  %v11809_v43 = vld [vmem:[#allocation66_spill] sm:$0xff] }
 0x66a   :  { %v3668_v36 = vmul.f32 0.5, %v3652_v51  ;;  %v761_v51 = vadd.f32 %v11810_v53, %v11809_v43 }
 0x66c   :  { %v3312_v59 = vpop.f32.mrf.mxu2  ;;  %v3394_v46 = vpop.f32.mrf.mxu3  ;;  %6573 = vtanh.f32 %v3668_v36 }
 0x66f   :  { %v3607_v35 = vpop.f32.mrf.mxu0 }
 0x674   :  { %v3315_v24 = vpop.f32.mrf.mxu2  ;;  %v3397_v61 = vpop.f32.mrf.mxu3 }
 0x677   :  { %v3610_v5 = vpop.f32.mrf.mxu0 }
 0x67c   :  { %v3318_v3 = vpop.f32.mrf.mxu2  ;;  %v3400_v60 = vpop.f32.mrf.mxu3 }
 0x67f   :  { %v9575_v8 = vpop.f32.mrf.mxu0 }
 0x684   :  { %v3321_v14 = vpop.f32.mrf.mxu2  ;;  %v9577_v16 = vpop.f32.mrf.mxu3 }
 0x685   :  { %v3322_v31 = vadd.f32 %v3321_v14, %v11637_v6  ;;  %v3440_v6 = vadd.f32 %v3394_v46, %v758_v12 }
 0x687   :  { %v3616_v20 = vpop.f32.mrf.mxu0  ;;  %v3456_v62 = vmul.f32 0.5, %v3440_v6 }
 0x688   :  { %v3656_v54 = vadd.f32 %v3616_v20, %v3322_v31  ;;  %v3316_v31 = vadd.f32 %v3315_v24, %v11632_v50  ;;  %v3455_v20 = vmul.f32 0.5, %v3439_v45  ;;  %v11812_v45 = vld [vmem:[#allocation78_spill] sm:$0xff] }
 0x68a   :  { %v3654_v46 = vadd.f32 %v3610_v5, %v3316_v31  ;;  %v11817_v5 = vld [vmem:[#allocation41_spill] sm:$0xff] }
 0x68c   :  { %v3324_v44 = vpop.f32.mrf.mxu2  ;;  %v9579_v2 = vpop.f32.mrf.mxu3 }
 0x68d   :  { %v3325_v14 = vadd.f32 %v3324_v44, %v11638_v21  ;;  %v3441_v44 = vadd.f32 %v3397_v61, %v761_v51  ;;  %v6574_v61 = vpop.eup %6573  ;;  %v3670_v51 = vmul.f32 0.5, %v3654_v46 }
 0x68f   :  { %v3619_v23 = vpop.f32.mrf.mxu0  ;;  %v3457_v31 = vmul.f32 0.5, %v3441_v44  ;;  %v11821_v44 = vld [vmem:[#allocation84_spill] sm:$0xff] }
 0x694   :  { %v3327_v58 = vpop.f32.mrf.mxu2  ;;  %v9581_v22 = vpop.f32.mrf.mxu3 }
 0x695   :  { %v3328_v12 = vadd.f32 %v3327_v58, %v11636_v11  ;;  %v11816_v58 = vld [vmem:[#allocation71_spill] sm:$0xff] }
 0x697   :  { %v3622_v41 = vpop.f32.mrf.mxu0 }
 0x69c   :  { %v9583_v52 = vpop.f32.mrf.mxu2  ;;  %v9585_v10 = vpop.f32.mrf.mxu3 }
 0x69f   :  { %v9587_v0 = vpop.f32.mrf.mxu0 }
 0x6a4   :  { %v3333_v48 = vpop.f32.mrf.mxu2  ;;  %v9589_v13 = vpop.f32.mrf.mxu3 }
 0x6a5   :  { %11803 = vst [vmem:[#allocation68_spill] sm:$0xff] %v9589_v13  ;;  %v3313_v13 = vadd.f32 %v3312_v59, %v11634_v39  ;;  %v3334_v55 = vadd.f32 %v3333_v48, %v8495_v29  ;;  %v3657_v39 = vadd.f32 %v3619_v23, %v3325_v14  ;;  %v3319_v29 = vadd.f32 %v3318_v3, %v11725_v26  ;;  %v11815_v23 = vld [vmem:[#allocation40_spill] sm:$0xff] }
 0x6a6   :  { %v3658_v3 = vadd.f32 %v3622_v41, %v3328_v12  ;;  %v11822_v41 = vld [vmem:[#allocation44_spill] sm:$0xff] }
 0x6a7   :  { %v3628_v28 = vpop.f32.mrf.mxu0  ;;  %v3653_v59 = vadd.f32 %v3607_v35, %v3313_v13  ;;  %v11814_v35 = vld [vmem:[#allocation74_spill] sm:$0xff]  ;;  %v3673_v6 = vmul.f32 0.5, %v3657_v39  ;;  %v9639_v12 = vadd.f32 %v11822_v41, %v11821_v44 }
 0x6a8   :  { %v3660_v24 = vadd.f32 %v3628_v28, %v3334_v55  ;;  %v770_v14 = vadd.f32 %v11815_v23, %v11814_v35  ;;  %v773_v28 = vadd.f32 %v11817_v5, %v11816_v58  ;;  %v11818_v55 = vld [vmem:[#allocation42_spill] sm:$0xff]  ;;  %v11823_v23 = vld [vmem:[#allocation45_spill] sm:$0xff] }
 0x6a9   :  { %v3669_v48 = vmul.f32 0.5, %v3653_v59  ;;  %v776_v53 = vadd.f32 %v11818_v55, %v11714_v56  ;;  %v9643_v46 = vadd.f32 %v11823_v23, %v11627_v33  ;;  %v3674_v55 = vmul.f32 0.5, %v3658_v3  ;;  %v11825_v23 = vld [vmem:[#allocation47_spill] sm:$0xff] }
 0x6aa   :  { %v9654_v33 = vadd.f32 %v11825_v23, %v11729_v63  ;;  %v3445_v23 = vadd.f32 %v9581_v22, %v773_v28 }
 0x6ac   :  { %v3336_v32 = vpop.f32.mrf.mxu2  ;;  %v9592_v19 = vpop.f32.mrf.mxu3 }
 0x6ad   :  { %11804 = vst [vmem:[#allocation35_spill] sm:$0xff] %v9592_v19  ;;  %v3672_v19 = vmul.f32 0.5, %v3656_v54  ;;  %v764_v54 = vadd.f32 %v11811_v34, %v11718_v15  ;;  %v3337_v59 = vadd.f32 %v3336_v32, %v8501_v49 }
 0x6af   :  { %v9595_v38 = vpop.f32.mrf.mxu0  ;;  %6575 = vtanh.f32 %v3672_v19  ;;  %v3442_v50 = vadd.f32 %v3400_v60, %v764_v54  ;;  %v11813_v19 = vld [vmem:[#allocation39_spill] sm:$0xff] }
 0x6b0   :  { %v767_v13 = vadd.f32 %v11813_v19, %v11812_v45  ;;  %6577 = vtanh.f32 %v3455_v20  ;;  %v11819_v54 = vld [vmem:[#allocation87_spill] sm:$0xff] }
 0x6b1   :  { %6579 = vtanh.f32 %v3456_v62  ;;  %v11820_v20 = vld [vmem:[#allocation43_spill] sm:$0xff]  ;;  %v3458_v19 = vmul.f32 0.5, %v3442_v50  ;;  %v3655_v62 = vadd.f32 %v9575_v8, %v3319_v29  ;;  %v11824_v50 = vld [vmem:[#allocation46_spill] sm:$0xff]  ;;  %v3446_v29 = vadd.f32 %v9585_v10, %v776_v53 }
 0x6b2   :  { %6581 = vtanh.f32 %v3660_v24  ;;  %v9634_v39 = vadd.f32 %v11820_v20, %v11819_v54  ;;  %v3443_v32 = vadd.f32 %v9577_v16, %v767_v13  ;;  %v3716_v24 = vmul.f32 0.5, %v6574_v61  ;;  %v11826_v16 = vld [vmem:[#allocation48_spill] sm:$0xff] }
 0x6b3   :  { %6583 = vtanh.f32 %v3669_v48  ;;  %v9648_v48 = vadd.f32 %v11824_v50, %v11629_v27  ;;  %v3661_v8 = vadd.f32 %v9595_v38, %v3337_v59  ;;  %v9658_v13 = vadd.f32 %v11826_v16, %v11731_v1 }
 0x6b4   :  { %v9602_v57 = vpop.f32.mrf.mxu2  ;;  %v9604_v7 = vpop.f32.mrf.mxu3  ;;  %6585 = vtanh.f32 %v3673_v6  ;;  %v3671_v6 = vmul.f32 0.5, %v3655_v62  ;;  %v3331_v10 = vadd.f32 %v9583_v52, %v11727_v18  ;;  %v3732_v59 = vadd.f32 0.5, %v3716_v24  ;;  %v11827_v62 = vld [vmem:[#allocation49_spill] sm:$0xff] }
 0x6b5   :  { %v6576_v60 = vpop.eup %6575  ;;  %6587 = vtanh.f32 %v3457_v31  ;;  %v3340_v38 = vadd.f32 %v9602_v57, %v8456_v17  ;;  %v9670_v16 = vadd.f32 %v11827_v62, %v11641_v47  ;;  %v3462_v1 = vmul.f32 0.5, %v3446_v29  ;;  %v11828_v29 = vld [vmem:[#allocation50_spill] sm:$0xff] }
 0x6b6   :  { %v3720_v5 = vmul.f32 0.5, %v6576_v60  ;;  %v6578_v20 = vpop.eup %6577  ;;  %6589 = vtanh.f32 %v3670_v51  ;;  %v3459_v60 = vmul.f32 0.5, %v3443_v32  ;;  %v3444_v32 = vadd.f32 %v9579_v2, %v770_v14 }
 0x6b7   :  { %v9609_v42 = vpop.f32.mrf.mxu0  ;;  %v6580_v41 = vpop.eup %6579  ;;  %6591 = vtanh.f32 %v3458_v19  ;;  %v3503_v57 = vmul.f32 0.5, %v6578_v20  ;;  %v3659_v22 = vadd.f32 %v9587_v0, %v3331_v10  ;;  %v3461_v2 = vmul.f32 0.5, %v3445_v23 }
 0x6b8   :  { %v6582_v3 = vpop.eup %6581  ;;  %v3736_v50 = vadd.f32 0.5, %v3720_v5  ;;  %6593 = vtanh.f32 %v3674_v55  ;;  %v3662_v28 = vadd.f32 %v9609_v42, %v3340_v38  ;;  %v3504_v20 = vmul.f32 0.5, %v6580_v41 }
 0x6b9   :  { %v6584_v51 = vpop.eup %6583  ;;  %6595 = vtanh.f32 %v3661_v8  ;;  %v9678_v8 = vadd.f32 %v11828_v29, %v11735_v40 }
 0x6ba   :  { %v6586_v19 = vpop.eup %6585  ;;  %6597 = vtanh.f32 %v3671_v6  ;;  %v3717_v5 = vmul.f32 0.5, %v6584_v51  ;;  %v3768_v62 = vmul.f32 %v3736_v50, %v9336_v4  ;;  %v3460_v6 = vmul.f32 0.5, %v3444_v32 }
 0x6bb   :  { %v6588_v63 = vpop.eup %6587  ;;  %6599 = vtanh.f32 %v3459_v60  ;;  %v3721_v47 = vmul.f32 0.5, %v6586_v19  ;;  %v3675_v51 = vmul.f32 0.5, %v3659_v22  ;;  %v9685_v19 = vadd.f32 0.5, %v3504_v20 }
 0x6bc   :  { %v9617_v21 = vpop.f32.mrf.mxu2  ;;  %v9619_v36 = vpop.f32.mrf.mxu3  ;;  %6601 = vtanh.f32 %v3462_v1  ;;  %v3505_v60 = vmul.f32 0.5, %v6588_v63  ;;  %v3733_v50 = vadd.f32 0.5, %v3717_v5  ;;  %v11829_v63 = vld [vmem:[#allocation17_spill] sm:$0xff] }
 0x6bd   :  { %v6590_v24 = vpop.eup %6589  ;;  %v3737_v23 = vadd.f32 0.5, %v3721_v47  ;;  %v3343_v32 = vadd.f32 %v9617_v21, %v11829_v63  ;;  %v11831_v21 = vld [vmem:[#allocation86_spill] sm:$0xff] }
 0x6be   :  { %v6592_v55 = vpop.eup %6591  ;;  %v3718_v38 = vmul.f32 0.5, %v6590_v24 }
 0x6bf   :  { %v9630_v34 = vpop.f32.mrf.mxu0  ;;  %v3506_v41 = vmul.f32 0.5, %v6592_v55  ;;  %v11830_v55 = vld [vmem:[#allocation35_spill] sm:$0xff]  ;;  %v3769_v29 = vmul.f32 %v3737_v23, %v11831_v21 }
 0x6c0   :  { %v3734_v47 = vadd.f32 0.5, %v3718_v38  ;;  %v11832_v38 = vld [vmem:[#allocation68_spill] sm:$0xff] }
 0x6c4   :  { %v3345_v61 = vpop.f32.mrf.mxu2  ;;  %v9660_v31 = vpop.f32.mrf.mxu3 }
 0x6c5   :  { %v3346_v53 = vadd.f32 %v3345_v61, %v11645_v9  ;;  %v3772_v61 = vmul.f32 %v6582_v3, %v3732_v59  ;;  %v6594_v3 = vpop.eup %6593  ;;  %v3451_v21 = vadd.f32 %v9660_v31, %v9654_v33 }
 0x6c6   :  { %v6596_v4 = vpop.eup %6595 }
 0x6c7   :  { %v3640_v52 = vpop.f32.mrf.mxu0  ;;  %v9682_v0 = vadd.f32 %v3772_v61, %v3768_v62  ;;  %v6598_v59 = vpop.eup %6597  ;;  %v3722_v61 = vmul.f32 0.5, %v6594_v3  ;;  %v3773_v24 = vmul.f32 %v6596_v4, %v3733_v50  ;;  %v3448_v62 = vadd.f32 %v11830_v55, %v9639_v12 }
 0x6c8   :  { %v3664_v27 = vadd.f32 %v3640_v52, %v3346_v53  ;;  %v9680_v53 = vadd.f32 0.5, %v3503_v57  ;;  %v6600_v1 = vpop.eup %6599  ;;  %v3450_v52 = vadd.f32 %v9619_v36, %v9648_v48  ;;  %v3449_v36 = vadd.f32 %v9604_v7, %v9643_v46  ;;  %v11834_v46 = vld [vmem:[#allocation29_spill] sm:$0xff] }
 0x6c9   :  { %v6602_v5 = vpop.eup %6601  ;;  %v3663_v3 = vadd.f32 %v9630_v34, %v3343_v32  ;;  %v3738_v4 = vadd.f32 0.5, %v3722_v61  ;;  %v9702_v12 = vadd.f32 %v3773_v24, %v3769_v29  ;;  %v3507_v34 = vmul.f32 0.5, %v6600_v1 }
 0x6ca   :  { %v3680_v14 = vmul.f32 0.5, %v3664_v27  ;;  %v3510_v32 = vmul.f32 0.5, %v6602_v5 }
 0x6cb   :  { %11833 = vst [vmem:[#allocation52_spill] sm:$0xff] %v9702_v12 }
 0x6cc   :  { %6603 = vtanh.f32 %v3680_v14  ;;  %v3348_v42 = vpop.f32.mrf.mxu2  ;;  %v3430_v10 = vpop.f32.mrf.mxu3  ;;  %v3522_v14 = vadd.f32 0.5, %v3506_v41 }
 0x6cd   :  { %6605 = vtanh.f32 %v3662_v28  ;;  %v3349_v27 = vadd.f32 %v3348_v42, %v8556_v25  ;;  %v9692_v28 = vadd.f32 0.5, %v3505_v60 }
 0x6ce   :  { %6607 = vtanh.f32 %v3461_v2 }
 0x6cf   :  { %6609 = vtanh.f32 %v3460_v6  ;;  %v3643_v57 = vpop.f32.mrf.mxu0  ;;  %v3719_v6 = vmul.f32 0.5, %v6598_v59 }
 0x6d0   :  { %v3665_v22 = vadd.f32 %v3643_v57, %v3349_v27  ;;  %6611 = vtanh.f32 %v9682_v0 }
 0x6d1   :  { %6613 = vtanh.f32 %v3675_v51  ;;  %v3447_v51 = vadd.f32 %v11832_v38, %v9634_v39  ;;  %v3452_v39 = vadd.f32 %v3430_v10, %v9658_v13  ;;  %v3526_v13 = vadd.f32 0.5, %v3510_v32 }
 0x6d2   :  { %v6604_v2 = vpop.eup %6603  ;;  %v3681_v48 = vmul.f32 0.5, %v3665_v22  ;;  %6615 = vtanh.f32 %v3450_v52 }
 0x6d3   :  { %v6606_v20 = vpop.eup %6605  ;;  %v3728_v60 = vmul.f32 0.5, %v6604_v2  ;;  %v11836_v2 = vld [vmem:[#allocation91_spill] sm:$0xff]  ;;  %v3468_v33 = vmul.f32 0.5, %v3452_v39 }
 0x6d4   :  { %v6608_v42 = vpop.eup %6607  ;;  %6617 = vtanh.f32 %v3681_v48  ;;  %v3351_v27 = vpop.f32.mrf.mxu2  ;;  %v3774_v57 = vmul.f32 %v6606_v20, %v3734_v47 }
 0x6d5   :  { %v3433_v50 = vpop.f32.mrf.mxu3  ;;  %v6610_v41 = vpop.eup %6609  ;;  %6619 = vtanh.f32 %v3448_v62  ;;  %v3744_v7 = vadd.f32 0.5, %v3728_v60  ;;  %v3352_v23 = vadd.f32 %v3351_v27, %v11834_v46  ;;  %v3509_v22 = vmul.f32 0.5, %v6608_v42 }
 0x6d6   :  { %v3453_v59 = vadd.f32 %v3433_v50, %v9670_v16  ;;  %v6612_v52 = vpop.eup %6611  ;;  %6621 = vtanh.f32 %v3449_v36  ;;  %v3770_v62 = vmul.f32 %v3738_v4, %v11836_v2  ;;  %v3508_v1 = vmul.f32 0.5, %v6610_v41  ;;  %v11896_v36 = vld [vmem:[#allocation19_spill] sm:$0xff] }
 0x6d7   :  { %v6614_v61 = vpop.eup %6613  ;;  %6623 = vtanh.f32 %v3663_v3  ;;  %v3646_v24 = vpop.f32.mrf.mxu0  ;;  %v9707_v55 = vmul.f32 %v6612_v52, %v3744_v7  ;;  %v3735_v42 = vadd.f32 0.5, %v3719_v6  ;;  %v3523_v4 = vadd.f32 0.5, %v3507_v34  ;;  %v11839_v52 = vld [vmem:[#allocation23_spill] sm:$0xff]  ;;  %v11840_v6 = vld [vmem:[#allocation73_spill] sm:$0xff] }
 0x6d8   :  { %v3666_v29 = vadd.f32 %v3646_v24, %v3352_v23  ;;  %6625 = vtanh.f32 %v9702_v12  ;;  %v6616_v16 = vpop.eup %6615  ;;  %v3469_v5 = vmul.f32 0.5, %v3453_v59  ;;  %v3723_v10 = vmul.f32 0.5, %v6614_v61 }
 0x6d9   :  { %11835 = vst [vmem:[#allocation63_spill] sm:$0xff] %v9707_v55  ;;  %6627 = vtanh.f32 %v3447_v51  ;;  %v9715_v20 = vadd.f32 %v3774_v57, %v3770_v62  ;;  %v3525_v27 = vadd.f32 0.5, %v3509_v22  ;;  %v3562_v50 = vmul.f32 %v6616_v16, %v3522_v14 }
 0x6da   :  { %v6618_v48 = vpop.eup %6617  ;;  %v3682_v3 = vmul.f32 0.5, %v3666_v29  ;;  %v3467_v41 = vmul.f32 0.5, %v3451_v21  ;;  %v3524_v24 = vadd.f32 0.5, %v3508_v1  ;;  %v3558_v34 = vmul.f32 %v3526_v13, %v11840_v6  ;;  %v11842_v29 = vld [vmem:[#allocation175_spill] sm:$0xff] }
 0x6db   :  { %11838 = vst [vmem:[#allocation22_spill] sm:$0xff] %v9715_v20  ;;  %v6620_v60 = vpop.eup %6619  ;;  %v3729_v31 = vmul.f32 0.5, %v6618_v48  ;;  %v3739_v39 = vadd.f32 0.5, %v3723_v10  ;;  %v3557_v16 = vmul.f32 %v3525_v27, %v11842_v29  ;;  %v9960_v10 = vld [vmem:[%s11046_s6 + $0x68] sm:$0xff] }
 0x6dc   :  { %v6622_v38 = vpop.eup %6621  ;;  %6629 = vtanh.f32 %v3682_v3  ;;  %v3354_v51 = vpop.f32.mrf.mxu2  ;;  %v3560_v1 = vmul.f32 %v6620_v60, %v9685_v19  ;;  %v9726_v48 = vadd.f32 %v3562_v50, %v3558_v34  ;;  %v11849_v50 = vld [vmem:[#allocation62_spill] sm:$0xff]  ;;  %11895 = vst [vmem:[#allocation147_spill] sm:$0xff] %v9960_v10 }
 0x6dd   :  { %v3436_v7 = vpop.f32.mrf.mxu3  ;;  %v6624_v23 = vpop.eup %6623  ;;  %v3745_v59 = vadd.f32 0.5, %v3729_v31  ;;  %6631 = vtanh.f32 %v3469_v5  ;;  %v3355_v32 = vadd.f32 %v3354_v51, %v11839_v52  ;;  %v3561_v14 = vmul.f32 %v6622_v38, %v9692_v28  ;;  %v11845_v28 = vld [vmem:[#allocation75_spill] sm:$0xff] }
 0x6de   :  { %v3454_v57 = vadd.f32 %v3436_v7, %v9678_v8  ;;  %v6626_v61 = vpop.eup %6625  ;;  %6633 = vtanh.f32 %v9715_v20  ;;  %v3775_v5 = vmul.f32 %v6624_v23, %v3735_v42  ;;  %11843 = vst [vmem:[#allocation55_spill] sm:$0xff] %v9726_v48  ;;  %v11846_v51 = vld [vmem:[#allocation67_spill] sm:$0xff] }
 0x6df   :  { %v6628_v22 = vpop.eup %6627  ;;  %6635 = vtanh.f32 %v3468_v33  ;;  %v3649_v62 = vpop.f32.mrf.mxu0  ;;  %v9722_v21 = vmul.f32 %v6626_v61, %v3745_v59  ;;  %v3771_v33 = vmul.f32 %v3739_v39, %v11845_v28  ;;  %v3556_v7 = vmul.f32 %v3524_v24, %v11846_v51 }
 0x6e0   :  { %v3470_v2 = vmul.f32 0.5, %v3454_v57  ;;  %6637 = vtanh.f32 %v3467_v41  ;;  %v3667_v8 = vadd.f32 %v3649_v62, %v3355_v32  ;;  %v3559_v27 = vmul.f32 %v6628_v22, %v9680_v53 }
 0x6e1   :  { %11841 = vst [vmem:[#allocation53_spill] sm:$0xff] %v9722_v21  ;;  %v9733_v42 = vadd.f32 %v3561_v14, %v3557_v16  ;;  %v9735_v19 = vadd.f32 %v3775_v5, %v3771_v33  ;;  %v3555_v59 = vmul.f32 %v3523_v4, %v11849_v50  ;;  %v9738_v32 = vadd.f32 %v3560_v1, %v3556_v7  ;;  %v9944_v50 = vld [vmem:[%s11046_s6 + $0x60] sm:$0xff]  ;;  %v11893_v14 = vld [vmem:[#allocation16_spill] sm:$0xff] }
 0x6e2   :  { %6639 = vtanh.f32 %v3470_v2  ;;  %v6630_v3 = vpop.eup %6629  ;;  %v3683_v31 = vmul.f32 0.5, %v3667_v8  ;;  %11892 = vst [vmem:[#allocation142_spill] sm:$0xff] %v9944_v50 }
 0x6e3   :  { %v6632_v38 = vpop.eup %6631  ;;  %11847 = vst [vmem:[#allocation173_spill] sm:$0xff] %v9733_v42  ;;  %v3730_v41 = vmul.f32 0.5, %v6630_v3  ;;  %v9741_v34 = vadd.f32 %v3559_v27, %v3555_v59 }
 0x6e4   :  { %v6634_v23 = vpop.eup %6633  ;;  %11848 = vst [vmem:[#allocation178_spill] sm:$0xff] %v9735_v19  ;;  %6641 = vtanh.f32 %v3683_v31  ;;  %v3517_v6 = vmul.f32 0.5, %v6632_v38 }
 0x6e5   :  { %v6636_v60 = vpop.eup %6635  ;;  %11850 = vst [vmem:[#allocation65_spill] sm:$0xff] %v9738_v32  ;;  %6643 = vtanh.f32 %v9726_v48  ;;  %v3746_v57 = vadd.f32 0.5, %v3730_v41  ;;  %v11908_v48 = vld [vmem:[#allocation93_spill] sm:$0xff] }
 0x6e6   :  { %v6638_v61 = vpop.eup %6637  ;;  %11851 = vst [vmem:[#allocation58_spill] sm:$0xff] %v9741_v34  ;;  %6645 = vtanh.f32 %v9733_v42  ;;  %v3516_v39 = vmul.f32 0.5, %v6636_v60  ;;  %v3533_v29 = vadd.f32 0.5, %v3517_v6  ;;  %v11858_v6 = vld [vmem:[#allocation176_spill] sm:$0xff]  ;;  %v820_v52 = vadd.f32 %v11908_v48, %v11805_v37 }
 0x6e7   :  { %v9744_v53 = vmul.f32 %v6634_v23, %v3746_v57  ;;  %6647 = vtanh.f32 %v9735_v19  ;;  %v3515_v62 = vmul.f32 0.5, %v6638_v61  ;;  %v9761_v57 = vld [vmem:[%s11046_s6] sm:$0xff]  ;;  %v11857_v61 = vld [vmem:[#allocation172_spill] sm:$0xff] }
 0x6e8   :  { %v6640_v24 = vpop.eup %6639  ;;  %6649 = vtanh.f32 %v9738_v32  ;;  %v3532_v1 = vadd.f32 0.5, %v3516_v39  ;;  %11856 = vst [vmem:[#allocation70_spill] sm:$0xff] %v9761_v57  ;;  %v11860_v39 = vld [vmem:[#allocation174_spill] sm:$0xff] }
 0x6e9   :  { %11852 = vst [vmem:[#allocation61_spill] sm:$0xff] %v9744_v53  ;;  %v3518_v22 = vmul.f32 0.5, %v6640_v24  ;;  %6651 = vtanh.f32 %v9741_v34  ;;  %v3531_v38 = vadd.f32 0.5, %v3515_v62  ;;  %v9773_v24 = vld [vmem:[%s11046_s6 + $0x8] sm:$0xff]  ;;  %v11863_v62 = vld [vmem:[#allocation180_spill] sm:$0xff] }
 0x6ea   :  { %v6642_v2 = vpop.eup %6641  ;;  %11859 = vst [vmem:[#allocation117_spill] sm:$0xff] %v9773_v24  ;;  %v11907_v32 = vld [vmem:[#allocation14_spill] sm:$0xff] }
 0x6eb   :  { %v3534_v16 = vadd.f32 0.5, %v3518_v22  ;;  %v6644_v5 = vpop.eup %6643  ;;  %v3731_v8 = vmul.f32 0.5, %v6642_v2  ;;  %v11861_v22 = vld [vmem:[#allocation99_spill] sm:$0xff] }
 0x6ec   :  { %v6646_v28 = vpop.eup %6645  ;;  %v9784_v2 = vld [vmem:[%s11046_s6 + $0x10] sm:$0xff] }
 0x6ed   :  { %v3574_v3 = vmul.f32 %v6644_v5, %v3534_v16  ;;  %v3747_v33 = vadd.f32 0.5, %v3731_v8  ;;  %v6648_v31 = vpop.eup %6647  ;;  %v3573_v51 = vmul.f32 %v6646_v28, %v3533_v29  ;;  %11862 = vst [vmem:[#allocation64_spill] sm:$0xff] %v9784_v2  ;;  %v9793_v29 = vld [vmem:[%s11047_s7 + $0x10] sm:$0xff]  ;;  %v9800_v16 = vld [vmem:[%s11046_s6 + $0x18] sm:$0xff]  ;;  %v9825_v28 = vld [vmem:[%s11047_s7 + $0x20] sm:$0xff] }
 0x6ee   :  { %v6650_v7 = vpop.eup %6649  ;;  %11864 = vst [vmem:[#allocation103_spill] sm:$0xff] %v9793_v29  ;;  %v11866_v5 = vld [vmem:[#allocation100_spill] sm:$0xff] }
 0x6ef   :  { %3824 = vmatpush.msrb.mxu1 %v3574_v3  ;;  %3906 = vmatpush.msrb.mxu2 %v3574_v3  ;;  %v9751_v27 = vmul.f32 %v6648_v31, %v3747_v33  ;;  %v3572_v41 = vmul.f32 %v6650_v7, %v3532_v1  ;;  %v6652_v23 = vpop.eup %6651  ;;  %11865 = vst [vmem:[#allocation112_spill] sm:$0xff] %v9800_v16  ;;  %v9809_v8 = vld [vmem:[%s11047_s7 + $0x18] sm:$0xff]  ;;  %v9816_v1 = vld [vmem:[%s11046_s6 + $0x20] sm:$0xff]  ;;  %v9832_v33 = vld [vmem:[%s11046_s6 + $0x28] sm:$0xff] }
 0x6f0   :  { %v3571_v59 = vmul.f32 %v6652_v23, %v3531_v38  ;;  %11867 = vst [vmem:[#allocation60_spill] sm:$0xff] %v9809_v8  ;;  %v11869_v3 = vld [vmem:[#allocation101_spill] sm:$0xff]  ;;  %v11872_v31 = vld [vmem:[#allocation104_spill] sm:$0xff]  ;;  %v9841_v38 = vld [vmem:[%s11047_s7 + $0x28] sm:$0xff] }
 0x6f1   :  { %11854 = vst [vmem:[#allocation123_spill] sm:$0xff] %v9751_v27  ;;  %3825 = vmatpush.msrb.mxu1 %v3573_v51  ;;  %3907 = vmatpush.msrb.mxu2 %v3573_v51  ;;  %v9848_v51 = vld [vmem:[%s11046_s6 + $0x30] sm:$0xff]  ;;  %v11875_v7 = vld [vmem:[#allocation109_spill] sm:$0xff] }
 0x6f2   :  { %4119 = vmatpush.msrb.mxu3 %v9751_v27  ;;  %11868 = vst [vmem:[#allocation118_spill] sm:$0xff] %v9816_v1  ;;  %v9864_v23 = vld [vmem:[%s11046_s6 + $0x38] sm:$0xff] }
 0x6f3   :  { %3826 = vmatpush.msrb.mxu1 %v3572_v41  ;;  %3908 = vmatpush.msrb.mxu2 %v3572_v41  ;;  %11870 = vst [vmem:[#allocation128_spill] sm:$0xff] %v9825_v28  ;;  %v9857_v41 = vld [vmem:[%s11047_s7 + $0x30] sm:$0xff] }
 0x6f4   :  { %4120 = vmatpush.msrb.mxu3 %v9744_v53  ;;  %11871 = vst [vmem:[#allocation57_spill] sm:$0xff] %v9832_v33  ;;  %v11906_v53 = vld [vmem:[#allocation181_spill] sm:$0xff] }
 0x6f5   :  { %3827 = vmatpush.msrb.mxu1 %v3571_v59  ;;  %3909 = vmatpush.msrb.mxu2 %v3571_v59  ;;  %11873 = vst [vmem:[#allocation107_spill] sm:$0xff] %v9841_v38  ;;  %v11878_v59 = vld [vmem:[#allocation114_spill] sm:$0xff] }
 0x6f6   :  { %4121 = vmatpush.msrb.mxu3 %v9722_v21  ;;  %6078 = vmatmul.msk.f32.vlgmr.msrb.gmra.mxu1 %vm1294_vm3, %v9761_v57  ;;  %11874 = vst [vmem:[#allocation54_spill] sm:$0xff] %v9848_v51 }
 0x6f7   :  { %6094 = vmatmul.msk.f32.vlgmr.msrb.gmra.mxu2 %vm1294_vm3, %v11857_v61  ;;  %11876 = vst [vmem:[#allocation131_spill] sm:$0xff] %v9857_v41  ;;  %v9873_v61 = vld [vmem:[%s11047_s7 + $0x38] sm:$0xff] }
 0x6f8   :  { %4122 = vmatpush.msrb.mxu3 %v9707_v55  ;;  %11877 = vst [vmem:[#allocation136_spill] sm:$0xff] %v9864_v23  ;;  %v11909_v55 = vld [vmem:[#allocation97_spill] sm:$0xff] }
 0x6f9   :  { %6110 = vmatmul.msk.f32.vlgmr.msrb.gmra.mxu3 %vm1294_vm3, %v11858_v6  ;;  %11879 = vst [vmem:[#allocation120_spill] sm:$0xff] %v9873_v61  ;;  %v9880_v6 = vld [vmem:[%s11046_s6 + $0x40] sm:$0xff]  ;;  %v823_v47 = vadd.f32 %v11909_v55, %v11807_v30 }
 0x6fa   :  { %11880 = vst [vmem:[#allocation125_spill] sm:$0xff] %v9880_v6 }
 0x6fe   :  { %6079 = vmatmul.msk.f32.gmra.mxu1 %vm1294_vm3, %v9773_v24 }
 0x6ff   :  { %6095 = vmatmul.msk.f32.gmra.mxu2 %vm1294_vm3, %v11860_v39  ;;  %v11881_v39 = vld [vmem:[#allocation96_spill] sm:$0xff] }
 0x701   :  { %6111 = vmatmul.msk.f32.gmra.mxu3 %vm1294_vm3, %v11861_v22  ;;  %v9889_v22 = vld [vmem:[%s11047_s7 + $0x40] sm:$0xff] }
 0x702   :  { %11882 = vst [vmem:[#allocation140_spill] sm:$0xff] %v9889_v22 }
 0x706   :  { %6080 = vmatmul.msk.f32.gmra.mxu1 %vm1294_vm3, %v9784_v2 }
 0x707   :  { %6096 = vmatmul.msk.f32.gmra.mxu2 %vm1294_vm3, %v11863_v62  ;;  %v9896_v62 = vld [vmem:[%s11046_s6 + $0x48] sm:$0xff] }
 0x708   :  { %11883 = vst [vmem:[#allocation129_spill] sm:$0xff] %v9896_v62 }
 0x709   :  { %6112 = vmatmul.msk.f32.gmra.mxu3 %vm1294_vm3, %v9793_v29 }
 0x70e   :  { %6081 = vmatmul.msk.f32.gmra.mxu1 %vm1294_vm3, %v9800_v16 }
 0x70f   :  { %6097 = vmatmul.msk.f32.gmra.mxu2 %vm1294_vm3, %v11866_v5  ;;  %v11884_v5 = vld [vmem:[#allocation25_spill] sm:$0xff] }
 0x711   :  { %6113 = vmatmul.msk.f32.gmra.mxu3 %vm1294_vm3, %v9809_v8 }
 0x716   :  { %6082 = vmatmul.msk.f32.gmra.mxu1 %vm1294_vm3, %v9816_v1 }
 0x717   :  { %6098 = vmatmul.msk.f32.gmra.mxu2 %vm1294_vm3, %v11869_v3  ;;  %v9905_v3 = vld [vmem:[%s11047_s7 + $0x48] sm:$0xff] }
 0x718   :  { %11885 = vst [vmem:[#allocation145_spill] sm:$0xff] %v9905_v3 }
 0x719   :  { %6114 = vmatmul.msk.f32.gmra.mxu3 %vm1294_vm3, %v9825_v28 }
 0x71e   :  { %6083 = vmatmul.msk.f32.gmra.mxu1 %vm1294_vm3, %v9832_v33 }
 0x71f   :  { %6099 = vmatmul.msk.f32.gmra.mxu2 %vm1294_vm3, %v11872_v31  ;;  %v9912_v31 = vld [vmem:[%s11046_s6 + $0x50] sm:$0xff] }
 0x720   :  { %11886 = vst [vmem:[#allocation134_spill] sm:$0xff] %v9912_v31 }
 0x721   :  { %6115 = vmatmul.msk.f32.gmra.mxu3 %vm1294_vm3, %v9841_v38 }
 0x726   :  { %6084 = vmatmul.msk.f32.gmra.mxu1 %vm1294_vm3, %v9848_v51 }
 0x727   :  { %6100 = vmatmul.msk.f32.gmra.mxu2 %vm1294_vm3, %v11875_v7  ;;  %v11887_v7 = vld [vmem:[#allocation13_spill] sm:$0xff] }
 0x729   :  { %6116 = vmatmul.msk.f32.gmra.mxu3 %vm1294_vm3, %v9857_v41 }
 0x72e   :  { %6085 = vmatmul.msk.f32.gmra.mxu1 %vm1294_vm3, %v9864_v23 }
 0x72f   :  { %6101 = vmatmul.msk.f32.gmra.mxu2 %vm1294_vm3, %v11878_v59  ;;  %v9921_v59 = vld [vmem:[%s11047_s7 + $0x50] sm:$0xff] }
 0x730   :  { %11888 = vst [vmem:[#allocation150_spill] sm:$0xff] %v9921_v59 }
 0x731   :  { %6117 = vmatmul.msk.f32.gmra.mxu3 %vm1294_vm3, %v9873_v61 }
 0x736   :  { %6086 = vmatmul.msk.f32.gmra.mxu1 %vm1294_vm3, %v9880_v6 }
 0x737   :  { %6102 = vmatmul.msk.f32.gmra.mxu2 %vm1294_vm3, %v11881_v39  ;;  %v9928_v39 = vld [vmem:[%s11046_s6 + $0x58] sm:$0xff] }
 0x738   :  { %11889 = vst [vmem:[#allocation139_spill] sm:$0xff] %v9928_v39 }
 0x739   :  { %6118 = vmatmul.msk.f32.gmra.mxu3 %vm1294_vm3, %v9889_v22 }
 0x73e   :  { %6087 = vmatmul.msk.f32.gmra.mxu1 %vm1294_vm3, %v9896_v62 }
 0x73f   :  { %6103 = vmatmul.msk.f32.gmra.mxu2 %vm1294_vm3, %v11884_v5  ;;  %v11890_v5 = vld [vmem:[#allocation28_spill] sm:$0xff] }
 0x741   :  { %6119 = vmatmul.msk.f32.gmra.mxu3 %vm1294_vm3, %v9905_v3 }
 0x746   :  { %6088 = vmatmul.msk.f32.gmra.mxu1 %vm1294_vm3, %v9912_v31 }
 0x747   :  { %6104 = vmatmul.msk.f32.gmra.mxu2 %vm1294_vm3, %v11887_v7  ;;  %v9937_v7 = vld [vmem:[%s11047_s7 + $0x58] sm:$0xff] }
 0x748   :  { %11891 = vst [vmem:[#allocation153_spill] sm:$0xff] %v9937_v7 }
 0x749   :  { %6120 = vmatmul.msk.f32.gmra.mxu3 %vm1294_vm3, %v9921_v59 }
 0x74e   :  { %6089 = vmatmul.msk.f32.gmra.mxu1 %vm1294_vm3, %v9928_v39 }
 0x74f   :  { %6105 = vmatmul.msk.f32.gmra.mxu2 %vm1294_vm3, %v11890_v5  ;;  %v9953_v5 = vld [vmem:[%s11047_s7 + $0x60] sm:$0xff] }
 0x750   :  { %11894 = vst [vmem:[#allocation158_spill] sm:$0xff] %v9953_v5 }
 0x751   :  { %6121 = vmatmul.msk.f32.gmra.mxu3 %vm1294_vm3, %v9937_v7 }
 0x756   :  { %6090 = vmatmul.msk.f32.gmra.mxu1 %vm1294_vm3, %v9944_v50 }
 0x757   :  { %6106 = vmatmul.msk.f32.gmra.mxu2 %vm1294_vm3, %v11893_v14  ;;  %v9969_v14 = vld [vmem:[%s11047_s7 + $0x68] sm:$0xff] }
 0x758   :  { %11897 = vst [vmem:[#allocation161_spill] sm:$0xff] %v9969_v14 }
 0x759   :  { %6122 = vmatmul.msk.f32.gmra.mxu3 %vm1294_vm3, %v9953_v5  ;;  %v9976_v5 = vld [vmem:[%s11046_s6 + $0x70] sm:$0xff] }
 0x75a   :  { %11898 = vst [vmem:[#allocation151_spill] sm:$0xff] %v9976_v5 }
 0x75e   :  { %6091 = vmatmul.msk.f32.gmra.mxu1 %vm1294_vm3, %v9960_v10  ;;  %v11899_v10 = vld [vmem:[#allocation31_spill] sm:$0xff] }
 0x75f   :  { %6107 = vmatmul.msk.f32.gmra.mxu2 %vm1294_vm3, %v11896_v36  ;;  %v9985_v36 = vld [vmem:[%s11047_s7 + $0x70] sm:$0xff] }
 0x760   :  { %11900 = vst [vmem:[#allocation164_spill] sm:$0xff] %v9985_v36 }
 0x761   :  { %6123 = vmatmul.msk.f32.gmra.mxu3 %vm1294_vm3, %v9969_v14  ;;  %v9992_v14 = vld [vmem:[%s11046_s6 + $0x78] sm:$0xff] }
 0x762   :  { %11901 = vst [vmem:[#allocation156_spill] sm:$0xff] %v9992_v14 }
 0x766   :  { %6092 = vmatmul.msk.f32.gmra.mxu1 %vm1294_vm3, %v9976_v5  ;;  %v11902_v5 = vld [vmem:[#allocation51_spill] sm:$0xff] }
 0x767   :  { %6108 = vmatmul.msk.f32.gmra.mxu2 %vm1294_vm3, %v11899_v10  ;;  %v10001_v10 = vld [vmem:[%s11047_s7 + $0x78] sm:$0xff] }
 0x768   :  { %11903 = vst [vmem:[#allocation167_spill] sm:$0xff] %v10001_v10 }
 0x769   :  { %6124 = vmatmul.msk.f32.gmra.mxu3 %vm1294_vm3, %v9985_v36 }
 0x76e   :  { %6093 = vmatmul.msk.f32.gmra.mxu1 %vm1294_vm3, %v9992_v14 }
 0x76f   :  { %6109 = vmatmul.msk.f32.gmra.mxu2 %vm1294_vm3, %v11902_v5 }
 0x771   :  { %6125 = vmatmul.msk.f32.gmra.mxu3 %vm1294_vm3, %v10001_v10 }
 0x773   :  { %v3829_v36 = vpop.f32.mrf.mxu1 }
 0x774   :  { %v3830_v4 = vadd.f32 %v3829_v36, %v11906_v53 }
 0x77a   :  { %v3911_v50 = vpop.f32.mrf.mxu2 }
 0x77b   :  { %v3832_v7 = vpop.f32.mrf.mxu1  ;;  %v3959_v20 = vadd.f32 %v3911_v50, %v820_v52  ;;  %v11913_v52 = vld [vmem:[#allocation179_spill] sm:$0xff]  ;;  %v11914_v50 = vld [vmem:[#allocation20_spill] sm:$0xff] }
 0x77c   :  { %v4124_v39 = vpop.f32.mrf.mxu3 }
 0x77d   :  { %v4172_v19 = vadd.f32 %v4124_v39, %v3830_v4 }
 0x77f   :  { %v4188_v46 = vmul.f32 0.5, %v4172_v19 }
 0x781   :  { %6653 = vtanh.f32 %v4188_v46 }
 0x782   :  { %v3914_v59 = vpop.f32.mrf.mxu2 }
 0x783   :  { %v3835_v31 = vpop.f32.mrf.mxu1  ;;  %v3960_v53 = vadd.f32 %v3914_v59, %v823_v47  ;;  %v11915_v47 = vld [vmem:[#allocation110_spill] sm:$0xff] }
 0x784   :  { %v4127_v3 = vpop.f32.mrf.mxu3  ;;  %v3836_v19 = vadd.f32 %v3835_v31, %v11913_v52  ;;  %v829_v59 = vadd.f32 %v11915_v47, %v11718_v15 }
 0x78a   :  { %v3917_v62 = vpop.f32.mrf.mxu2 }
 0x78b   :  { %v3838_v14 = vpop.f32.mrf.mxu1 }
 0x78c   :  { %v4130_v22 = vpop.f32.mrf.mxu3 }
 0x792   :  { %v3920_v6 = vpop.f32.mrf.mxu2 }
 0x793   :  { %v3841_v5 = vpop.f32.mrf.mxu1 }
 0x794   :  { %v4133_v61 = vpop.f32.mrf.mxu3  ;;  %v3842_v21 = vadd.f32 %v3841_v5, %v11907_v32  ;;  %v11911_v5 = vld [vmem:[#allocation183_spill] sm:$0xff] }
 0x79a   :  { %v10005_v23 = vpop.f32.mrf.mxu2 }
 0x79b   :  { %v3844_v41 = vpop.f32.mrf.mxu1 }
 0x79c   :  { %v4136_v51 = vpop.f32.mrf.mxu3  ;;  %v3845_v32 = vadd.f32 %v3844_v41, %v11911_v5  ;;  %v3839_v41 = vadd.f32 %v3838_v14, %v11725_v26  ;;  %v4174_v5 = vadd.f32 %v4130_v22, %v3836_v19 }
 0x79d   :  { %v4176_v42 = vadd.f32 %v4136_v51, %v3842_v21  ;;  %v11912_v21 = vld [vmem:[#allocation105_spill] sm:$0xff]  ;;  %v3975_v51 = vmul.f32 0.5, %v3959_v20 }
 0x79e   :  { %v826_v48 = vadd.f32 %v11912_v21, %v11809_v43  ;;  %v3962_v21 = vadd.f32 %v3920_v6, %v829_v59  ;;  %v4175_v20 = vadd.f32 %v4133_v61, %v3839_v41  ;;  %v4190_v6 = vmul.f32 0.5, %v4174_v5  ;;  %v11918_v61 = vld [vmem:[#allocation126_spill] sm:$0xff] }
 0x7a2   :  { %v10007_v38 = vpop.f32.mrf.mxu2 }
 0x7a3   :  { %v3847_v10 = vpop.f32.mrf.mxu1 }
 0x7a4   :  { %v4139_v33 = vpop.f32.mrf.mxu3  ;;  %v3848_v46 = vadd.f32 %v3847_v10, %v11636_v11 }
 0x7aa   :  { %v10009_v28 = vpop.f32.mrf.mxu2 }
 0x7ab   :  { %v10011_v1 = vpop.f32.mrf.mxu1 }
 0x7ac   :  { %v4142_v8 = vpop.f32.mrf.mxu3 }
 0x7b2   :  { %v10013_v16 = vpop.f32.mrf.mxu2 }
 0x7b3   :  { %v3853_v29 = vpop.f32.mrf.mxu1 }
 0x7b4   :  { %v10015_v2 = vpop.f32.mrf.mxu3  ;;  %v3854_v39 = vadd.f32 %v3853_v29, %v11914_v50  ;;  %v11916_v29 = vld [vmem:[#allocation115_spill] sm:$0xff] }
 0x7ba   :  { %v10017_v24 = vpop.f32.mrf.mxu2 }
 0x7bb   :  { %11904 = vst [vmem:[#allocation24_spill] sm:$0xff] %v10017_v24  ;;  %v3856_v57 = vpop.f32.mrf.mxu1  ;;  %v4192_v24 = vmul.f32 0.5, %v4176_v42  ;;  %v4177_v42 = vadd.f32 %v4139_v33, %v3845_v32  ;;  %v6654_v32 = vpop.eup %6653  ;;  %v832_v33 = vadd.f32 %v11916_v29, %v11812_v45 }
 0x7bc   :  { %v4148_v27 = vpop.f32.mrf.mxu3  ;;  %v4236_v19 = vmul.f32 0.5, %v6654_v32 }
 0x7bd   :  { %6655 = vtanh.f32 %v4192_v24  ;;  %v4180_v30 = vadd.f32 %v4148_v27, %v3854_v39  ;;  %v11917_v27 = vld [vmem:[#allocation121_spill] sm:$0xff]  ;;  %v11919_v39 = vld [vmem:[#allocation132_spill] sm:$0xff] }
 0x7be   :  { %6657 = vtanh.f32 %v3975_v51  ;;  %v835_v22 = vadd.f32 %v11917_v27, %v11814_v35  ;;  %v3963_v51 = vadd.f32 %v10005_v23, %v832_v33  ;;  %v841_v47 = vadd.f32 %v11919_v39, %v11714_v56  ;;  %v11920_v23 = vld [vmem:[#allocation137_spill] sm:$0xff]  ;;  %v11923_v27 = vld [vmem:[#allocation148_spill] sm:$0xff] }
 0x7bf   :  { %v10063_v41 = vadd.f32 %v11920_v23, %v11819_v54  ;;  %v4252_v29 = vadd.f32 0.5, %v4236_v19 }
 0x7c2   :  { %v10019_v60 = vpop.f32.mrf.mxu2 }
 0x7c3   :  { %11905 = vst [vmem:[#allocation170_spill] sm:$0xff] %v10019_v60  ;;  %v10022_v34 = vpop.f32.mrf.mxu1  ;;  %v11910_v60 = vld [vmem:[#allocation182_spill] sm:$0xff]  ;;  %v6656_v14 = vpop.eup %6655 }
 0x7c4   :  { %v4151_v13 = vpop.f32.mrf.mxu3  ;;  %v3833_v36 = vadd.f32 %v3832_v7, %v11910_v60  ;;  %v3976_v7 = vmul.f32 0.5, %v3960_v53  ;;  %v3961_v60 = vadd.f32 %v3917_v62, %v826_v48  ;;  %v4178_v62 = vadd.f32 %v4142_v8, %v3848_v46 }
 0x7c5   :  { %v3978_v48 = vmul.f32 0.5, %v3962_v21  ;;  %v3857_v8 = vadd.f32 %v3856_v57, %v8501_v49  ;;  %v3979_v21 = vmul.f32 0.5, %v3963_v51  ;;  %v3860_v51 = vadd.f32 %v10022_v34, %v8456_v17  ;;  %v11935_v17 = vld [vmem:[#allocation52_spill] sm:$0xff] }
 0x7c6   :  { %v4173_v55 = vadd.f32 %v4127_v3, %v3833_v36  ;;  %v4193_v3 = vmul.f32 0.5, %v4177_v42  ;;  %6659 = vtanh.f32 %v3976_v7  ;;  %v3977_v53 = vmul.f32 0.5, %v3961_v60 }
 0x7c7   :  { %6661 = vtanh.f32 %v4180_v30  ;;  %v838_v36 = vadd.f32 %v11918_v61, %v11816_v58  ;;  %v3964_v60 = vadd.f32 %v10007_v38, %v835_v22  ;;  %v4240_v42 = vmul.f32 0.5, %v6656_v14  ;;  %v6658_v30 = vpop.eup %6657  ;;  %v11921_v38 = vld [vmem:[#allocation143_spill] sm:$0xff]  ;;  %v11922_v14 = vld [vmem:[#allocation81_spill] sm:$0xff] }
 0x7c8   :  { %v4189_v37 = vmul.f32 0.5, %v4173_v55  ;;  %v4191_v55 = vmul.f32 0.5, %v4175_v20  ;;  %v4194_v5 = vmul.f32 0.5, %v4178_v62  ;;  %v4181_v59 = vadd.f32 %v4151_v13, %v3857_v8  ;;  %v11924_v8 = vld [vmem:[#allocation79_spill] sm:$0xff] }
 0x7c9   :  { %v10067_v57 = vadd.f32 %v11921_v38, %v11821_v44  ;;  %v3980_v20 = vmul.f32 0.5, %v3964_v60  ;;  %v4256_v33 = vadd.f32 0.5, %v4240_v42  ;;  %v850_v22 = vadd.f32 %v11923_v27, %v11922_v14 }
 0x7ca   :  { %v10029_v12 = vpop.f32.mrf.mxu2  ;;  %6663 = vtanh.f32 %v4189_v37  ;;  %v3965_v37 = vadd.f32 %v10009_v28, %v838_v36  ;;  %v3966_v28 = vadd.f32 %v10013_v16, %v841_v47  ;;  %v4023_v38 = vmul.f32 0.5, %v6658_v30 }
 0x7cb   :  { %v10032_v63 = vpop.f32.mrf.mxu1  ;;  %6665 = vtanh.f32 %v4193_v3  ;;  %v3851_v3 = vadd.f32 %v10011_v1, %v11727_v18 }
 0x7cc   :  { %v10035_v4 = vpop.f32.mrf.mxu3  ;;  %6667 = vtanh.f32 %v3977_v53  ;;  %v6660_v7 = vpop.eup %6659 }
 0x7cd   :  { %6669 = vtanh.f32 %v4190_v6  ;;  %v6662_v46 = vpop.eup %6661  ;;  %v3981_v6 = vmul.f32 0.5, %v3965_v37  ;;  %v4179_v61 = vadd.f32 %v10015_v2, %v3851_v3  ;;  %v4288_v2 = vmul.f32 %v4256_v33, %v9682_v0  ;;  %v11926_v3 = vld [vmem:[#allocation92_spill] sm:$0xff]  ;;  %v11931_v33 = vld [vmem:[#allocation89_spill] sm:$0xff] }
 0x7ce   :  { %6671 = vtanh.f32 %v3978_v48  ;;  %v4292_v16 = vmul.f32 %v6662_v46, %v4252_v29  ;;  %v4182_v37 = vadd.f32 %v10035_v4, %v3860_v51  ;;  %v11927_v29 = vld [vmem:[#allocation160_spill] sm:$0xff]  ;;  %v11932_v4 = vld [vmem:[#allocation166_spill] sm:$0xff] }
 0x7cf   :  { %6673 = vtanh.f32 %v4191_v55  ;;  %v4195_v34 = vmul.f32 0.5, %v4179_v61 }
 0x7d0   :  { %v6664_v32 = vpop.eup %6663  ;;  %6675 = vtanh.f32 %v4194_v5  ;;  %v3982_v5 = vmul.f32 0.5, %v3966_v28  ;;  %v10090_v27 = vadd.f32 %v4292_v16, %v4288_v2  ;;  %v10099_v2 = vadd.f32 0.5, %v4023_v38 }
 0x7d1   :  { %v6666_v62 = vpop.eup %6665  ;;  %6677 = vtanh.f32 %v4181_v59  ;;  %v4237_v42 = vmul.f32 0.5, %v6664_v32  ;;  %v11928_v32 = vld [vmem:[#allocation90_spill] sm:$0xff] }
 0x7d2   :  { %v10045_v24 = vpop.f32.mrf.mxu2  ;;  %v6668_v48 = vpop.eup %6667  ;;  %6679 = vtanh.f32 %v3979_v21  ;;  %v4241_v47 = vmul.f32 0.5, %v6666_v62  ;;  %v4024_v21 = vmul.f32 0.5, %v6660_v7  ;;  %11930 = vst [vmem:[#allocation27_spill] sm:$0xff] %v10090_v27  ;;  %v862_v62 = vadd.f32 %v11932_v4, %v11931_v33 }
 0x7d3   :  { %v3865_v31 = vpop.f32.mrf.mxu1  ;;  %v6670_v60 = vpop.eup %6669  ;;  %6681 = vtanh.f32 %v3980_v20  ;;  %v11929_v20 = vld [vmem:[#allocation163_spill] sm:$0xff]  ;;  %v4253_v61 = vadd.f32 0.5, %v4237_v42 }
 0x7d4   :  { %v10051_v10 = vpop.f32.mrf.mxu3  ;;  %v3866_v53 = vadd.f32 %v3865_v31, %v11645_v9  ;;  %v11925_v31 = vld [vmem:[#allocation154_spill] sm:$0xff]  ;;  %v6672_v39 = vpop.eup %6671  ;;  %6683 = vtanh.f32 %v3981_v6  ;;  %v859_v28 = vadd.f32 %v11929_v20, %v11928_v32  ;;  %v4238_v30 = vmul.f32 0.5, %v6670_v60 }
 0x7d5   :  { %v853_v19 = vadd.f32 %v11925_v31, %v11924_v8  ;;  %v6674_v23 = vpop.eup %6673  ;;  %v4257_v51 = vadd.f32 0.5, %v4241_v47 }
 0x7d6   :  { %v6676_v46 = vpop.eup %6675 }
 0x7d7   :  { %v6678_v0 = vpop.eup %6677  ;;  %v4242_v60 = vmul.f32 0.5, %v6676_v46  ;;  %v3969_v46 = vadd.f32 %v10029_v12, %v850_v22 }
 0x7d8   :  { %v6680_v6 = vpop.eup %6679 }
 0x7d9   :  { %v6682_v31 = vpop.eup %6681 }
 0x7da   :  { %v10072_v13 = vpop.f32.mrf.mxu2  ;;  %v6684_v42 = vpop.eup %6683  ;;  %v4028_v9 = vmul.f32 0.5, %v6682_v31 }
 0x7db   :  { %v3868_v36 = vpop.f32.mrf.mxu1 }
 0x7dc   :  { %v4160_v1 = vpop.f32.mrf.mxu3 }
 0x7dd   :  { %v4184_v55 = vadd.f32 %v4160_v1, %v3866_v53  ;;  %v10086_v53 = vadd.f32 %v11927_v29, %v11926_v3  ;;  %v4025_v1 = vmul.f32 0.5, %v6668_v48  ;;  %v11933_v29 = vld [vmem:[#allocation169_spill] sm:$0xff] }
 0x7de   :  { %v10097_v16 = vadd.f32 %v11933_v29, %v11735_v40  ;;  %v3970_v29 = vadd.f32 %v10045_v24, %v853_v19  ;;  %v4258_v40 = vadd.f32 0.5, %v4242_v60  ;;  %v4029_v19 = vmul.f32 0.5, %v6684_v42  ;;  %v11940_v42 = vld [vmem:[#allocation22_spill] sm:$0xff] }
 0x7df   :  { %v4200_v59 = vmul.f32 0.5, %v4184_v55  ;;  %v3869_v55 = vadd.f32 %v3868_v36, %v8556_v25  ;;  %v10104_v47 = vadd.f32 0.5, %v4025_v1  ;;  %v4254_v36 = vadd.f32 0.5, %v4238_v30 }
 0x7e1   :  { %6685 = vtanh.f32 %v4200_v59  ;;  %v10101_v59 = vadd.f32 0.5, %v4024_v21  ;;  %v4026_v21 = vmul.f32 0.5, %v6672_v39  ;;  %v11937_v39 = vld [vmem:[#allocation170_spill] sm:$0xff] }
 0x7e2   :  { %6687 = vtanh.f32 %v3982_v5  ;;  %v3950_v7 = vpop.f32.mrf.mxu2  ;;  %v4293_v5 = vmul.f32 %v6678_v0, %v4253_v61 }
 0x7e3   :  { %6689 = vtanh.f32 %v4182_v37  ;;  %v11934_v37 = vld [vmem:[#allocation17_spill] sm:$0xff]  ;;  %v3871_v38 = vpop.f32.mrf.mxu1 }
 0x7e4   :  { %6691 = vtanh.f32 %v4195_v34  ;;  %v4163_v48 = vpop.f32.mrf.mxu3  ;;  %v3863_v4 = vadd.f32 %v10032_v63, %v11934_v37  ;;  %v4289_v34 = vmul.f32 %v4257_v51, %v11935_v17  ;;  %v3968_v17 = vadd.f32 %v11937_v39, %v10067_v57  ;;  %v12029_v37 = vld [vmem:[#allocation108_spill] sm:$0xff] }
 0x7e5   :  { %v4185_v20 = vadd.f32 %v4163_v48, %v3869_v55  ;;  %6693 = vtanh.f32 %v10090_v27  ;;  %v4239_v55 = vmul.f32 0.5, %v6674_v23  ;;  %v4027_v48 = vmul.f32 0.5, %v6680_v6  ;;  %v11938_v23 = vld [vmem:[#allocation24_spill] sm:$0xff] }
 0x7e6   :  { %v4183_v1 = vadd.f32 %v10051_v10, %v3863_v4  ;;  %v10112_v63 = vadd.f32 %v4293_v5, %v4289_v34  ;;  %v3967_v6 = vadd.f32 %v11938_v23, %v10063_v41  ;;  %v4290_v34 = vmul.f32 %v4258_v40, %v11940_v42 }
 0x7e7   :  { %v6686_v25 = vpop.eup %6685  ;;  %v4201_v0 = vmul.f32 0.5, %v4185_v20  ;;  %v3972_v57 = vadd.f32 %v3950_v7, %v859_v28  ;;  %v3971_v41 = vadd.f32 %v10072_v13, %v10086_v53  ;;  %v4043_v13 = vadd.f32 0.5, %v4027_v48 }
 0x7e8   :  { %v6688_v61 = vpop.eup %6687  ;;  %v4248_v27 = vmul.f32 0.5, %v6686_v25  ;;  %11936 = vst [vmem:[#allocation12_spill] sm:$0xff] %v10112_v63  ;;  %v11939_v25 = vld [vmem:[#allocation29_spill] sm:$0xff]  ;;  %v4044_v53 = vadd.f32 0.5, %v4028_v9  ;;  %v4045_v23 = vadd.f32 0.5, %v4029_v19 }
 0x7e9   :  { %v6690_v30 = vpop.eup %6689  ;;  %6695 = vtanh.f32 %v4201_v0  ;;  %v3872_v10 = vadd.f32 %v3871_v38, %v11939_v25  ;;  %v4030_v60 = vmul.f32 0.5, %v6688_v61  ;;  %v11941_v38 = vld [vmem:[#allocation80_spill] sm:$0xff]  ;;  %v4042_v61 = vadd.f32 0.5, %v4026_v21  ;;  %v12028_v25 = vld [vmem:[#allocation14_spill] sm:$0xff] }
 0x7ea   :  { %v6692_v24 = vpop.eup %6691  ;;  %6697 = vtanh.f32 %v3970_v29  ;;  %v4264_v12 = vadd.f32 0.5, %v4248_v27  ;;  %v3953_v22 = vpop.f32.mrf.mxu2  ;;  %v4294_v5 = vmul.f32 %v6690_v30, %v4254_v36 }
 0x7eb   :  { %v6694_v51 = vpop.eup %6693  ;;  %6699 = vtanh.f32 %v3969_v46  ;;  %v3973_v31 = vadd.f32 %v3953_v22, %v862_v62  ;;  %v4243_v27 = vmul.f32 0.5, %v6692_v24  ;;  %v11942_v62 = vld [vmem:[#allocation63_spill] sm:$0xff]  ;;  %v4046_v7 = vadd.f32 0.5, %v4030_v60 }
 0x7ec   :  { %6701 = vtanh.f32 %v4183_v1  ;;  %v4166_v20 = vpop.f32.mrf.mxu3  ;;  %v10119_v4 = vmul.f32 %v6694_v51, %v4264_v12  ;;  %v11943_v46 = vmax.f32 %v11941_v38, %v11942_v62  ;;  %v4255_v1 = vadd.f32 0.5, %v4239_v55  ;;  %v11946_v60 = vld [vmem:[#allocation23_spill] sm:$0xff] }
 0x7ed   :  { %v4186_v29 = vadd.f32 %v4166_v20, %v3872_v10  ;;  %6703 = vtanh.f32 %v10112_v63  ;;  %v3989_v30 = vmul.f32 0.5, %v3973_v31  ;;  %v10131_v39 = vadd.f32 %v4294_v5, %v4290_v34 }
 0x7ee   :  { %6705 = vtanh.f32 %v3968_v17  ;;  %v10129_v36 = vmax.f32 %v11943_v46, %v10119_v4  ;;  %v3874_v17 = vpop.f32.mrf.mxu1  ;;  %v3988_v22 = vmul.f32 0.5, %v3972_v57  ;;  %v4259_v10 = vadd.f32 0.5, %v4243_v27  ;;  %v11948_v46 = vld [vmem:[#allocation173_spill] sm:$0xff] }
 0x7ef   :  { %v6696_v0 = vpop.eup %6695  ;;  %v4202_v40 = vmul.f32 0.5, %v4186_v29  ;;  %6707 = vtanh.f32 %v3967_v6  ;;  %11945 = vst [vmem:[#allocation15_spill] sm:$0xff] %v10131_v39  ;;  %v3987_v20 = vmul.f32 0.5, %v3971_v41  ;;  %v3875_v6 = vadd.f32 %v3874_v17, %v11946_v60  ;;  %v11947_v29 = vld [vmem:[#allocation55_spill] sm:$0xff] }
 0x7f0   :  { %11944 = vst [vmem:[#allocation18_spill] sm:$0xff] %v10129_v36  ;;  %v6698_v28 = vpop.eup %6697  ;;  %v4249_v24 = vmul.f32 0.5, %v6696_v0  ;;  %v4078_v38 = vmul.f32 %v4046_v7, %v11947_v29  ;;  %v4077_v0 = vmul.f32 %v4045_v23, %v11948_v46  ;;  %v11956_v23 = vld [vmem:[#allocation65_spill] sm:$0xff] }
 0x7f1   :  { %v6700_v12 = vpop.eup %6699  ;;  %6709 = vtanh.f32 %v4202_v40  ;;  %v4082_v42 = vmul.f32 %v6698_v28, %v4042_v61  ;;  %v11949_v61 = vld [vmem:[#allocation178_spill] sm:$0xff]  ;;  %v11951_v40 = vld [vmem:[#allocation53_spill] sm:$0xff] }
 0x7f2   :  { %v6702_v51 = vpop.eup %6701  ;;  %v4265_v21 = vadd.f32 0.5, %v4249_v24  ;;  %v3956_v55 = vpop.f32.mrf.mxu2  ;;  %6711 = vtanh.f32 %v3989_v30  ;;  %v4081_v9 = vmul.f32 %v6700_v12, %v10104_v47  ;;  %v4291_v30 = vmul.f32 %v4259_v10, %v11949_v61 }
 0x7f3   :  { %v6704_v31 = vpop.eup %6703  ;;  %v3974_v5 = vadd.f32 %v3956_v55, %v10097_v16  ;;  %6713 = vtanh.f32 %v10131_v39  ;;  %v4295_v57 = vmul.f32 %v6702_v51, %v4255_v1  ;;  %v11950_v16 = vld [vmem:[#allocation69_spill] sm:$0xff]  ;;  %v10149_v17 = vadd.f32 %v4082_v42, %v4078_v38 }
 0x7f4   :  { %v6706_v34 = vpop.eup %6705  ;;  %v4169_v48 = vpop.f32.mrf.mxu3  ;;  %v10138_v19 = vmul.f32 %v6704_v31, %v4265_v21  ;;  %6715 = vtanh.f32 %v3988_v22  ;;  %v11952_v28 = vmax.f32 %v11950_v16, %v11951_v40  ;;  %v10151_v12 = vadd.f32 %v4081_v9, %v4077_v0 }
 0x7f5   :  { %v3990_v27 = vmul.f32 0.5, %v3974_v5  ;;  %v4187_v41 = vadd.f32 %v4169_v48, %v3875_v6  ;;  %v6708_v62 = vpop.eup %6707  ;;  %6717 = vtanh.f32 %v3987_v20  ;;  %v4080_v24 = vmul.f32 %v6706_v34, %v10101_v59  ;;  %11954 = vst [vmem:[#allocation30_spill] sm:$0xff] %v10149_v17  ;;  %v11958_v5 = vld [vmem:[#allocation58_spill] sm:$0xff] }
 0x7f6   :  { %v10146_v47 = vmax.f32 %v11952_v28, %v10138_v19  ;;  %11955 = vst [vmem:[#allocation59_spill] sm:$0xff] %v10151_v12  ;;  %v4076_v10 = vmul.f32 %v4044_v53, %v11956_v23  ;;  %v4079_v20 = vmul.f32 %v6708_v62, %v10099_v2  ;;  %v10155_v21 = vadd.f32 %v4295_v57, %v4291_v30  ;;  %v11961_v57 = vld [vmem:[#allocation82_spill] sm:$0xff] }
 0x7f7   :  { %v6710_v7 = vpop.eup %6709  ;;  %6719 = vtanh.f32 %v3990_v27  ;;  %v4203_v1 = vmul.f32 0.5, %v4187_v41  ;;  %v4075_v59 = vmul.f32 %v4043_v13, %v11958_v5  ;;  %v11962_v27 = vld [vmem:[#allocation61_spill] sm:$0xff] }
 0x7f8   :  { %11953 = vst [vmem:[#allocation56_spill] sm:$0xff] %v10146_v47  ;;  %v4250_v22 = vmul.f32 0.5, %v6710_v7  ;;  %v6712_v51 = vpop.eup %6711  ;;  %v10158_v42 = vadd.f32 %v4080_v24, %v4076_v10  ;;  %v11963_v41 = vmax.f32 %v11961_v57, %v11962_v27  ;;  %v10216_v57 = vld [vmem:[%s11044_s4 + $0x10] sm:$0xff] }
 0x7f9   :  { %11957 = vst [vmem:[#allocation34_spill] sm:$0xff] %v10155_v21  ;;  %6721 = vtanh.f32 %v4203_v1  ;;  %v6714_v55 = vpop.eup %6713  ;;  %v4037_v29 = vmul.f32 0.5, %v6712_v51  ;;  %v10162_v9 = vadd.f32 %v4079_v20, %v4075_v59  ;;  %v11965_v20 = vld [vmem:[#allocation177_spill] sm:$0xff]  ;;  %v11977_v27 = vld [vmem:[#allocation103_spill] sm:$0xff] }
 0x7fa   :  { %v4266_v31 = vadd.f32 0.5, %v4250_v22  ;;  %v6716_v6 = vpop.eup %6715  ;;  %11959 = vst [vmem:[#allocation21_spill] sm:$0xff] %v10158_v42  ;;  %6723 = vtanh.f32 %v10149_v17  ;;  %v12023_v47 = vld [vmem:[#allocation95_spill] sm:$0xff] }
 0x7fb   :  { %v6718_v34 = vpop.eup %6717  ;;  %6725 = vtanh.f32 %v10151_v12  ;;  %11960 = vst [vmem:[#allocation33_spill] sm:$0xff] %v10162_v9  ;;  %v4036_v2 = vmul.f32 0.5, %v6716_v6  ;;  %v4053_v0 = vadd.f32 0.5, %v4037_v29  ;;  %v11969_v29 = vld [vmem:[#allocation70_spill] sm:$0xff] }
 0x7fc   :  { %v4306_v38 = vmul.f32 %v6714_v55, %v4266_v31  ;;  %6727 = vtanh.f32 %v10155_v21  ;;  %v4035_v46 = vmul.f32 0.5, %v6718_v34  ;;  %v11966_v55 = vld [vmem:[#allocation123_spill] sm:$0xff]  ;;  %11976 = vst [vmem:[#allocation74_spill] sm:$0xff] %v10216_v57  ;;  %v12027_v12 = vld [vmem:[#allocation102_spill] sm:$0xff] }
 0x7fd   :  { %v6720_v53 = vpop.eup %6719  ;;  %6729 = vtanh.f32 %v10158_v42  ;;  %v4052_v28 = vadd.f32 0.5, %v4036_v2  ;;  %v11967_v31 = vmax.f32 %v11965_v20, %v11966_v55  ;;  %v10200_v2 = vld [vmem:[%s11044_s4 + $0x8] sm:$0xff]  ;;  %v10282_v20 = vld [vmem:[%s11044_s4 + $0x40] sm:$0xff]  ;;  %v11995_v55 = vld [vmem:[#allocation140_spill] sm:$0xff] }
 0x7fe   :  { %v4038_v48 = vmul.f32 0.5, %v6720_v53  ;;  %v10168_v13 = vmax.f32 %v11963_v41, %v4306_v38  ;;  %6731 = vtanh.f32 %v10162_v9  ;;  %v4051_v22 = vadd.f32 0.5, %v4035_v46  ;;  %v10183_v53 = vld [vmem:[%s11044_s4] sm:$0xff]  ;;  %11973 = vst [vmem:[#allocation78_spill] sm:$0xff] %v10200_v2  ;;  %v11978_v41 = vld [vmem:[#allocation112_spill] sm:$0xff] }
 0x7ff   :  { %v6722_v62 = vpop.eup %6721  ;;  %11970 = vst [vmem:[#allocation37_spill] sm:$0xff] %v10183_v53  ;;  %v11980_v46 = vld [vmem:[#allocation60_spill] sm:$0xff] }
 0x800   :  { %11964 = vst [vmem:[#allocation36_spill] sm:$0xff] %v10168_v13  ;;  %v4054_v61 = vadd.f32 0.5, %v4038_v48  ;;  %v4251_v30 = vmul.f32 0.5, %v6722_v62  ;;  %v6724_v16 = vpop.eup %6723  ;;  %v11975_v48 = vld [vmem:[#allocation64_spill] sm:$0xff]  ;;  %v12022_v13 = vld [vmem:[#allocation77_spill] sm:$0xff] }
 0x801   :  { %v6726_v40 = vpop.eup %6725  ;;  %v10227_v62 = vld [vmem:[%s11044_s4 + $0x18] sm:$0xff]  ;;  %11994 = vst [vmem:[#allocation43_spill] sm:$0xff] %v10282_v20  ;;  %v885_v21 = vadd.f32 %v12023_v47, %v12022_v13 }
 0x802   :  { %v4094_v7 = vmul.f32 %v6724_v16, %v4054_v61  ;;  %v4267_v24 = vadd.f32 0.5, %v4251_v30  ;;  %v6728_v1 = vpop.eup %6727  ;;  %v4093_v23 = vmul.f32 %v6726_v40, %v4053_v0  ;;  %11979 = vst [vmem:[#allocation40_spill] sm:$0xff] %v10227_v62  ;;  %v11981_v0 = vld [vmem:[#allocation118_spill] sm:$0xff]  ;;  %v11983_v30 = vld [vmem:[#allocation128_spill] sm:$0xff]  ;;  %v11984_v16 = vld [vmem:[#allocation57_spill] sm:$0xff] }
 0x803   :  { %v6730_v10 = vpop.eup %6729  ;;  %v10238_v61 = vld [vmem:[%s11044_s4 + $0x20] sm:$0xff]  ;;  %v10249_v40 = vld [vmem:[%s11044_s4 + $0x28] sm:$0xff]  ;;  %v12026_v42 = vld [vmem:[#allocation72_spill] sm:$0xff] }
 0x804   :  { %v4307_v51 = vmul.f32 %v6728_v1, %v4267_v24  ;;  %4344 = vmatpush.msra.mxu0 %v4094_v7  ;;  %4426 = vmatpush.msra.mxu1 %v4094_v7  ;;  %v4092_v5 = vmul.f32 %v6730_v10, %v4052_v28  ;;  %v6732_v59 = vpop.eup %6731  ;;  %11982 = vst [vmem:[#allocation71_spill] sm:$0xff] %v10238_v61  ;;  %v11986_v28 = vld [vmem:[#allocation107_spill] sm:$0xff]  ;;  %v11987_v7 = vld [vmem:[#allocation54_spill] sm:$0xff]  ;;  %v11993_v10 = vld [vmem:[#allocation125_spill] sm:$0xff] }
 0x805   :  { %v4091_v34 = vmul.f32 %v6732_v59, %v4051_v22  ;;  %11985 = vst [vmem:[#allocation41_spill] sm:$0xff] %v10249_v40  ;;  %v10260_v24 = vld [vmem:[%s11044_s4 + $0x30] sm:$0xff]  ;;  %v11998_v59 = vld [vmem:[#allocation145_spill] sm:$0xff]  ;;  %v888_v36 = vadd.f32 %v12027_v12, %v12026_v42 }
 0x806   :  { %v10175_v6 = vmax.f32 %v11967_v31, %v4307_v51  ;;  %4345 = vmatpush.msra.mxu0 %v4093_v23  ;;  %4427 = vmatpush.msra.mxu1 %v4093_v23  ;;  %11988 = vst [vmem:[#allocation42_spill] sm:$0xff] %v10260_v24  ;;  %v11989_v1 = vld [vmem:[#allocation131_spill] sm:$0xff]  ;;  %v11990_v22 = vld [vmem:[#allocation136_spill] sm:$0xff]  ;;  %v11996_v31 = vld [vmem:[#allocation129_spill] sm:$0xff] }
 0x807   :  { %4639 = vmatpush.msra.mxu2 %v4307_v51  ;;  %v10271_v51 = vld [vmem:[%s11044_s4 + $0x38] sm:$0xff] }
 0x808   :  { %11968 = vst [vmem:[#allocation66_spill] sm:$0xff] %v10175_v6  ;;  %4346 = vmatpush.msra.mxu0 %v4092_v5  ;;  %4428 = vmatpush.msra.mxu1 %v4092_v5  ;;  %v11992_v23 = vld [vmem:[#allocation120_spill] sm:$0xff]  ;;  %v10293_v5 = vld [vmem:[%s11044_s4 + $0x48] sm:$0xff]  ;;  %v12031_v47 = vld [vmem:[#allocation113_spill] sm:$0xff] }
 0x809   :  { %4640 = vmatpush.msra.mxu2 %v4306_v38  ;;  %v10191_v38 = vld [vmem:[%s11047_s7] sm:$0xff]  ;;  %11991 = vst [vmem:[#allocation87_spill] sm:$0xff] %v10271_v51  ;;  %v894_v13 = vadd.f32 %v12031_v47, %v11718_v15 }
 0x80a   :  { %4347 = vmatpush.msra.mxu0 %v4091_v34  ;;  %4429 = vmatpush.msra.mxu1 %v4091_v34  ;;  %11971 = vst [vmem:[#allocation38_spill] sm:$0xff] %v10191_v38  ;;  %v11999_v34 = vld [vmem:[#allocation134_spill] sm:$0xff] }
 0x80b   :  { %4641 = vmatpush.msra.mxu2 %v10138_v19  ;;  %6126 = vmatmul.msk.f32.vlgmr.msra.gmra.mxu0 %vm1294_vm3, %v11969_v29  ;;  %v11972_v19 = vld [vmem:[#allocation117_spill] sm:$0xff]  ;;  %11997 = vst [vmem:[#allocation84_spill] sm:$0xff] %v10293_v5  ;;  %v10304_v29 = vld [vmem:[%s11044_s4 + $0x50] sm:$0xff] }
 0x80c   :  { %6142 = vmatmul.msk.f32.vlgmr.msra.gmra.mxu1 %vm1294_vm3, %v10183_v53  ;;  %12000 = vst [vmem:[#allocation44_spill] sm:$0xff] %v10304_v29 }
 0x80d   :  { %4642 = vmatpush.msra.mxu2 %v10119_v4  ;;  %v10207_v4 = vld [vmem:[%s11047_s7 + $0x8] sm:$0xff] }
 0x80e   :  { %6158 = vmatmul.msk.f32.vlgmr.msra.gmra.mxu2 %vm1294_vm3, %v10191_v38  ;;  %11974 = vst [vmem:[#allocation39_spill] sm:$0xff] %v10207_v4 }
 0x813   :  { %6127 = vmatmul.msk.f32.gmra.mxu0 %vm1294_vm3, %v11972_v19  ;;  %v12001_v19 = vld [vmem:[#allocation150_spill] sm:$0xff] }
 0x814   :  { %6143 = vmatmul.msk.f32.gmra.mxu1 %vm1294_vm3, %v10200_v2  ;;  %v12020_v2 = vld [vmem:[#allocation181_spill] sm:$0xff] }
 0x816   :  { %6159 = vmatmul.msk.f32.gmra.mxu2 %vm1294_vm3, %v10207_v4 }
 0x81b   :  { %6128 = vmatmul.msk.f32.gmra.mxu0 %vm1294_vm3, %v11975_v48  ;;  %v12002_v48 = vld [vmem:[#allocation139_spill] sm:$0xff] }
 0x81c   :  { %6144 = vmatmul.msk.f32.gmra.mxu1 %vm1294_vm3, %v10216_v57 }
 0x81e   :  { %6160 = vmatmul.msk.f32.gmra.mxu2 %vm1294_vm3, %v11977_v27  ;;  %v10315_v27 = vld [vmem:[%s11044_s4 + $0x58] sm:$0xff] }
 0x81f   :  { %12003 = vst [vmem:[#allocation45_spill] sm:$0xff] %v10315_v27 }
 0x823   :  { %6129 = vmatmul.msk.f32.gmra.mxu0 %vm1294_vm3, %v11978_v41  ;;  %v12004_v41 = vld [vmem:[#allocation153_spill] sm:$0xff] }
 0x824   :  { %6145 = vmatmul.msk.f32.gmra.mxu1 %vm1294_vm3, %v10227_v62 }
 0x826   :  { %6161 = vmatmul.msk.f32.gmra.mxu2 %vm1294_vm3, %v11980_v46  ;;  %v12005_v46 = vld [vmem:[#allocation142_spill] sm:$0xff] }
 0x82b   :  { %6130 = vmatmul.msk.f32.gmra.mxu0 %vm1294_vm3, %v11981_v0  ;;  %v10326_v0 = vld [vmem:[%s11044_s4 + $0x60] sm:$0xff] }
 0x82c   :  { %6146 = vmatmul.msk.f32.gmra.mxu1 %vm1294_vm3, %v10238_v61  ;;  %12006 = vst [vmem:[#allocation46_spill] sm:$0xff] %v10326_v0 }
 0x82e   :  { %6162 = vmatmul.msk.f32.gmra.mxu2 %vm1294_vm3, %v11983_v30  ;;  %v12007_v30 = vld [vmem:[#allocation158_spill] sm:$0xff] }
 0x833   :  { %6131 = vmatmul.msk.f32.gmra.mxu0 %vm1294_vm3, %v11984_v16  ;;  %v12008_v16 = vld [vmem:[#allocation147_spill] sm:$0xff] }
 0x834   :  { %6147 = vmatmul.msk.f32.gmra.mxu1 %vm1294_vm3, %v10249_v40 }
 0x836   :  { %6163 = vmatmul.msk.f32.gmra.mxu2 %vm1294_vm3, %v11986_v28  ;;  %v10337_v28 = vld [vmem:[%s11044_s4 + $0x68] sm:$0xff] }
 0x837   :  { %12009 = vst [vmem:[#allocation47_spill] sm:$0xff] %v10337_v28 }
 0x83b   :  { %6132 = vmatmul.msk.f32.gmra.mxu0 %vm1294_vm3, %v11987_v7  ;;  %v12010_v7 = vld [vmem:[#allocation161_spill] sm:$0xff] }
 0x83c   :  { %6148 = vmatmul.msk.f32.gmra.mxu1 %vm1294_vm3, %v10260_v24 }
 0x83e   :  { %6164 = vmatmul.msk.f32.gmra.mxu2 %vm1294_vm3, %v11989_v1  ;;  %v12011_v1 = vld [vmem:[#allocation151_spill] sm:$0xff] }
 0x843   :  { %6133 = vmatmul.msk.f32.gmra.mxu0 %vm1294_vm3, %v11990_v22  ;;  %v10348_v22 = vld [vmem:[%s11044_s4 + $0x70] sm:$0xff] }
 0x844   :  { %6149 = vmatmul.msk.f32.gmra.mxu1 %vm1294_vm3, %v10271_v51  ;;  %12012 = vst [vmem:[#allocation48_spill] sm:$0xff] %v10348_v22 }
 0x846   :  { %6165 = vmatmul.msk.f32.gmra.mxu2 %vm1294_vm3, %v11992_v23  ;;  %v12013_v23 = vld [vmem:[#allocation164_spill] sm:$0xff] }
 0x84b   :  { %6134 = vmatmul.msk.f32.gmra.mxu0 %vm1294_vm3, %v11993_v10  ;;  %v12014_v10 = vld [vmem:[#allocation156_spill] sm:$0xff] }
 0x84c   :  { %6150 = vmatmul.msk.f32.gmra.mxu1 %vm1294_vm3, %v10282_v20 }
 0x84e   :  { %6166 = vmatmul.msk.f32.gmra.mxu2 %vm1294_vm3, %v11995_v55  ;;  %v10359_v55 = vld [vmem:[%s11044_s4 + $0x78] sm:$0xff] }
 0x84f   :  { %12015 = vst [vmem:[#allocation49_spill] sm:$0xff] %v10359_v55 }
 0x853   :  { %6135 = vmatmul.msk.f32.gmra.mxu0 %vm1294_vm3, %v11996_v31  ;;  %v12016_v31 = vld [vmem:[#allocation167_spill] sm:$0xff] }
 0x854   :  { %6151 = vmatmul.msk.f32.gmra.mxu1 %vm1294_vm3, %v10293_v5 }
 0x856   :  { %6167 = vmatmul.msk.f32.gmra.mxu2 %vm1294_vm3, %v11998_v59 }
 0x85b   :  { %6136 = vmatmul.msk.f32.gmra.mxu0 %vm1294_vm3, %v11999_v34 }
 0x85c   :  { %6152 = vmatmul.msk.f32.gmra.mxu1 %vm1294_vm3, %v10304_v29 }
 0x85e   :  { %6168 = vmatmul.msk.f32.gmra.mxu2 %vm1294_vm3, %v12001_v19 }
 0x863   :  { %6137 = vmatmul.msk.f32.gmra.mxu0 %vm1294_vm3, %v12002_v48 }
 0x864   :  { %6153 = vmatmul.msk.f32.gmra.mxu1 %vm1294_vm3, %v10315_v27 }
 0x866   :  { %6169 = vmatmul.msk.f32.gmra.mxu2 %vm1294_vm3, %v12004_v41 }
 0x86b   :  { %6138 = vmatmul.msk.f32.gmra.mxu0 %vm1294_vm3, %v12005_v46 }
 0x86c   :  { %6154 = vmatmul.msk.f32.gmra.mxu1 %vm1294_vm3, %v10326_v0 }
 0x86e   :  { %6170 = vmatmul.msk.f32.gmra.mxu2 %vm1294_vm3, %v12007_v30 }
 0x873   :  { %6139 = vmatmul.msk.f32.gmra.mxu0 %vm1294_vm3, %v12008_v16 }
 0x874   :  { %6155 = vmatmul.msk.f32.gmra.mxu1 %vm1294_vm3, %v10337_v28 }
 0x876   :  { %6171 = vmatmul.msk.f32.gmra.mxu2 %vm1294_vm3, %v12010_v7 }
 0x87b   :  { %6140 = vmatmul.msk.f32.gmra.mxu0 %vm1294_vm3, %v12011_v1 }
 0x87c   :  { %6156 = vmatmul.msk.f32.gmra.mxu1 %vm1294_vm3, %v10348_v22 }
 0x87e   :  { %6172 = vmatmul.msk.f32.gmra.mxu2 %vm1294_vm3, %v12013_v23 }
 0x883   :  { %6141 = vmatmul.msk.f32.gmra.mxu0 %vm1294_vm3, %v12014_v10 }
 0x884   :  { %6157 = vmatmul.msk.f32.gmra.mxu1 %vm1294_vm3, %v10359_v55 }
 0x886   :  { %6173 = vmatmul.msk.f32.gmra.mxu2 %vm1294_vm3, %v12016_v31 }
 0x888   :  { %v4349_v59 = vpop.f32.mrf.mxu0 }
 0x889   :  { %v4431_v34 = vpop.f32.mrf.mxu1  ;;  %v4350_v6 = vadd.f32 %v4349_v59, %v12020_v2  ;;  %v12030_v2 = vld [vmem:[#allocation182_spill] sm:$0xff] }
 0x88a   :  { %v4479_v17 = vadd.f32 %v4431_v34, %v885_v21 }
 0x890   :  { %v4352_v19 = vpop.f32.mrf.mxu0 }
 0x891   :  { %v4434_v48 = vpop.f32.mrf.mxu1  ;;  %v4644_v41 = vpop.f32.mrf.mxu2 }
 0x892   :  { %v4692_v39 = vadd.f32 %v4644_v41, %v4350_v6  ;;  %v4480_v59 = vadd.f32 %v4434_v48, %v888_v36 }
 0x894   :  { %v4496_v32 = vmul.f32 0.5, %v4480_v59  ;;  %v12038_v59 = vld [vmem:[#allocation146_spill] sm:$0xff] }
 0x898   :  { %v4355_v46 = vpop.f32.mrf.mxu0 }
 0x899   :  { %v4437_v30 = vpop.f32.mrf.mxu1  ;;  %v4647_v16 = vpop.f32.mrf.mxu2  ;;  %v4356_v12 = vadd.f32 %v4355_v46, %v11913_v52 }
 0x8a0   :  { %v4358_v7 = vpop.f32.mrf.mxu0 }
 0x8a1   :  { %v4440_v1 = vpop.f32.mrf.mxu1  ;;  %v4650_v23 = vpop.f32.mrf.mxu2 }
 0x8a2   :  { %v4482_v21 = vadd.f32 %v4440_v1, %v894_v13  ;;  %v4694_v36 = vadd.f32 %v4650_v23, %v4356_v12 }
 0x8a4   :  { %v4498_v48 = vmul.f32 0.5, %v4482_v21  ;;  %v4710_v23 = vmul.f32 0.5, %v4694_v36 }
 0x8a8   :  { %v4361_v10 = vpop.f32.mrf.mxu0 }
 0x8a9   :  { %v4443_v22 = vpop.f32.mrf.mxu1  ;;  %v4653_v28 = vpop.f32.mrf.mxu2  ;;  %v4362_v63 = vadd.f32 %v4361_v10, %v12028_v25 }
 0x8b0   :  { %v4364_v0 = vpop.f32.mrf.mxu0 }
 0x8b1   :  { %v4446_v27 = vpop.f32.mrf.mxu1  ;;  %v4656_v55 = vpop.f32.mrf.mxu2 }
 0x8b8   :  { %v10365_v29 = vpop.f32.mrf.mxu0 }
 0x8b9   :  { %v10367_v31 = vpop.f32.mrf.mxu1  ;;  %v4659_v5 = vpop.f32.mrf.mxu2  ;;  %v4368_v36 = vadd.f32 %v10365_v29, %v11636_v11 }
 0x8c0   :  { %v10369_v20 = vpop.f32.mrf.mxu0 }
 0x8c1   :  { %v4452_v51 = vpop.f32.mrf.mxu1  ;;  %v10371_v24 = vpop.f32.mrf.mxu2 }
 0x8c2   :  { %v4698_v29 = vadd.f32 %v10371_v24, %v4368_v36 }
 0x8c8   :  { %v4373_v40 = vpop.f32.mrf.mxu0 }
 0x8c9   :  { %v10373_v61 = vpop.f32.mrf.mxu1  ;;  %v10375_v62 = vpop.f32.mrf.mxu2 }
 0x8ca   :  { %12017 = vst [vmem:[#allocation50_spill] sm:$0xff] %v10373_v61  ;;  %v891_v61 = vadd.f32 %v12029_v37, %v11809_v43 }
 0x8cb   :  { %12018 = vst [vmem:[#allocation35_spill] sm:$0xff] %v10375_v62 }
 0x8cc   :  { %v4481_v62 = vadd.f32 %v4437_v30, %v891_v61  ;;  %v12035_v30 = vld [vmem:[#allocation130_spill] sm:$0xff] }
 0x8d0   :  { %v10377_v4 = vpop.f32.mrf.mxu0 }
 0x8d1   :  { %v10379_v57 = vpop.f32.mrf.mxu1  ;;  %v4668_v38 = vpop.f32.mrf.mxu2 }
 0x8d2   :  { %12019 = vst [vmem:[#allocation86_spill] sm:$0xff] %v10379_v57  ;;  %v4696_v57 = vadd.f32 %v4656_v55, %v4362_v63  ;;  %v4497_v63 = vmul.f32 0.5, %v4481_v62  ;;  %v12032_v55 = vld [vmem:[#allocation183_spill] sm:$0xff] }
 0x8d4   :  { %v4712_v34 = vmul.f32 0.5, %v4696_v57  ;;  %v4359_v57 = vadd.f32 %v4358_v7, %v11725_v26 }
 0x8d6   :  { %v4695_v10 = vadd.f32 %v4653_v28, %v4359_v57 }
 0x8d8   :  { %v10382_v53 = vpop.f32.mrf.mxu0 }
 0x8d9   :  { %12021 = vst [vmem:[#allocation68_spill] sm:$0xff] %v10382_v53  ;;  %v10386_v9 = vpop.f32.mrf.mxu1  ;;  %v10388_v60 = vpop.f32.mrf.mxu2  ;;  %v4353_v53 = vadd.f32 %v4352_v19, %v12030_v2  ;;  %v4365_v19 = vadd.f32 %v4364_v0, %v12032_v55  ;;  %v4374_v0 = vadd.f32 %v4373_v40, %v11914_v50 }
 0x8da   :  { %12024 = vst [vmem:[#allocation91_spill] sm:$0xff] %v10386_v9  ;;  %v4708_v9 = vmul.f32 0.5, %v4692_v39  ;;  %v12033_v39 = vld [vmem:[#allocation119_spill] sm:$0xff] }
 0x8db   :  { %12025 = vst [vmem:[#allocation73_spill] sm:$0xff] %v10388_v60  ;;  %v4495_v60 = vmul.f32 0.5, %v4479_v17  ;;  %v4693_v33 = vadd.f32 %v4647_v16, %v4353_v53  ;;  %v897_v17 = vadd.f32 %v12033_v39, %v11812_v45  ;;  %v12034_v53 = vld [vmem:[#allocation124_spill] sm:$0xff]  ;;  %v4697_v46 = vadd.f32 %v4659_v5, %v4365_v19  ;;  %v12036_v16 = vld [vmem:[#allocation135_spill] sm:$0xff] }
 0x8dc   :  { %6733 = vtanh.f32 %v4708_v9  ;;  %v900_v61 = vadd.f32 %v12034_v53, %v11814_v35  ;;  %v903_v9 = vadd.f32 %v12035_v30, %v11816_v58  ;;  %v906_v1 = vadd.f32 %v12036_v16, %v11714_v56  ;;  %v12041_v53 = vld [vmem:[#allocation162_spill] sm:$0xff] }
 0x8dd   :  { %6735 = vtanh.f32 %v4495_v60  ;;  %v4709_v13 = vmul.f32 0.5, %v4693_v33  ;;  %v4483_v62 = vadd.f32 %v4443_v22, %v897_v17  ;;  %v12037_v33 = vld [vmem:[#allocation141_spill] sm:$0xff]  ;;  %v4700_v5 = vadd.f32 %v4668_v38, %v4374_v0  ;;  %v12042_v16 = vld [vmem:[#allocation90_spill] sm:$0xff] }
 0x8de   :  { %6737 = vtanh.f32 %v4496_v32  ;;  %v10418_v32 = vadd.f32 %v12037_v33, %v11819_v54  ;;  %v4484_v60 = vadd.f32 %v4446_v27, %v900_v61  ;;  %v10422_v22 = vadd.f32 %v12038_v59, %v11821_v44  ;;  %v12040_v17 = vld [vmem:[#allocation157_spill] sm:$0xff]  ;;  %v12045_v33 = vld [vmem:[#allocation168_spill] sm:$0xff]  ;;  %v12046_v59 = vld [vmem:[#allocation35_spill] sm:$0xff] }
 0x8df   :  { %6739 = vtanh.f32 %v4712_v34  ;;  %v4713_v40 = vmul.f32 0.5, %v4697_v46  ;;  %v4486_v47 = vadd.f32 %v4452_v51, %v906_v1  ;;  %v12039_v34 = vld [vmem:[#allocation152_spill] sm:$0xff]  ;;  %v4485_v38 = vadd.f32 %v10367_v31, %v903_v9  ;;  %v12043_v1 = vld [vmem:[#allocation165_spill] sm:$0xff] }
 0x8e0   :  { %v10399_v6 = vpop.f32.mrf.mxu0  ;;  %6741 = vtanh.f32 %v4497_v63  ;;  %v10426_v28 = vadd.f32 %v12039_v34, %v11922_v14  ;;  %v4499_v63 = vmul.f32 0.5, %v4483_v62  ;;  %v918_v51 = vadd.f32 %v12040_v17, %v11924_v8  ;;  %v12048_v34 = vld [vmem:[#allocation85_spill] sm:$0xff] }
 0x8e1   :  { %v10401_v41 = vpop.f32.mrf.mxu1  ;;  %v10403_v37 = vpop.f32.mrf.mxu2  ;;  %6743 = vtanh.f32 %v4709_v13  ;;  %v10439_v61 = vadd.f32 %v12041_v53, %v11926_v3  ;;  %v4711_v13 = vmul.f32 0.5, %v4695_v10  ;;  %v4500_v46 = vmul.f32 0.5, %v4484_v60  ;;  %v12044_v10 = vld [vmem:[#allocation89_spill] sm:$0xff] }
 0x8e2   :  { %v6734_v7 = vpop.eup %6733  ;;  %6745 = vtanh.f32 %v4498_v48  ;;  %v4371_v30 = vadd.f32 %v10369_v20, %v11727_v18  ;;  %v4502_v9 = vmul.f32 0.5, %v4486_v47  ;;  %v4377_v62 = vadd.f32 %v10377_v4, %v8501_v49  ;;  %v12049_v4 = vld [vmem:[#allocation171_spill] sm:$0xff] }
 0x8e3   :  { %v6736_v21 = vpop.eup %6735  ;;  %6747 = vtanh.f32 %v4710_v23  ;;  %v4756_v48 = vmul.f32 0.5, %v6734_v7  ;;  %v10448_v23 = vadd.f32 %v12043_v1, %v12042_v16  ;;  %v10452_v60 = vadd.f32 %v12045_v33, %v12044_v10 }
 0x8e4   :  { %v6738_v39 = vpop.eup %6737  ;;  %6749 = vtanh.f32 %v4700_v5  ;;  %v4501_v24 = vmul.f32 0.5, %v4485_v38  ;;  %v4699_v20 = vadd.f32 %v12046_v59, %v4371_v30  ;;  %v10458_v36 = vadd.f32 %v12049_v4, %v12048_v34 }
 0x8e5   :  { %v6740_v57 = vpop.eup %6739  ;;  %6751 = vtanh.f32 %v4713_v40  ;;  %v12047_v40 = vld [vmem:[#allocation73_spill] sm:$0xff]  ;;  %v4543_v17 = vmul.f32 0.5, %v6736_v21  ;;  %v4714_v53 = vmul.f32 0.5, %v4698_v29  ;;  %v4544_v16 = vmul.f32 0.5, %v6738_v39 }
 0x8e6   :  { %v6742_v31 = vpop.eup %6741  ;;  %6753 = vtanh.f32 %v4499_v63  ;;  %v4760_v7 = vmul.f32 0.5, %v6740_v57  ;;  %v4701_v47 = vadd.f32 %v12047_v40, %v4377_v62  ;;  %v4772_v33 = vadd.f32 0.5, %v4756_v48  ;;  %v12050_v63 = vld [vmem:[#allocation26_spill] sm:$0xff] }
 0x8e7   :  { %v6744_v0 = vpop.eup %6743  ;;  %6755 = vtanh.f32 %v4711_v13  ;;  %v4545_v57 = vmul.f32 0.5, %v6742_v31  ;;  %v4715_v34 = vmul.f32 0.5, %v4699_v20  ;;  %v10461_v29 = vadd.f32 0.5, %v4543_v17 }
 0x8e8   :  { %v4385_v12 = vpop.f32.mrf.mxu0  ;;  %v6746_v5 = vpop.eup %6745  ;;  %6757 = vtanh.f32 %v4500_v46  ;;  %v4757_v10 = vmul.f32 0.5, %v6744_v0  ;;  %v4776_v4 = vadd.f32 0.5, %v4760_v7  ;;  %v10465_v31 = vadd.f32 0.5, %v4544_v16 }
 0x8e9   :  { %v10431_v27 = vpop.f32.mrf.mxu1  ;;  %v10433_v19 = vpop.f32.mrf.mxu2  ;;  %6759 = vtanh.f32 %v4502_v9  ;;  %v4386_v38 = vadd.f32 %v4385_v12, %v12050_v63  ;;  %v4546_v30 = vmul.f32 0.5, %v6746_v5  ;;  %v12051_v12 = vld [vmem:[#allocation86_spill] sm:$0xff]  ;;  %v12053_v5 = vld [vmem:[#allocation68_spill] sm:$0xff]  ;;  %v10469_v20 = vadd.f32 0.5, %v4545_v57  ;;  %v12055_v57 = vld [vmem:[#allocation91_spill] sm:$0xff] }
 0x8ea   :  { %v6748_v1 = vpop.eup %6747  ;;  %6761 = vtanh.f32 %v4501_v24  ;;  %v4488_v48 = vadd.f32 %v12051_v12, %v10422_v22  ;;  %v12052_v24 = vld [vmem:[#allocation11_spill] sm:$0xff]  ;;  %v4490_v17 = vadd.f32 %v10401_v41, %v918_v51  ;;  %v12056_v41 = vld [vmem:[#allocation32_spill] sm:$0xff] }
 0x8eb   :  { %v6750_v13 = vpop.eup %6749  ;;  %6763 = vtanh.f32 %v4701_v47  ;;  %v4758_v39 = vmul.f32 0.5, %v6748_v1  ;;  %v4380_v8 = vadd.f32 %v12053_v5, %v12052_v24  ;;  %v4773_v47 = vadd.f32 0.5, %v4757_v10 }
 0x8ec   :  { %v6752_v40 = vpop.eup %6751  ;;  %6765 = vtanh.f32 %v4714_v53  ;;  %v4812_v0 = vmul.f32 %v6750_v13, %v4772_v33  ;;  %v10472_v53 = vadd.f32 0.5, %v4546_v30 }
 0x8ed   :  { %v6754_v46 = vpop.eup %6753  ;;  %6767 = vtanh.f32 %v4715_v34  ;;  %v4702_v16 = vadd.f32 %v10403_v37, %v4380_v8  ;;  %v10476_v13 = vadd.f32 0.5, %v4758_v39 }
 0x8ee   :  { %v6756_v9 = vpop.eup %6755  ;;  %v4547_v12 = vmul.f32 0.5, %v6754_v46  ;;  %6769 = vtanh.f32 %v4488_v48  ;;  %v12057_v46 = vld [vmem:[#allocation50_spill] sm:$0xff] }
 0x8ef   :  { %v6758_v7 = vpop.eup %6757  ;;  %v4487_v39 = vadd.f32 %v12057_v46, %v10418_v32  ;;  %v12059_v32 = vld [vmem:[#allocation12_spill] sm:$0xff] }
 0x8f0   :  { %v4388_v3 = vpop.f32.mrf.mxu0  ;;  %v6760_v1 = vpop.eup %6759 }
 0x8f1   :  { %v4470_v62 = vpop.f32.mrf.mxu1  ;;  %v4680_v59 = vpop.f32.mrf.mxu2  ;;  %v4389_v51 = vadd.f32 %v4388_v3, %v12056_v41 }
 0x8f2   :  { %v4704_v21 = vadd.f32 %v4680_v59, %v4386_v38  ;;  %v4761_v38 = vmul.f32 0.5, %v6752_v40  ;;  %v12054_v59 = vld [vmem:[#allocation27_spill] sm:$0xff]  ;;  %v6762_v33 = vpop.eup %6761  ;;  %v4759_v40 = vmul.f32 0.5, %v6756_v9 }
 0x8f3   :  { %v4808_v22 = vmul.f32 %v4776_v4, %v12054_v59  ;;  %v6764_v10 = vpop.eup %6763  ;;  %v4548_v4 = vmul.f32 0.5, %v6758_v7  ;;  %v4550_v59 = vmul.f32 0.5, %v6760_v1  ;;  %v4549_v9 = vmul.f32 0.5, %v6762_v33 }
 0x8f4   :  { %v4720_v14 = vmul.f32 0.5, %v4704_v21  ;;  %v4489_v21 = vadd.f32 %v12055_v57, %v10426_v28  ;;  %v6766_v30 = vpop.eup %6765  ;;  %v4777_v34 = vadd.f32 0.5, %v4761_v38 }
 0x8f5   :  { %v10480_v5 = vadd.f32 %v4812_v0, %v4808_v22  ;;  %v4813_v0 = vmul.f32 %v6764_v10, %v4773_v47  ;;  %v12058_v22 = vld [vmem:[#allocation17_spill] sm:$0xff]  ;;  %v6768_v7 = vpop.eup %6767  ;;  %v4762_v38 = vmul.f32 0.5, %v6766_v30  ;;  %v4566_v46 = vadd.f32 0.5, %v4550_v59 }
 0x8f6   :  { %6771 = vtanh.f32 %v4720_v14  ;;  %v4383_v14 = vadd.f32 %v10399_v6, %v12058_v22  ;;  %v6770_v57 = vpop.eup %6769  ;;  %v4775_v6 = vadd.f32 0.5, %v4759_v40  ;;  %v4564_v30 = vadd.f32 0.5, %v4548_v4 }
 0x8f7   :  { %6773 = vtanh.f32 %v4490_v17  ;;  %v4492_v17 = vadd.f32 %v4470_v62, %v10448_v23 }
 0x8f8   :  { %6775 = vtanh.f32 %v4702_v16  ;;  %v4391_v3 = vpop.f32.mrf.mxu0  ;;  %v4809_v16 = vmul.f32 %v4777_v34, %v12059_v32  ;;  %v4703_v47 = vadd.f32 %v10433_v19, %v4383_v14  ;;  %v4778_v34 = vadd.f32 0.5, %v4762_v38 }
 0x8f9   :  { %v4473_v8 = vpop.f32.mrf.mxu1  ;;  %v4683_v37 = vpop.f32.mrf.mxu2  ;;  %6777 = vtanh.f32 %v4489_v21  ;;  %v4563_v21 = vadd.f32 0.5, %v4547_v12  ;;  %v4508_v59 = vmul.f32 0.5, %v4492_v17 }
 0x8fa   :  { %v4493_v28 = vadd.f32 %v4473_v8, %v10452_v60  ;;  %v4705_v48 = vadd.f32 %v4683_v37, %v4389_v51  ;;  %6779 = vtanh.f32 %v10480_v5  ;;  %v4491_v60 = vadd.f32 %v10431_v27, %v10439_v61  ;;  %v12061_v61 = vld [vmem:[#allocation30_spill] sm:$0xff] }
 0x8fb   :  { %6781 = vtanh.f32 %v4487_v39  ;;  %v10494_v23 = vadd.f32 %v4813_v0, %v4809_v16  ;;  %v4565_v37 = vadd.f32 0.5, %v4549_v9  ;;  %v4598_v19 = vmul.f32 %v4566_v46, %v12061_v61 }
 0x8fc   :  { %v4721_v1 = vmul.f32 0.5, %v4705_v48  ;;  %v6772_v33 = vpop.eup %6771  ;;  %v4509_v10 = vmul.f32 0.5, %v4493_v28  ;;  %v12060_v48 = vld [vmem:[#allocation29_spill] sm:$0xff]  ;;  %v4507_v14 = vmul.f32 0.5, %v4491_v60  ;;  %v4763_v9 = vmul.f32 0.5, %v6768_v7  ;;  %v12063_v7 = vld [vmem:[#allocation18_spill] sm:$0xff] }
 0x8fd   :  { %v6774_v51 = vpop.eup %6773  ;;  %v4768_v62 = vmul.f32 0.5, %v6772_v33  ;;  %v4392_v32 = vadd.f32 %v4391_v3, %v12060_v48  ;;  %v12062_v33 = vld [vmem:[#allocation15_spill] sm:$0xff] }
 0x8fe   :  { %6783 = vtanh.f32 %v4721_v1  ;;  %v6776_v8 = vpop.eup %6775  ;;  %v4602_v4 = vmul.f32 %v6774_v51, %v10472_v53  ;;  %v4810_v53 = vmul.f32 %v4778_v34, %v12062_v33  ;;  %v12064_v51 = vld [vmem:[#allocation59_spill] sm:$0xff] }
 0x8ff   :  { %v6778_v27 = vpop.eup %6777  ;;  %6785 = vtanh.f32 %v4703_v47  ;;  %v4784_v12 = vadd.f32 0.5, %v4768_v62  ;;  %v4814_v38 = vmul.f32 %v6776_v8, %v10476_v13  ;;  %v4597_v62 = vmul.f32 %v4565_v37, %v12064_v51  ;;  %v12114_v13 = vld [vmem:[#allocation46_spill] sm:$0xff] }
 0x900   :  { %v6780_v28 = vpop.eup %6779  ;;  %6787 = vtanh.f32 %v4509_v10  ;;  %v4601_v16 = vmul.f32 %v6778_v27, %v10469_v20  ;;  %v4600_v10 = vmul.f32 %v6770_v57, %v10465_v31  ;;  %v10510_v8 = vadd.f32 %v4602_v4, %v4598_v19  ;;  %v12069_v19 = vld [vmem:[#allocation33_spill] sm:$0xff] }
 0x901   :  { %v4476_v40 = vpop.f32.mrf.mxu1  ;;  %v4686_v39 = vpop.f32.mrf.mxu2  ;;  %6789 = vtanh.f32 %v10494_v23  ;;  %v10502_v3 = vmul.f32 %v6780_v28, %v4784_v12  ;;  %v10514_v12 = vadd.f32 %v4814_v38, %v4810_v53  ;;  %v4779_v57 = vadd.f32 0.5, %v4763_v9  ;;  %v10727_v53 = vld [vmem:[%s11046_s6 + $0x60] sm:$0xff] }
 0x902   :  { %v4494_v0 = vadd.f32 %v4476_v40, %v10458_v36  ;;  %v4706_v1 = vadd.f32 %v4686_v39, %v4392_v32  ;;  %v6782_v17 = vpop.eup %6781  ;;  %6791 = vtanh.f32 %v4508_v59  ;;  %v4394_v36 = vpop.f32.mrf.mxu0  ;;  %v12065_v59 = vld [vmem:[#allocation21_spill] sm:$0xff]  ;;  %v10516_v34 = vadd.f32 %v4601_v16, %v4597_v62  ;;  %v12068_v40 = vld [vmem:[#allocation23_spill] sm:$0xff]  ;;  %12113 = vst [vmem:[#allocation110_spill] sm:$0xff] %v10727_v53 }
 0x903   :  { %6793 = vtanh.f32 %v4507_v14  ;;  %v4596_v27 = vmul.f32 %v4564_v30, %v12065_v59  ;;  %v4599_v61 = vmul.f32 %v6782_v17, %v10461_v29  ;;  %12066 = vst [vmem:[#allocation175_spill] sm:$0xff] %v10514_v12  ;;  %v4395_v39 = vadd.f32 %v4394_v36, %v12068_v40  ;;  %v12130_v40 = vld [vmem:[#allocation106_spill] sm:$0xff] }
 0x904   :  { %v4510_v46 = vmul.f32 0.5, %v4494_v0  ;;  %v4722_v60 = vmul.f32 0.5, %v4706_v1  ;;  %v6784_v47 = vpop.eup %6783  ;;  %12067 = vst [vmem:[#allocation75_spill] sm:$0xff] %v10516_v34  ;;  %v4595_v28 = vmul.f32 %v4563_v21, %v12069_v19 }
 0x905   :  { %v4769_v32 = vmul.f32 0.5, %v6784_v47  ;;  %v6786_v20 = vpop.eup %6785  ;;  %v10520_v4 = vadd.f32 %v4600_v10, %v4596_v27 }
 0x906   :  { %6795 = vtanh.f32 %v4510_v46  ;;  %v6788_v31 = vpop.eup %6787  ;;  %v4815_v29 = vmul.f32 %v6786_v20, %v4775_v6  ;;  %v10525_v9 = vadd.f32 %v4599_v61, %v4595_v28 }
 0x907   :  { %6797 = vtanh.f32 %v4722_v60  ;;  %v4785_v14 = vadd.f32 0.5, %v4769_v32  ;;  %v6790_v37 = vpop.eup %6789  ;;  %v4557_v16 = vmul.f32 0.5, %v6788_v31  ;;  %v12071_v60 = vld [vmem:[#allocation34_spill] sm:$0xff] }
 0x908   :  { %v6792_v1 = vpop.eup %6791  ;;  %6799 = vtanh.f32 %v10510_v8  ;;  %v4811_v47 = vmul.f32 %v4779_v57, %v12071_v60 }
 0x909   :  { %v4689_v0 = vpop.f32.mrf.mxu2  ;;  %v10523_v38 = vmul.f32 %v6790_v37, %v4785_v14  ;;  %v6794_v17 = vpop.eup %6793  ;;  %6801 = vtanh.f32 %v10514_v12  ;;  %v4556_v6 = vmul.f32 0.5, %v6792_v1  ;;  %v4573_v20 = vadd.f32 0.5, %v4557_v16 }
 0x90a   :  { %v4707_v30 = vadd.f32 %v4689_v0, %v4395_v39  ;;  %6803 = vtanh.f32 %v10516_v34  ;;  %v10533_v51 = vadd.f32 %v4815_v29, %v4811_v47  ;;  %v4555_v32 = vmul.f32 0.5, %v6794_v17  ;;  %v12129_v29 = vld [vmem:[#allocation83_spill] sm:$0xff] }
 0x90b   :  { %12070 = vst [vmem:[#allocation67_spill] sm:$0xff] %v10523_v38  ;;  %6805 = vtanh.f32 %v10520_v4  ;;  %v4572_v57 = vadd.f32 0.5, %v4556_v6  ;;  %v10546_v6 = vld [vmem:[%s11046_s6] sm:$0xff] }
 0x90c   :  { %v6796_v46 = vpop.eup %6795  ;;  %v4723_v21 = vmul.f32 0.5, %v4707_v30  ;;  %12073 = vst [vmem:[#allocation62_spill] sm:$0xff] %v10533_v51  ;;  %v4571_v28 = vadd.f32 0.5, %v4555_v32  ;;  %v10711_v32 = vld [vmem:[%s11046_s6 + $0x58] sm:$0xff] }
 0x90d   :  { %v6798_v10 = vpop.eup %6797  ;;  %v4558_v36 = vmul.f32 0.5, %v6796_v46  ;;  %12077 = vst [vmem:[#allocation174_spill] sm:$0xff] %v10546_v6  ;;  %v12111_v30 = vld [vmem:[#allocation45_spill] sm:$0xff] }
 0x90e   :  { %v4770_v62 = vmul.f32 0.5, %v6798_v10  ;;  %6807 = vtanh.f32 %v4723_v21  ;;  %v6800_v27 = vpop.eup %6799  ;;  %12110 = vst [vmem:[#allocation179_spill] sm:$0xff] %v10711_v32 }
 0x90f   :  { %v4574_v59 = vadd.f32 0.5, %v4558_v36  ;;  %6809 = vtanh.f32 %v10525_v9  ;;  %v6802_v31 = vpop.eup %6801  ;;  %v12078_v36 = vld [vmem:[#allocation37_spill] sm:$0xff] }
 0x910   :  { %v4786_v61 = vadd.f32 0.5, %v4770_v62  ;;  %v6804_v39 = vpop.eup %6803  ;;  %6811 = vtanh.f32 %v10533_v51  ;;  %v953_v51 = vadd.f32 %v12129_v29, %v12026_v42 }
 0x911   :  { %v4614_v14 = vmul.f32 %v6800_v27, %v4574_v59  ;;  %v6806_v19 = vpop.eup %6805  ;;  %v4613_v0 = vmul.f32 %v6804_v39, %v4573_v20  ;;  %v10561_v20 = vld [vmem:[%s11046_s6 + $0x8] sm:$0xff]  ;;  %v12087_v39 = vld [vmem:[#allocation40_spill] sm:$0xff] }
 0x912   :  { %v10537_v37 = vmul.f32 %v6802_v31, %v4786_v61  ;;  %v4612_v16 = vmul.f32 %v6806_v19, %v4572_v57  ;;  %12080 = vst [vmem:[#allocation99_spill] sm:$0xff] %v10561_v20  ;;  %v12081_v59 = vld [vmem:[#allocation78_spill] sm:$0xff]  ;;  %v10572_v61 = vld [vmem:[%s11046_s6 + $0x10] sm:$0xff] }
 0x913   :  { %4864 = vmatpush.msra.mxu3 %v4614_v14  ;;  %4946 = vmatpush.msrb.mxu0 %v4614_v14  ;;  %v12082_v27 = vld [vmem:[#allocation38_spill] sm:$0xff]  ;;  %12083 = vst [vmem:[#allocation180_spill] sm:$0xff] %v10572_v61  ;;  %v12085_v57 = vld [vmem:[#allocation39_spill] sm:$0xff]  ;;  %v10583_v14 = vld [vmem:[%s11046_s6 + $0x18] sm:$0xff] }
 0x914   :  { %12074 = vst [vmem:[#allocation172_spill] sm:$0xff] %v10537_v37  ;;  %v6808_v1 = vpop.eup %6807  ;;  %v12084_v31 = vld [vmem:[#allocation74_spill] sm:$0xff]  ;;  %v10592_v19 = vld [vmem:[%s11047_s7 + $0x10] sm:$0xff] }
 0x915   :  { %v4771_v17 = vmul.f32 0.5, %v6808_v1  ;;  %4865 = vmatpush.msra.mxu3 %v4613_v0  ;;  %4947 = vmatpush.msrb.mxu0 %v4613_v0  ;;  %v6810_v46 = vpop.eup %6809  ;;  %12086 = vst [vmem:[#allocation100_spill] sm:$0xff] %v10583_v14  ;;  %v12090_v0 = vld [vmem:[#allocation71_spill] sm:$0xff]  ;;  %v10608_v1 = vld [vmem:[%s11047_s7 + $0x18] sm:$0xff] }
 0x916   :  { %v4611_v47 = vmul.f32 %v6810_v46, %v4571_v28  ;;  %v6812_v21 = vpop.eup %6811  ;;  %12088 = vst [vmem:[#allocation101_spill] sm:$0xff] %v10592_v19  ;;  %v10599_v28 = vld [vmem:[%s11046_s6 + $0x20] sm:$0xff] }
 0x917   :  { %v4787_v60 = vadd.f32 0.5, %v4771_v17  ;;  %4866 = vmatpush.msra.mxu3 %v4612_v16  ;;  %4948 = vmatpush.msrb.mxu0 %v4612_v16  ;;  %12089 = vst [vmem:[#allocation104_spill] sm:$0xff] %v10599_v28  ;;  %v10615_v17 = vld [vmem:[%s11046_s6 + $0x28] sm:$0xff]  ;;  %v12093_v16 = vld [vmem:[#allocation41_spill] sm:$0xff] }
 0x918   :  { %12091 = vst [vmem:[#allocation109_spill] sm:$0xff] %v10608_v1  ;;  %v10624_v46 = vld [vmem:[%s11047_s7 + $0x20] sm:$0xff] }
 0x919   :  { %v10541_v10 = vmul.f32 %v6812_v21, %v4787_v60  ;;  %4867 = vmatpush.msra.mxu3 %v4611_v47  ;;  %4949 = vmatpush.msrb.mxu0 %v4611_v47  ;;  %12092 = vst [vmem:[#allocation114_spill] sm:$0xff] %v10615_v17  ;;  %v10631_v60 = vld [vmem:[%s11046_s6 + $0x30] sm:$0xff]  ;;  %v12096_v47 = vld [vmem:[#allocation42_spill] sm:$0xff] }
 0x91a   :  { %6174 = vmatmul.msk.f32.vlgmr.msra.gmra.mxu3 %vm1294_vm3, %v10546_v6  ;;  %6190 = vmatmul.msk.f32.vlgmr.msrb.gmra.mxu0 %vm1294_vm3, %v12078_v36  ;;  %12094 = vst [vmem:[#allocation96_spill] sm:$0xff] %v10624_v46  ;;  %v10640_v21 = vld [vmem:[%s11047_s7 + $0x28] sm:$0xff]  ;;  %v10647_v36 = vld [vmem:[%s11046_s6 + $0x38] sm:$0xff] }
 0x91b   :  { %12076 = vst [vmem:[#allocation176_spill] sm:$0xff] %v10541_v10  ;;  %5159 = vmatpush.msrb.mxu1 %v10541_v10 }
 0x91c   :  { %12095 = vst [vmem:[#allocation25_spill] sm:$0xff] %v10631_v60 }
 0x91d   :  { %5160 = vmatpush.msrb.mxu1 %v10537_v37  ;;  %12097 = vst [vmem:[#allocation13_spill] sm:$0xff] %v10640_v21 }
 0x91e   :  { %12098 = vst [vmem:[#allocation28_spill] sm:$0xff] %v10647_v36 }
 0x91f   :  { %5161 = vmatpush.msrb.mxu1 %v10523_v38 }
 0x921   :  { %5162 = vmatpush.msrb.mxu1 %v10502_v3 }
 0x922   :  { %6175 = vmatmul.msk.f32.gmra.mxu3 %vm1294_vm3, %v10561_v20  ;;  %6191 = vmatmul.msk.f32.gmra.mxu0 %vm1294_vm3, %v12081_v59  ;;  %v12099_v59 = vld [vmem:[#allocation87_spill] sm:$0xff]  ;;  %v12128_v20 = vld [vmem:[#allocation76_spill] sm:$0xff] }
 0x923   :  { %6206 = vmatmul.msk.f32.vlgmr.msrb.gmra.mxu1 %vm1294_vm3, %v12082_v27  ;;  %v10656_v27 = vld [vmem:[%s11047_s7 + $0x30] sm:$0xff] }
 0x924   :  { %12100 = vst [vmem:[#allocation16_spill] sm:$0xff] %v10656_v27 }
 0x92a   :  { %6176 = vmatmul.msk.f32.gmra.mxu3 %vm1294_vm3, %v10572_v61  ;;  %6192 = vmatmul.msk.f32.gmra.mxu0 %vm1294_vm3, %v12084_v31  ;;  %v10663_v31 = vld [vmem:[%s11046_s6 + $0x40] sm:$0xff] }
 0x92b   :  { %6207 = vmatmul.msk.f32.gmra.mxu1 %vm1294_vm3, %v12085_v57  ;;  %12101 = vst [vmem:[#allocation19_spill] sm:$0xff] %v10663_v31  ;;  %v12102_v57 = vld [vmem:[#allocation43_spill] sm:$0xff]  ;;  %v12127_v61 = vld [vmem:[#allocation77_spill] sm:$0xff] }
 0x92c   :  { %v950_v10 = vadd.f32 %v12128_v20, %v12127_v61 }
 0x932   :  { %6177 = vmatmul.msk.f32.gmra.mxu3 %vm1294_vm3, %v10583_v14  ;;  %6193 = vmatmul.msk.f32.gmra.mxu0 %vm1294_vm3, %v12087_v39  ;;  %v10672_v39 = vld [vmem:[%s11047_s7 + $0x38] sm:$0xff] }
 0x933   :  { %6208 = vmatmul.msk.f32.gmra.mxu1 %vm1294_vm3, %v10592_v19  ;;  %12103 = vst [vmem:[#allocation31_spill] sm:$0xff] %v10672_v39 }
 0x93a   :  { %6178 = vmatmul.msk.f32.gmra.mxu3 %vm1294_vm3, %v10599_v28  ;;  %6194 = vmatmul.msk.f32.gmra.mxu0 %vm1294_vm3, %v12090_v0  ;;  %v10679_v0 = vld [vmem:[%s11046_s6 + $0x48] sm:$0xff] }
 0x93b   :  { %6209 = vmatmul.msk.f32.gmra.mxu1 %vm1294_vm3, %v10608_v1  ;;  %12104 = vst [vmem:[#allocation51_spill] sm:$0xff] %v10679_v0 }
 0x942   :  { %6179 = vmatmul.msk.f32.gmra.mxu3 %vm1294_vm3, %v10615_v17  ;;  %6195 = vmatmul.msk.f32.gmra.mxu0 %vm1294_vm3, %v12093_v16  ;;  %v12105_v16 = vld [vmem:[#allocation84_spill] sm:$0xff]  ;;  %v12126_v17 = vld [vmem:[#allocation98_spill] sm:$0xff] }
 0x943   :  { %6210 = vmatmul.msk.f32.gmra.mxu1 %vm1294_vm3, %v10624_v46  ;;  %v962_v1 = vadd.f32 %v12126_v17, %v11812_v45  ;;  %v965_v45 = vadd.f32 %v12130_v40, %v11814_v35 }
 0x94a   :  { %6180 = vmatmul.msk.f32.gmra.mxu3 %vm1294_vm3, %v10631_v60  ;;  %6196 = vmatmul.msk.f32.gmra.mxu0 %vm1294_vm3, %v12096_v47  ;;  %v10688_v47 = vld [vmem:[%s11047_s7 + $0x40] sm:$0xff] }
 0x94b   :  { %6211 = vmatmul.msk.f32.gmra.mxu1 %vm1294_vm3, %v10640_v21  ;;  %12106 = vst [vmem:[#allocation93_spill] sm:$0xff] %v10688_v47 }
 0x952   :  { %6181 = vmatmul.msk.f32.gmra.mxu3 %vm1294_vm3, %v10647_v36  ;;  %6197 = vmatmul.msk.f32.gmra.mxu0 %vm1294_vm3, %v12099_v59  ;;  %v10695_v59 = vld [vmem:[%s11046_s6 + $0x50] sm:$0xff] }
 0x953   :  { %6212 = vmatmul.msk.f32.gmra.mxu1 %vm1294_vm3, %v10656_v27  ;;  %12107 = vst [vmem:[#allocation97_spill] sm:$0xff] %v10695_v59 }
 0x95a   :  { %6182 = vmatmul.msk.f32.gmra.mxu3 %vm1294_vm3, %v10663_v31  ;;  %6198 = vmatmul.msk.f32.gmra.mxu0 %vm1294_vm3, %v12102_v57  ;;  %v12108_v57 = vld [vmem:[#allocation44_spill] sm:$0xff] }
 0x95b   :  { %6213 = vmatmul.msk.f32.gmra.mxu1 %vm1294_vm3, %v10672_v39 }
 0x962   :  { %6183 = vmatmul.msk.f32.gmra.mxu3 %vm1294_vm3, %v10679_v0  ;;  %6199 = vmatmul.msk.f32.gmra.mxu0 %vm1294_vm3, %v12105_v16  ;;  %v10704_v16 = vld [vmem:[%s11047_s7 + $0x48] sm:$0xff] }
 0x963   :  { %6214 = vmatmul.msk.f32.gmra.mxu1 %vm1294_vm3, %v10688_v47  ;;  %12109 = vst [vmem:[#allocation105_spill] sm:$0xff] %v10704_v16 }
 0x96a   :  { %6184 = vmatmul.msk.f32.gmra.mxu3 %vm1294_vm3, %v10695_v59  ;;  %6200 = vmatmul.msk.f32.gmra.mxu0 %vm1294_vm3, %v12108_v57  ;;  %v10720_v57 = vld [vmem:[%s11047_s7 + $0x50] sm:$0xff] }
 0x96b   :  { %6215 = vmatmul.msk.f32.gmra.mxu1 %vm1294_vm3, %v10704_v16  ;;  %12112 = vst [vmem:[#allocation20_spill] sm:$0xff] %v10720_v57 }
 0x972   :  { %6185 = vmatmul.msk.f32.gmra.mxu3 %vm1294_vm3, %v10711_v32  ;;  %6201 = vmatmul.msk.f32.gmra.mxu0 %vm1294_vm3, %v12111_v30  ;;  %v10736_v30 = vld [vmem:[%s11047_s7 + $0x58] sm:$0xff] }
 0x973   :  { %6216 = vmatmul.msk.f32.gmra.mxu1 %vm1294_vm3, %v10720_v57  ;;  %12115 = vst [vmem:[#allocation115_spill] sm:$0xff] %v10736_v30  ;;  %v10743_v57 = vld [vmem:[%s11046_s6 + $0x68] sm:$0xff]  ;;  %v10791_v32 = vld [vmem:[%s11047_s7 + $0x78] sm:$0xff] }
 0x974   :  { %12116 = vst [vmem:[#allocation121_spill] sm:$0xff] %v10743_v57 }
 0x975   :  { %12125 = vst [vmem:[#allocation154_spill] sm:$0xff] %v10791_v32 }
 0x97a   :  { %6186 = vmatmul.msk.f32.gmra.mxu3 %vm1294_vm3, %v10727_v53  ;;  %6202 = vmatmul.msk.f32.gmra.mxu0 %vm1294_vm3, %v12114_v13  ;;  %v12117_v53 = vld [vmem:[#allocation47_spill] sm:$0xff]  ;;  %v10752_v13 = vld [vmem:[%s11047_s7 + $0x60] sm:$0xff] }
 0x97b   :  { %6217 = vmatmul.msk.f32.gmra.mxu1 %vm1294_vm3, %v10736_v30  ;;  %12118 = vst [vmem:[#allocation126_spill] sm:$0xff] %v10752_v13  ;;  %v10759_v30 = vld [vmem:[%s11046_s6 + $0x70] sm:$0xff] }
 0x97c   :  { %12119 = vst [vmem:[#allocation132_spill] sm:$0xff] %v10759_v30 }
 0x982   :  { %6187 = vmatmul.msk.f32.gmra.mxu3 %vm1294_vm3, %v10743_v57  ;;  %6203 = vmatmul.msk.f32.gmra.mxu0 %vm1294_vm3, %v12117_v53  ;;  %v12120_v57 = vld [vmem:[#allocation48_spill] sm:$0xff]  ;;  %v10768_v53 = vld [vmem:[%s11047_s7 + $0x68] sm:$0xff] }
 0x983   :  { %6218 = vmatmul.msk.f32.gmra.mxu1 %vm1294_vm3, %v10752_v13  ;;  %12121 = vst [vmem:[#allocation137_spill] sm:$0xff] %v10768_v53  ;;  %v10775_v13 = vld [vmem:[%s11046_s6 + $0x78] sm:$0xff] }
 0x984   :  { %12122 = vst [vmem:[#allocation143_spill] sm:$0xff] %v10775_v13 }
 0x98a   :  { %6188 = vmatmul.msk.f32.gmra.mxu3 %vm1294_vm3, %v10759_v30  ;;  %6204 = vmatmul.msk.f32.gmra.mxu0 %vm1294_vm3, %v12120_v57  ;;  %v12123_v30 = vld [vmem:[#allocation49_spill] sm:$0xff]  ;;  %v10784_v57 = vld [vmem:[%s11047_s7 + $0x70] sm:$0xff] }
 0x98b   :  { %6219 = vmatmul.msk.f32.gmra.mxu1 %vm1294_vm3, %v10768_v53  ;;  %12124 = vst [vmem:[#allocation148_spill] sm:$0xff] %v10784_v57 }
 0x992   :  { %6189 = vmatmul.msk.f32.gmra.mxu3 %vm1294_vm3, %v10775_v13  ;;  %6205 = vmatmul.msk.f32.gmra.mxu0 %vm1294_vm3, %v12123_v30 }
 0x993   :  { %6220 = vmatmul.msk.f32.gmra.mxu1 %vm1294_vm3, %v10784_v57 }
 0x997   :  { %v4951_v53 = vpop.f32.mrf.mxu0 }
 0x998   :  { %v4999_v6 = vadd.f32 %v4951_v53, %v950_v10 }
 0x99a   :  { %v5015_v17 = vmul.f32 0.5, %v4999_v6 }
 0x99b   :  { %6221 = vmatmul.msk.f32.gmra.mxu1 %vm1294_vm3, %v10791_v32 }
 0x99d   :  { %v4869_v13 = vpop.f32.mrf.mxu3 }
 0x99f   :  { %v4954_v16 = vpop.f32.mrf.mxu0 }
 0x9a0   :  { %v5164_v30 = vpop.f32.mrf.mxu1  ;;  %v5000_v34 = vadd.f32 %v4954_v16, %v953_v51  ;;  %v12132_v51 = vld [vmem:[#allocation122_spill] sm:$0xff] }
 0x9a2   :  { %v5016_v42 = vmul.f32 0.5, %v5000_v34 }
 0x9a5   :  { %v4872_v59 = vpop.f32.mrf.mxu3 }
 0x9a7   :  { %v10795_v47 = vpop.f32.mrf.mxu0 }
 0x9a8   :  { %v5167_v0 = vpop.f32.mrf.mxu1 }
 0x9ad   :  { %v10797_v39 = vpop.f32.mrf.mxu3 }
 0x9af   :  { %v10799_v31 = vpop.f32.mrf.mxu0 }
 0x9b0   :  { %v10801_v57 = vpop.f32.mrf.mxu1 }
 0x9b5   :  { %v10803_v27 = vpop.f32.mrf.mxu3 }
 0x9b7   :  { %v4963_v36 = vpop.f32.mrf.mxu0 }
 0x9b8   :  { %v10805_v21 = vpop.f32.mrf.mxu1  ;;  %v5003_v19 = vadd.f32 %v4963_v36, %v962_v1  ;;  %v12131_v1 = vld [vmem:[#allocation181_spill] sm:$0xff] }
 0x9b9   :  { %v4870_v36 = vadd.f32 %v4869_v13, %v12131_v1 }
 0x9ba   :  { %v5019_v37 = vmul.f32 0.5, %v5003_v19  ;;  %v4873_v19 = vadd.f32 %v4872_v59, %v12030_v2 }
 0x9bb   :  { %v5212_v29 = vadd.f32 %v5164_v30, %v4870_v36 }
 0x9bc   :  { %6813 = vtanh.f32 %v5019_v37  ;;  %v974_v37 = vadd.f32 %v12132_v51, %v11819_v54 }
 0x9bd   :  { %v4881_v60 = vpop.f32.mrf.mxu3  ;;  %6815 = vtanh.f32 %v5015_v17  ;;  %v5228_v6 = vmul.f32 0.5, %v5212_v29 }
 0x9be   :  { %v4882_v38 = vadd.f32 %v4881_v60, %v12028_v25  ;;  %6817 = vtanh.f32 %v5016_v42 }
 0x9bf   :  { %v4966_v32 = vpop.f32.mrf.mxu0 }
 0x9c0   :  { %v5176_v46 = vpop.f32.mrf.mxu1  ;;  %v5004_v20 = vadd.f32 %v4966_v32, %v965_v45 }
 0x9c1   :  { %v5216_v61 = vadd.f32 %v5176_v46, %v4882_v38  ;;  %v5213_v38 = vadd.f32 %v5167_v0, %v4873_v19 }
 0x9c2   :  { %v5020_v60 = vmul.f32 0.5, %v5004_v20  ;;  %v6814_v53 = vpop.eup %6813 }
 0x9c3   :  { %v5232_v25 = vmul.f32 0.5, %v5216_v61  ;;  %v6816_v16 = vpop.eup %6815  ;;  %v5067_v46 = vmul.f32 0.5, %v6814_v53  ;;  %v12133_v61 = vld [vmem:[#allocation127_spill] sm:$0xff] }
 0x9c4   :  { %6819 = vtanh.f32 %v5020_v60  ;;  %v5063_v30 = vmul.f32 0.5, %v6816_v16  ;;  %v6818_v17 = vpop.eup %6817  ;;  %v977_v42 = vadd.f32 %v12133_v61, %v11821_v44 }
 0x9c5   :  { %v4884_v28 = vpop.f32.mrf.mxu3  ;;  %6821 = vtanh.f32 %v5232_v25  ;;  %v5083_v45 = vadd.f32 0.5, %v5067_v46 }
 0x9c6   :  { %v4885_v35 = vadd.f32 %v4884_v28, %v12032_v55  ;;  %v5229_v28 = vmul.f32 0.5, %v5213_v38  ;;  %v5079_v19 = vadd.f32 0.5, %v5063_v30  ;;  %v5064_v38 = vmul.f32 0.5, %v6818_v17 }
 0x9c7   :  { %v10809_v14 = vpop.f32.mrf.mxu0  ;;  %v5115_v25 = vmul.f32 %v5083_v45, %v10525_v9 }
 0x9c8   :  { %v5179_v62 = vpop.f32.mrf.mxu1 }
 0x9c9   :  { %v5217_v59 = vadd.f32 %v5179_v62, %v4885_v35 }
 0x9ca   :  { %v6820_v20 = vpop.eup %6819 }
 0x9cb   :  { %v5233_v36 = vmul.f32 0.5, %v5217_v59  ;;  %v6822_v29 = vpop.eup %6821 }
 0x9cc   :  { %v5280_v16 = vmul.f32 0.5, %v6822_v29 }
 0x9cd   :  { %v10816_v33 = vpop.f32.mrf.mxu3 }
 0x9cf   :  { %v10821_v12 = vpop.f32.mrf.mxu0 }
 0x9d0   :  { %v10823_v10 = vpop.f32.mrf.mxu1 }
 0x9d5   :  { %v10827_v40 = vpop.f32.mrf.mxu3 }
 0x9d7   :  { %v4975_v32 = vpop.f32.mrf.mxu0 }
 0x9d8   :  { %v5007_v34 = vadd.f32 %v4975_v32, %v974_v37  ;;  %v10831_v13 = vpop.f32.mrf.mxu1  ;;  %v5068_v37 = vmul.f32 0.5, %v6820_v20 }
 0x9da   :  { %6823 = vtanh.f32 %v5007_v34  ;;  %v5084_v34 = vadd.f32 0.5, %v5068_v37 }
 0x9db   :  { %6825 = vtanh.f32 %v5228_v6 }
 0x9dc   :  { %6827 = vtanh.f32 %v5229_v28  ;;  %v5296_v28 = vadd.f32 0.5, %v5280_v16  ;;  %v5116_v17 = vmul.f32 %v5084_v34, %v10520_v4 }
 0x9dd   :  { %v4893_v54 = vpop.f32.mrf.mxu3  ;;  %6829 = vtanh.f32 %v5233_v36 }
 0x9de   :  { %v4894_v0 = vadd.f32 %v4893_v54, %v11914_v50  ;;  %v5080_v54 = vadd.f32 0.5, %v5064_v38 }
 0x9df   :  { %v4978_v60 = vpop.f32.mrf.mxu0 }
 0x9e0   :  { %v6824_v53 = vpop.eup %6823  ;;  %v5008_v62 = vadd.f32 %v4978_v60, %v977_v42  ;;  %v5188_v35 = vpop.f32.mrf.mxu1  ;;  %v5328_v60 = vmul.f32 %v5296_v28, %v10480_v5  ;;  %v4876_v28 = vadd.f32 %v10797_v39, %v11913_v52 }
 0x9e1   :  { %v6826_v51 = vpop.eup %6825  ;;  %v5119_v6 = vmul.f32 %v6824_v53, %v5079_v19  ;;  %v5220_v32 = vadd.f32 %v5188_v35, %v4894_v0 }
 0x9e2   :  { %6831 = vtanh.f32 %v5008_v62  ;;  %v5276_v46 = vmul.f32 0.5, %v6826_v51  ;;  %v6828_v30 = vpop.eup %6827  ;;  %v5214_v39 = vadd.f32 %v10801_v57, %v4876_v28 }
 0x9e3   :  { %v10837_v44 = vadd.f32 %v5119_v6, %v5115_v25  ;;  %6833 = vtanh.f32 %v5220_v32  ;;  %v6830_v45 = vpop.eup %6829  ;;  %v5277_v35 = vmul.f32 0.5, %v6828_v30 }
 0x9e4   :  { %v5292_v20 = vadd.f32 0.5, %v5276_v46  ;;  %v5281_v53 = vmul.f32 0.5, %v6830_v45 }
 0x9e5   :  { %v4896_v59 = vpop.f32.mrf.mxu3  ;;  %v5293_v16 = vadd.f32 0.5, %v5277_v35 }
 0x9e6   :  { %v4897_v9 = vadd.f32 %v4896_v59, %v8501_v49  ;;  %v5297_v6 = vadd.f32 0.5, %v5281_v53  ;;  %v12134_v59 = vld [vmem:[#allocation88_spill] sm:$0xff]  ;;  %v5230_v53 = vmul.f32 0.5, %v5214_v39  ;;  %v12142_v39 = vld [vmem:[#allocation89_spill] sm:$0xff] }
 0x9e7   :  { %v10840_v61 = vpop.f32.mrf.mxu0  ;;  %v956_v5 = vadd.f32 %v12134_v59, %v11809_v43  ;;  %v12137_v43 = vld [vmem:[#allocation111_spill] sm:$0xff] }
 0x9e8   :  { %v6832_v36 = vpop.eup %6831  ;;  %v5191_v42 = vpop.f32.mrf.mxu1  ;;  %v5329_v4 = vmul.f32 %v5297_v6, %v10494_v23  ;;  %v12140_v59 = vld [vmem:[#allocation79_spill] sm:$0xff] }
 0x9e9   :  { %v6834_v0 = vpop.eup %6833  ;;  %v5120_v29 = vmul.f32 %v6832_v36, %v5080_v54  ;;  %v5221_v19 = vadd.f32 %v5191_v42, %v4897_v9  ;;  %v12135_v9 = vld [vmem:[#allocation94_spill] sm:$0xff]  ;;  %v5001_v54 = vadd.f32 %v10795_v47, %v956_v5 }
 0x9ea   :  { %v5332_v25 = vmul.f32 %v6834_v0, %v5292_v20  ;;  %v959_v30 = vadd.f32 %v12135_v9, %v11718_v15  ;;  %v12136_v20 = vld [vmem:[#allocation116_spill] sm:$0xff]  ;;  %v4888_v0 = vadd.f32 %v10816_v33, %v11636_v11  ;;  %v4879_v15 = vadd.f32 %v10803_v27, %v11725_v26  ;;  %v12141_v5 = vld [vmem:[#allocation138_spill] sm:$0xff] }
 0x9eb   :  { %v10844_v62 = vadd.f32 %v5120_v29, %v5116_v17  ;;  %6835 = vtanh.f32 %v5221_v19  ;;  %v971_v42 = vadd.f32 %v12136_v20, %v11714_v56  ;;  %v968_v17 = vadd.f32 %v12137_v43, %v11816_v58 }
 0x9ec   :  { %v10846_v51 = vadd.f32 %v5332_v25, %v5328_v60  ;;  %v5002_v23 = vadd.f32 %v10799_v31, %v959_v30  ;;  %v5017_v56 = vmul.f32 0.5, %v5001_v54  ;;  %v5218_v33 = vadd.f32 %v10823_v10, %v4888_v0 }
 0x9ed   :  { %v4899_v37 = vpop.f32.mrf.mxu3  ;;  %v5006_v47 = vadd.f32 %v10821_v12, %v971_v42  ;;  %v5005_v31 = vadd.f32 %v10809_v14, %v968_v17  ;;  %v5215_v58 = vadd.f32 %v10805_v21, %v4879_v15  ;;  %v4891_v12 = vadd.f32 %v10827_v40, %v11727_v18  ;;  %v12138_v14 = vld [vmem:[#allocation81_spill] sm:$0xff]  ;;  %v12143_v15 = vld [vmem:[#allocation155_spill] sm:$0xff] }
 0x9ee   :  { %v5018_v60 = vmul.f32 0.5, %v5002_v23  ;;  %6837 = vtanh.f32 %v5017_v56  ;;  %v5234_v6 = vmul.f32 0.5, %v5218_v33  ;;  %v4900_v21 = vadd.f32 %v4899_v37, %v12052_v24 }
 0x9ef   :  { %v4984_v32 = vpop.f32.mrf.mxu0  ;;  %v5022_v25 = vmul.f32 0.5, %v5006_v47  ;;  %v5021_v57 = vmul.f32 0.5, %v5005_v31  ;;  %v5231_v10 = vmul.f32 0.5, %v5215_v58  ;;  %v983_v28 = vadd.f32 %v12141_v5, %v12140_v59 }
 0x9f0   :  { %v5194_v38 = vpop.f32.mrf.mxu1  ;;  %6839 = vtanh.f32 %v5018_v60  ;;  %v5219_v40 = vadd.f32 %v10831_v13, %v4891_v12  ;;  %v992_v47 = vadd.f32 %v12143_v15, %v12142_v39  ;;  %v12144_v60 = vld [vmem:[#allocation92_spill] sm:$0xff] }
 0x9f1   :  { %v6836_v46 = vpop.eup %6835  ;;  %6841 = vtanh.f32 %v5230_v53  ;;  %v5010_v20 = vadd.f32 %v4984_v32, %v983_v28  ;;  %v5222_v0 = vadd.f32 %v5194_v38, %v4900_v21  ;;  %v12146_v32 = vld [vmem:[#allocation90_spill] sm:$0xff]  ;;  %v12147_v53 = vld [vmem:[#allocation149_spill] sm:$0xff] }
 0x9f2   :  { %v5333_v34 = vmul.f32 %v6836_v46, %v5293_v16  ;;  %v12139_v46 = vld [vmem:[#allocation133_spill] sm:$0xff]  ;;  %6843 = vtanh.f32 %v5022_v25  ;;  %v5235_v56 = vmul.f32 0.5, %v5219_v40  ;;  %v989_v58 = vadd.f32 %v12147_v53, %v12146_v32 }
 0x9f3   :  { %6845 = vtanh.f32 %v5021_v57 }
 0x9f4   :  { %v10855_v45 = vadd.f32 %v5333_v34, %v5329_v4  ;;  %v980_v4 = vadd.f32 %v12139_v46, %v12138_v14  ;;  %6847 = vtanh.f32 %v5234_v6  ;;  %v6838_v54 = vpop.eup %6837 }
 0x9f5   :  { %v4902_v36 = vpop.f32.mrf.mxu3  ;;  %6849 = vtanh.f32 %v5231_v10 }
 0x9f6   :  { %v5009_v30 = vadd.f32 %v10840_v61, %v980_v4  ;;  %v6840_v23 = vpop.eup %6839  ;;  %v12145_v61 = vld [vmem:[#allocation144_spill] sm:$0xff]  ;;  %v4903_v38 = vadd.f32 %v4902_v36, %v12058_v22 }
 0x9f7   :  { %v10866_v29 = vpop.f32.mrf.mxu0  ;;  %v6842_v43 = vpop.eup %6841  ;;  %v986_v33 = vadd.f32 %v12145_v61, %v12144_v60  ;;  %v5066_v6 = vmul.f32 0.5, %v6840_v23 }
 0x9f8   :  { %v10871_v19 = vpop.f32.mrf.mxu1  ;;  %v6844_v17 = vpop.eup %6843  ;;  %v5278_v14 = vmul.f32 0.5, %v6842_v43 }
 0x9f9   :  { %v6846_v13 = vpop.eup %6845  ;;  %v5070_v46 = vmul.f32 0.5, %v6844_v17  ;;  %v5011_v36 = vadd.f32 %v10866_v29, %v986_v33  ;;  %v5223_v28 = vadd.f32 %v10871_v19, %v4903_v38 }
 0x9fa   :  { %v6848_v57 = vpop.eup %6847  ;;  %v5069_v21 = vmul.f32 0.5, %v6846_v13  ;;  %v5294_v17 = vadd.f32 0.5, %v5278_v14  ;;  %v12150_v14 = vmax.f32 %v12063_v7, %v10502_v3 }
 0x9fb   :  { %v6850_v10 = vpop.eup %6849  ;;  %v5282_v5 = vmul.f32 0.5, %v6848_v57  ;;  %v5086_v39 = vadd.f32 0.5, %v5070_v46  ;;  %v5027_v61 = vmul.f32 0.5, %v5011_v36 }
 0x9fc   :  { %v5085_v13 = vadd.f32 0.5, %v5069_v21 }
 0x9fd   :  { %v4905_v35 = vpop.f32.mrf.mxu3  ;;  %v5298_v60 = vadd.f32 0.5, %v5282_v5  ;;  %v5118_v57 = vmul.f32 %v5086_v39, %v10510_v8  ;;  %v12152_v8 = vld [vmem:[#allocation75_spill] sm:$0xff] }
 0x9fe   :  { %v4906_v27 = vadd.f32 %v4905_v35, %v12050_v63  ;;  %v5065_v35 = vmul.f32 0.5, %v6838_v54  ;;  %v12149_v54 = vld [vmem:[#allocation159_spill] sm:$0xff]  ;;  %v5117_v5 = vmul.f32 %v5085_v13, %v12152_v8 }
 0x9ff   :  { %v4990_v16 = vpop.f32.mrf.mxu0  ;;  %v12155_v13 = vld [vmem:[#allocation67_spill] sm:$0xff] }
 0xa00   :  { %v5200_v34 = vpop.f32.mrf.mxu1 }
 0xa01   :  { %v5224_v9 = vadd.f32 %v5200_v34, %v4906_v27  ;;  %v5012_v34 = vadd.f32 %v4990_v16, %v989_v58 }
 0xa03   :  { %v5240_v42 = vmul.f32 0.5, %v5224_v9 }
 0xa05   :  { %6851 = vtanh.f32 %v5240_v42  ;;  %v4908_v37 = vpop.f32.mrf.mxu3  ;;  %v5081_v42 = vadd.f32 0.5, %v5065_v35 }
 0xa06   :  { %6853 = vtanh.f32 %v5009_v30  ;;  %v4909_v31 = vadd.f32 %v4908_v37, %v12056_v41  ;;  %v12148_v30 = vld [vmem:[#allocation85_spill] sm:$0xff]  ;;  %v5082_v37 = vadd.f32 0.5, %v5066_v6 }
 0xa07   :  { %6855 = vtanh.f32 %v5010_v20  ;;  %v4993_v25 = vpop.f32.mrf.mxu0  ;;  %v995_v20 = vadd.f32 %v12149_v54, %v12148_v30 }
 0xa08   :  { %6857 = vtanh.f32 %v5222_v0  ;;  %v5013_v12 = vadd.f32 %v4993_v25, %v992_v47  ;;  %v5203_v27 = vpop.f32.mrf.mxu1  ;;  %v5279_v47 = vmul.f32 0.5, %v6850_v10  ;;  %v12151_v10 = vld [vmem:[#allocation175_spill] sm:$0xff] }
 0xa09   :  { %v5225_v4 = vadd.f32 %v5203_v27, %v4909_v31  ;;  %6859 = vtanh.f32 %v10846_v51  ;;  %v5330_v21 = vmul.f32 %v5298_v60, %v12151_v10 }
 0xa0a   :  { %6861 = vtanh.f32 %v5235_v56  ;;  %v5029_v0 = vmul.f32 0.5, %v5013_v12  ;;  %v5028_v56 = vmul.f32 0.5, %v5012_v34 }
 0xa0b   :  { %v6852_v59 = vpop.eup %6851  ;;  %v5241_v9 = vmul.f32 0.5, %v5225_v4 }
 0xa0c   :  { %v6854_v40 = vpop.eup %6853  ;;  %v5288_v23 = vmul.f32 0.5, %v6852_v59 }
 0xa0d   :  { %v6856_v43 = vpop.eup %6855  ;;  %6863 = vtanh.f32 %v5241_v9  ;;  %v4911_v16 = vpop.f32.mrf.mxu3  ;;  %v5121_v12 = vmul.f32 %v6854_v40, %v5081_v42 }
 0xa0e   :  { %v6858_v15 = vpop.eup %6857  ;;  %v5304_v29 = vadd.f32 0.5, %v5288_v23  ;;  %v4912_v19 = vadd.f32 %v4911_v16, %v12060_v48  ;;  %6865 = vtanh.f32 %v5223_v28  ;;  %v5122_v53 = vmul.f32 %v6856_v43, %v5082_v37 }
 0xa0f   :  { %v6860_v31 = vpop.eup %6859  ;;  %v4996_v33 = vpop.f32.mrf.mxu0  ;;  %6867 = vtanh.f32 %v5029_v0  ;;  %v5334_v35 = vmul.f32 %v6858_v15, %v5294_v17  ;;  %v5125_v3 = vadd.f32 %v5121_v12, %v5117_v5  ;;  %v5295_v0 = vadd.f32 0.5, %v5279_v47  ;;  %v12157_v47 = vld [vmem:[#allocation62_spill] sm:$0xff] }
 0xa10   :  { %v6862_v32 = vpop.eup %6861  ;;  %v5014_v58 = vadd.f32 %v4996_v33, %v995_v20  ;;  %v5206_v38 = vpop.f32.mrf.mxu1  ;;  %v10900_v25 = vmul.f32 %v6860_v31, %v5304_v29  ;;  %6869 = vtanh.f32 %v10855_v45  ;;  %v5126_v36 = vadd.f32 %v5122_v53, %v5118_v57  ;;  %v12153_v20 = vld [vmem:[#allocation23_spill] sm:$0xff]  ;;  %v12154_v31 = vld [vmem:[#allocation56_spill] sm:$0xff] }
 0xa11   :  { %v5226_v6 = vadd.f32 %v5206_v38, %v4912_v19  ;;  %6871 = vtanh.f32 %v5028_v56  ;;  %v5283_v34 = vmul.f32 0.5, %v6862_v32  ;;  %v10912_v40 = vadd.f32 %v5334_v35, %v5330_v21 }
 0xa12   :  { %v5030_v27 = vmul.f32 0.5, %v5014_v58  ;;  %v10908_v46 = vmax.f32 %v12150_v14, %v10900_v25  ;;  %6873 = vtanh.f32 %v5027_v61  ;;  %v12156_v60 = vmax.f32 %v12154_v31, %v12155_v13  ;;  %v7087_v31 = vld [vmem:[%s11047_s7] sm:$0xff]  ;;  %v12166_v13 = vld [vmem:[#allocation180_spill] sm:$0xff] }
 0xa13   :  { %v6864_v4 = vpop.eup %6863  ;;  %v5242_v59 = vmul.f32 0.5, %v5226_v6  ;;  %v5299_v43 = vadd.f32 0.5, %v5283_v34 }
 0xa14   :  { %v5289_v28 = vmul.f32 0.5, %v6864_v4  ;;  %6875 = vtanh.f32 %v5030_v27  ;;  %v6866_v9 = vpop.eup %6865 }
 0xa15   :  { %6877 = vtanh.f32 %v5242_v59  ;;  %v4914_v30 = vpop.f32.mrf.mxu3  ;;  %v6868_v54 = vpop.eup %6867  ;;  %v5335_v15 = vmul.f32 %v6866_v9, %v5295_v0  ;;  %v5331_v32 = vmul.f32 %v5299_v43, %v12157_v47  ;;  %v12159_v9 = vld [vmem:[#allocation172_spill] sm:$0xff]  ;;  %v12170_v47 = vld [vmem:[#allocation109_spill] sm:$0xff] }
 0xa16   :  { %v5305_v7 = vadd.f32 0.5, %v5289_v28  ;;  %v4915_v42 = vadd.f32 %v4914_v30, %v12153_v20  ;;  %v6870_v23 = vpop.eup %6869  ;;  %6879 = vtanh.f32 %v5126_v36  ;;  %v5077_v56 = vmul.f32 0.5, %v6868_v54  ;;  %v12158_v28 = vld [vmem:[#allocation36_spill] sm:$0xff] }
 0xa17   :  { %v6872_v37 = vpop.eup %6871  ;;  %6881 = vtanh.f32 %v10912_v40  ;;  %v10923_v6 = vadd.f32 %v5335_v15, %v5331_v32  ;;  %v12160_v30 = vmax.f32 %v12158_v28, %v12159_v9  ;;  %v12163_v15 = vld [vmem:[#allocation176_spill] sm:$0xff]  ;;  %v12171_v32 = vld [vmem:[#allocation114_spill] sm:$0xff]  ;;  %v12190_v9 = vld [vmem:[#allocation137_spill] sm:$0xff] }
 0xa18   :  { %v5209_v17 = vpop.f32.mrf.mxu1  ;;  %v5345_v39 = vmul.f32 %v6870_v23, %v5305_v7  ;;  %v6874_v16 = vpop.eup %6873  ;;  %6883 = vtanh.f32 %v5125_v3  ;;  %v5076_v53 = vmul.f32 0.5, %v6872_v37  ;;  %v5093_v12 = vadd.f32 0.5, %v5077_v56  ;;  %v12189_v28 = vld [vmem:[#allocation132_spill] sm:$0xff] }
 0xa19   :  { %v5227_v29 = vadd.f32 %v5209_v17, %v4915_v42  ;;  %6885 = vtanh.f32 %v10844_v62  ;;  %v5075_v57 = vmul.f32 0.5, %v6874_v16  ;;  %v12161_v17 = vld [vmem:[#allocation174_spill] sm:$0xff] }
 0xa1a   :  { %v6876_v19 = vpop.eup %6875  ;;  %v10919_v61 = vmax.f32 %v12156_v60, %v5345_v39  ;;  %v5092_v21 = vadd.f32 0.5, %v5076_v53  ;;  %v12162_v16 = vld [vmem:[#allocation66_spill] sm:$0xff]  ;;  %v12172_v53 = vld [vmem:[#allocation96_spill] sm:$0xff] }
 0xa1b   :  { %v6878_v33 = vpop.eup %6877  ;;  %v5078_v58 = vmul.f32 0.5, %v6876_v19  ;;  %v5243_v38 = vmul.f32 0.5, %v5227_v29  ;;  %v5091_v5 = vadd.f32 0.5, %v5075_v57  ;;  %v12164_v56 = vmax.f32 %v12162_v16, %v12163_v15  ;;  %v12165_v19 = vld [vmem:[#allocation99_spill] sm:$0xff]  ;;  %v12175_v57 = vld [vmem:[#allocation28_spill] sm:$0xff] }
 0xa1c   :  { %v5290_v35 = vmul.f32 0.5, %v6878_v33  ;;  %v6880_v14 = vpop.eup %6879  ;;  %v7088_v60 = vld [vmem:[%s11047_s7 + $0x8] sm:$0xff]  ;;  %v12169_v33 = vld [vmem:[#allocation104_spill] sm:$0xff] }
 0xa1d   :  { %v5094_v27 = vadd.f32 0.5, %v5078_v58  ;;  %6887 = vtanh.f32 %v5243_v38  ;;  %v6882_v10 = vpop.eup %6881  ;;  %v12173_v58 = vld [vmem:[#allocation25_spill] sm:$0xff] }
 0xa1e   :  { %6889 = vtanh.f32 %v10837_v44  ;;  %v5306_v4 = vadd.f32 0.5, %v5290_v35  ;;  %v6884_v59 = vpop.eup %6883  ;;  %v12174_v38 = vld [vmem:[#allocation13_spill] sm:$0xff]  ;;  %v12176_v35 = vld [vmem:[#allocation16_spill] sm:$0xff] }
 0xa1f   :  { %v5134_v34 = vmul.f32 %v6880_v14, %v5094_v27  ;;  %6891 = vtanh.f32 %v10923_v6  ;;  %v5133_v62 = vmul.f32 %v6884_v59, %v5093_v12  ;;  %v6886_v36 = vpop.eup %6885  ;;  %v12177_v12 = vld [vmem:[#allocation19_spill] sm:$0xff]  ;;  %v12184_v59 = vld [vmem:[#allocation20_spill] sm:$0xff] }
 0xa20   :  { %v5346_v8 = vmul.f32 %v6882_v10, %v5306_v4  ;;  %v5132_v44 = vmul.f32 %v6886_v36, %v5092_v21  ;;  %v12178_v27 = vld [vmem:[#allocation31_spill] sm:$0xff]  ;;  %v12180_v4 = vld [vmem:[#allocation93_spill] sm:$0xff]  ;;  %v12188_v36 = vld [vmem:[#allocation126_spill] sm:$0xff] }
 0xa21   :  { %5384 = vmatpush.msrb.mxu2 %v5134_v34  ;;  %v12179_v14 = vld [vmem:[#allocation51_spill] sm:$0xff]  ;;  %v12181_v10 = vld [vmem:[#allocation97_spill] sm:$0xff] }
 0xa22   :  { %v10930_v54 = vmax.f32 %v12160_v30, %v5346_v8  ;;  %v12182_v21 = vld [vmem:[#allocation105_spill] sm:$0xff]  ;;  %v12183_v34 = vld [vmem:[#allocation179_spill] sm:$0xff] }
 0xa23   :  { %v6888_v3 = vpop.eup %6887  ;;  %5385 = vmatpush.msrb.mxu2 %v5133_v62  ;;  %v12187_v62 = vld [vmem:[#allocation121_spill] sm:$0xff]  ;;  %v12191_v30 = vld [vmem:[#allocation143_spill] sm:$0xff] }
 0xa24   :  { %v6890_v7 = vpop.eup %6889  ;;  %v5291_v42 = vmul.f32 0.5, %v6888_v3  ;;  %v12192_v3 = vld [vmem:[#allocation148_spill] sm:$0xff] }
 0xa25   :  { %5386 = vmatpush.msrb.mxu2 %v5132_v44  ;;  %v5131_v23 = vmul.f32 %v6890_v7, %v5091_v5  ;;  %v6892_v43 = vpop.eup %6891  ;;  %v12186_v5 = vld [vmem:[#allocation115_spill] sm:$0xff]  ;;  %v12193_v44 = vld [vmem:[#allocation154_spill] sm:$0xff] }
 0xa26   :  { %v5307_v0 = vadd.f32 0.5, %v5291_v42 }
 0xa27   :  { %5387 = vmatpush.msrb.mxu2 %v5131_v23 }
 0xa28   :  { %v5347_v37 = vmul.f32 %v6892_v43, %v5307_v0  ;;  %6222 = vmatmul.msk.f32.vlgmr.msrb.gmra.mxu2 %vm1294_vm3, %v12161_v17 }
 0xa2a   :  { %v10937_v29 = vmax.f32 %v12164_v56, %v5347_v37  ;;  %5453 = vmatpush.msrb.mxu3 %v5347_v37 }
 0xa2c   :  { %5454 = vmatpush.msrb.mxu3 %v5346_v8  ;;  %v12185_v8 = vld [vmem:[#allocation110_spill] sm:$0xff] }
 0xa2e   :  { %5455 = vmatpush.msrb.mxu3 %v5345_v39  ;;  %v12167_v39 = vld [vmem:[#allocation100_spill] sm:$0xff] }
 0xa30   :  { %5456 = vmatpush.msrb.mxu3 %v10900_v25  ;;  %6223 = vmatmul.msk.f32.gmra.mxu2 %vm1294_vm3, %v12165_v19  ;;  %v12168_v25 = vld [vmem:[#allocation101_spill] sm:$0xff] }
 0xa31   :  { %6238 = vmatmul.msk.f32.vlgmr.msrb.gmra.mxu3 %vm1294_vm3, %v7087_v31 }
 0xa38   :  { %6224 = vmatmul.msk.f32.gmra.mxu2 %vm1294_vm3, %v12166_v13 }
 0xa39   :  { %6239 = vmatmul.msk.f32.gmra.mxu3 %vm1294_vm3, %v7088_v60 }
 0xa40   :  { %6225 = vmatmul.msk.f32.gmra.mxu2 %vm1294_vm3, %v12167_v39 }
 0xa41   :  { %6240 = vmatmul.msk.f32.gmra.mxu3 %vm1294_vm3, %v12168_v25 }
 0xa48   :  { %6226 = vmatmul.msk.f32.gmra.mxu2 %vm1294_vm3, %v12169_v33 }
 0xa49   :  { %6241 = vmatmul.msk.f32.gmra.mxu3 %vm1294_vm3, %v12170_v47 }
 0xa50   :  { %6227 = vmatmul.msk.f32.gmra.mxu2 %vm1294_vm3, %v12171_v32 }
 0xa51   :  { %6242 = vmatmul.msk.f32.gmra.mxu3 %vm1294_vm3, %v12172_v53 }
 0xa58   :  { %6228 = vmatmul.msk.f32.gmra.mxu2 %vm1294_vm3, %v12173_v58 }
 0xa59   :  { %6243 = vmatmul.msk.f32.gmra.mxu3 %vm1294_vm3, %v12174_v38 }
 0xa60   :  { %6229 = vmatmul.msk.f32.gmra.mxu2 %vm1294_vm3, %v12175_v57 }
 0xa61   :  { %6244 = vmatmul.msk.f32.gmra.mxu3 %vm1294_vm3, %v12176_v35 }
 0xa68   :  { %6230 = vmatmul.msk.f32.gmra.mxu2 %vm1294_vm3, %v12177_v12 }
 0xa69   :  { %6245 = vmatmul.msk.f32.gmra.mxu3 %vm1294_vm3, %v12178_v27 }
 0xa70   :  { %6231 = vmatmul.msk.f32.gmra.mxu2 %vm1294_vm3, %v12179_v14 }
 0xa71   :  { %6246 = vmatmul.msk.f32.gmra.mxu3 %vm1294_vm3, %v12180_v4 }
 0xa78   :  { %6232 = vmatmul.msk.f32.gmra.mxu2 %vm1294_vm3, %v12181_v10 }
 0xa79   :  { %6247 = vmatmul.msk.f32.gmra.mxu3 %vm1294_vm3, %v12182_v21 }
 0xa80   :  { %6233 = vmatmul.msk.f32.gmra.mxu2 %vm1294_vm3, %v12183_v34 }
 0xa81   :  { %6248 = vmatmul.msk.f32.gmra.mxu3 %vm1294_vm3, %v12184_v59 }
 0xa88   :  { %6234 = vmatmul.msk.f32.gmra.mxu2 %vm1294_vm3, %v12185_v8 }
 0xa89   :  { %6249 = vmatmul.msk.f32.gmra.mxu3 %vm1294_vm3, %v12186_v5 }
 0xa90   :  { %6235 = vmatmul.msk.f32.gmra.mxu2 %vm1294_vm3, %v12187_v62 }
 0xa91   :  { %6250 = vmatmul.msk.f32.gmra.mxu3 %vm1294_vm3, %v12188_v36 }
 0xa98   :  { %6236 = vmatmul.msk.f32.gmra.mxu2 %vm1294_vm3, %v12189_v28 }
 0xa99   :  { %6251 = vmatmul.msk.f32.gmra.mxu3 %vm1294_vm3, %v12190_v9 }
 0xaa0   :  { %6237 = vmatmul.msk.f32.gmra.mxu2 %vm1294_vm3, %v12191_v30 }
 0xaa1   :  { %6252 = vmatmul.msk.f32.gmra.mxu3 %vm1294_vm3, %v12192_v3 }
 0xaa9   :  { %6253 = vmatmul.msk.f32.gmra.mxu3 %vm1294_vm3, %v12193_v44 }
 0xaab   :  { %v5389_v7 = vpop.f32.mrf.mxu2 }
 0xaac   :  { %v5390_v42 = vadd.f32 %v5389_v7, %v12131_v1  ;;  %v12194_v1 = vld [vmem:[#allocation14_spill] sm:$0xff] }
 0xab3   :  { %v5392_v23 = vpop.f32.mrf.mxu2 }
 0xab4   :  { %v5458_v0 = vpop.f32.mrf.mxu3  ;;  %v5393_v37 = vadd.f32 %v5392_v23, %v12030_v2 }
 0xab5   :  { %v5506_v43 = vadd.f32 %v5458_v0, %v5390_v42 }
 0xab7   :  { %v5522_v14 = vmul.f32 0.5, %v5506_v43 }
 0xabb   :  { %v5395_v17 = vpop.f32.mrf.mxu2 }
 0xabc   :  { %v5461_v16 = vpop.f32.mrf.mxu3  ;;  %v5396_v56 = vadd.f32 %v5395_v17, %v11913_v52 }
 0xabd   :  { %v5507_v15 = vadd.f32 %v5461_v16, %v5393_v37 }
 0xabf   :  { %v5523_v21 = vmul.f32 0.5, %v5507_v15 }
 0xac3   :  { %v5398_v19 = vpop.f32.mrf.mxu2 }
 0xac4   :  { %v5464_v31 = vpop.f32.mrf.mxu3  ;;  %v5399_v60 = vadd.f32 %v5398_v19, %v11725_v26 }
 0xac5   :  { %v5508_v13 = vadd.f32 %v5464_v31, %v5396_v56 }
 0xacb   :  { %v5401_v39 = vpop.f32.mrf.mxu2 }
 0xacc   :  { %v5467_v25 = vpop.f32.mrf.mxu3  ;;  %v5402_v47 = vadd.f32 %v5401_v39, %v12194_v1 }
 0xacd   :  { %v11010_v33 = vadd.f32 %v5467_v25, %v5399_v60 }
 0xad3   :  { %v5404_v32 = vpop.f32.mrf.mxu2 }
 0xad4   :  { %v5470_v53 = vpop.f32.mrf.mxu3  ;;  %v5405_v2 = vadd.f32 %v5404_v32, %v12032_v55 }
 0xad5   :  { %v5510_v58 = vadd.f32 %v5470_v53, %v5402_v47 }
 0xad7   :  { %v5526_v27 = vmul.f32 0.5, %v5510_v58 }
 0xad9   :  { %6893 = vtanh.f32 %v5526_v27 }
 0xada   :  { %6895 = vtanh.f32 %v5522_v14 }
 0xadb   :  { %v5407_v38 = vpop.f32.mrf.mxu2 }
 0xadc   :  { %v5473_v57 = vpop.f32.mrf.mxu3  ;;  %v5408_v32 = vadd.f32 %v5407_v38, %v11636_v11 }
 0xadd   :  { %v5511_v35 = vadd.f32 %v5473_v57, %v5405_v2 }
 0xadf   :  { %v5527_v10 = vmul.f32 0.5, %v5511_v35  ;;  %v6894_v34 = vpop.eup %6893 }
 0xae0   :  { %v6896_v62 = vpop.eup %6895  ;;  %v5574_v36 = vmul.f32 0.5, %v6894_v34 }
 0xae1   :  { %6897 = vtanh.f32 %v5527_v10  ;;  %v5570_v28 = vmul.f32 0.5, %v6896_v62 }
 0xae2   :  { %6899 = vtanh.f32 %v5523_v21  ;;  %v5590_v9 = vadd.f32 0.5, %v5574_v36  ;;  %v5525_v21 = vmul.f32 0.5, %v11010_v33 }
 0xae3   :  { %v5410_v52 = vpop.f32.mrf.mxu2  ;;  %v5586_v42 = vadd.f32 0.5, %v5570_v28 }
 0xae4   :  { %v5476_v12 = vpop.f32.mrf.mxu3  ;;  %v5411_v35 = vadd.f32 %v5410_v52, %v11727_v18 }
 0xae5   :  { %v5512_v58 = vadd.f32 %v5476_v12, %v5408_v32 }
 0xae7   :  { %v6898_v30 = vpop.eup %6897  ;;  %v5528_v2 = vmul.f32 0.5, %v5512_v58 }
 0xae8   :  { %v6900_v7 = vpop.eup %6899  ;;  %v5575_v37 = vmul.f32 0.5, %v6898_v30 }
 0xae9   :  { %v5571_v16 = vmul.f32 0.5, %v6900_v7 }
 0xaea   :  { %v5591_v56 = vadd.f32 0.5, %v5575_v37 }
 0xaeb   :  { %v5413_v4 = vpop.f32.mrf.mxu2  ;;  %v5587_v31 = vadd.f32 0.5, %v5571_v16 }
 0xaec   :  { %v5479_v26 = vpop.f32.mrf.mxu3  ;;  %v5414_v59 = vadd.f32 %v5413_v4, %v11914_v50  ;;  %v5622_v50 = vmul.f32 %v5590_v9, %v10846_v51  ;;  %v5524_v51 = vmul.f32 0.5, %v5508_v13 }
 0xaed   :  { %v5513_v10 = vadd.f32 %v5479_v26, %v5411_v35 }
 0xaef   :  { %v5529_v38 = vmul.f32 0.5, %v5513_v10 }
 0xaf3   :  { %v5416_v8 = vpop.f32.mrf.mxu2 }
 0xaf4   :  { %v5482_v5 = vpop.f32.mrf.mxu3  ;;  %v5417_v3 = vadd.f32 %v5416_v8, %v8501_v49  ;;  %v5623_v49 = vmul.f32 %v5591_v56, %v10855_v45 }
 0xaf5   :  { %v5514_v55 = vadd.f32 %v5482_v5, %v5414_v59 }
 0xaf7   :  { %6901 = vtanh.f32 %v5514_v55 }
 0xafb   :  { %v5419_v44 = vpop.f32.mrf.mxu2 }
 0xafc   :  { %v5485_v23 = vpop.f32.mrf.mxu3  ;;  %v5420_v45 = vadd.f32 %v5419_v44, %v12052_v24 }
 0xafd   :  { %v6902_v0 = vpop.eup %6901  ;;  %v5515_v43 = vadd.f32 %v5485_v23, %v5417_v3 }
 0xafe   :  { %v5626_v17 = vmul.f32 %v6902_v0, %v5586_v42 }
 0xaff   :  { %6903 = vtanh.f32 %v5515_v43 }
 0xb00   :  { %v5630_v15 = vadd.f32 %v5626_v17, %v5622_v50  ;;  %6905 = vtanh.f32 %v5524_v51 }
 0xb01   :  { %6907 = vtanh.f32 %v5528_v2 }
 0xb03   :  { %v5422_v19 = vpop.f32.mrf.mxu2 }
 0xb04   :  { %v5488_v60 = vpop.f32.mrf.mxu3  ;;  %v5423_v26 = vadd.f32 %v5422_v19, %v12058_v22 }
 0xb05   :  { %v6904_v39 = vpop.eup %6903  ;;  %v5516_v11 = vadd.f32 %v5488_v60, %v5420_v45 }
 0xb06   :  { %v5627_v25 = vmul.f32 %v6904_v39, %v5587_v31  ;;  %v6906_v13 = vpop.eup %6905 }
 0xb07   :  { %v6908_v12 = vpop.eup %6907  ;;  %v5572_v8 = vmul.f32 0.5, %v6906_v13 }
 0xb08   :  { %v5631_v1 = vadd.f32 %v5627_v25, %v5623_v49  ;;  %v5576_v33 = vmul.f32 0.5, %v6908_v12  ;;  %v5675_v12 = vpop.permute.xlu1 %5674 }
 0xb09   :  { %v5588_v30 = vadd.f32 0.5, %v5572_v8 }
 0xb0a   :  { %v5592_v3 = vadd.f32 0.5, %v5576_v33 }
 0xb0b   :  { %v5425_v47 = vpop.f32.mrf.mxu2 }
 0xb0c   :  { %v5491_v53 = vpop.f32.mrf.mxu3  ;;  %v5426_v57 = vadd.f32 %v5425_v47, %v12050_v63  ;;  %v5624_v17 = vmul.f32 %v5592_v3, %v10912_v40 }
 0xb0d   :  { %v5517_v62 = vadd.f32 %v5491_v53, %v5423_v26 }
 0xb13   :  { %v5428_v27 = vpop.f32.mrf.mxu2 }
 0xb14   :  { %v5494_v14 = vpop.f32.mrf.mxu3  ;;  %v5429_v63 = vadd.f32 %v5428_v27, %v12056_v41 }
 0xb15   :  { %v5518_v4 = vadd.f32 %v5494_v14, %v5426_v57 }
 0xb17   :  { %v5534_v34 = vmul.f32 0.5, %v5518_v4 }
 0xb19   :  { %6909 = vtanh.f32 %v5534_v34 }
 0xb1a   :  { %6911 = vtanh.f32 %v5525_v21 }
 0xb1b   :  { %6913 = vtanh.f32 %v5516_v11  ;;  %v5431_v59 = vpop.f32.mrf.mxu2 }
 0xb1c   :  { %v5497_v18 = vpop.f32.mrf.mxu3  ;;  %6915 = vtanh.f32 %v5630_v15  ;;  %v5432_v44 = vadd.f32 %v5431_v59, %v12060_v48 }
 0xb1d   :  { %v5519_v52 = vadd.f32 %v5497_v18, %v5429_v63  ;;  %6917 = vtanh.f32 %v5529_v38 }
 0xb1f   :  { %v6910_v24 = vpop.eup %6909  ;;  %v5535_v5 = vmul.f32 0.5, %v5519_v52 }
 0xb20   :  { %v5582_v55 = vmul.f32 0.5, %v6910_v24  ;;  %v6912_v36 = vpop.eup %6911 }
 0xb21   :  { %6919 = vtanh.f32 %v5535_v5  ;;  %v6914_v28 = vpop.eup %6913  ;;  %v5573_v37 = vmul.f32 0.5, %v6912_v36 }
 0xb22   :  { %v5598_v9 = vadd.f32 0.5, %v5582_v55  ;;  %v6916_v41 = vpop.eup %6915  ;;  %6921 = vtanh.f32 %v5517_v62  ;;  %v5628_v23 = vmul.f32 %v6914_v28, %v5588_v30 }
 0xb23   :  { %v6918_v7 = vpop.eup %6917  ;;  %6923 = vtanh.f32 %v5631_v1  ;;  %v5434_v19 = vpop.f32.mrf.mxu2  ;;  %v5589_v49 = vadd.f32 0.5, %v5573_v37 }
 0xb24   :  { %v5638_v42 = vmul.f32 %v6916_v41, %v5598_v9  ;;  %v5500_v22 = vpop.f32.mrf.mxu3  ;;  %v5577_v16 = vmul.f32 0.5, %v6918_v7  ;;  %v5632_v31 = vadd.f32 %v5628_v23, %v5624_v17  ;;  %v5435_v1 = vadd.f32 %v5434_v19, %v12153_v20 }
 0xb25   :  { %v5520_v0 = vadd.f32 %v5500_v22, %v5432_v44 }
 0xb26   :  { %v5654_v43 = vmax.f32 %v10908_v46, %v5638_v42  ;;  %v5593_v25 = vadd.f32 0.5, %v5577_v16 }
 0xb27   :  { %v6920_v50 = vpop.eup %6919  ;;  %v5536_v15 = vmul.f32 0.5, %v5520_v0 }
 0xb28   :  { %v5583_v56 = vmul.f32 0.5, %v6920_v50  ;;  %v6922_v48 = vpop.eup %6921  ;;  %v5625_v51 = vmul.f32 %v5593_v25, %v10923_v6 }
 0xb29   :  { %6925 = vtanh.f32 %v5536_v15  ;;  %v6924_v39 = vpop.eup %6923  ;;  %v5629_v46 = vmul.f32 %v6922_v48, %v5589_v49 }
 0xb2a   :  { %v5599_v60 = vadd.f32 0.5, %v5583_v56  ;;  %6927 = vtanh.f32 %v5632_v31 }
 0xb2b   :  { %v5633_v35 = vadd.f32 %v5629_v46, %v5625_v51 }
 0xb2c   :  { %v5639_v47 = vmul.f32 %v6924_v39, %v5599_v60  ;;  %v5503_v32 = vpop.f32.mrf.mxu3 }
 0xb2d   :  { %v5521_v53 = vadd.f32 %v5503_v32, %v5435_v1 }
 0xb2e   :  { %v5655_v40 = vmax.f32 %v10919_v61, %v5639_v47 }
 0xb2f   :  { %v6926_v58 = vpop.eup %6925  ;;  %v5537_v2 = vmul.f32 0.5, %v5521_v53 }
 0xb30   :  { %v5584_v57 = vmul.f32 0.5, %v6926_v58  ;;  %v6928_v14 = vpop.eup %6927 }
 0xb31   :  { %6929 = vtanh.f32 %v5537_v2 }
 0xb32   :  { %v5600_v27 = vadd.f32 0.5, %v5584_v57  ;;  %6931 = vtanh.f32 %v5633_v35 }
 0xb34   :  { %v5640_v4 = vmul.f32 %v6928_v14, %v5600_v27 }
 0xb36   :  { %v5656_v20 = vmax.f32 %v10930_v54, %v5640_v4  ;;  %v5670_v54 = vld [vmem:[%s11049_s9] sm:$0xf] }
 0xb37   :  { %v6930_v10 = vpop.eup %6929 }
 0xb38   :  { %v5585_v45 = vmul.f32 0.5, %v6930_v10  ;;  %v6932_v34 = vpop.eup %6931 }
 0xb3a   :  { %v5601_v21 = vadd.f32 0.5, %v5585_v45 }
 0xb3c   :  { %v5641_v11 = vmul.f32 %v6932_v34, %v5601_v21 }
 0xb3e   :  { %v5657_v61 = vmax.f32 %v10937_v29, %v5641_v11 }
 0xb40   :  { %6933 = vtanh.f32 %v5657_v61 }
 0xb41   :  { %6935 = vtanh.f32 %v5656_v20 }
 0xb42   :  { %6937 = vtanh.f32 %v5655_v40 }
 0xb43   :  { %6939 = vtanh.f32 %v5654_v43 }
 0xb46   :  { %v6934_v6 = vpop.eup %6933 }
 0xb47   :  { %5692 = vmatpush.msra.mxu0 %v6934_v6  ;;  %v6936_v38 = vpop.eup %6935 }
 0xb48   :  { %v6938_v13 = vpop.eup %6937 }
 0xb49   :  { %5693 = vmatpush.msra.mxu0 %v6936_v38  ;;  %v6940_v63 = vpop.eup %6939 }
 0xb4b   :  { %5694 = vmatpush.msra.mxu0 %v6938_v13 }
 0xb4d   :  { %5695 = vmatpush.msra.mxu0 %v6940_v63 }
 0xb4e   :  { %6254 = vmatmul.msk.f32.vlgmr.msra.gmra.mxu0 %vm1294_vm3, %v5670_v54 }
 0xbcb   :  { %v5697_v29 = vpop.f32.mrf.mxu0 }
 0xbcc   :  { %v5698_v18 = vadd.f32 %v5697_v29, %v5675_v12 }
 0xbce   :  { %6941 = vtanh.f32 %v5698_v18 }
 0xbd4   :  { %v6942_v52 = vpop.eup %6941 }
 0xbd5   :  { %5701 = vst [vmem:[#allocation8] sm:$0xf] %v6942_v52 }
 0xbd6   :  { %5712 = dma.vmem_to_hbm [thread:$0]  %s5708_s16, 64, %s5710_s18, [#allocation9]  }
 0xbd7   :  { %7113 = dma.done.wait [#allocation9], 64  }
 0xbd8   :  { %7114 = vsyncadd [#allocation9], 4294967232 }
 0xbd9   :  { %5717 = vsyncpa [#allocation9], 1 }

</bundles_post_ra>
